<compile_context>
chip_gen: v7x
topology: tpu7x:2x2x1
jax: 0.10.0
libtpu: 0.0.40
codegen_flags: <defaults>
</compile_context>

<pallas_src>
import functools

import jax
import jax.numpy as jnp
from jax import lax
from jax.experimental import pallas as pl
from jax.experimental.pallas import tpu as pltpu

# Make the pure-JAX reference use full-precision f32 matmuls so it matches the
# in-kernel MXU f32 matmuls.
jax.config.update("jax_default_matmul_precision", "highest")


def _mogrifier_rnn_kernel(x_ref, wx_ref, wh_ref, b_ref, wq_ref, bq_ref,
                          wr_ref, br_ref, h0_ref,
                          seq_ref, h_ref, c_ref,
                          *, mogrify_steps, chunk_steps):
    # h_ref / c_ref have a constant block index -> VMEM-resident across the
    # whole grid; they serve directly as the recurrent state (no scratch).
    @pl.when(pl.program_id(0) == 0)
    def _():
        h_ref[...] = h0_ref[...]
        c_ref[...] = jnp.zeros_like(c_ref)

    H = h_ref.shape[-1]

    # Hoist resident operands out of the unrolled time loop.
    wx = wx_ref[...]      # (F, 4H)
    wh = wh_ref[...]      # (H, 4H)
    b4 = b_ref[...]       # (1, 4H)  fused x2h + h2h bias
    wq = wq_ref[...]      # (H, F)
    bq = bq_ref[...]      # (1, F)
    wr = wr_ref[...]      # (F, H)
    br = br_ref[...]      # (1, H)

    h = h_ref[...]        # (B, H)
    c = c_ref[...]        # (B, H)

    # Fully unrolled recurrence over the time steps of this chunk (short,
    # static trip count -> best LLO scheduling, no per-step grid overhead).
    for t in range(chunk_steps):
        x_t = x_ref[t]                                            # (B, F)

        # Mogrifier: alternately modulate x (odd i) and h (even i).
        for s in range(1, mogrify_steps + 1):
            if s % 2 == 0:
                h = 2.0 * jax.nn.sigmoid(
                    jnp.dot(x_t, wr, preferred_element_type=jnp.float32) + br) * h
            else:
                x_t = 2.0 * jax.nn.sigmoid(
                    jnp.dot(h, wq, preferred_element_type=jnp.float32) + bq) * x_t

        gates = (jnp.dot(x_t, wx, preferred_element_type=jnp.float32)
                 + jnp.dot(h, wh, preferred_element_type=jnp.float32)
                 + b4)                                            # (B, 4H)

        i_g = jax.nn.sigmoid(gates[:, :H])
        f_g = jax.nn.sigmoid(gates[:, H:2 * H])
        g_g = jnp.tanh(gates[:, 2 * H:3 * H])
        o_g = jax.nn.sigmoid(gates[:, 3 * H:])

        c = f_g * c + i_g * g_g
        h = o_g * jnp.tanh(c)

        seq_ref[t] = h.astype(seq_ref.dtype)                      # output[t] = h_t

    # Write the carried state once per chunk (not once per step).
    h_ref[...] = h
    c_ref[...] = c


def mogrifier_rnn_forward(x, params, mogrify_steps, h0=None, chunk_steps=None):
    """x: (seq_len, batch, input_size) f32.  params: PyTorch-layout weights.

    Returns (output (T, B, H), (h (1, B, H), c (1, B, H))).
    """
    # TODO(synk): the PyTorch branch that passes a raw 2-D `hidden` tensor
    # straight through (and unpacks it along dim 0 in the cell) is not
    # reproduced; only hidden=None and a (1, B, H) initial h are supported.
    T, B, F = x.shape
    Wx, bx = params["x2h_w"], params["x2h_b"]   # (4H, F), (4H,)
    Wh, bh = params["h2h_w"], params["h2h_b"]   # (4H, H), (4H,)
    Wq, bq = params["q_w"], params["q_b"]       # (F, H),  (F,)
    Wr, br = params["r_w"], params["r_b"]       # (H, F),  (H,)
    H = Wh.shape[1]
    H4 = 4 * H

    if chunk_steps is None:
        chunk_steps = T                          # whole sequence in one grid step
    assert T % chunk_steps == 0, "chunk_steps must divide seq_len"
    n_chunks = T // chunk_steps

    if h0 is None:
        h0 = jnp.zeros((B, H), jnp.float32)
    else:
        h0 = jnp.reshape(h0, (B, H)).astype(jnp.float32)

    # Matmul-friendly layouts (row-vector @ weight) with fused LSTM bias.
    wx_t = Wx.T                                  # (F, 4H)
    wh_t = Wh.T                                  # (H, 4H)
    b4 = (bx + bh).reshape(1, H4)
    wq_t = Wq.T                                  # (H, F)
    bq2 = bq.reshape(1, F)
    wr_t = Wr.T                                  # (F, H)
    br2 = br.reshape(1, H)

    kernel = functools.partial(_mogrifier_rnn_kernel,
                               mogrify_steps=mogrify_steps,
                               chunk_steps=chunk_steps)

    grid_spec = pltpu.PrefetchScalarGridSpec(
        num_scalar_prefetch=0,
        grid=(n_chunks,),
        in_specs=[
            pl.BlockSpec((chunk_steps, B, F), lambda c: (c, 0, 0)),  # x chunk
            pl.BlockSpec((F, H4), lambda c: (0, 0)),                 # W_x2h^T (resident)
            pl.BlockSpec((H, H4), lambda c: (0, 0)),                 # W_h2h^T (resident)
            pl.BlockSpec((1, H4), lambda c: (0, 0)),                 # fused gate bias
            pl.BlockSpec((H, F), lambda c: (0, 0)),                  # W_q^T
            pl.BlockSpec((1, F), lambda c: (0, 0)),                  # b_q
            pl.BlockSpec((F, H), lambda c: (0, 0)),                  # W_r^T
            pl.BlockSpec((1, H), lambda c: (0, 0)),                  # b_r
            pl.BlockSpec((B, H), lambda c: (0, 0)),                  # h0
        ],
        out_specs=[
            pl.BlockSpec((chunk_steps, B, H), lambda c: (c, 0, 0)),  # hidden_seq chunk
            pl.BlockSpec((B, H), lambda c: (0, 0)),                  # final h (resident state)
            pl.BlockSpec((B, H), lambda c: (0, 0)),                  # final c (resident state)
        ],
    )

    # Advisory cost estimate so XLA can overlap this serial kernel with
    # surrounding work.
    ms = mogrify_steps
    flops = int(T * (ms * 2 * B * F * H + 2 * B * H4 * (F + H) + 10 * B * H))
    transcend = int(T * B * (((ms + 1) // 2) * F + (ms // 2) * H + 5 * H))
    bytes_acc = int(4 * (x.size + wx_t.size + wh_t.size + b4.size + wq_t.size
                         + bq2.size + wr_t.size + br2.size + h0.size
                         + T * B * H + 2 * B * H))

    seq, h, c = pl.pallas_call(
        kernel,
        out_shape=(
            jax.ShapeDtypeStruct((T, B, H), jnp.float32),
            jax.ShapeDtypeStruct((B, H), jnp.float32),
            jax.ShapeDtypeStruct((B, H), jnp.float32),
        ),
        grid_spec=grid_spec,
        compiler_params=pltpu.CompilerParams(
            dimension_semantics=("arbitrary",)),   # sequential recurrence over time chunks
        cost_estimate=pl.CostEstimate(flops=flops,
                                      transcendentals=transcend,
                                      bytes_accessed=bytes_acc),
    )(x, wx_t, wh_t, b4, wq_t, bq2, wr_t, br2, h0)

    return seq, (h[None], c[None])


def _reference_forward(x, params, mogrify_steps):
    """Pure-JAX reference mirroring MogrifierRNNGit.forward (hidden=None)."""
    Wx, bx = params["x2h_w"], params["x2h_b"]
    Wh, bh = params["h2h_w"], params["h2h_b"]
    Wq, bq = params["q_w"], params["q_b"]
    Wr, br = params["r_w"], params["r_b"]
    T, B, F = x.shape
    H = Wh.shape[1]

    def cell(carry, x_t):
        h, c = carry
        xt = x_t
        for s in range(1, mogrify_steps + 1):
            if s % 2 == 0:
                h = 2.0 * jax.nn.sigmoid(xt @ Wr.T + br) * h
            else:
                xt = 2.0 * jax.nn.sigmoid(h @ Wq.T + bq) * xt
        gates = xt @ Wx.T + bx + h @ Wh.T + bh
        i_g = jax.nn.sigmoid(gates[:, :H])
        f_g = jax.nn.sigmoid(gates[:, H:2 * H])
        g_g = jnp.tanh(gates[:, 2 * H:3 * H])
        o_g = jax.nn.sigmoid(gates[:, 3 * H:])
        c = f_g * c + i_g * g_g
        h = o_g * jnp.tanh(c)
        return (h, c), h

    h0 = jnp.zeros((B, H), jnp.float32)
    c0 = jnp.zeros((B, H), jnp.float32)
    (h, c), hs = lax.scan(cell, (h0, c0), x)
    return hs, (h[None], c[None])


if __name__ == "__main__":
    # Small shapes consistent with the module: seq=8, batch=2, input=16,
    # hidden=32, n_mogrifying=5.
    T, B, F, H, MOG = 8, 2, 16, 32, 5
    key = jax.random.PRNGKey(0)
    keys = jax.random.split(key, 9)

    # init_parameters(): every parameter ~ uniform(-1/sqrt(H), 1/sqrt(H)),
    # with native PyTorch nn.Linear layouts (out_features, in_features).
    std = 1.0 / H ** 0.5
    u = lambda k, shape: jax.random.uniform(k, shape, jnp.float32, -std, std)
    params = {
        "x2h_w": u(keys[0], (4 * H, F)), "x2h_b": u(keys[1], (4 * H,)),
        "h2h_w": u(keys[2], (4 * H, H)), "h2h_b": u(keys[3], (4 * H,)),
        "q_w":   u(keys[4], (F, H)),     "q_b":   u(keys[5], (F,)),
        "r_w":   u(keys[6], (H, F)),     "r_b":   u(keys[7], (H,)),
    }
    x = jax.random.normal(keys[8], (T, B, F), jnp.float32)

    seq, (h, c) = mogrifier_rnn_forward(x, params, MOG)
    jax.block_until_ready((seq, h, c))

    ref_seq, (ref_h, ref_c) = _reference_forward(x, params, MOG)
    assert seq.shape == (T, B, H)
    assert h.shape == (1, B, H) and c.shape == (1, B, H)
    assert jnp.allclose(seq, ref_seq, atol=1e-4, rtol=1e-4)
    assert jnp.allclose(h, ref_h, atol=1e-4, rtol=1e-4)
    assert jnp.allclose(c, ref_c, atol=1e-4, rtol=1e-4)

    print("KERNEL_OK")
</pallas_src>

<mosaic_0001>
module attributes {stable_mosaic.version = 11 : i64} {
  func.func @_mogrifier_rnn_kernel(%arg0: i32, %arg1: memref<8x2x16xf32, #tpu.memory_space<vmem>>, %arg2: memref<16x128xf32, #tpu.memory_space<vmem>>, %arg3: memref<32x128xf32, #tpu.memory_space<vmem>>, %arg4: memref<1x128xf32, #tpu.memory_space<vmem>>, %arg5: memref<32x16xf32, #tpu.memory_space<vmem>>, %arg6: memref<1x16xf32, #tpu.memory_space<vmem>>, %arg7: memref<16x32xf32, #tpu.memory_space<vmem>>, %arg8: memref<1x32xf32, #tpu.memory_space<vmem>>, %arg9: memref<2x32xf32, #tpu.memory_space<vmem>>, %arg10: memref<8x2x32xf32, #tpu.memory_space<vmem>>, %arg11: memref<2x32xf32, #tpu.memory_space<vmem>>, %arg12: memref<2x32xf32, #tpu.memory_space<vmem>>) attributes {dimension_semantics = [#tpu.dimension_semantics<arbitrary>], iteration_bounds = array<i64: 1>, scalar_prefetch = 0 : i64, scratch_operands = 0 : i64, tpu.core_type = #tpu.core_type<tc>, window_params = [{transform_indices = @transform_0, window_bounds = array<i64: 8, 2, 16>}, {pipeline_mode = #tpu.pipeline_mode<synchronous>, transform_indices = @transform_1, window_bounds = array<i64: 16, 128>}, {pipeline_mode = #tpu.pipeline_mode<synchronous>, transform_indices = @transform_2, window_bounds = array<i64: 32, 128>}, {pipeline_mode = #tpu.pipeline_mode<synchronous>, transform_indices = @transform_3, window_bounds = array<i64: 1, 128>}, {pipeline_mode = #tpu.pipeline_mode<synchronous>, transform_indices = @transform_4, window_bounds = array<i64: 32, 16>}, {pipeline_mode = #tpu.pipeline_mode<synchronous>, transform_indices = @transform_5, window_bounds = array<i64: 1, 16>}, {pipeline_mode = #tpu.pipeline_mode<synchronous>, transform_indices = @transform_6, window_bounds = array<i64: 16, 32>}, {pipeline_mode = #tpu.pipeline_mode<synchronous>, transform_indices = @transform_7, window_bounds = array<i64: 1, 32>}, {pipeline_mode = #tpu.pipeline_mode<synchronous>, transform_indices = @transform_8, window_bounds = array<i64: 2, 32>}, {transform_indices = @transform_9, window_bounds = array<i64: 8, 2, 32>}, {pipeline_mode = #tpu.pipeline_mode<synchronous>, transform_indices = @transform_10, window_bounds = array<i64: 2, 32>}, {pipeline_mode = #tpu.pipeline_mode<synchronous>, transform_indices = @transform_11, window_bounds = array<i64: 2, 32>}]} {
    %c0_i32 = arith.constant 0 : i32
    %0 = arith.cmpi eq, %arg0, %c0_i32 : i32
    %1 = arith.extui %0 : i1 to i32
    %c0_i32_0 = arith.constant 0 : i32
    %2 = arith.cmpi ne, %1, %c0_i32_0 : i32
    scf.if %2 {
      %c0_222 = arith.constant 0 : index
      %c0_223 = arith.constant 0 : index
      %734 = vector.load %arg9[%c0_222, %c0_223] : memref<2x32xf32, #tpu.memory_space<vmem>>, vector<2x32xf32>
      %c0_224 = arith.constant 0 : index
      %c0_225 = arith.constant 0 : index
      %735 = vector.load %arg11[%c0_224, %c0_225] : memref<2x32xf32, #tpu.memory_space<vmem>>, vector<2x32xf32>
      tpu.vector_store %arg11[%c0_224, %c0_225], %734 {strides = array<i32>} : memref<2x32xf32, #tpu.memory_space<vmem>>, vector<2x32xf32>,
      %cst_226 = arith.constant 0.000000e+00 : f32
      %736 = vector.broadcast %cst_226 : f32 to vector<2x32xf32>
      %c0_227 = arith.constant 0 : index
      %c0_228 = arith.constant 0 : index
      %737 = vector.load %arg12[%c0_227, %c0_228] : memref<2x32xf32, #tpu.memory_space<vmem>>, vector<2x32xf32>
      tpu.vector_store %arg12[%c0_227, %c0_228], %736 {strides = array<i32>} : memref<2x32xf32, #tpu.memory_space<vmem>>, vector<2x32xf32>,
    } else {
    }
    %c0 = arith.constant 0 : index
    %c0_1 = arith.constant 0 : index
    %3 = vector.load %arg2[%c0, %c0_1] : memref<16x128xf32, #tpu.memory_space<vmem>>, vector<16x128xf32>
    %c0_2 = arith.constant 0 : index
    %c0_3 = arith.constant 0 : index
    %4 = vector.load %arg3[%c0_2, %c0_3] : memref<32x128xf32, #tpu.memory_space<vmem>>, vector<32x128xf32>
    %c0_4 = arith.constant 0 : index
    %c0_5 = arith.constant 0 : index
    %5 = vector.load %arg4[%c0_4, %c0_5] : memref<1x128xf32, #tpu.memory_space<vmem>>, vector<1x128xf32>
    %c0_6 = arith.constant 0 : index
    %c0_7 = arith.constant 0 : index
    %6 = vector.load %arg5[%c0_6, %c0_7] : memref<32x16xf32, #tpu.memory_space<vmem>>, vector<32x16xf32>
    %c0_8 = arith.constant 0 : index
    %c0_9 = arith.constant 0 : index
    %7 = vector.load %arg6[%c0_8, %c0_9] : memref<1x16xf32, #tpu.memory_space<vmem>>, vector<1x16xf32>
    %c0_10 = arith.constant 0 : index
    %c0_11 = arith.constant 0 : index
    %8 = vector.load %arg7[%c0_10, %c0_11] : memref<16x32xf32, #tpu.memory_space<vmem>>, vector<16x32xf32>
    %c0_12 = arith.constant 0 : index
    %c0_13 = arith.constant 0 : index
    %9 = vector.load %arg8[%c0_12, %c0_13] : memref<1x32xf32, #tpu.memory_space<vmem>>, vector<1x32xf32>
    %c0_14 = arith.constant 0 : index
    %c0_15 = arith.constant 0 : index
    %10 = vector.load %arg11[%c0_14, %c0_15] : memref<2x32xf32, #tpu.memory_space<vmem>>, vector<2x32xf32>
    %c0_16 = arith.constant 0 : index
    %c0_17 = arith.constant 0 : index
    %11 = vector.load %arg12[%c0_16, %c0_17] : memref<2x32xf32, #tpu.memory_space<vmem>>, vector<2x32xf32>
    %c0_18 = arith.constant 0 : index
    %c0_19 = arith.constant 0 : index
    %c0_20 = arith.constant 0 : index
    %12 = vector.load %arg1[%c0_18, %c0_19, %c0_20] : memref<8x2x16xf32, #tpu.memory_space<vmem>>, vector<1x2x16xf32>
    %13 = vector.shape_cast %12 : vector<1x2x16xf32> to vector<2x16xf32>
    %cst = arith.constant dense<0.000000e+00> : vector<2x16xf32>
    %14 = tpu.matmul %10, %6, %cst {dimension_numbers = #tpu.dot_dimension_numbers<[1], [0], [0], [1], [0, 0, 1, 1], [], []>, precision = #tpu.contract_precision<fp32>} : vector<2x32xf32>, vector<32x16xf32>, vector<2x16xf32> -> vector<2x16xf32>
    %15 = vector.broadcast %7 : vector<1x16xf32> to vector<2x16xf32>
    %16 = arith.addf %14, %15 : vector<2x16xf32>
    %17 = arith.negf %16 : vector<2x16xf32>
    %18 = math.exp %17 : vector<2x16xf32>
    %cst_21 = arith.constant 1.000000e+00 : f32
    %19 = vector.broadcast %cst_21 : f32 to vector<2x16xf32>
    %20 = arith.addf %19, %18 : vector<2x16xf32>
    %21 = arith.divf %19, %20 : vector<2x16xf32>
    %cst_22 = arith.constant 2.000000e+00 : f32
    %22 = vector.broadcast %cst_22 : f32 to vector<2x16xf32>
    %23 = arith.mulf %22, %21 : vector<2x16xf32>
    %24 = arith.mulf %23, %13 : vector<2x16xf32>
    %cst_23 = arith.constant dense<0.000000e+00> : vector<2x32xf32>
    %25 = tpu.matmul %24, %8, %cst_23 {dimension_numbers = #tpu.dot_dimension_numbers<[1], [0], [0], [1], [0, 0, 1, 1], [], []>, precision = #tpu.contract_precision<fp32>} : vector<2x16xf32>, vector<16x32xf32>, vector<2x32xf32> -> vector<2x32xf32>
    %26 = vector.broadcast %9 : vector<1x32xf32> to vector<2x32xf32>
    %27 = arith.addf %25, %26 : vector<2x32xf32>
    %28 = arith.negf %27 : vector<2x32xf32>
    %29 = math.exp %28 : vector<2x32xf32>
    %cst_24 = arith.constant 1.000000e+00 : f32
    %30 = vector.broadcast %cst_24 : f32 to vector<2x32xf32>
    %31 = arith.addf %30, %29 : vector<2x32xf32>
    %32 = arith.divf %30, %31 : vector<2x32xf32>
    %cst_25 = arith.constant 2.000000e+00 : f32
    %33 = vector.broadcast %cst_25 : f32 to vector<2x32xf32>
    %34 = arith.mulf %33, %32 : vector<2x32xf32>
    %35 = arith.mulf %34, %10 : vector<2x32xf32>
    %cst_26 = arith.constant dense<0.000000e+00> : vector<2x16xf32>
    %36 = tpu.matmul %35, %6, %cst_26 {dimension_numbers = #tpu.dot_dimension_numbers<[1], [0], [0], [1], [0, 0, 1, 1], [], []>, precision = #tpu.contract_precision<fp32>} : vector<2x32xf32>, vector<32x16xf32>, vector<2x16xf32> -> vector<2x16xf32>
    %37 = vector.broadcast %7 : vector<1x16xf32> to vector<2x16xf32>
    %38 = arith.addf %36, %37 : vector<2x16xf32>
    %39 = arith.negf %38 : vector<2x16xf32>
    %40 = math.exp %39 : vector<2x16xf32>
    %cst_27 = arith.constant 1.000000e+00 : f32
    %41 = vector.broadcast %cst_27 : f32 to vector<2x16xf32>
    %42 = arith.addf %41, %40 : vector<2x16xf32>
    %43 = arith.divf %41, %42 : vector<2x16xf32>
    %cst_28 = arith.constant 2.000000e+00 : f32
    %44 = vector.broadcast %cst_28 : f32 to vector<2x16xf32>
    %45 = arith.mulf %44, %43 : vector<2x16xf32>
    %46 = arith.mulf %45, %24 : vector<2x16xf32>
    %cst_29 = arith.constant dense<0.000000e+00> : vector<2x32xf32>
    %47 = tpu.matmul %46, %8, %cst_29 {dimension_numbers = #tpu.dot_dimension_numbers<[1], [0], [0], [1], [0, 0, 1, 1], [], []>, precision = #tpu.contract_precision<fp32>} : vector<2x16xf32>, vector<16x32xf32>, vector<2x32xf32> -> vector<2x32xf32>
    %48 = vector.broadcast %9 : vector<1x32xf32> to vector<2x32xf32>
    %49 = arith.addf %47, %48 : vector<2x32xf32>
    %50 = arith.negf %49 : vector<2x32xf32>
    %51 = math.exp %50 : vector<2x32xf32>
    %cst_30 = arith.constant 1.000000e+00 : f32
    %52 = vector.broadcast %cst_30 : f32 to vector<2x32xf32>
    %53 = arith.addf %52, %51 : vector<2x32xf32>
    %54 = arith.divf %52, %53 : vector<2x32xf32>
    %cst_31 = arith.constant 2.000000e+00 : f32
    %55 = vector.broadcast %cst_31 : f32 to vector<2x32xf32>
    %56 = arith.mulf %55, %54 : vector<2x32xf32>
    %57 = arith.mulf %56, %35 : vector<2x32xf32>
    %cst_32 = arith.constant dense<0.000000e+00> : vector<2x16xf32>
    %58 = tpu.matmul %57, %6, %cst_32 {dimension_numbers = #tpu.dot_dimension_numbers<[1], [0], [0], [1], [0, 0, 1, 1], [], []>, precision = #tpu.contract_precision<fp32>} : vector<2x32xf32>, vector<32x16xf32>, vector<2x16xf32> -> vector<2x16xf32>
    %59 = vector.broadcast %7 : vector<1x16xf32> to vector<2x16xf32>
    %60 = arith.addf %58, %59 : vector<2x16xf32>
    %61 = arith.negf %60 : vector<2x16xf32>
    %62 = math.exp %61 : vector<2x16xf32>
    %cst_33 = arith.constant 1.000000e+00 : f32
    %63 = vector.broadcast %cst_33 : f32 to vector<2x16xf32>
    %64 = arith.addf %63, %62 : vector<2x16xf32>
    %65 = arith.divf %63, %64 : vector<2x16xf32>
    %cst_34 = arith.constant 2.000000e+00 : f32
    %66 = vector.broadcast %cst_34 : f32 to vector<2x16xf32>
    %67 = arith.mulf %66, %65 : vector<2x16xf32>
    %68 = arith.mulf %67, %46 : vector<2x16xf32>
    %cst_35 = arith.constant dense<0.000000e+00> : vector<2x128xf32>
    %69 = tpu.matmul %68, %3, %cst_35 {dimension_numbers = #tpu.dot_dimension_numbers<[1], [0], [0], [1], [0, 0, 1, 1], [], []>, precision = #tpu.contract_precision<fp32>} : vector<2x16xf32>, vector<16x128xf32>, vector<2x128xf32> -> vector<2x128xf32>
    %cst_36 = arith.constant dense<0.000000e+00> : vector<2x128xf32>
    %70 = tpu.matmul %57, %4, %cst_36 {dimension_numbers = #tpu.dot_dimension_numbers<[1], [0], [0], [1], [0, 0, 1, 1], [], []>, precision = #tpu.contract_precision<fp32>} : vector<2x32xf32>, vector<32x128xf32>, vector<2x128xf32> -> vector<2x128xf32>
    %71 = arith.addf %69, %70 : vector<2x128xf32>
    %72 = vector.broadcast %5 : vector<1x128xf32> to vector<2x128xf32>
    %73 = arith.addf %71, %72 : vector<2x128xf32>
    %74 = vector.extract_strided_slice %73 {offsets = [0, 0], sizes = [2, 32], strides = [1, 1]} : vector<2x128xf32> to vector<2x32xf32>
    %75 = arith.negf %74 : vector<2x32xf32>
    %76 = math.exp %75 : vector<2x32xf32>
    %cst_37 = arith.constant 1.000000e+00 : f32
    %77 = vector.broadcast %cst_37 : f32 to vector<2x32xf32>
    %78 = arith.addf %77, %76 : vector<2x32xf32>
    %79 = arith.divf %77, %78 : vector<2x32xf32>
    %80 = vector.extract_strided_slice %73 {offsets = [0, 32], sizes = [2, 32], strides = [1, 1]} : vector<2x128xf32> to vector<2x32xf32>
    %81 = arith.negf %80 : vector<2x32xf32>
    %82 = math.exp %81 : vector<2x32xf32>
    %cst_38 = arith.constant 1.000000e+00 : f32
    %83 = vector.broadcast %cst_38 : f32 to vector<2x32xf32>
    %84 = arith.addf %83, %82 : vector<2x32xf32>
    %85 = arith.divf %83, %84 : vector<2x32xf32>
    %86 = vector.extract_strided_slice %73 {offsets = [0, 64], sizes = [2, 32], strides = [1, 1]} : vector<2x128xf32> to vector<2x32xf32>
    %87 = math.tanh %86 : vector<2x32xf32>
    %88 = vector.extract_strided_slice %73 {offsets = [0, 96], sizes = [2, 32], strides = [1, 1]} : vector<2x128xf32> to vector<2x32xf32>
    %89 = arith.negf %88 : vector<2x32xf32>
    %90 = math.exp %89 : vector<2x32xf32>
    %cst_39 = arith.constant 1.000000e+00 : f32
    %91 = vector.broadcast %cst_39 : f32 to vector<2x32xf32>
    %92 = arith.addf %91, %90 : vector<2x32xf32>
    %93 = arith.divf %91, %92 : vector<2x32xf32>
    %94 = arith.mulf %85, %11 : vector<2x32xf32>
    %95 = arith.mulf %79, %87 : vector<2x32xf32>
    %96 = arith.addf %94, %95 : vector<2x32xf32>
    %97 = math.tanh %96 : vector<2x32xf32>
    %98 = arith.mulf %93, %97 : vector<2x32xf32>
    %c0_40 = arith.constant 0 : index
    %c0_41 = arith.constant 0 : index
    %c0_42 = arith.constant 0 : index
    %99 = vector.load %arg10[%c0_40, %c0_41, %c0_42] : memref<8x2x32xf32, #tpu.memory_space<vmem>>, vector<1x2x32xf32>
    %100 = vector.shape_cast %99 : vector<1x2x32xf32> to vector<2x32xf32>
    %101 = vector.shape_cast %98 : vector<2x32xf32> to vector<1x2x32xf32>
    tpu.vector_store %arg10[%c0_40, %c0_41, %c0_42], %101 {strides = array<i32>} : memref<8x2x32xf32, #tpu.memory_space<vmem>>, vector<1x2x32xf32>,
    %c1 = arith.constant 1 : index
    %c0_43 = arith.constant 0 : index
    %c0_44 = arith.constant 0 : index
    %102 = vector.load %arg1[%c1, %c0_43, %c0_44] : memref<8x2x16xf32, #tpu.memory_space<vmem>>, vector<1x2x16xf32>
    %103 = vector.shape_cast %102 : vector<1x2x16xf32> to vector<2x16xf32>
    %cst_45 = arith.constant dense<0.000000e+00> : vector<2x16xf32>
    %104 = tpu.matmul %98, %6, %cst_45 {dimension_numbers = #tpu.dot_dimension_numbers<[1], [0], [0], [1], [0, 0, 1, 1], [], []>, precision = #tpu.contract_precision<fp32>} : vector<2x32xf32>, vector<32x16xf32>, vector<2x16xf32> -> vector<2x16xf32>
    %105 = vector.broadcast %7 : vector<1x16xf32> to vector<2x16xf32>
    %106 = arith.addf %104, %105 : vector<2x16xf32>
    %107 = arith.negf %106 : vector<2x16xf32>
    %108 = math.exp %107 : vector<2x16xf32>
    %cst_46 = arith.constant 1.000000e+00 : f32
    %109 = vector.broadcast %cst_46 : f32 to vector<2x16xf32>
    %110 = arith.addf %109, %108 : vector<2x16xf32>
    %111 = arith.divf %109, %110 : vector<2x16xf32>
    %cst_47 = arith.constant 2.000000e+00 : f32
    %112 = vector.broadcast %cst_47 : f32 to vector<2x16xf32>
    %113 = arith.mulf %112, %111 : vector<2x16xf32>
    %114 = arith.mulf %113, %103 : vector<2x16xf32>
    %cst_48 = arith.constant dense<0.000000e+00> : vector<2x32xf32>
    %115 = tpu.matmul %114, %8, %cst_48 {dimension_numbers = #tpu.dot_dimension_numbers<[1], [0], [0], [1], [0, 0, 1, 1], [], []>, precision = #tpu.contract_precision<fp32>} : vector<2x16xf32>, vector<16x32xf32>, vector<2x32xf32> -> vector<2x32xf32>
    %116 = vector.broadcast %9 : vector<1x32xf32> to vector<2x32xf32>
    %117 = arith.addf %115, %116 : vector<2x32xf32>
    %118 = arith.negf %117 : vector<2x32xf32>
    %119 = math.exp %118 : vector<2x32xf32>
    %cst_49 = arith.constant 1.000000e+00 : f32
    %120 = vector.broadcast %cst_49 : f32 to vector<2x32xf32>
    %121 = arith.addf %120, %119 : vector<2x32xf32>
    %122 = arith.divf %120, %121 : vector<2x32xf32>
    %cst_50 = arith.constant 2.000000e+00 : f32
    %123 = vector.broadcast %cst_50 : f32 to vector<2x32xf32>
    %124 = arith.mulf %123, %122 : vector<2x32xf32>
    %125 = arith.mulf %124, %98 : vector<2x32xf32>
    %cst_51 = arith.constant dense<0.000000e+00> : vector<2x16xf32>
    %126 = tpu.matmul %125, %6, %cst_51 {dimension_numbers = #tpu.dot_dimension_numbers<[1], [0], [0], [1], [0, 0, 1, 1], [], []>, precision = #tpu.contract_precision<fp32>} : vector<2x32xf32>, vector<32x16xf32>, vector<2x16xf32> -> vector<2x16xf32>
    %127 = vector.broadcast %7 : vector<1x16xf32> to vector<2x16xf32>
    %128 = arith.addf %126, %127 : vector<2x16xf32>
    %129 = arith.negf %128 : vector<2x16xf32>
    %130 = math.exp %129 : vector<2x16xf32>
    %cst_52 = arith.constant 1.000000e+00 : f32
    %131 = vector.broadcast %cst_52 : f32 to vector<2x16xf32>
    %132 = arith.addf %131, %130 : vector<2x16xf32>
    %133 = arith.divf %131, %132 : vector<2x16xf32>
    %cst_53 = arith.constant 2.000000e+00 : f32
    %134 = vector.broadcast %cst_53 : f32 to vector<2x16xf32>
    %135 = arith.mulf %134, %133 : vector<2x16xf32>
    %136 = arith.mulf %135, %114 : vector<2x16xf32>
    %cst_54 = arith.constant dense<0.000000e+00> : vector<2x32xf32>
    %137 = tpu.matmul %136, %8, %cst_54 {dimension_numbers = #tpu.dot_dimension_numbers<[1], [0], [0], [1], [0, 0, 1, 1], [], []>, precision = #tpu.contract_precision<fp32>} : vector<2x16xf32>, vector<16x32xf32>, vector<2x32xf32> -> vector<2x32xf32>
    %138 = vector.broadcast %9 : vector<1x32xf32> to vector<2x32xf32>
    %139 = arith.addf %137, %138 : vector<2x32xf32>
    %140 = arith.negf %139 : vector<2x32xf32>
    %141 = math.exp %140 : vector<2x32xf32>
    %cst_55 = arith.constant 1.000000e+00 : f32
    %142 = vector.broadcast %cst_55 : f32 to vector<2x32xf32>
    %143 = arith.addf %142, %141 : vector<2x32xf32>
    %144 = arith.divf %142, %143 : vector<2x32xf32>
    %cst_56 = arith.constant 2.000000e+00 : f32
    %145 = vector.broadcast %cst_56 : f32 to vector<2x32xf32>
    %146 = arith.mulf %145, %144 : vector<2x32xf32>
    %147 = arith.mulf %146, %125 : vector<2x32xf32>
    %cst_57 = arith.constant dense<0.000000e+00> : vector<2x16xf32>
    %148 = tpu.matmul %147, %6, %cst_57 {dimension_numbers = #tpu.dot_dimension_numbers<[1], [0], [0], [1], [0, 0, 1, 1], [], []>, precision = #tpu.contract_precision<fp32>} : vector<2x32xf32>, vector<32x16xf32>, vector<2x16xf32> -> vector<2x16xf32>
    %149 = vector.broadcast %7 : vector<1x16xf32> to vector<2x16xf32>
    %150 = arith.addf %148, %149 : vector<2x16xf32>
    %151 = arith.negf %150 : vector<2x16xf32>
    %152 = math.exp %151 : vector<2x16xf32>
    %cst_58 = arith.constant 1.000000e+00 : f32
    %153 = vector.broadcast %cst_58 : f32 to vector<2x16xf32>
    %154 = arith.addf %153, %152 : vector<2x16xf32>
    %155 = arith.divf %153, %154 : vector<2x16xf32>
    %cst_59 = arith.constant 2.000000e+00 : f32
    %156 = vector.broadcast %cst_59 : f32 to vector<2x16xf32>
    %157 = arith.mulf %156, %155 : vector<2x16xf32>
    %158 = arith.mulf %157, %136 : vector<2x16xf32>
    %cst_60 = arith.constant dense<0.000000e+00> : vector<2x128xf32>
    %159 = tpu.matmul %158, %3, %cst_60 {dimension_numbers = #tpu.dot_dimension_numbers<[1], [0], [0], [1], [0, 0, 1, 1], [], []>, precision = #tpu.contract_precision<fp32>} : vector<2x16xf32>, vector<16x128xf32>, vector<2x128xf32> -> vector<2x128xf32>
    %cst_61 = arith.constant dense<0.000000e+00> : vector<2x128xf32>
    %160 = tpu.matmul %147, %4, %cst_61 {dimension_numbers = #tpu.dot_dimension_numbers<[1], [0], [0], [1], [0, 0, 1, 1], [], []>, precision = #tpu.contract_precision<fp32>} : vector<2x32xf32>, vector<32x128xf32>, vector<2x128xf32> -> vector<2x128xf32>
    %161 = arith.addf %159, %160 : vector<2x128xf32>
    %162 = vector.broadcast %5 : vector<1x128xf32> to vector<2x128xf32>
    %163 = arith.addf %161, %162 : vector<2x128xf32>
    %164 = vector.extract_strided_slice %163 {offsets = [0, 0], sizes = [2, 32], strides = [1, 1]} : vector<2x128xf32> to vector<2x32xf32>
    %165 = arith.negf %164 : vector<2x32xf32>
    %166 = math.exp %165 : vector<2x32xf32>
    %cst_62 = arith.constant 1.000000e+00 : f32
    %167 = vector.broadcast %cst_62 : f32 to vector<2x32xf32>
    %168 = arith.addf %167, %166 : vector<2x32xf32>
    %169 = arith.divf %167, %168 : vector<2x32xf32>
    %170 = vector.extract_strided_slice %163 {offsets = [0, 32], sizes = [2, 32], strides = [1, 1]} : vector<2x128xf32> to vector<2x32xf32>
    %171 = arith.negf %170 : vector<2x32xf32>
    %172 = math.exp %171 : vector<2x32xf32>
    %cst_63 = arith.constant 1.000000e+00 : f32
    %173 = vector.broadcast %cst_63 : f32 to vector<2x32xf32>
    %174 = arith.addf %173, %172 : vector<2x32xf32>
    %175 = arith.divf %173, %174 : vector<2x32xf32>
    %176 = vector.extract_strided_slice %163 {offsets = [0, 64], sizes = [2, 32], strides = [1, 1]} : vector<2x128xf32> to vector<2x32xf32>
    %177 = math.tanh %176 : vector<2x32xf32>
    %178 = vector.extract_strided_slice %163 {offsets = [0, 96], sizes = [2, 32], strides = [1, 1]} : vector<2x128xf32> to vector<2x32xf32>
    %179 = arith.negf %178 : vector<2x32xf32>
    %180 = math.exp %179 : vector<2x32xf32>
    %cst_64 = arith.constant 1.000000e+00 : f32
    %181 = vector.broadcast %cst_64 : f32 to vector<2x32xf32>
    %182 = arith.addf %181, %180 : vector<2x32xf32>
    %183 = arith.divf %181, %182 : vector<2x32xf32>
    %184 = arith.mulf %175, %96 : vector<2x32xf32>
    %185 = arith.mulf %169, %177 : vector<2x32xf32>
    %186 = arith.addf %184, %185 : vector<2x32xf32>
    %187 = math.tanh %186 : vector<2x32xf32>
    %188 = arith.mulf %183, %187 : vector<2x32xf32>
    %c1_65 = arith.constant 1 : index
    %c0_66 = arith.constant 0 : index
    %c0_67 = arith.constant 0 : index
    %189 = vector.load %arg10[%c1_65, %c0_66, %c0_67] : memref<8x2x32xf32, #tpu.memory_space<vmem>>, vector<1x2x32xf32>
    %190 = vector.shape_cast %189 : vector<1x2x32xf32> to vector<2x32xf32>
    %191 = vector.shape_cast %188 : vector<2x32xf32> to vector<1x2x32xf32>
    tpu.vector_store %arg10[%c1_65, %c0_66, %c0_67], %191 {strides = array<i32>} : memref<8x2x32xf32, #tpu.memory_space<vmem>>, vector<1x2x32xf32>,
    %c2 = arith.constant 2 : index
    %c0_68 = arith.constant 0 : index
    %c0_69 = arith.constant 0 : index
    %192 = vector.load %arg1[%c2, %c0_68, %c0_69] : memref<8x2x16xf32, #tpu.memory_space<vmem>>, vector<1x2x16xf32>
    %193 = vector.shape_cast %192 : vector<1x2x16xf32> to vector<2x16xf32>
    %cst_70 = arith.constant dense<0.000000e+00> : vector<2x16xf32>
    %194 = tpu.matmul %188, %6, %cst_70 {dimension_numbers = #tpu.dot_dimension_numbers<[1], [0], [0], [1], [0, 0, 1, 1], [], []>, precision = #tpu.contract_precision<fp32>} : vector<2x32xf32>, vector<32x16xf32>, vector<2x16xf32> -> vector<2x16xf32>
    %195 = vector.broadcast %7 : vector<1x16xf32> to vector<2x16xf32>
    %196 = arith.addf %194, %195 : vector<2x16xf32>
    %197 = arith.negf %196 : vector<2x16xf32>
    %198 = math.exp %197 : vector<2x16xf32>
    %cst_71 = arith.constant 1.000000e+00 : f32
    %199 = vector.broadcast %cst_71 : f32 to vector<2x16xf32>
    %200 = arith.addf %199, %198 : vector<2x16xf32>
    %201 = arith.divf %199, %200 : vector<2x16xf32>
    %cst_72 = arith.constant 2.000000e+00 : f32
    %202 = vector.broadcast %cst_72 : f32 to vector<2x16xf32>
    %203 = arith.mulf %202, %201 : vector<2x16xf32>
    %204 = arith.mulf %203, %193 : vector<2x16xf32>
    %cst_73 = arith.constant dense<0.000000e+00> : vector<2x32xf32>
    %205 = tpu.matmul %204, %8, %cst_73 {dimension_numbers = #tpu.dot_dimension_numbers<[1], [0], [0], [1], [0, 0, 1, 1], [], []>, precision = #tpu.contract_precision<fp32>} : vector<2x16xf32>, vector<16x32xf32>, vector<2x32xf32> -> vector<2x32xf32>
    %206 = vector.broadcast %9 : vector<1x32xf32> to vector<2x32xf32>
    %207 = arith.addf %205, %206 : vector<2x32xf32>
    %208 = arith.negf %207 : vector<2x32xf32>
    %209 = math.exp %208 : vector<2x32xf32>
    %cst_74 = arith.constant 1.000000e+00 : f32
    %210 = vector.broadcast %cst_74 : f32 to vector<2x32xf32>
    %211 = arith.addf %210, %209 : vector<2x32xf32>
    %212 = arith.divf %210, %211 : vector<2x32xf32>
    %cst_75 = arith.constant 2.000000e+00 : f32
    %213 = vector.broadcast %cst_75 : f32 to vector<2x32xf32>
    %214 = arith.mulf %213, %212 : vector<2x32xf32>
    %215 = arith.mulf %214, %188 : vector<2x32xf32>
    %cst_76 = arith.constant dense<0.000000e+00> : vector<2x16xf32>
    %216 = tpu.matmul %215, %6, %cst_76 {dimension_numbers = #tpu.dot_dimension_numbers<[1], [0], [0], [1], [0, 0, 1, 1], [], []>, precision = #tpu.contract_precision<fp32>} : vector<2x32xf32>, vector<32x16xf32>, vector<2x16xf32> -> vector<2x16xf32>
    %217 = vector.broadcast %7 : vector<1x16xf32> to vector<2x16xf32>
    %218 = arith.addf %216, %217 : vector<2x16xf32>
    %219 = arith.negf %218 : vector<2x16xf32>
    %220 = math.exp %219 : vector<2x16xf32>
    %cst_77 = arith.constant 1.000000e+00 : f32
    %221 = vector.broadcast %cst_77 : f32 to vector<2x16xf32>
    %222 = arith.addf %221, %220 : vector<2x16xf32>
    %223 = arith.divf %221, %222 : vector<2x16xf32>
    %cst_78 = arith.constant 2.000000e+00 : f32
    %224 = vector.broadcast %cst_78 : f32 to vector<2x16xf32>
    %225 = arith.mulf %224, %223 : vector<2x16xf32>
    %226 = arith.mulf %225, %204 : vector<2x16xf32>
    %cst_79 = arith.constant dense<0.000000e+00> : vector<2x32xf32>
    %227 = tpu.matmul %226, %8, %cst_79 {dimension_numbers = #tpu.dot_dimension_numbers<[1], [0], [0], [1], [0, 0, 1, 1], [], []>, precision = #tpu.contract_precision<fp32>} : vector<2x16xf32>, vector<16x32xf32>, vector<2x32xf32> -> vector<2x32xf32>
    %228 = vector.broadcast %9 : vector<1x32xf32> to vector<2x32xf32>
    %229 = arith.addf %227, %228 : vector<2x32xf32>
    %230 = arith.negf %229 : vector<2x32xf32>
    %231 = math.exp %230 : vector<2x32xf32>
    %cst_80 = arith.constant 1.000000e+00 : f32
    %232 = vector.broadcast %cst_80 : f32 to vector<2x32xf32>
    %233 = arith.addf %232, %231 : vector<2x32xf32>
    %234 = arith.divf %232, %233 : vector<2x32xf32>
    %cst_81 = arith.constant 2.000000e+00 : f32
    %235 = vector.broadcast %cst_81 : f32 to vector<2x32xf32>
    %236 = arith.mulf %235, %234 : vector<2x32xf32>
    %237 = arith.mulf %236, %215 : vector<2x32xf32>
    %cst_82 = arith.constant dense<0.000000e+00> : vector<2x16xf32>
    %238 = tpu.matmul %237, %6, %cst_82 {dimension_numbers = #tpu.dot_dimension_numbers<[1], [0], [0], [1], [0, 0, 1, 1], [], []>, precision = #tpu.contract_precision<fp32>} : vector<2x32xf32>, vector<32x16xf32>, vector<2x16xf32> -> vector<2x16xf32>
    %239 = vector.broadcast %7 : vector<1x16xf32> to vector<2x16xf32>
    %240 = arith.addf %238, %239 : vector<2x16xf32>
    %241 = arith.negf %240 : vector<2x16xf32>
    %242 = math.exp %241 : vector<2x16xf32>
    %cst_83 = arith.constant 1.000000e+00 : f32
    %243 = vector.broadcast %cst_83 : f32 to vector<2x16xf32>
    %244 = arith.addf %243, %242 : vector<2x16xf32>
    %245 = arith.divf %243, %244 : vector<2x16xf32>
    %cst_84 = arith.constant 2.000000e+00 : f32
    %246 = vector.broadcast %cst_84 : f32 to vector<2x16xf32>
    %247 = arith.mulf %246, %245 : vector<2x16xf32>
    %248 = arith.mulf %247, %226 : vector<2x16xf32>
    %cst_85 = arith.constant dense<0.000000e+00> : vector<2x128xf32>
    %249 = tpu.matmul %248, %3, %cst_85 {dimension_numbers = #tpu.dot_dimension_numbers<[1], [0], [0], [1], [0, 0, 1, 1], [], []>, precision = #tpu.contract_precision<fp32>} : vector<2x16xf32>, vector<16x128xf32>, vector<2x128xf32> -> vector<2x128xf32>
    %cst_86 = arith.constant dense<0.000000e+00> : vector<2x128xf32>
    %250 = tpu.matmul %237, %4, %cst_86 {dimension_numbers = #tpu.dot_dimension_numbers<[1], [0], [0], [1], [0, 0, 1, 1], [], []>, precision = #tpu.contract_precision<fp32>} : vector<2x32xf32>, vector<32x128xf32>, vector<2x128xf32> -> vector<2x128xf32>
    %251 = arith.addf %249, %250 : vector<2x128xf32>
    %252 = vector.broadcast %5 : vector<1x128xf32> to vector<2x128xf32>
    %253 = arith.addf %251, %252 : vector<2x128xf32>
    %254 = vector.extract_strided_slice %253 {offsets = [0, 0], sizes = [2, 32], strides = [1, 1]} : vector<2x128xf32> to vector<2x32xf32>
    %255 = arith.negf %254 : vector<2x32xf32>
    %256 = math.exp %255 : vector<2x32xf32>
    %cst_87 = arith.constant 1.000000e+00 : f32
    %257 = vector.broadcast %cst_87 : f32 to vector<2x32xf32>
    %258 = arith.addf %257, %256 : vector<2x32xf32>
    %259 = arith.divf %257, %258 : vector<2x32xf32>
    %260 = vector.extract_strided_slice %253 {offsets = [0, 32], sizes = [2, 32], strides = [1, 1]} : vector<2x128xf32> to vector<2x32xf32>
    %261 = arith.negf %260 : vector<2x32xf32>
    %262 = math.exp %261 : vector<2x32xf32>
    %cst_88 = arith.constant 1.000000e+00 : f32
    %263 = vector.broadcast %cst_88 : f32 to vector<2x32xf32>
    %264 = arith.addf %263, %262 : vector<2x32xf32>
    %265 = arith.divf %263, %264 : vector<2x32xf32>
    %266 = vector.extract_strided_slice %253 {offsets = [0, 64], sizes = [2, 32], strides = [1, 1]} : vector<2x128xf32> to vector<2x32xf32>
    %267 = math.tanh %266 : vector<2x32xf32>
    %268 = vector.extract_strided_slice %253 {offsets = [0, 96], sizes = [2, 32], strides = [1, 1]} : vector<2x128xf32> to vector<2x32xf32>
    %269 = arith.negf %268 : vector<2x32xf32>
    %270 = math.exp %269 : vector<2x32xf32>
    %cst_89 = arith.constant 1.000000e+00 : f32
    %271 = vector.broadcast %cst_89 : f32 to vector<2x32xf32>
    %272 = arith.addf %271, %270 : vector<2x32xf32>
    %273 = arith.divf %271, %272 : vector<2x32xf32>
    %274 = arith.mulf %265, %186 : vector<2x32xf32>
    %275 = arith.mulf %259, %267 : vector<2x32xf32>
    %276 = arith.addf %274, %275 : vector<2x32xf32>
    %277 = math.tanh %276 : vector<2x32xf32>
    %278 = arith.mulf %273, %277 : vector<2x32xf32>
    %c2_90 = arith.constant 2 : index
    %c0_91 = arith.constant 0 : index
    %c0_92 = arith.constant 0 : index
    %279 = vector.load %arg10[%c2_90, %c0_91, %c0_92] : memref<8x2x32xf32, #tpu.memory_space<vmem>>, vector<1x2x32xf32>
    %280 = vector.shape_cast %279 : vector<1x2x32xf32> to vector<2x32xf32>
    %281 = vector.shape_cast %278 : vector<2x32xf32> to vector<1x2x32xf32>
    tpu.vector_store %arg10[%c2_90, %c0_91, %c0_92], %281 {strides = array<i32>} : memref<8x2x32xf32, #tpu.memory_space<vmem>>, vector<1x2x32xf32>,
    %c3 = arith.constant 3 : index
    %c0_93 = arith.constant 0 : index
    %c0_94 = arith.constant 0 : index
    %282 = vector.load %arg1[%c3, %c0_93, %c0_94] : memref<8x2x16xf32, #tpu.memory_space<vmem>>, vector<1x2x16xf32>
    %283 = vector.shape_cast %282 : vector<1x2x16xf32> to vector<2x16xf32>
    %cst_95 = arith.constant dense<0.000000e+00> : vector<2x16xf32>
    %284 = tpu.matmul %278, %6, %cst_95 {dimension_numbers = #tpu.dot_dimension_numbers<[1], [0], [0], [1], [0, 0, 1, 1], [], []>, precision = #tpu.contract_precision<fp32>} : vector<2x32xf32>, vector<32x16xf32>, vector<2x16xf32> -> vector<2x16xf32>
    %285 = vector.broadcast %7 : vector<1x16xf32> to vector<2x16xf32>
    %286 = arith.addf %284, %285 : vector<2x16xf32>
    %287 = arith.negf %286 : vector<2x16xf32>
    %288 = math.exp %287 : vector<2x16xf32>
    %cst_96 = arith.constant 1.000000e+00 : f32
    %289 = vector.broadcast %cst_96 : f32 to vector<2x16xf32>
    %290 = arith.addf %289, %288 : vector<2x16xf32>
    %291 = arith.divf %289, %290 : vector<2x16xf32>
    %cst_97 = arith.constant 2.000000e+00 : f32
    %292 = vector.broadcast %cst_97 : f32 to vector<2x16xf32>
    %293 = arith.mulf %292, %291 : vector<2x16xf32>
    %294 = arith.mulf %293, %283 : vector<2x16xf32>
    %cst_98 = arith.constant dense<0.000000e+00> : vector<2x32xf32>
    %295 = tpu.matmul %294, %8, %cst_98 {dimension_numbers = #tpu.dot_dimension_numbers<[1], [0], [0], [1], [0, 0, 1, 1], [], []>, precision = #tpu.contract_precision<fp32>} : vector<2x16xf32>, vector<16x32xf32>, vector<2x32xf32> -> vector<2x32xf32>
    %296 = vector.broadcast %9 : vector<1x32xf32> to vector<2x32xf32>
    %297 = arith.addf %295, %296 : vector<2x32xf32>
    %298 = arith.negf %297 : vector<2x32xf32>
    %299 = math.exp %298 : vector<2x32xf32>
    %cst_99 = arith.constant 1.000000e+00 : f32
    %300 = vector.broadcast %cst_99 : f32 to vector<2x32xf32>
    %301 = arith.addf %300, %299 : vector<2x32xf32>
    %302 = arith.divf %300, %301 : vector<2x32xf32>
    %cst_100 = arith.constant 2.000000e+00 : f32
    %303 = vector.broadcast %cst_100 : f32 to vector<2x32xf32>
    %304 = arith.mulf %303, %302 : vector<2x32xf32>
    %305 = arith.mulf %304, %278 : vector<2x32xf32>
    %cst_101 = arith.constant dense<0.000000e+00> : vector<2x16xf32>
    %306 = tpu.matmul %305, %6, %cst_101 {dimension_numbers = #tpu.dot_dimension_numbers<[1], [0], [0], [1], [0, 0, 1, 1], [], []>, precision = #tpu.contract_precision<fp32>} : vector<2x32xf32>, vector<32x16xf32>, vector<2x16xf32> -> vector<2x16xf32>
    %307 = vector.broadcast %7 : vector<1x16xf32> to vector<2x16xf32>
    %308 = arith.addf %306, %307 : vector<2x16xf32>
    %309 = arith.negf %308 : vector<2x16xf32>
    %310 = math.exp %309 : vector<2x16xf32>
    %cst_102 = arith.constant 1.000000e+00 : f32
    %311 = vector.broadcast %cst_102 : f32 to vector<2x16xf32>
    %312 = arith.addf %311, %310 : vector<2x16xf32>
    %313 = arith.divf %311, %312 : vector<2x16xf32>
    %cst_103 = arith.constant 2.000000e+00 : f32
    %314 = vector.broadcast %cst_103 : f32 to vector<2x16xf32>
    %315 = arith.mulf %314, %313 : vector<2x16xf32>
    %316 = arith.mulf %315, %294 : vector<2x16xf32>
    %cst_104 = arith.constant dense<0.000000e+00> : vector<2x32xf32>
    %317 = tpu.matmul %316, %8, %cst_104 {dimension_numbers = #tpu.dot_dimension_numbers<[1], [0], [0], [1], [0, 0, 1, 1], [], []>, precision = #tpu.contract_precision<fp32>} : vector<2x16xf32>, vector<16x32xf32>, vector<2x32xf32> -> vector<2x32xf32>
    %318 = vector.broadcast %9 : vector<1x32xf32> to vector<2x32xf32>
    %319 = arith.addf %317, %318 : vector<2x32xf32>
    %320 = arith.negf %319 : vector<2x32xf32>
    %321 = math.exp %320 : vector<2x32xf32>
    %cst_105 = arith.constant 1.000000e+00 : f32
    %322 = vector.broadcast %cst_105 : f32 to vector<2x32xf32>
    %323 = arith.addf %322, %321 : vector<2x32xf32>
    %324 = arith.divf %322, %323 : vector<2x32xf32>
    %cst_106 = arith.constant 2.000000e+00 : f32
    %325 = vector.broadcast %cst_106 : f32 to vector<2x32xf32>
    %326 = arith.mulf %325, %324 : vector<2x32xf32>
    %327 = arith.mulf %326, %305 : vector<2x32xf32>
    %cst_107 = arith.constant dense<0.000000e+00> : vector<2x16xf32>
    %328 = tpu.matmul %327, %6, %cst_107 {dimension_numbers = #tpu.dot_dimension_numbers<[1], [0], [0], [1], [0, 0, 1, 1], [], []>, precision = #tpu.contract_precision<fp32>} : vector<2x32xf32>, vector<32x16xf32>, vector<2x16xf32> -> vector<2x16xf32>
    %329 = vector.broadcast %7 : vector<1x16xf32> to vector<2x16xf32>
    %330 = arith.addf %328, %329 : vector<2x16xf32>
    %331 = arith.negf %330 : vector<2x16xf32>
    %332 = math.exp %331 : vector<2x16xf32>
    %cst_108 = arith.constant 1.000000e+00 : f32
    %333 = vector.broadcast %cst_108 : f32 to vector<2x16xf32>
    %334 = arith.addf %333, %332 : vector<2x16xf32>
    %335 = arith.divf %333, %334 : vector<2x16xf32>
    %cst_109 = arith.constant 2.000000e+00 : f32
    %336 = vector.broadcast %cst_109 : f32 to vector<2x16xf32>
    %337 = arith.mulf %336, %335 : vector<2x16xf32>
    %338 = arith.mulf %337, %316 : vector<2x16xf32>
    %cst_110 = arith.constant dense<0.000000e+00> : vector<2x128xf32>
    %339 = tpu.matmul %338, %3, %cst_110 {dimension_numbers = #tpu.dot_dimension_numbers<[1], [0], [0], [1], [0, 0, 1, 1], [], []>, precision = #tpu.contract_precision<fp32>} : vector<2x16xf32>, vector<16x128xf32>, vector<2x128xf32> -> vector<2x128xf32>
    %cst_111 = arith.constant dense<0.000000e+00> : vector<2x128xf32>
    %340 = tpu.matmul %327, %4, %cst_111 {dimension_numbers = #tpu.dot_dimension_numbers<[1], [0], [0], [1], [0, 0, 1, 1], [], []>, precision = #tpu.contract_precision<fp32>} : vector<2x32xf32>, vector<32x128xf32>, vector<2x128xf32> -> vector<2x128xf32>
    %341 = arith.addf %339, %340 : vector<2x128xf32>
    %342 = vector.broadcast %5 : vector<1x128xf32> to vector<2x128xf32>
    %343 = arith.addf %341, %342 : vector<2x128xf32>
    %344 = vector.extract_strided_slice %343 {offsets = [0, 0], sizes = [2, 32], strides = [1, 1]} : vector<2x128xf32> to vector<2x32xf32>
    %345 = arith.negf %344 : vector<2x32xf32>
    %346 = math.exp %345 : vector<2x32xf32>
    %cst_112 = arith.constant 1.000000e+00 : f32
    %347 = vector.broadcast %cst_112 : f32 to vector<2x32xf32>
    %348 = arith.addf %347, %346 : vector<2x32xf32>
    %349 = arith.divf %347, %348 : vector<2x32xf32>
    %350 = vector.extract_strided_slice %343 {offsets = [0, 32], sizes = [2, 32], strides = [1, 1]} : vector<2x128xf32> to vector<2x32xf32>
    %351 = arith.negf %350 : vector<2x32xf32>
    %352 = math.exp %351 : vector<2x32xf32>
    %cst_113 = arith.constant 1.000000e+00 : f32
    %353 = vector.broadcast %cst_113 : f32 to vector<2x32xf32>
    %354 = arith.addf %353, %352 : vector<2x32xf32>
    %355 = arith.divf %353, %354 : vector<2x32xf32>
    %356 = vector.extract_strided_slice %343 {offsets = [0, 64], sizes = [2, 32], strides = [1, 1]} : vector<2x128xf32> to vector<2x32xf32>
    %357 = math.tanh %356 : vector<2x32xf32>
    %358 = vector.extract_strided_slice %343 {offsets = [0, 96], sizes = [2, 32], strides = [1, 1]} : vector<2x128xf32> to vector<2x32xf32>
    %359 = arith.negf %358 : vector<2x32xf32>
    %360 = math.exp %359 : vector<2x32xf32>
    %cst_114 = arith.constant 1.000000e+00 : f32
    %361 = vector.broadcast %cst_114 : f32 to vector<2x32xf32>
    %362 = arith.addf %361, %360 : vector<2x32xf32>
    %363 = arith.divf %361, %362 : vector<2x32xf32>
    %364 = arith.mulf %355, %276 : vector<2x32xf32>
    %365 = arith.mulf %349, %357 : vector<2x32xf32>
    %366 = arith.addf %364, %365 : vector<2x32xf32>
    %367 = math.tanh %366 : vector<2x32xf32>
    %368 = arith.mulf %363, %367 : vector<2x32xf32>
    %c3_115 = arith.constant 3 : index
    %c0_116 = arith.constant 0 : index
    %c0_117 = arith.constant 0 : index
    %369 = vector.load %arg10[%c3_115, %c0_116, %c0_117] : memref<8x2x32xf32, #tpu.memory_space<vmem>>, vector<1x2x32xf32>
    %370 = vector.shape_cast %369 : vector<1x2x32xf32> to vector<2x32xf32>
    %371 = vector.shape_cast %368 : vector<2x32xf32> to vector<1x2x32xf32>
    tpu.vector_store %arg10[%c3_115, %c0_116, %c0_117], %371 {strides = array<i32>} : memref<8x2x32xf32, #tpu.memory_space<vmem>>, vector<1x2x32xf32>,
    %c4 = arith.constant 4 : index
    %c0_118 = arith.constant 0 : index
    %c0_119 = arith.constant 0 : index
    %372 = vector.load %arg1[%c4, %c0_118, %c0_119] : memref<8x2x16xf32, #tpu.memory_space<vmem>>, vector<1x2x16xf32>
    %373 = vector.shape_cast %372 : vector<1x2x16xf32> to vector<2x16xf32>
    %cst_120 = arith.constant dense<0.000000e+00> : vector<2x16xf32>
    %374 = tpu.matmul %368, %6, %cst_120 {dimension_numbers = #tpu.dot_dimension_numbers<[1], [0], [0], [1], [0, 0, 1, 1], [], []>, precision = #tpu.contract_precision<fp32>} : vector<2x32xf32>, vector<32x16xf32>, vector<2x16xf32> -> vector<2x16xf32>
    %375 = vector.broadcast %7 : vector<1x16xf32> to vector<2x16xf32>
    %376 = arith.addf %374, %375 : vector<2x16xf32>
    %377 = arith.negf %376 : vector<2x16xf32>
    %378 = math.exp %377 : vector<2x16xf32>
    %cst_121 = arith.constant 1.000000e+00 : f32
    %379 = vector.broadcast %cst_121 : f32 to vector<2x16xf32>
    %380 = arith.addf %379, %378 : vector<2x16xf32>
    %381 = arith.divf %379, %380 : vector<2x16xf32>
    %cst_122 = arith.constant 2.000000e+00 : f32
    %382 = vector.broadcast %cst_122 : f32 to vector<2x16xf32>
    %383 = arith.mulf %382, %381 : vector<2x16xf32>
    %384 = arith.mulf %383, %373 : vector<2x16xf32>
    %cst_123 = arith.constant dense<0.000000e+00> : vector<2x32xf32>
    %385 = tpu.matmul %384, %8, %cst_123 {dimension_numbers = #tpu.dot_dimension_numbers<[1], [0], [0], [1], [0, 0, 1, 1], [], []>, precision = #tpu.contract_precision<fp32>} : vector<2x16xf32>, vector<16x32xf32>, vector<2x32xf32> -> vector<2x32xf32>
    %386 = vector.broadcast %9 : vector<1x32xf32> to vector<2x32xf32>
    %387 = arith.addf %385, %386 : vector<2x32xf32>
    %388 = arith.negf %387 : vector<2x32xf32>
    %389 = math.exp %388 : vector<2x32xf32>
    %cst_124 = arith.constant 1.000000e+00 : f32
    %390 = vector.broadcast %cst_124 : f32 to vector<2x32xf32>
    %391 = arith.addf %390, %389 : vector<2x32xf32>
    %392 = arith.divf %390, %391 : vector<2x32xf32>
    %cst_125 = arith.constant 2.000000e+00 : f32
    %393 = vector.broadcast %cst_125 : f32 to vector<2x32xf32>
    %394 = arith.mulf %393, %392 : vector<2x32xf32>
    %395 = arith.mulf %394, %368 : vector<2x32xf32>
    %cst_126 = arith.constant dense<0.000000e+00> : vector<2x16xf32>
    %396 = tpu.matmul %395, %6, %cst_126 {dimension_numbers = #tpu.dot_dimension_numbers<[1], [0], [0], [1], [0, 0, 1, 1], [], []>, precision = #tpu.contract_precision<fp32>} : vector<2x32xf32>, vector<32x16xf32>, vector<2x16xf32> -> vector<2x16xf32>
    %397 = vector.broadcast %7 : vector<1x16xf32> to vector<2x16xf32>
    %398 = arith.addf %396, %397 : vector<2x16xf32>
    %399 = arith.negf %398 : vector<2x16xf32>
    %400 = math.exp %399 : vector<2x16xf32>
    %cst_127 = arith.constant 1.000000e+00 : f32
    %401 = vector.broadcast %cst_127 : f32 to vector<2x16xf32>
    %402 = arith.addf %401, %400 : vector<2x16xf32>
    %403 = arith.divf %401, %402 : vector<2x16xf32>
    %cst_128 = arith.constant 2.000000e+00 : f32
    %404 = vector.broadcast %cst_128 : f32 to vector<2x16xf32>
    %405 = arith.mulf %404, %403 : vector<2x16xf32>
    %406 = arith.mulf %405, %384 : vector<2x16xf32>
    %cst_129 = arith.constant dense<0.000000e+00> : vector<2x32xf32>
    %407 = tpu.matmul %406, %8, %cst_129 {dimension_numbers = #tpu.dot_dimension_numbers<[1], [0], [0], [1], [0, 0, 1, 1], [], []>, precision = #tpu.contract_precision<fp32>} : vector<2x16xf32>, vector<16x32xf32>, vector<2x32xf32> -> vector<2x32xf32>
    %408 = vector.broadcast %9 : vector<1x32xf32> to vector<2x32xf32>
    %409 = arith.addf %407, %408 : vector<2x32xf32>
    %410 = arith.negf %409 : vector<2x32xf32>
    %411 = math.exp %410 : vector<2x32xf32>
    %cst_130 = arith.constant 1.000000e+00 : f32
    %412 = vector.broadcast %cst_130 : f32 to vector<2x32xf32>
    %413 = arith.addf %412, %411 : vector<2x32xf32>
    %414 = arith.divf %412, %413 : vector<2x32xf32>
    %cst_131 = arith.constant 2.000000e+00 : f32
    %415 = vector.broadcast %cst_131 : f32 to vector<2x32xf32>
    %416 = arith.mulf %415, %414 : vector<2x32xf32>
    %417 = arith.mulf %416, %395 : vector<2x32xf32>
    %cst_132 = arith.constant dense<0.000000e+00> : vector<2x16xf32>
    %418 = tpu.matmul %417, %6, %cst_132 {dimension_numbers = #tpu.dot_dimension_numbers<[1], [0], [0], [1], [0, 0, 1, 1], [], []>, precision = #tpu.contract_precision<fp32>} : vector<2x32xf32>, vector<32x16xf32>, vector<2x16xf32> -> vector<2x16xf32>
    %419 = vector.broadcast %7 : vector<1x16xf32> to vector<2x16xf32>
    %420 = arith.addf %418, %419 : vector<2x16xf32>
    %421 = arith.negf %420 : vector<2x16xf32>
    %422 = math.exp %421 : vector<2x16xf32>
    %cst_133 = arith.constant 1.000000e+00 : f32
    %423 = vector.broadcast %cst_133 : f32 to vector<2x16xf32>
    %424 = arith.addf %423, %422 : vector<2x16xf32>
    %425 = arith.divf %423, %424 : vector<2x16xf32>
    %cst_134 = arith.constant 2.000000e+00 : f32
    %426 = vector.broadcast %cst_134 : f32 to vector<2x16xf32>
    %427 = arith.mulf %426, %425 : vector<2x16xf32>
    %428 = arith.mulf %427, %406 : vector<2x16xf32>
    %cst_135 = arith.constant dense<0.000000e+00> : vector<2x128xf32>
    %429 = tpu.matmul %428, %3, %cst_135 {dimension_numbers = #tpu.dot_dimension_numbers<[1], [0], [0], [1], [0, 0, 1, 1], [], []>, precision = #tpu.contract_precision<fp32>} : vector<2x16xf32>, vector<16x128xf32>, vector<2x128xf32> -> vector<2x128xf32>
    %cst_136 = arith.constant dense<0.000000e+00> : vector<2x128xf32>
    %430 = tpu.matmul %417, %4, %cst_136 {dimension_numbers = #tpu.dot_dimension_numbers<[1], [0], [0], [1], [0, 0, 1, 1], [], []>, precision = #tpu.contract_precision<fp32>} : vector<2x32xf32>, vector<32x128xf32>, vector<2x128xf32> -> vector<2x128xf32>
    %431 = arith.addf %429, %430 : vector<2x128xf32>
    %432 = vector.broadcast %5 : vector<1x128xf32> to vector<2x128xf32>
    %433 = arith.addf %431, %432 : vector<2x128xf32>
    %434 = vector.extract_strided_slice %433 {offsets = [0, 0], sizes = [2, 32], strides = [1, 1]} : vector<2x128xf32> to vector<2x32xf32>
    %435 = arith.negf %434 : vector<2x32xf32>
    %436 = math.exp %435 : vector<2x32xf32>
    %cst_137 = arith.constant 1.000000e+00 : f32
    %437 = vector.broadcast %cst_137 : f32 to vector<2x32xf32>
    %438 = arith.addf %437, %436 : vector<2x32xf32>
    %439 = arith.divf %437, %438 : vector<2x32xf32>
    %440 = vector.extract_strided_slice %433 {offsets = [0, 32], sizes = [2, 32], strides = [1, 1]} : vector<2x128xf32> to vector<2x32xf32>
    %441 = arith.negf %440 : vector<2x32xf32>
    %442 = math.exp %441 : vector<2x32xf32>
    %cst_138 = arith.constant 1.000000e+00 : f32
    %443 = vector.broadcast %cst_138 : f32 to vector<2x32xf32>
    %444 = arith.addf %443, %442 : vector<2x32xf32>
    %445 = arith.divf %443, %444 : vector<2x32xf32>
    %446 = vector.extract_strided_slice %433 {offsets = [0, 64], sizes = [2, 32], strides = [1, 1]} : vector<2x128xf32> to vector<2x32xf32>
    %447 = math.tanh %446 : vector<2x32xf32>
    %448 = vector.extract_strided_slice %433 {offsets = [0, 96], sizes = [2, 32], strides = [1, 1]} : vector<2x128xf32> to vector<2x32xf32>
    %449 = arith.negf %448 : vector<2x32xf32>
    %450 = math.exp %449 : vector<2x32xf32>
    %cst_139 = arith.constant 1.000000e+00 : f32
    %451 = vector.broadcast %cst_139 : f32 to vector<2x32xf32>
    %452 = arith.addf %451, %450 : vector<2x32xf32>
    %453 = arith.divf %451, %452 : vector<2x32xf32>
    %454 = arith.mulf %445, %366 : vector<2x32xf32>
    %455 = arith.mulf %439, %447 : vector<2x32xf32>
    %456 = arith.addf %454, %455 : vector<2x32xf32>
    %457 = math.tanh %456 : vector<2x32xf32>
    %458 = arith.mulf %453, %457 : vector<2x32xf32>
    %c4_140 = arith.constant 4 : index
    %c0_141 = arith.constant 0 : index
    %c0_142 = arith.constant 0 : index
    %459 = vector.load %arg10[%c4_140, %c0_141, %c0_142] : memref<8x2x32xf32, #tpu.memory_space<vmem>>, vector<1x2x32xf32>
    %460 = vector.shape_cast %459 : vector<1x2x32xf32> to vector<2x32xf32>
    %461 = vector.shape_cast %458 : vector<2x32xf32> to vector<1x2x32xf32>
    tpu.vector_store %arg10[%c4_140, %c0_141, %c0_142], %461 {strides = array<i32>} : memref<8x2x32xf32, #tpu.memory_space<vmem>>, vector<1x2x32xf32>,
    %c5 = arith.constant 5 : index
    %c0_143 = arith.constant 0 : index
    %c0_144 = arith.constant 0 : index
    %462 = vector.load %arg1[%c5, %c0_143, %c0_144] : memref<8x2x16xf32, #tpu.memory_space<vmem>>, vector<1x2x16xf32>
    %463 = vector.shape_cast %462 : vector<1x2x16xf32> to vector<2x16xf32>
    %cst_145 = arith.constant dense<0.000000e+00> : vector<2x16xf32>
    %464 = tpu.matmul %458, %6, %cst_145 {dimension_numbers = #tpu.dot_dimension_numbers<[1], [0], [0], [1], [0, 0, 1, 1], [], []>, precision = #tpu.contract_precision<fp32>} : vector<2x32xf32>, vector<32x16xf32>, vector<2x16xf32> -> vector<2x16xf32>
    %465 = vector.broadcast %7 : vector<1x16xf32> to vector<2x16xf32>
    %466 = arith.addf %464, %465 : vector<2x16xf32>
    %467 = arith.negf %466 : vector<2x16xf32>
    %468 = math.exp %467 : vector<2x16xf32>
    %cst_146 = arith.constant 1.000000e+00 : f32
    %469 = vector.broadcast %cst_146 : f32 to vector<2x16xf32>
    %470 = arith.addf %469, %468 : vector<2x16xf32>
    %471 = arith.divf %469, %470 : vector<2x16xf32>
    %cst_147 = arith.constant 2.000000e+00 : f32
    %472 = vector.broadcast %cst_147 : f32 to vector<2x16xf32>
    %473 = arith.mulf %472, %471 : vector<2x16xf32>
    %474 = arith.mulf %473, %463 : vector<2x16xf32>
    %cst_148 = arith.constant dense<0.000000e+00> : vector<2x32xf32>
    %475 = tpu.matmul %474, %8, %cst_148 {dimension_numbers = #tpu.dot_dimension_numbers<[1], [0], [0], [1], [0, 0, 1, 1], [], []>, precision = #tpu.contract_precision<fp32>} : vector<2x16xf32>, vector<16x32xf32>, vector<2x32xf32> -> vector<2x32xf32>
    %476 = vector.broadcast %9 : vector<1x32xf32> to vector<2x32xf32>
    %477 = arith.addf %475, %476 : vector<2x32xf32>
    %478 = arith.negf %477 : vector<2x32xf32>
    %479 = math.exp %478 : vector<2x32xf32>
    %cst_149 = arith.constant 1.000000e+00 : f32
    %480 = vector.broadcast %cst_149 : f32 to vector<2x32xf32>
    %481 = arith.addf %480, %479 : vector<2x32xf32>
    %482 = arith.divf %480, %481 : vector<2x32xf32>
    %cst_150 = arith.constant 2.000000e+00 : f32
    %483 = vector.broadcast %cst_150 : f32 to vector<2x32xf32>
    %484 = arith.mulf %483, %482 : vector<2x32xf32>
    %485 = arith.mulf %484, %458 : vector<2x32xf32>
    %cst_151 = arith.constant dense<0.000000e+00> : vector<2x16xf32>
    %486 = tpu.matmul %485, %6, %cst_151 {dimension_numbers = #tpu.dot_dimension_numbers<[1], [0], [0], [1], [0, 0, 1, 1], [], []>, precision = #tpu.contract_precision<fp32>} : vector<2x32xf32>, vector<32x16xf32>, vector<2x16xf32> -> vector<2x16xf32>
    %487 = vector.broadcast %7 : vector<1x16xf32> to vector<2x16xf32>
    %488 = arith.addf %486, %487 : vector<2x16xf32>
    %489 = arith.negf %488 : vector<2x16xf32>
    %490 = math.exp %489 : vector<2x16xf32>
    %cst_152 = arith.constant 1.000000e+00 : f32
    %491 = vector.broadcast %cst_152 : f32 to vector<2x16xf32>
    %492 = arith.addf %491, %490 : vector<2x16xf32>
    %493 = arith.divf %491, %492 : vector<2x16xf32>
    %cst_153 = arith.constant 2.000000e+00 : f32
    %494 = vector.broadcast %cst_153 : f32 to vector<2x16xf32>
    %495 = arith.mulf %494, %493 : vector<2x16xf32>
    %496 = arith.mulf %495, %474 : vector<2x16xf32>
    %cst_154 = arith.constant dense<0.000000e+00> : vector<2x32xf32>
    %497 = tpu.matmul %496, %8, %cst_154 {dimension_numbers = #tpu.dot_dimension_numbers<[1], [0], [0], [1], [0, 0, 1, 1], [], []>, precision = #tpu.contract_precision<fp32>} : vector<2x16xf32>, vector<16x32xf32>, vector<2x32xf32> -> vector<2x32xf32>
    %498 = vector.broadcast %9 : vector<1x32xf32> to vector<2x32xf32>
    %499 = arith.addf %497, %498 : vector<2x32xf32>
    %500 = arith.negf %499 : vector<2x32xf32>
    %501 = math.exp %500 : vector<2x32xf32>
    %cst_155 = arith.constant 1.000000e+00 : f32
    %502 = vector.broadcast %cst_155 : f32 to vector<2x32xf32>
    %503 = arith.addf %502, %501 : vector<2x32xf32>
    %504 = arith.divf %502, %503 : vector<2x32xf32>
    %cst_156 = arith.constant 2.000000e+00 : f32
    %505 = vector.broadcast %cst_156 : f32 to vector<2x32xf32>
    %506 = arith.mulf %505, %504 : vector<2x32xf32>
    %507 = arith.mulf %506, %485 : vector<2x32xf32>
    %cst_157 = arith.constant dense<0.000000e+00> : vector<2x16xf32>
    %508 = tpu.matmul %507, %6, %cst_157 {dimension_numbers = #tpu.dot_dimension_numbers<[1], [0], [0], [1], [0, 0, 1, 1], [], []>, precision = #tpu.contract_precision<fp32>} : vector<2x32xf32>, vector<32x16xf32>, vector<2x16xf32> -> vector<2x16xf32>
    %509 = vector.broadcast %7 : vector<1x16xf32> to vector<2x16xf32>
    %510 = arith.addf %508, %509 : vector<2x16xf32>
    %511 = arith.negf %510 : vector<2x16xf32>
    %512 = math.exp %511 : vector<2x16xf32>
    %cst_158 = arith.constant 1.000000e+00 : f32
    %513 = vector.broadcast %cst_158 : f32 to vector<2x16xf32>
    %514 = arith.addf %513, %512 : vector<2x16xf32>
    %515 = arith.divf %513, %514 : vector<2x16xf32>
    %cst_159 = arith.constant 2.000000e+00 : f32
    %516 = vector.broadcast %cst_159 : f32 to vector<2x16xf32>
    %517 = arith.mulf %516, %515 : vector<2x16xf32>
    %518 = arith.mulf %517, %496 : vector<2x16xf32>
    %cst_160 = arith.constant dense<0.000000e+00> : vector<2x128xf32>
    %519 = tpu.matmul %518, %3, %cst_160 {dimension_numbers = #tpu.dot_dimension_numbers<[1], [0], [0], [1], [0, 0, 1, 1], [], []>, precision = #tpu.contract_precision<fp32>} : vector<2x16xf32>, vector<16x128xf32>, vector<2x128xf32> -> vector<2x128xf32>
    %cst_161 = arith.constant dense<0.000000e+00> : vector<2x128xf32>
    %520 = tpu.matmul %507, %4, %cst_161 {dimension_numbers = #tpu.dot_dimension_numbers<[1], [0], [0], [1], [0, 0, 1, 1], [], []>, precision = #tpu.contract_precision<fp32>} : vector<2x32xf32>, vector<32x128xf32>, vector<2x128xf32> -> vector<2x128xf32>
    %521 = arith.addf %519, %520 : vector<2x128xf32>
    %522 = vector.broadcast %5 : vector<1x128xf32> to vector<2x128xf32>
    %523 = arith.addf %521, %522 : vector<2x128xf32>
    %524 = vector.extract_strided_slice %523 {offsets = [0, 0], sizes = [2, 32], strides = [1, 1]} : vector<2x128xf32> to vector<2x32xf32>
    %525 = arith.negf %524 : vector<2x32xf32>
    %526 = math.exp %525 : vector<2x32xf32>
    %cst_162 = arith.constant 1.000000e+00 : f32
    %527 = vector.broadcast %cst_162 : f32 to vector<2x32xf32>
    %528 = arith.addf %527, %526 : vector<2x32xf32>
    %529 = arith.divf %527, %528 : vector<2x32xf32>
    %530 = vector.extract_strided_slice %523 {offsets = [0, 32], sizes = [2, 32], strides = [1, 1]} : vector<2x128xf32> to vector<2x32xf32>
    %531 = arith.negf %530 : vector<2x32xf32>
    %532 = math.exp %531 : vector<2x32xf32>
    %cst_163 = arith.constant 1.000000e+00 : f32
    %533 = vector.broadcast %cst_163 : f32 to vector<2x32xf32>
    %534 = arith.addf %533, %532 : vector<2x32xf32>
    %535 = arith.divf %533, %534 : vector<2x32xf32>
    %536 = vector.extract_strided_slice %523 {offsets = [0, 64], sizes = [2, 32], strides = [1, 1]} : vector<2x128xf32> to vector<2x32xf32>
    %537 = math.tanh %536 : vector<2x32xf32>
    %538 = vector.extract_strided_slice %523 {offsets = [0, 96], sizes = [2, 32], strides = [1, 1]} : vector<2x128xf32> to vector<2x32xf32>
    %539 = arith.negf %538 : vector<2x32xf32>
    %540 = math.exp %539 : vector<2x32xf32>
    %cst_164 = arith.constant 1.000000e+00 : f32
    %541 = vector.broadcast %cst_164 : f32 to vector<2x32xf32>
    %542 = arith.addf %541, %540 : vector<2x32xf32>
    %543 = arith.divf %541, %542 : vector<2x32xf32>
    %544 = arith.mulf %535, %456 : vector<2x32xf32>
    %545 = arith.mulf %529, %537 : vector<2x32xf32>
    %546 = arith.addf %544, %545 : vector<2x32xf32>
    %547 = math.tanh %546 : vector<2x32xf32>
    %548 = arith.mulf %543, %547 : vector<2x32xf32>
    %c5_165 = arith.constant 5 : index
    %c0_166 = arith.constant 0 : index
    %c0_167 = arith.constant 0 : index
    %549 = vector.load %arg10[%c5_165, %c0_166, %c0_167] : memref<8x2x32xf32, #tpu.memory_space<vmem>>, vector<1x2x32xf32>
    %550 = vector.shape_cast %549 : vector<1x2x32xf32> to vector<2x32xf32>
    %551 = vector.shape_cast %548 : vector<2x32xf32> to vector<1x2x32xf32>
    tpu.vector_store %arg10[%c5_165, %c0_166, %c0_167], %551 {strides = array<i32>} : memref<8x2x32xf32, #tpu.memory_space<vmem>>, vector<1x2x32xf32>,
    %c6 = arith.constant 6 : index
    %c0_168 = arith.constant 0 : index
    %c0_169 = arith.constant 0 : index
    %552 = vector.load %arg1[%c6, %c0_168, %c0_169] : memref<8x2x16xf32, #tpu.memory_space<vmem>>, vector<1x2x16xf32>
    %553 = vector.shape_cast %552 : vector<1x2x16xf32> to vector<2x16xf32>
    %cst_170 = arith.constant dense<0.000000e+00> : vector<2x16xf32>
    %554 = tpu.matmul %548, %6, %cst_170 {dimension_numbers = #tpu.dot_dimension_numbers<[1], [0], [0], [1], [0, 0, 1, 1], [], []>, precision = #tpu.contract_precision<fp32>} : vector<2x32xf32>, vector<32x16xf32>, vector<2x16xf32> -> vector<2x16xf32>
    %555 = vector.broadcast %7 : vector<1x16xf32> to vector<2x16xf32>
    %556 = arith.addf %554, %555 : vector<2x16xf32>
    %557 = arith.negf %556 : vector<2x16xf32>
    %558 = math.exp %557 : vector<2x16xf32>
    %cst_171 = arith.constant 1.000000e+00 : f32
    %559 = vector.broadcast %cst_171 : f32 to vector<2x16xf32>
    %560 = arith.addf %559, %558 : vector<2x16xf32>
    %561 = arith.divf %559, %560 : vector<2x16xf32>
    %cst_172 = arith.constant 2.000000e+00 : f32
    %562 = vector.broadcast %cst_172 : f32 to vector<2x16xf32>
    %563 = arith.mulf %562, %561 : vector<2x16xf32>
    %564 = arith.mulf %563, %553 : vector<2x16xf32>
    %cst_173 = arith.constant dense<0.000000e+00> : vector<2x32xf32>
    %565 = tpu.matmul %564, %8, %cst_173 {dimension_numbers = #tpu.dot_dimension_numbers<[1], [0], [0], [1], [0, 0, 1, 1], [], []>, precision = #tpu.contract_precision<fp32>} : vector<2x16xf32>, vector<16x32xf32>, vector<2x32xf32> -> vector<2x32xf32>
    %566 = vector.broadcast %9 : vector<1x32xf32> to vector<2x32xf32>
    %567 = arith.addf %565, %566 : vector<2x32xf32>
    %568 = arith.negf %567 : vector<2x32xf32>
    %569 = math.exp %568 : vector<2x32xf32>
    %cst_174 = arith.constant 1.000000e+00 : f32
    %570 = vector.broadcast %cst_174 : f32 to vector<2x32xf32>
    %571 = arith.addf %570, %569 : vector<2x32xf32>
    %572 = arith.divf %570, %571 : vector<2x32xf32>
    %cst_175 = arith.constant 2.000000e+00 : f32
    %573 = vector.broadcast %cst_175 : f32 to vector<2x32xf32>
    %574 = arith.mulf %573, %572 : vector<2x32xf32>
    %575 = arith.mulf %574, %548 : vector<2x32xf32>
    %cst_176 = arith.constant dense<0.000000e+00> : vector<2x16xf32>
    %576 = tpu.matmul %575, %6, %cst_176 {dimension_numbers = #tpu.dot_dimension_numbers<[1], [0], [0], [1], [0, 0, 1, 1], [], []>, precision = #tpu.contract_precision<fp32>} : vector<2x32xf32>, vector<32x16xf32>, vector<2x16xf32> -> vector<2x16xf32>
    %577 = vector.broadcast %7 : vector<1x16xf32> to vector<2x16xf32>
    %578 = arith.addf %576, %577 : vector<2x16xf32>
    %579 = arith.negf %578 : vector<2x16xf32>
    %580 = math.exp %579 : vector<2x16xf32>
    %cst_177 = arith.constant 1.000000e+00 : f32
    %581 = vector.broadcast %cst_177 : f32 to vector<2x16xf32>
    %582 = arith.addf %581, %580 : vector<2x16xf32>
    %583 = arith.divf %581, %582 : vector<2x16xf32>
    %cst_178 = arith.constant 2.000000e+00 : f32
    %584 = vector.broadcast %cst_178 : f32 to vector<2x16xf32>
    %585 = arith.mulf %584, %583 : vector<2x16xf32>
    %586 = arith.mulf %585, %564 : vector<2x16xf32>
    %cst_179 = arith.constant dense<0.000000e+00> : vector<2x32xf32>
    %587 = tpu.matmul %586, %8, %cst_179 {dimension_numbers = #tpu.dot_dimension_numbers<[1], [0], [0], [1], [0, 0, 1, 1], [], []>, precision = #tpu.contract_precision<fp32>} : vector<2x16xf32>, vector<16x32xf32>, vector<2x32xf32> -> vector<2x32xf32>
    %588 = vector.broadcast %9 : vector<1x32xf32> to vector<2x32xf32>
    %589 = arith.addf %587, %588 : vector<2x32xf32>
    %590 = arith.negf %589 : vector<2x32xf32>
    %591 = math.exp %590 : vector<2x32xf32>
    %cst_180 = arith.constant 1.000000e+00 : f32
    %592 = vector.broadcast %cst_180 : f32 to vector<2x32xf32>
    %593 = arith.addf %592, %591 : vector<2x32xf32>
    %594 = arith.divf %592, %593 : vector<2x32xf32>
    %cst_181 = arith.constant 2.000000e+00 : f32
    %595 = vector.broadcast %cst_181 : f32 to vector<2x32xf32>
    %596 = arith.mulf %595, %594 : vector<2x32xf32>
    %597 = arith.mulf %596, %575 : vector<2x32xf32>
    %cst_182 = arith.constant dense<0.000000e+00> : vector<2x16xf32>
    %598 = tpu.matmul %597, %6, %cst_182 {dimension_numbers = #tpu.dot_dimension_numbers<[1], [0], [0], [1], [0, 0, 1, 1], [], []>, precision = #tpu.contract_precision<fp32>} : vector<2x32xf32>, vector<32x16xf32>, vector<2x16xf32> -> vector<2x16xf32>
    %599 = vector.broadcast %7 : vector<1x16xf32> to vector<2x16xf32>
    %600 = arith.addf %598, %599 : vector<2x16xf32>
    %601 = arith.negf %600 : vector<2x16xf32>
    %602 = math.exp %601 : vector<2x16xf32>
    %cst_183 = arith.constant 1.000000e+00 : f32
    %603 = vector.broadcast %cst_183 : f32 to vector<2x16xf32>
    %604 = arith.addf %603, %602 : vector<2x16xf32>
    %605 = arith.divf %603, %604 : vector<2x16xf32>
    %cst_184 = arith.constant 2.000000e+00 : f32
    %606 = vector.broadcast %cst_184 : f32 to vector<2x16xf32>
    %607 = arith.mulf %606, %605 : vector<2x16xf32>
    %608 = arith.mulf %607, %586 : vector<2x16xf32>
    %cst_185 = arith.constant dense<0.000000e+00> : vector<2x128xf32>
    %609 = tpu.matmul %608, %3, %cst_185 {dimension_numbers = #tpu.dot_dimension_numbers<[1], [0], [0], [1], [0, 0, 1, 1], [], []>, precision = #tpu.contract_precision<fp32>} : vector<2x16xf32>, vector<16x128xf32>, vector<2x128xf32> -> vector<2x128xf32>
    %cst_186 = arith.constant dense<0.000000e+00> : vector<2x128xf32>
    %610 = tpu.matmul %597, %4, %cst_186 {dimension_numbers = #tpu.dot_dimension_numbers<[1], [0], [0], [1], [0, 0, 1, 1], [], []>, precision = #tpu.contract_precision<fp32>} : vector<2x32xf32>, vector<32x128xf32>, vector<2x128xf32> -> vector<2x128xf32>
    %611 = arith.addf %609, %610 : vector<2x128xf32>
    %612 = vector.broadcast %5 : vector<1x128xf32> to vector<2x128xf32>
    %613 = arith.addf %611, %612 : vector<2x128xf32>
    %614 = vector.extract_strided_slice %613 {offsets = [0, 0], sizes = [2, 32], strides = [1, 1]} : vector<2x128xf32> to vector<2x32xf32>
    %615 = arith.negf %614 : vector<2x32xf32>
    %616 = math.exp %615 : vector<2x32xf32>
    %cst_187 = arith.constant 1.000000e+00 : f32
    %617 = vector.broadcast %cst_187 : f32 to vector<2x32xf32>
    %618 = arith.addf %617, %616 : vector<2x32xf32>
    %619 = arith.divf %617, %618 : vector<2x32xf32>
    %620 = vector.extract_strided_slice %613 {offsets = [0, 32], sizes = [2, 32], strides = [1, 1]} : vector<2x128xf32> to vector<2x32xf32>
    %621 = arith.negf %620 : vector<2x32xf32>
    %622 = math.exp %621 : vector<2x32xf32>
    %cst_188 = arith.constant 1.000000e+00 : f32
    %623 = vector.broadcast %cst_188 : f32 to vector<2x32xf32>
    %624 = arith.addf %623, %622 : vector<2x32xf32>
    %625 = arith.divf %623, %624 : vector<2x32xf32>
    %626 = vector.extract_strided_slice %613 {offsets = [0, 64], sizes = [2, 32], strides = [1, 1]} : vector<2x128xf32> to vector<2x32xf32>
    %627 = math.tanh %626 : vector<2x32xf32>
    %628 = vector.extract_strided_slice %613 {offsets = [0, 96], sizes = [2, 32], strides = [1, 1]} : vector<2x128xf32> to vector<2x32xf32>
    %629 = arith.negf %628 : vector<2x32xf32>
    %630 = math.exp %629 : vector<2x32xf32>
    %cst_189 = arith.constant 1.000000e+00 : f32
    %631 = vector.broadcast %cst_189 : f32 to vector<2x32xf32>
    %632 = arith.addf %631, %630 : vector<2x32xf32>
    %633 = arith.divf %631, %632 : vector<2x32xf32>
    %634 = arith.mulf %625, %546 : vector<2x32xf32>
    %635 = arith.mulf %619, %627 : vector<2x32xf32>
    %636 = arith.addf %634, %635 : vector<2x32xf32>
    %637 = math.tanh %636 : vector<2x32xf32>
    %638 = arith.mulf %633, %637 : vector<2x32xf32>
    %c6_190 = arith.constant 6 : index
    %c0_191 = arith.constant 0 : index
    %c0_192 = arith.constant 0 : index
    %639 = vector.load %arg10[%c6_190, %c0_191, %c0_192] : memref<8x2x32xf32, #tpu.memory_space<vmem>>, vector<1x2x32xf32>
    %640 = vector.shape_cast %639 : vector<1x2x32xf32> to vector<2x32xf32>
    %641 = vector.shape_cast %638 : vector<2x32xf32> to vector<1x2x32xf32>
    tpu.vector_store %arg10[%c6_190, %c0_191, %c0_192], %641 {strides = array<i32>} : memref<8x2x32xf32, #tpu.memory_space<vmem>>, vector<1x2x32xf32>,
    %c7 = arith.constant 7 : index
    %c0_193 = arith.constant 0 : index
    %c0_194 = arith.constant 0 : index
    %642 = vector.load %arg1[%c7, %c0_193, %c0_194] : memref<8x2x16xf32, #tpu.memory_space<vmem>>, vector<1x2x16xf32>
    %643 = vector.shape_cast %642 : vector<1x2x16xf32> to vector<2x16xf32>
    %cst_195 = arith.constant dense<0.000000e+00> : vector<2x16xf32>
    %644 = tpu.matmul %638, %6, %cst_195 {dimension_numbers = #tpu.dot_dimension_numbers<[1], [0], [0], [1], [0, 0, 1, 1], [], []>, precision = #tpu.contract_precision<fp32>} : vector<2x32xf32>, vector<32x16xf32>, vector<2x16xf32> -> vector<2x16xf32>
    %645 = vector.broadcast %7 : vector<1x16xf32> to vector<2x16xf32>
    %646 = arith.addf %644, %645 : vector<2x16xf32>
    %647 = arith.negf %646 : vector<2x16xf32>
    %648 = math.exp %647 : vector<2x16xf32>
    %cst_196 = arith.constant 1.000000e+00 : f32
    %649 = vector.broadcast %cst_196 : f32 to vector<2x16xf32>
    %650 = arith.addf %649, %648 : vector<2x16xf32>
    %651 = arith.divf %649, %650 : vector<2x16xf32>
    %cst_197 = arith.constant 2.000000e+00 : f32
    %652 = vector.broadcast %cst_197 : f32 to vector<2x16xf32>
    %653 = arith.mulf %652, %651 : vector<2x16xf32>
    %654 = arith.mulf %653, %643 : vector<2x16xf32>
    %cst_198 = arith.constant dense<0.000000e+00> : vector<2x32xf32>
    %655 = tpu.matmul %654, %8, %cst_198 {dimension_numbers = #tpu.dot_dimension_numbers<[1], [0], [0], [1], [0, 0, 1, 1], [], []>, precision = #tpu.contract_precision<fp32>} : vector<2x16xf32>, vector<16x32xf32>, vector<2x32xf32> -> vector<2x32xf32>
    %656 = vector.broadcast %9 : vector<1x32xf32> to vector<2x32xf32>
    %657 = arith.addf %655, %656 : vector<2x32xf32>
    %658 = arith.negf %657 : vector<2x32xf32>
    %659 = math.exp %658 : vector<2x32xf32>
    %cst_199 = arith.constant 1.000000e+00 : f32
    %660 = vector.broadcast %cst_199 : f32 to vector<2x32xf32>
    %661 = arith.addf %660, %659 : vector<2x32xf32>
    %662 = arith.divf %660, %661 : vector<2x32xf32>
    %cst_200 = arith.constant 2.000000e+00 : f32
    %663 = vector.broadcast %cst_200 : f32 to vector<2x32xf32>
    %664 = arith.mulf %663, %662 : vector<2x32xf32>
    %665 = arith.mulf %664, %638 : vector<2x32xf32>
    %cst_201 = arith.constant dense<0.000000e+00> : vector<2x16xf32>
    %666 = tpu.matmul %665, %6, %cst_201 {dimension_numbers = #tpu.dot_dimension_numbers<[1], [0], [0], [1], [0, 0, 1, 1], [], []>, precision = #tpu.contract_precision<fp32>} : vector<2x32xf32>, vector<32x16xf32>, vector<2x16xf32> -> vector<2x16xf32>
    %667 = vector.broadcast %7 : vector<1x16xf32> to vector<2x16xf32>
    %668 = arith.addf %666, %667 : vector<2x16xf32>
    %669 = arith.negf %668 : vector<2x16xf32>
    %670 = math.exp %669 : vector<2x16xf32>
    %cst_202 = arith.constant 1.000000e+00 : f32
    %671 = vector.broadcast %cst_202 : f32 to vector<2x16xf32>
    %672 = arith.addf %671, %670 : vector<2x16xf32>
    %673 = arith.divf %671, %672 : vector<2x16xf32>
    %cst_203 = arith.constant 2.000000e+00 : f32
    %674 = vector.broadcast %cst_203 : f32 to vector<2x16xf32>
    %675 = arith.mulf %674, %673 : vector<2x16xf32>
    %676 = arith.mulf %675, %654 : vector<2x16xf32>
    %cst_204 = arith.constant dense<0.000000e+00> : vector<2x32xf32>
    %677 = tpu.matmul %676, %8, %cst_204 {dimension_numbers = #tpu.dot_dimension_numbers<[1], [0], [0], [1], [0, 0, 1, 1], [], []>, precision = #tpu.contract_precision<fp32>} : vector<2x16xf32>, vector<16x32xf32>, vector<2x32xf32> -> vector<2x32xf32>
    %678 = vector.broadcast %9 : vector<1x32xf32> to vector<2x32xf32>
    %679 = arith.addf %677, %678 : vector<2x32xf32>
    %680 = arith.negf %679 : vector<2x32xf32>
    %681 = math.exp %680 : vector<2x32xf32>
    %cst_205 = arith.constant 1.000000e+00 : f32
    %682 = vector.broadcast %cst_205 : f32 to vector<2x32xf32>
    %683 = arith.addf %682, %681 : vector<2x32xf32>
    %684 = arith.divf %682, %683 : vector<2x32xf32>
    %cst_206 = arith.constant 2.000000e+00 : f32
    %685 = vector.broadcast %cst_206 : f32 to vector<2x32xf32>
    %686 = arith.mulf %685, %684 : vector<2x32xf32>
    %687 = arith.mulf %686, %665 : vector<2x32xf32>
    %cst_207 = arith.constant dense<0.000000e+00> : vector<2x16xf32>
    %688 = tpu.matmul %687, %6, %cst_207 {dimension_numbers = #tpu.dot_dimension_numbers<[1], [0], [0], [1], [0, 0, 1, 1], [], []>, precision = #tpu.contract_precision<fp32>} : vector<2x32xf32>, vector<32x16xf32>, vector<2x16xf32> -> vector<2x16xf32>
    %689 = vector.broadcast %7 : vector<1x16xf32> to vector<2x16xf32>
    %690 = arith.addf %688, %689 : vector<2x16xf32>
    %691 = arith.negf %690 : vector<2x16xf32>
    %692 = math.exp %691 : vector<2x16xf32>
    %cst_208 = arith.constant 1.000000e+00 : f32
    %693 = vector.broadcast %cst_208 : f32 to vector<2x16xf32>
    %694 = arith.addf %693, %692 : vector<2x16xf32>
    %695 = arith.divf %693, %694 : vector<2x16xf32>
    %cst_209 = arith.constant 2.000000e+00 : f32
    %696 = vector.broadcast %cst_209 : f32 to vector<2x16xf32>
    %697 = arith.mulf %696, %695 : vector<2x16xf32>
    %698 = arith.mulf %697, %676 : vector<2x16xf32>
    %cst_210 = arith.constant dense<0.000000e+00> : vector<2x128xf32>
    %699 = tpu.matmul %698, %3, %cst_210 {dimension_numbers = #tpu.dot_dimension_numbers<[1], [0], [0], [1], [0, 0, 1, 1], [], []>, precision = #tpu.contract_precision<fp32>} : vector<2x16xf32>, vector<16x128xf32>, vector<2x128xf32> -> vector<2x128xf32>
    %cst_211 = arith.constant dense<0.000000e+00> : vector<2x128xf32>
    %700 = tpu.matmul %687, %4, %cst_211 {dimension_numbers = #tpu.dot_dimension_numbers<[1], [0], [0], [1], [0, 0, 1, 1], [], []>, precision = #tpu.contract_precision<fp32>} : vector<2x32xf32>, vector<32x128xf32>, vector<2x128xf32> -> vector<2x128xf32>
    %701 = arith.addf %699, %700 : vector<2x128xf32>
    %702 = vector.broadcast %5 : vector<1x128xf32> to vector<2x128xf32>
    %703 = arith.addf %701, %702 : vector<2x128xf32>
    %704 = vector.extract_strided_slice %703 {offsets = [0, 0], sizes = [2, 32], strides = [1, 1]} : vector<2x128xf32> to vector<2x32xf32>
    %705 = arith.negf %704 : vector<2x32xf32>
    %706 = math.exp %705 : vector<2x32xf32>
    %cst_212 = arith.constant 1.000000e+00 : f32
    %707 = vector.broadcast %cst_212 : f32 to vector<2x32xf32>
    %708 = arith.addf %707, %706 : vector<2x32xf32>
    %709 = arith.divf %707, %708 : vector<2x32xf32>
    %710 = vector.extract_strided_slice %703 {offsets = [0, 32], sizes = [2, 32], strides = [1, 1]} : vector<2x128xf32> to vector<2x32xf32>
    %711 = arith.negf %710 : vector<2x32xf32>
    %712 = math.exp %711 : vector<2x32xf32>
    %cst_213 = arith.constant 1.000000e+00 : f32
    %713 = vector.broadcast %cst_213 : f32 to vector<2x32xf32>
    %714 = arith.addf %713, %712 : vector<2x32xf32>
    %715 = arith.divf %713, %714 : vector<2x32xf32>
    %716 = vector.extract_strided_slice %703 {offsets = [0, 64], sizes = [2, 32], strides = [1, 1]} : vector<2x128xf32> to vector<2x32xf32>
    %717 = math.tanh %716 : vector<2x32xf32>
    %718 = vector.extract_strided_slice %703 {offsets = [0, 96], sizes = [2, 32], strides = [1, 1]} : vector<2x128xf32> to vector<2x32xf32>
    %719 = arith.negf %718 : vector<2x32xf32>
    %720 = math.exp %719 : vector<2x32xf32>
    %cst_214 = arith.constant 1.000000e+00 : f32
    %721 = vector.broadcast %cst_214 : f32 to vector<2x32xf32>
    %722 = arith.addf %721, %720 : vector<2x32xf32>
    %723 = arith.divf %721, %722 : vector<2x32xf32>
    %724 = arith.mulf %715, %636 : vector<2x32xf32>
    %725 = arith.mulf %709, %717 : vector<2x32xf32>
    %726 = arith.addf %724, %725 : vector<2x32xf32>
    %727 = math.tanh %726 : vector<2x32xf32>
    %728 = arith.mulf %723, %727 : vector<2x32xf32>
    %c7_215 = arith.constant 7 : index
    %c0_216 = arith.constant 0 : index
    %c0_217 = arith.constant 0 : index
    %729 = vector.load %arg10[%c7_215, %c0_216, %c0_217] : memref<8x2x32xf32, #tpu.memory_space<vmem>>, vector<1x2x32xf32>
    %730 = vector.shape_cast %729 : vector<1x2x32xf32> to vector<2x32xf32>
    %731 = vector.shape_cast %728 : vector<2x32xf32> to vector<1x2x32xf32>
    tpu.vector_store %arg10[%c7_215, %c0_216, %c0_217], %731 {strides = array<i32>} : memref<8x2x32xf32, #tpu.memory_space<vmem>>, vector<1x2x32xf32>,
    %c0_218 = arith.constant 0 : index
    %c0_219 = arith.constant 0 : index
    %732 = vector.load %arg11[%c0_218, %c0_219] : memref<2x32xf32, #tpu.memory_space<vmem>>, vector<2x32xf32>
    tpu.vector_store %arg11[%c0_218, %c0_219], %728 {strides = array<i32>} : memref<2x32xf32, #tpu.memory_space<vmem>>, vector<2x32xf32>,
    %c0_220 = arith.constant 0 : index
    %c0_221 = arith.constant 0 : index
    %733 = vector.load %arg12[%c0_220, %c0_221] : memref<2x32xf32, #tpu.memory_space<vmem>>, vector<2x32xf32>
    tpu.vector_store %arg12[%c0_220, %c0_221], %726 {strides = array<i32>} : memref<2x32xf32, #tpu.memory_space<vmem>>, vector<2x32xf32>,
    return
  }
  func.func @transform_0(%arg0: i32) -> (i32, i32, i32) {
    %c0_i32 = arith.constant 0 : i32
    %c0_i32_0 = arith.constant 0 : i32
    %c0_i32_1 = arith.constant 0 : i32
    return %arg0, %c0_i32, %c0_i32_0 : i32, i32, i32
  }
  func.func @transform_1(%arg0: i32) -> (i32, i32) {
    %c0_i32 = arith.constant 0 : i32
    %c0_i32_0 = arith.constant 0 : i32
    %c0_i32_1 = arith.constant 0 : i32
    return %c0_i32, %c0_i32_0 : i32, i32
  }
  func.func @transform_2(%arg0: i32) -> (i32, i32) {
    %c0_i32 = arith.constant 0 : i32
    %c0_i32_0 = arith.constant 0 : i32
    %c0_i32_1 = arith.constant 0 : i32
    return %c0_i32, %c0_i32_0 : i32, i32
  }
  func.func @transform_3(%arg0: i32) -> (i32, i32) {
    %c0_i32 = arith.constant 0 : i32
    %c0_i32_0 = arith.constant 0 : i32
    %c0_i32_1 = arith.constant 0 : i32
    return %c0_i32, %c0_i32_0 : i32, i32
  }
  func.func @transform_4(%arg0: i32) -> (i32, i32) {
    %c0_i32 = arith.constant 0 : i32
    %c0_i32_0 = arith.constant 0 : i32
    %c0_i32_1 = arith.constant 0 : i32
    return %c0_i32, %c0_i32_0 : i32, i32
  }
  func.func @transform_5(%arg0: i32) -> (i32, i32) {
    %c0_i32 = arith.constant 0 : i32
    %c0_i32_0 = arith.constant 0 : i32
    %c0_i32_1 = arith.constant 0 : i32
    return %c0_i32, %c0_i32_0 : i32, i32
  }
  func.func @transform_6(%arg0: i32) -> (i32, i32) {
    %c0_i32 = arith.constant 0 : i32
    %c0_i32_0 = arith.constant 0 : i32
    %c0_i32_1 = arith.constant 0 : i32
    return %c0_i32, %c0_i32_0 : i32, i32
  }
  func.func @transform_7(%arg0: i32) -> (i32, i32) {
    %c0_i32 = arith.constant 0 : i32
    %c0_i32_0 = arith.constant 0 : i32
    %c0_i32_1 = arith.constant 0 : i32
    return %c0_i32, %c0_i32_0 : i32, i32
  }
  func.func @transform_8(%arg0: i32) -> (i32, i32) {
    %c0_i32 = arith.constant 0 : i32
    %c0_i32_0 = arith.constant 0 : i32
    %c0_i32_1 = arith.constant 0 : i32
    return %c0_i32, %c0_i32_0 : i32, i32
  }
  func.func @transform_9(%arg0: i32) -> (i32, i32, i32) {
    %c0_i32 = arith.constant 0 : i32
    %c0_i32_0 = arith.constant 0 : i32
    %c0_i32_1 = arith.constant 0 : i32
    return %arg0, %c0_i32, %c0_i32_0 : i32, i32, i32
  }
  func.func @transform_10(%arg0: i32) -> (i32, i32) {
    %c0_i32 = arith.constant 0 : i32
    %c0_i32_0 = arith.constant 0 : i32
    %c0_i32_1 = arith.constant 0 : i32
    return %c0_i32, %c0_i32_0 : i32, i32
  }
  func.func @transform_11(%arg0: i32) -> (i32, i32) {
    %c0_i32 = arith.constant 0 : i32
    %c0_i32_0 = arith.constant 0 : i32
    %c0_i32_1 = arith.constant 0 : i32
    return %c0_i32, %c0_i32_0 : i32, i32
  }
}

</mosaic_0001>

<bundles_post_ra>
// kernel: tpu_custom_call.1
= control target key start
LH: loop header
LB: loop body
LE: loop exit
PB: predicated region body
PF: predicated region fallthrough
CT: control target
= control target key end

     0   :  { %17 = vsyncpa [#allocation3], 0  ;;  %s36837_s0 = inlined_call_operand.vmem [shape: f32[8,2,16], index: 0, kind: input, shape index: {}]   ;;  %s36838_s1 = inlined_call_operand.hbm [shape: f32[16,128], index: 1, kind: input, shape index: {}]   ;;  %s36839_s2 = inlined_call_operand.vmem [shape: f32[32,128], index: 2, kind: input, shape index: {}]   ;;  %s36840_s3 = inlined_call_operand.hbm [shape: f32[1,128], index: 3, kind: input, shape index: {}]   ;;  %s36841_s4 = inlined_call_operand.vmem [shape: f32[32,16], index: 4, kind: input, shape index: {}]   ;;  %s36842_s5 = inlined_call_operand.hbm [shape: f32[1,16], index: 5, kind: input, shape index: {}]   ;;  %s36843_s6 = inlined_call_operand.vmem [shape: f32[16,32], index: 6, kind: input, shape index: {}]   ;;  %s36844_s7 = inlined_call_operand.vmem [shape: f32[1,32], index: 7, kind: input, shape index: {}]   ;;  %s36845_s8 = inlined_call_operand.vmem [shape: f32[2,32], index: 8, kind: input, shape index: {}]   ;;  %s36846_s9 = inlined_call_operand.hbm [shape: f32[8,2,32], index: 9, kind: output, shape index: {0}]   ;;  %s36847_s10 = inlined_call_operand.hbm [shape: f32[2,32], index: 10, kind: output, shape index: {1}]   ;;  %s36848_s11 = inlined_call_operand.hbm [shape: f32[2,32], index: 11, kind: output, shape index: {2}]  }
   0x1   :  { %18 = vsyncpa [#allocation6], 0 }
   0x2   :  { %19 = vsyncpa [#allocation4], 0 }
   0x3   :  { %20 = vsyncpa [#allocation10], 0  ;;  %s34414_s17 = smov [#allocation5]   ;;  %s34415_s19 = smov [#allocation2]  }
   0x4   :  { %s43_s18 = sshll.u32 %s34414_s17, 4  ;;  %s28_s20 = sshll.u32 %s34415_s19, 4  ;;  %s44_s18 = int_to_ptr.vmem [resolvable:$true] %s43_s18  ;;  %s34489_s20 = int_to_ptr.vmem [resolvable:$true] %s28_s20 }
   0x5   :  { %s34274_s23 = scalar_lea.hbm %s36840_s3, 16 }
   0x6   :  { %p34275_p0 = scmp.ne.s32.totalorder %s36840_s3, %s34274_s23  ;;  %p34278_p1 = scmp.lt.u32.totalorder %s34274_s23, %s36840_s3 }
   0x8   :  { %p34280_p2 = pnand %p34278_p1, %p34275_p0 }
   0xa   :  { %34283 = shalt.err (!%p34280_p2)
}
   0xb   :  { %s34284_s28 = scalar_lea.vmem %s44_s18, 16  ;;  %s34288_s29 = scalar_lea.vmem %s44_s18, 32 }
   0xc   :  { %p34285_p3 = scmp.ne.s32.totalorder %s44_s18, %s34284_s28  ;;  %p34289_p4 = scmp.lt.s32.totalorder %s44_s18, %s44_s18 }
   0xd   :  { %p34290_p5 = scmp.lt.s32.totalorder %s34288_s29, %s34284_s28 }
   0xf   :  { %p34291_p6 = por %p34290_p5, %p34289_p4 }
  0x11   :  { %p34292_p7 = pnand %p34291_p6, %p34285_p3 }
  0x13   :  { %34295 = shalt.err (!%p34292_p7)
}
  0x14   :  { %46 = dma.hbm_to_vmem [thread:$0]  %s36840_s3, 16, %s44_s18, [#allocation6]  }
  0x15   :  { %s34296_s15 = scalar_lea.hbm %s36838_s1, 256 }
  0x16   :  { %p34297_p8 = scmp.ne.s32.totalorder %s36838_s1, %s34296_s15  ;;  %p34300_p9 = scmp.lt.u32.totalorder %s34296_s15, %s36838_s1 }
  0x18   :  { %p34302_p10 = pnand %p34300_p9, %p34297_p8 }
  0x1a   :  { %34305 = shalt.err (!%p34302_p10)
}
  0x1b   :  { %s34306_s22 = scalar_lea.vmem %s34489_s20, 256  ;;  %p34311_p12 = scmp.lt.s32.totalorder %s34489_s20, %s34489_s20 }
  0x1c   :  { %p34307_p11 = scmp.ne.s32.totalorder %s34489_s20, %s34306_s22  ;;  %p34312_p13 = scmp.lt.s32.totalorder %s34306_s22, %s34306_s22 }
  0x1e   :  { %p34313_p0 = por %p34312_p13, %p34311_p12 }
  0x20   :  { %p34314_p1 = pnand %p34313_p0, %p34307_p11 }
  0x22   :  { %34317 = shalt.err (!%p34314_p1)
}
  0x23   :  { %s34416_s3 = smov 128   ;;  %s34417_s18 = smov 8  }
  0x24   :  { %34 = dma.hbm_to_vmem [thread:$0]  %s36838_s1, 256, %s34489_s20, [#allocation3], %s34416_s3, %s34416_s3, %s34417_s18  }
  0x25   :  { %s34418_s25 = smov [#allocation7]   ;;  %s34318_s29 = scalar_lea.hbm %s36842_s5, 16 }
  0x26   :  { %s55_s26 = sshll.u32 %s34418_s25, 4  ;;  %p34319_p2 = scmp.ne.s32.totalorder %s36842_s5, %s34318_s29  ;;  %s56_s26 = int_to_ptr.vmem [resolvable:$true] %s55_s26 }
  0x27   :  { %p34322_p3 = scmp.lt.u32.totalorder %s34318_s29, %s36842_s5 }
  0x29   :  { %p34324_p4 = pnand %p34322_p3, %p34319_p2 }
  0x2b   :  { %34327 = shalt.err (!%p34324_p4)
}
  0x2c   :  { %s34328_s15 = scalar_lea.vmem %s56_s26, 16  ;;  %s34332_s1 = scalar_lea.vmem %s56_s26, 32 }
  0x2d   :  { %p34329_p5 = scmp.ne.s32.totalorder %s56_s26, %s34328_s15  ;;  %p34333_p6 = scmp.lt.s32.totalorder %s56_s26, %s56_s26 }
  0x2e   :  { %p34334_p7 = scmp.lt.s32.totalorder %s34332_s1, %s34328_s15 }
  0x30   :  { %p34335_p8 = por %p34334_p7, %p34333_p6 }
  0x32   :  { %p34336_p9 = pnand %p34335_p8, %p34329_p5 }
  0x34   :  { %34339 = shalt.err (!%p34336_p9)
}
  0x35   :  { %58 = dma.hbm_to_vmem [thread:$0]  %s36842_s5, 16, %s56_s26, [#allocation6]  }
  0x36   :  { %34406 = dma.done.wait [#allocation3], 256  }
  0x37   :  { %34407 = vsyncadd [#allocation3], 4294967040 }
  0x38   :  { %34408 = dma.done.wait [#allocation6], 32  }
  0x39   :  { %34409 = vsyncadd [#allocation6], 4294967264  ;;  %vm79_vm0 = vcmask 254976   ;;  %v34419_v0 = vmov 0.0|0.0   ;;  %vm34420_vm1 = vmmov 0   ;;  %v34421_v1 = vmov 0.0  }
  0x3a   :  { %32000 = vmatprep.subr.bf16.mxu0 %v34419_v0  ;;  %28888 = vmatprep.mubr.msk.f32.mxu0 %vm34420_vm1, %v34421_v1  ;;  %81 = vst.msk [vmem:[#allocation11] sm:$0x3] %vm79_vm0, %v34421_v1  ;;  %v89_v2 = vld [vmem:[%s36841_s4] sm:$0xff]  ;;  %v90_v3 = vld [vmem:[%s36841_s4 + $0x8] sm:$0xff]  ;;  %v91_v4 = vld [vmem:[%s36841_s4 + $0x10] sm:$0xff]  ;;  %vm106_vm2 = vcmask 261120  }
  0x3b   :  { %32036 = vmatprep.subr.bf16.mxu1 %v34419_v0  ;;  %28950 = vmatprep.mubr.msk.f32.mxu1 %vm34420_vm1, %v34421_v1  ;;  %v111_v5 = vand.u32 4294901760, %v89_v2  ;;  %v114_v6 = vand.u32 4294901760, %v90_v3  ;;  %v92_v7 = vld [vmem:[%s36841_s4 + $0x18] sm:$0xff]  ;;  %v117_v8 = vand.u32 4294901760, %v91_v4  ;;  %v78_v9 = vld [vmem:[%s36845_s8] sm:$0x3] }
  0x3c   :  { %v120_v10 = vand.u32 4294901760, %v92_v7  ;;  %80 = vst.msk [vmem:[#allocation9] sm:$0x3] %vm79_vm0, %v78_v9  ;;  %v94_v42 = vld [vmem:[%s36843_s6] sm:$0xff]  ;;  %v95_v43 = vld [vmem:[%s36843_s6 + $0x8] sm:$0xff]  ;;  %vm609_vm3 = vcmask 130048  }
  0x3d   :  { %v34556_v11 = vpack.c.bf16 %v114_v6, %v111_v5  ;;  %v191_v12 = vsub.f32 %v89_v2, %v111_v5  ;;  %v198_v13 = vsub.f32 %v90_v3, %v114_v6  ;;  %v205_v15 = vsub.f32 %v91_v4, %v117_v8  ;;  %v34630_v58 = vld [vmem:[#allocation7] ss:$0 sm:$0xff]  ;;  %v99_v4 = vld [vmem:[%s36837_s0] sm:$0x3]  ;;  %s34423_s17 = smov 32   ;;  %s34425_s20 = smov [#allocation9]  }
  0x3e   :  { %v34559_v14 = vpack.c.bf16 %v120_v10, %v117_v8  ;;  %v212_v18 = vsub.f32 %v92_v7, %v120_v10  ;;  %v614_v44 = vand.u32 4294901760, %v94_v42  ;;  %v617_v45 = vand.u32 4294901760, %v95_v43  ;;  %s27403_s16 = sshll.u32 %s34425_s20, 4  ;;  %s34426_s5 = smov [#allocation8]   ;;  %s27404_s16 = int_to_ptr.vmem [resolvable:$true] %s27403_s16 }
  0x3f   :  { %32002 = vmatpush3.bf16.msra.mxu0 %v34556_v11  ;;  %v192_v16 = vand.u32 4294901760, %v191_v12  ;;  %v199_v17 = vand.u32 4294901760, %v198_v13  ;;  %v206_v20 = vand.u32 4294901760, %v205_v15  ;;  %v34577_v38 = vpack.c.bf16 %v198_v13, %v191_v12  ;;  %s27390_s19 = sshll.u32 %s34426_s5, 4  ;;  %s34427_s21 = smov [#allocation11]   ;;  %s36783_s19 = int_to_ptr.vmem [resolvable:$true] %s27390_s19 }
  0x40   :  { %32003 = vmatprep.subr.bf16.mxu0 %v34419_v0  ;;  %v213_v24 = vand.u32 4294901760, %v212_v18  ;;  %v34581_v39 = vpack.c.bf16 %v212_v18, %v205_v15  ;;  %v34618_v46 = vpack.c.bf16 %v617_v45, %v614_v44  ;;  %v692_v47 = vsub.f32 %v94_v42, %v614_v44  ;;  %s27413_s22 = sshll.u32 %s34427_s21, 4  ;;  %p34345_p11 = scmp.lt.s32.totalorder %s27404_s16, %s27404_s16  ;;  %s36787_s22 = int_to_ptr.vmem [resolvable:$true] %s27413_s22 }
  0x41   :  { %v193_v22 = vsub.f32 %v191_v12, %v192_v16  ;;  %v200_v23 = vsub.f32 %v198_v13, %v199_v17  ;;  %v207_v29 = vsub.f32 %v205_v15, %v206_v20  ;;  %v34593_v40 = vpack.c.bf16 %v199_v17, %v192_v16  ;;  %v34669_v15 = vld [vmem:[%s36844_s7] ss:$0 sm:$0xff] }
  0x42   :  { %v214_v30 = vsub.f32 %v212_v18, %v213_v24  ;;  %v34597_v41 = vpack.c.bf16 %v213_v24, %v206_v20  ;;  %32038 = vmatpush3.bf16.msra.mxu1 %v34618_v46  ;;  %v699_v48 = vsub.f32 %v95_v43, %v617_v45  ;;  %v693_v49 = vand.u32 4294901760, %v692_v47 }
  0x43   :  { %32005 = vmatpush3.bf16.msra.mxu0 %v34559_v14  ;;  %v34563_v19 = vld [vmem:[#allocation9] sm:$0x3]  ;;  %v194_v27 = vand.u32 4294901760, %v193_v22  ;;  %v201_v28 = vand.u32 4294901760, %v200_v23  ;;  %v208_v34 = vand.u32 4294901760, %v207_v29  ;;  %32039 = vmatprep.subr.bf16.mxu1 %v34419_v0 }
  0x44   :  { %32006 = vmatprep.subr.bf16.mxu0 %v34419_v0  ;;  %v108_v21 = vsel %vm106_vm2, %v34563_v19, 0  ;;  %v215_v35 = vand.u32 4294901760, %v214_v30  ;;  %v700_v50 = vand.u32 4294901760, %v699_v48  ;;  %v694_v51 = vsub.f32 %v692_v47, %v693_v49 }
  0x45   :  { %v179_v25 = vand.u32 4294901760, %v108_v21  ;;  %v34568_v33 = vpack.c.bf16 %v201_v28, %v194_v27  ;;  %v34626_v56 = vpack.c.bf16 %v699_v48, %v692_v47 }
  0x46   :  { %v34571_v37 = vpack.c.bf16 %v215_v35, %v208_v34  ;;  %v701_v52 = vsub.f32 %v699_v48, %v700_v50  ;;  %v695_v53 = vand.u32 4294901760, %v694_v51  ;;  %v34628_v57 = vpack.c.bf16 %v700_v50, %v693_v49 }
  0x47   :  { %v180_v26 = vsub.f32 %v108_v21, %v179_v25 }
  0x48   :  { %v702_v54 = vand.u32 4294901760, %v701_v52 }
  0x49   :  { %v181_v31 = vand.u32 4294901760, %v180_v26 }
  0x4a   :  { %v34624_v55 = vpack.c.bf16 %v702_v54, %v695_v53  ;;  %v84_v53 = vld [vmem:[%s36839_s2] sm:$0xff]  ;;  %v85_v54 = vld [vmem:[%s36839_s2 + $0x8] sm:$0xff] }
  0x4b   :  { %v182_v32 = vsub.f32 %v180_v26, %v181_v31 }
  0x4d   :  { %v183_v36 = vand.u32 4294901760, %v182_v32 }
  0x4f   :  { %28889 = vmatmul.mubr.f32.vlgmr.msra.gmra.mrb[0].mxu0 %v183_v36 }
  0x50   :  { %32008 = vmatpush3.bf16.msra.mxu0 %v34568_v33  ;;  %28899 = vmatprep.mubr.msk.f32.mxu0 %vm34420_vm1, %v34421_v1 }
  0x51   :  { %32009 = vmatprep.subr.bf16.mxu0 %v34419_v0 }
  0x54   :  { %32011 = vmatpush3.bf16.msra.mxu0 %v34571_v37 }
  0x55   :  { %32012 = vmatprep.subr.bf16.mxu0 %v34419_v0 }
  0x57   :  { %28900 = vmatmul.mubr.f32.vlgmr.msra.gmra.mrb[0].mxu0 %v179_v25 }
  0x58   :  { %32014 = vmatpush3.bf16.msra.mxu0 %v34577_v38  ;;  %28910 = vmatprep.mubr.msk.f32.mxu0 %vm34420_vm1, %v34421_v1 }
  0x59   :  { %32015 = vmatprep.subr.bf16.mxu0 %v34419_v0 }
  0x5c   :  { %32017 = vmatpush3.bf16.msra.mxu0 %v34581_v39 }
  0x5d   :  { %32018 = vmatprep.subr.bf16.mxu0 %v34419_v0 }
  0x5f   :  { %28911 = vmatmul.mubr.f32.vlgmr.msra.gmra.mrb[0].mxu0 %v180_v26 }
  0x60   :  { %32020 = vmatpush3.bf16.msra.mxu0 %v34556_v11  ;;  %28921 = vmatprep.mubr.msk.f32.mxu0 %vm34420_vm1, %v34421_v1 }
  0x61   :  { %32021 = vmatprep.subr.bf16.mxu0 %v34419_v0 }
  0x64   :  { %32023 = vmatpush3.bf16.msra.mxu0 %v34559_v14 }
  0x65   :  { %32024 = vmatprep.subr.bf16.mxu0 %v34419_v0 }
  0x67   :  { %28922 = vmatmul.mubr.f32.vlgmr.msra.gmra.mrb[0].mxu0 %v181_v31 }
  0x68   :  { %32026 = vmatpush3.bf16.msra.mxu0 %v34593_v40  ;;  %28932 = vmatprep.mubr.msk.f32.mxu0 %vm34420_vm1, %v34421_v1 }
  0x69   :  { %32027 = vmatprep.subr.bf16.mxu0 %v34419_v0 }
  0x6c   :  { %32029 = vmatpush3.bf16.msra.mxu0 %v34597_v41 }
  0x6d   :  { %32030 = vmatprep.subr.bf16.mxu0 %v34419_v0 }
  0x6f   :  { %28933 = vmatmul.mubr.f32.vlgmr.msra.gmra.mrb[0].mxu0 %v179_v25 }
  0x70   :  { %32032 = vmatpush3.bf16.msra.mxu0 %v34556_v11  ;;  %28943 = vmatprep.mubr.msk.f32.mxu0 %vm34420_vm1, %v34421_v1 }
  0x71   :  { %32033 = vmatprep.subr.bf16.mxu0 %v34419_v0 }
  0x74   :  { %32035 = vmatpush3.bf16.msra.mxu0 %v34559_v14 }
  0x75   :  { %32090 = vmatprep.subr.bf16.mxu0 %v34419_v0 }
  0x77   :  { %28944 = vmatmul.mubr.f32.vlgmr.msra.gmra.mrb[0].mxu0 %v179_v25 }
  0x78   :  { %29058 = vmatprep.mubr.msk.f32.mxu0 %vm34420_vm1, %v34421_v1  ;;  %32092 = vmatpush3.bf16.msra.mxu0 %v34618_v46 }
  0x79   :  { %32093 = vmatprep.subr.bf16.mxu0 %v34419_v0 }
 0x14a   :  { %v591_v59 = vpop.f32.mrb[0].mxu0 }
 0x14b   :  { %v33584_v60 = vadd.f32 %v34630_v58, %v591_v59  ;;  %v28945_v61 = vpop.f32.mrb[1].mxu0  ;;  %v2543_v59 = vand.u32 4294901760, %v84_v53 }
 0x14d   :  { %v27431_v62 = vmul.f32 -1.442695, %v33584_v60  ;;  %v2546_v60 = vand.u32 4294901760, %v85_v54 }
 0x14f   :  { %34039 = vpow2.f32 %v27431_v62  ;;  %v34747_v61 = vpack.c.bf16 %v2546_v60, %v2543_v59  ;;  %v2623_v62 = vsub.f32 %v84_v53, %v2543_v59 }
 0x159   :  { %v34040_v63 = vpop.eup %34039 }
 0x15a   :  { %v598_v2 = vadd.f32 1.0, %v34040_v63  ;;  %v2630_v63 = vsub.f32 %v85_v54, %v2546_v60  ;;  %v83_v54 = vld [vmem:[#allocation2 + $0x8] sm:$0xff] }
 0x15b   :  { %v3034_v60 = vand.u32 4294901760, %v83_v54 }
 0x15c   :  { %34041 = vrcp.f32 %v598_v2  ;;  %v86_v2 = vld [vmem:[%s36839_s2 + $0x10] sm:$0xff] }
 0x166   :  { %v34042_v3 = vpop.eup %34041 }
 0x167   :  { %v601_v5 = vmul.f32 2.0, %v34042_v3  ;;  %v87_v3 = vld [vmem:[%s36839_s2 + $0x18] sm:$0xff]  ;;  %s34422_s2 = smov 64  }
 0x169   :  { %v34636_v6 = vmul.f32 %v601_v5, %v99_v4  ;;  %v2549_v4 = vand.u32 4294901760, %v86_v2  ;;  %v2552_v5 = vand.u32 4294901760, %v87_v3 }
 0x16b   :  { %v611_v7 = vsel %vm609_vm3, %v34636_v6, 0 }
 0x16c   :  { %v680_v8 = vand.u32 4294901760, %v611_v7 }
 0x16e   :  { %v681_v9 = vsub.f32 %v611_v7, %v680_v8  ;;  %v2631_v7 = vand.u32 4294901760, %v2630_v63 }
 0x170   :  { %v682_v10 = vand.u32 4294901760, %v681_v9 }
 0x172   :  { %v683_v12 = vsub.f32 %v681_v9, %v682_v10 }
 0x174   :  { %v684_v13 = vand.u32 4294901760, %v683_v12  ;;  %v2637_v12 = vsub.f32 %v86_v2, %v2549_v4 }
 0x176   :  { %28951 = vmatmul.mubr.f32.vlgmr.msra.gmra.mrb[0].mxu1 %v684_v13  ;;  %v2644_v13 = vsub.f32 %v87_v3, %v2552_v5 }
 0x177   :  { %32041 = vmatpush3.bf16.msra.mxu1 %v34624_v55  ;;  %28957 = vmatprep.mubr.msk.f32.mxu1 %vm34420_vm1, %v34421_v1 }
 0x178   :  { %32042 = vmatprep.subr.bf16.mxu1 %v34419_v0 }
 0x17e   :  { %28958 = vmatmul.mubr.f32.vlgmr.msra.gmra.mrb[0].mxu1 %v680_v8 }
 0x17f   :  { %32044 = vmatpush3.bf16.msra.mxu1 %v34626_v56  ;;  %28964 = vmatprep.mubr.msk.f32.mxu1 %vm34420_vm1, %v34421_v1 }
 0x180   :  { %32045 = vmatprep.subr.bf16.mxu1 %v34419_v0 }
 0x186   :  { %28965 = vmatmul.mubr.f32.vlgmr.msra.gmra.mrb[0].mxu1 %v681_v9 }
 0x187   :  { %32047 = vmatpush3.bf16.msra.mxu1 %v34618_v46  ;;  %28971 = vmatprep.mubr.msk.f32.mxu1 %vm34420_vm1, %v34421_v1 }
 0x188   :  { %32048 = vmatprep.subr.bf16.mxu1 %v34419_v0 }
 0x18e   :  { %28972 = vmatmul.mubr.f32.vlgmr.msra.gmra.mrb[0].mxu1 %v682_v10  ;;  %v2632_v10 = vsub.f32 %v2630_v63, %v2631_v7 }
 0x18f   :  { %32050 = vmatpush3.bf16.msra.mxu1 %v34628_v57  ;;  %28978 = vmatprep.mubr.msk.f32.mxu1 %vm34420_vm1, %v34421_v1 }
 0x190   :  { %32051 = vmatprep.subr.bf16.mxu1 %v34419_v0 }
 0x196   :  { %28979 = vmatmul.mubr.f32.vlgmr.msra.gmra.mrb[0].mxu1 %v680_v8 }
 0x197   :  { %32053 = vmatpush3.bf16.msra.mxu1 %v34618_v46  ;;  %28985 = vmatprep.mubr.msk.f32.mxu1 %vm34420_vm1, %v34421_v1 }
 0x198   :  { %32054 = vmatprep.subr.bf16.mxu1 %v34419_v0 }
 0x19e   :  { %28986 = vmatmul.mubr.f32.vlgmr.msra.gmra.mrb[0].mxu1 %v680_v8  ;;  %v34757_v8 = vpack.c.bf16 %v2552_v5, %v2549_v4 }
 0x19f   :  { %32056 = vmatpush3.bf16.msra.mxu1 %v34556_v11  ;;  %28996 = vmatprep.mubr.msk.f32.mxu1 %vm34420_vm1, %v34421_v1 }
 0x1a0   :  { %32057 = vmatprep.subr.bf16.mxu1 %v34419_v0 }
 0x1a3   :  { %32059 = vmatpush3.bf16.msra.mxu1 %v34559_v14 }
 0x1a4   :  { %32060 = vmatprep.subr.bf16.mxu1 %v34419_v0 }
 0x271   :  { %v1068_v16 = vpop.f32.mrb[0].mxu1 }
 0x272   :  { %v33585_v17 = vadd.f32 %v34669_v15, %v1068_v16  ;;  %v28987_v18 = vpop.f32.mrb[1].mxu1 }
 0x273   :  { %v2638_v18 = vand.u32 4294901760, %v2637_v12 }
 0x274   :  { %v27433_v20 = vmul.f32 -1.442695, %v33585_v17  ;;  %v2633_v17 = vand.u32 4294901760, %v2632_v10 }
 0x276   :  { %34043 = vpow2.f32 %v27433_v20  ;;  %v2645_v20 = vand.u32 4294901760, %v2644_v13 }
 0x280   :  { %v34044_v21 = vpop.eup %34043 }
 0x281   :  { %v1075_v22 = vadd.f32 1.0, %v34044_v21 }
 0x283   :  { %34045 = vrcp.f32 %v1075_v22  ;;  %v2639_v22 = vsub.f32 %v2637_v12, %v2638_v18 }
 0x28d   :  { %v34046_v23 = vpop.eup %34045 }
 0x28e   :  { %v1078_v24 = vmul.f32 2.0, %v34046_v23  ;;  %v2646_v23 = vsub.f32 %v2644_v13, %v2645_v20 }
 0x290   :  { %v34673_v25 = vmul.f32 %v1078_v24, %v34563_v19  ;;  %v2640_v24 = vand.u32 4294901760, %v2639_v22 }
 0x292   :  { %v1081_v26 = vsel %vm106_vm2, %v34673_v25, 0 }
 0x293   :  { %v1152_v27 = vand.u32 4294901760, %v1081_v26 }
 0x295   :  { %v1153_v28 = vsub.f32 %v1081_v26, %v1152_v27  ;;  %v2647_v26 = vand.u32 4294901760, %v2646_v23 }
 0x297   :  { %v1154_v29 = vand.u32 4294901760, %v1153_v28 }
 0x299   :  { %v1155_v30 = vsub.f32 %v1153_v28, %v1154_v29 }
 0x29b   :  { %v1156_v31 = vand.u32 4294901760, %v1155_v30 }
 0x29d   :  { %28997 = vmatmul.mubr.f32.vlgmr.msra.gmra.mrb[2].mxu1 %v1156_v31  ;;  %v34771_v31 = vpack.c.bf16 %v2645_v20, %v2638_v18 }
 0x29e   :  { %32062 = vmatpush3.bf16.msra.mxu1 %v34568_v33  ;;  %29007 = vmatprep.mubr.msk.f32.mxu1 %vm34420_vm1, %v34421_v1 }
 0x29f   :  { %32063 = vmatprep.subr.bf16.mxu1 %v34419_v0 }
 0x2a2   :  { %32065 = vmatpush3.bf16.msra.mxu1 %v34571_v37 }
 0x2a3   :  { %32066 = vmatprep.subr.bf16.mxu1 %v34419_v0 }
 0x2a5   :  { %29008 = vmatmul.mubr.f32.vlgmr.msra.gmra.mrb[2].mxu1 %v1152_v27 }
 0x2a6   :  { %32068 = vmatpush3.bf16.msra.mxu1 %v34577_v38  ;;  %29018 = vmatprep.mubr.msk.f32.mxu1 %vm34420_vm1, %v34421_v1 }
 0x2a7   :  { %32069 = vmatprep.subr.bf16.mxu1 %v34419_v0 }
 0x2aa   :  { %32071 = vmatpush3.bf16.msra.mxu1 %v34581_v39 }
 0x2ab   :  { %32072 = vmatprep.subr.bf16.mxu1 %v34419_v0 }
 0x2ad   :  { %29019 = vmatmul.mubr.f32.vlgmr.msra.gmra.mrb[2].mxu1 %v1153_v28  ;;  %v34765_v28 = vpack.c.bf16 %v2630_v63, %v2623_v62  ;;  %v3116_v63 = vsub.f32 %v83_v54, %v3034_v60 }
 0x2ae   :  { %32074 = vmatpush3.bf16.msra.mxu1 %v34556_v11  ;;  %29029 = vmatprep.mubr.msk.f32.mxu1 %vm34420_vm1, %v34421_v1 }
 0x2af   :  { %32075 = vmatprep.subr.bf16.mxu1 %v34419_v0  ;;  %v3117_v3 = vand.u32 4294901760, %v3116_v63 }
 0x2b1   :  { %v3118_v5 = vsub.f32 %v3116_v63, %v3117_v3 }
 0x2b2   :  { %32077 = vmatpush3.bf16.msra.mxu1 %v34559_v14 }
 0x2b3   :  { %32078 = vmatprep.subr.bf16.mxu1 %v34419_v0 }
 0x2b5   :  { %29030 = vmatmul.mubr.f32.vlgmr.msra.gmra.mrb[2].mxu1 %v1154_v29  ;;  %v34767_v29 = vpack.c.bf16 %v2644_v13, %v2637_v12 }
 0x2b6   :  { %32080 = vmatpush3.bf16.msra.mxu1 %v34593_v40  ;;  %29040 = vmatprep.mubr.msk.f32.mxu1 %vm34420_vm1, %v34421_v1 }
 0x2b7   :  { %32081 = vmatprep.subr.bf16.mxu1 %v34419_v0 }
 0x2ba   :  { %32083 = vmatpush3.bf16.msra.mxu1 %v34597_v41 }
 0x2bb   :  { %32084 = vmatprep.subr.bf16.mxu1 %v34419_v0 }
 0x2bd   :  { %29041 = vmatmul.mubr.f32.vlgmr.msra.gmra.mrb[2].mxu1 %v1152_v27 }
 0x2be   :  { %32086 = vmatpush3.bf16.msra.mxu1 %v34556_v11  ;;  %29051 = vmatprep.mubr.msk.f32.mxu1 %vm34420_vm1, %v34421_v1 }
 0x2bf   :  { %32087 = vmatprep.subr.bf16.mxu1 %v34419_v0 }
 0x2c2   :  { %32089 = vmatpush3.bf16.msra.mxu1 %v34559_v14 }
 0x2c3   :  { %32144 = vmatprep.subr.bf16.mxu1 %v34419_v0 }
 0x2c5   :  { %29052 = vmatmul.mubr.f32.vlgmr.msra.gmra.mrb[2].mxu1 %v1152_v27  ;;  %v34763_v27 = vpack.c.bf16 %v2647_v26, %v2640_v24 }
 0x2c6   :  { %29170 = vmatprep.mubr.msk.f32.mxu1 %vm34420_vm1, %v34421_v1  ;;  %32146 = vmatpush3.bf16.msra.mxu1 %v34747_v61 }
 0x2c7   :  { %32147 = vmatprep.subr.bf16.mxu1 %v34419_v0 }
 0x2ca   :  { %32149 = vmatpush3.bf16.msra.mxu1 %v34757_v8 }
 0x2cb   :  { %32150 = vmatprep.subr.bf16.mxu1 %v34419_v0 }
 0x398   :  { %v1564_v19 = vpop.f32.mrb[2].mxu1 }
 0x399   :  { %v33586_v32 = vadd.f32 %v34630_v58, %v1564_v19  ;;  %v29053_v34 = vpop.f32.mrb[3].mxu1 }
 0x39b   :  { %v27434_v35 = vmul.f32 -1.442695, %v33586_v32 }
 0x39d   :  { %34047 = vpow2.f32 %v27434_v35 }
 0x3a7   :  { %v34048_v36 = vpop.eup %34047 }
 0x3a8   :  { %v1571_v42 = vadd.f32 1.0, %v34048_v36 }
 0x3aa   :  { %34049 = vrcp.f32 %v1571_v42 }
 0x3b4   :  { %v34050_v43 = vpop.eup %34049 }
 0x3b5   :  { %v1574_v44 = vmul.f32 2.0, %v34050_v43 }
 0x3b7   :  { %v34711_v45 = vmul.f32 %v1574_v44, %v34636_v6  ;;  %v2624_v6 = vand.u32 4294901760, %v2623_v62 }
 0x3b9   :  { %v1577_v47 = vsel %vm609_vm3, %v34711_v45, 0  ;;  %v2625_v9 = vsub.f32 %v2623_v62, %v2624_v6  ;;  %v34769_v30 = vpack.c.bf16 %v2631_v7, %v2624_v6  ;;  %v3119_v7 = vand.u32 4294901760, %v3118_v5 }
 0x3ba   :  { %v1646_v48 = vand.u32 4294901760, %v1577_v47 }
 0x3bb   :  { %v2626_v16 = vand.u32 4294901760, %v2625_v9 }
 0x3bc   :  { %v1647_v49 = vsub.f32 %v1577_v47, %v1646_v48 }
 0x3bd   :  { %v34761_v21 = vpack.c.bf16 %v2633_v17, %v2626_v16 }
 0x3be   :  { %v1648_v50 = vand.u32 4294901760, %v1647_v49 }
 0x3c0   :  { %v1649_v51 = vsub.f32 %v1647_v49, %v1648_v50 }
 0x3c2   :  { %v1650_v52 = vand.u32 4294901760, %v1649_v51 }
 0x3c4   :  { %29059 = vmatmul.mubr.f32.vlgmr.msra.gmra.mrb[2].mxu0 %v1650_v52 }
 0x3c5   :  { %32095 = vmatpush3.bf16.msra.mxu0 %v34624_v55  ;;  %29065 = vmatprep.mubr.msk.f32.mxu0 %vm34420_vm1, %v34421_v1 }
 0x3c6   :  { %32096 = vmatprep.subr.bf16.mxu0 %v34419_v0 }
 0x3cc   :  { %29066 = vmatmul.mubr.f32.vlgmr.msra.gmra.mrb[2].mxu0 %v1646_v48 }
 0x3cd   :  { %32098 = vmatpush3.bf16.msra.mxu0 %v34626_v56  ;;  %29072 = vmatprep.mubr.msk.f32.mxu0 %vm34420_vm1, %v34421_v1 }
 0x3ce   :  { %32099 = vmatprep.subr.bf16.mxu0 %v34419_v0 }
 0x3d4   :  { %29073 = vmatmul.mubr.f32.vlgmr.msra.gmra.mrb[2].mxu0 %v1647_v49 }
 0x3d5   :  { %32101 = vmatpush3.bf16.msra.mxu0 %v34618_v46  ;;  %29079 = vmatprep.mubr.msk.f32.mxu0 %vm34420_vm1, %v34421_v1 }
 0x3d6   :  { %32102 = vmatprep.subr.bf16.mxu0 %v34419_v0 }
 0x3dc   :  { %29080 = vmatmul.mubr.f32.vlgmr.msra.gmra.mrb[2].mxu0 %v1648_v50 }
 0x3dd   :  { %32104 = vmatpush3.bf16.msra.mxu0 %v34628_v57  ;;  %29086 = vmatprep.mubr.msk.f32.mxu0 %vm34420_vm1, %v34421_v1 }
 0x3de   :  { %32105 = vmatprep.subr.bf16.mxu0 %v34419_v0 }
 0x3e4   :  { %29087 = vmatmul.mubr.f32.vlgmr.msra.gmra.mrb[2].mxu0 %v1646_v48 }
 0x3e5   :  { %32107 = vmatpush3.bf16.msra.mxu0 %v34618_v46  ;;  %29093 = vmatprep.mubr.msk.f32.mxu0 %vm34420_vm1, %v34421_v1 }
 0x3e6   :  { %32108 = vmatprep.subr.bf16.mxu0 %v34419_v0 }
 0x3ec   :  { %29094 = vmatmul.mubr.f32.vlgmr.msra.gmra.mrb[2].mxu0 %v1646_v48 }
 0x3ed   :  { %32110 = vmatpush3.bf16.msra.mxu0 %v34556_v11  ;;  %29104 = vmatprep.mubr.msk.f32.mxu0 %vm34420_vm1, %v34421_v1 }
 0x3ee   :  { %32111 = vmatprep.subr.bf16.mxu0 %v34419_v0 }
 0x3f1   :  { %32113 = vmatpush3.bf16.msra.mxu0 %v34559_v14 }
 0x3f2   :  { %32114 = vmatprep.subr.bf16.mxu0 %v34419_v0 }
 0x4bf   :  { %v2034_v19 = vpop.f32.mrb[2].mxu0 }
 0x4c0   :  { %v33587_v32 = vadd.f32 %v34669_v15, %v2034_v19  ;;  %v29095_v34 = vpop.f32.mrb[3].mxu0 }
 0x4c2   :  { %v27435_v35 = vmul.f32 -1.442695, %v33587_v32 }
 0x4c4   :  { %34051 = vpow2.f32 %v27435_v35 }
 0x4ce   :  { %v34052_v36 = vpop.eup %34051 }
 0x4cf   :  { %v2041_v42 = vadd.f32 1.0, %v34052_v36 }
 0x4d1   :  { %34053 = vrcp.f32 %v2041_v42 }
 0x4db   :  { %v34054_v43 = vpop.eup %34053 }
 0x4dc   :  { %v2044_v44 = vmul.f32 2.0, %v34054_v43 }
 0x4de   :  { %v2045_v47 = vmul.f32 %v2044_v44, %v34673_v25  ;;  %v82_v25 = vld [vmem:[#allocation2] sm:$0xff] }
 0x4df   :  { %v3031_v59 = vand.u32 4294901760, %v82_v25 }
 0x4e0   :  { %v2047_v48 = vsel %vm106_vm2, %v2045_v47, 0 }
 0x4e1   :  { %v34776_v49 = vand.u32 4294901760, %v2047_v48  ;;  %v3109_v62 = vsub.f32 %v82_v25, %v3031_v59  ;;  %v34849_v9 = vpack.c.bf16 %v3034_v60, %v3031_v59 }
 0x4e3   :  { %v2119_v50 = vsub.f32 %v2047_v48, %v34776_v49  ;;  %v3110_v2 = vand.u32 4294901760, %v3109_v62  ;;  %v34857_v12 = vpack.c.bf16 %v3116_v63, %v3109_v62 }
 0x4e5   :  { %v2120_v51 = vand.u32 4294901760, %v2119_v50  ;;  %v3111_v4 = vsub.f32 %v3109_v62, %v3110_v2  ;;  %v34859_v13 = vpack.c.bf16 %v3117_v3, %v3110_v2 }
 0x4e7   :  { %v2121_v52 = vsub.f32 %v2119_v50, %v2120_v51  ;;  %v3112_v6 = vand.u32 4294901760, %v3111_v4 }
 0x4e9   :  { %v2122_v53 = vand.u32 4294901760, %v2121_v52  ;;  %v34851_v10 = vpack.c.bf16 %v3119_v7, %v3112_v6 }
 0x4eb   :  { %29105 = vmatmul.mubr.f32.vlgmr.msra.gmra.mrb[4].mxu0 %v2122_v53  ;;  %29171 = vmatmul.mubr.f32.vlgmr.msra.gmra.mrb[4].mxu1 %v2122_v53 }
 0x4ec   :  { %32116 = vmatpush3.bf16.msra.mxu0 %v34568_v33  ;;  %32152 = vmatpush3.bf16.msra.mxu1 %v34761_v21 }
 0x4ed   :  { %32117 = vmatprep.subr.bf16.mxu0 %v34419_v0  ;;  %32153 = vmatprep.subr.bf16.mxu1 %v34419_v0 }
 0x4ee   :  { %29181 = vmatprep.mubr.msk.f32.mxu1 %vm34420_vm1, %v34421_v1  ;;  %29115 = vmatprep.mubr.msk.f32.mxu0 %vm34420_vm1, %v34421_v1 }
 0x4f0   :  { %32119 = vmatpush3.bf16.msra.mxu0 %v34571_v37  ;;  %32155 = vmatpush3.bf16.msra.mxu1 %v34763_v27 }
 0x4f1   :  { %32120 = vmatprep.subr.bf16.mxu0 %v34419_v0  ;;  %32156 = vmatprep.subr.bf16.mxu1 %v34419_v0 }
 0x4f3   :  { %29182 = vmatmul.mubr.f32.vlgmr.msra.gmra.mrb[6].mxu1 %v34776_v49  ;;  %29116 = vmatmul.mubr.f32.vlgmr.msra.gmra.mrb[4].mxu0 %v34776_v49 }
 0x4f4   :  { %32122 = vmatpush3.bf16.msra.mxu0 %v34577_v38  ;;  %32158 = vmatpush3.bf16.msra.mxu1 %v34765_v28 }
 0x4f5   :  { %32123 = vmatprep.subr.bf16.mxu0 %v34419_v0  ;;  %32159 = vmatprep.subr.bf16.mxu1 %v34419_v0 }
 0x4f6   :  { %29192 = vmatprep.mubr.msk.f32.mxu1 %vm34420_vm1, %v34421_v1  ;;  %29126 = vmatprep.mubr.msk.f32.mxu0 %vm34420_vm1, %v34421_v1 }
 0x4f8   :  { %32125 = vmatpush3.bf16.msra.mxu0 %v34581_v39  ;;  %32161 = vmatpush3.bf16.msra.mxu1 %v34767_v29 }
 0x4f9   :  { %32126 = vmatprep.subr.bf16.mxu0 %v34419_v0  ;;  %32162 = vmatprep.subr.bf16.mxu1 %v34419_v0 }
 0x4fb   :  { %29193 = vmatmul.mubr.f32.vlgmr.msra.gmra.mrb[8].mxu1 %v2119_v50  ;;  %29127 = vmatmul.mubr.f32.vlgmr.msra.gmra.mrb[4].mxu0 %v2119_v50 }
 0x4fc   :  { %32128 = vmatpush3.bf16.msra.mxu0 %v34556_v11  ;;  %32164 = vmatpush3.bf16.msra.mxu1 %v34747_v61 }
 0x4fd   :  { %32129 = vmatprep.subr.bf16.mxu0 %v34419_v0  ;;  %32165 = vmatprep.subr.bf16.mxu1 %v34419_v0 }
 0x4fe   :  { %29203 = vmatprep.mubr.msk.f32.mxu1 %vm34420_vm1, %v34421_v1  ;;  %29137 = vmatprep.mubr.msk.f32.mxu0 %vm34420_vm1, %v34421_v1 }
 0x500   :  { %32131 = vmatpush3.bf16.msra.mxu0 %v34559_v14  ;;  %32167 = vmatpush3.bf16.msra.mxu1 %v34757_v8 }
 0x501   :  { %32132 = vmatprep.subr.bf16.mxu0 %v34419_v0  ;;  %32168 = vmatprep.subr.bf16.mxu1 %v34419_v0 }
 0x503   :  { %29204 = vmatmul.mubr.f32.vlgmr.msra.gmra.mrb[10].mxu1 %v2120_v51  ;;  %29138 = vmatmul.mubr.f32.vlgmr.msra.gmra.mrb[4].mxu0 %v2120_v51 }
 0x504   :  { %32134 = vmatpush3.bf16.msra.mxu0 %v34593_v40  ;;  %32170 = vmatpush3.bf16.msra.mxu1 %v34769_v30 }
 0x505   :  { %32135 = vmatprep.subr.bf16.mxu0 %v34419_v0  ;;  %32171 = vmatprep.subr.bf16.mxu1 %v34419_v0 }
 0x506   :  { %29214 = vmatprep.mubr.msk.f32.mxu1 %vm34420_vm1, %v34421_v1  ;;  %29148 = vmatprep.mubr.msk.f32.mxu0 %vm34420_vm1, %v34421_v1 }
 0x508   :  { %32137 = vmatpush3.bf16.msra.mxu0 %v34597_v41  ;;  %32173 = vmatpush3.bf16.msra.mxu1 %v34771_v31 }
 0x509   :  { %32138 = vmatprep.subr.bf16.mxu0 %v34419_v0  ;;  %32174 = vmatprep.subr.bf16.mxu1 %v34419_v0 }
 0x50b   :  { %29215 = vmatmul.mubr.f32.vlgmr.msra.gmra.mrb[12].mxu1 %v34776_v49  ;;  %29149 = vmatmul.mubr.f32.vlgmr.msra.gmra.mrb[4].mxu0 %v34776_v49 }
 0x50c   :  { %32140 = vmatpush3.bf16.msra.mxu0 %v34556_v11  ;;  %32176 = vmatpush3.bf16.msra.mxu1 %v34747_v61 }
 0x50d   :  { %32141 = vmatprep.subr.bf16.mxu0 %v34419_v0  ;;  %32177 = vmatprep.subr.bf16.mxu1 %v34419_v0 }
 0x50e   :  { %29225 = vmatprep.mubr.msk.f32.mxu1 %vm34420_vm1, %v34421_v1  ;;  %29159 = vmatprep.mubr.msk.f32.mxu0 %vm34420_vm1, %v34421_v1 }
 0x510   :  { %32143 = vmatpush3.bf16.msra.mxu0 %v34559_v14  ;;  %32179 = vmatpush3.bf16.msra.mxu1 %v34757_v8 }
 0x511   :  { %32183 = vmatprep.subr.bf16.mxu1 %v34419_v0  ;;  %32180 = vmatprep.subr.bf16.mxu0 %v34419_v0 }
 0x513   :  { %29226 = vmatmul.mubr.f32.vlgmr.msra.gmra.mrb[14].mxu1 %v34776_v49  ;;  %29160 = vmatmul.mubr.f32.vlgmr.msra.gmra.mrb[4].mxu0 %v34776_v49 }
 0x514   :  { %29239 = vmatprep.mubr.msk.f32.mxu1 %vm34420_vm1, %v34421_v1  ;;  %29232 = vmatprep.mubr.msk.f32.mxu0 %vm34420_vm1, %v34421_v1 }
 0x515   :  { %32182 = vmatpush3.bf16.msra.mxu0 %v34849_v9  ;;  %32185 = vmatpush3.bf16.msra.mxu1 %v34851_v10 }
 0x516   :  { %32186 = vmatprep.subr.bf16.mxu0 %v34419_v0  ;;  %32189 = vmatprep.subr.bf16.mxu1 %v34419_v0 }
 0x5be   :  { %v2617_v16 = vpop.f32.mrb[4].mxu1 }
 0x5bf   :  { %v29172_v17 = vpop.f32.mrb[5].mxu1 }
 0x5c6   :  { %v2708_v18 = vpop.f32.mrb[6].mxu1 }
 0x5c7   :  { %v2709_v20 = vadd.f32 %v2708_v18, %v2617_v16  ;;  %v29183_v22 = vpop.f32.mrb[7].mxu1 }
 0x5ce   :  { %v2788_v23 = vpop.f32.mrb[8].mxu1 }
 0x5cf   :  { %v2789_v24 = vadd.f32 %v2788_v23, %v2709_v20  ;;  %v29194_v26 = vpop.f32.mrb[9].mxu1 }
 0x5d6   :  { %v2865_v19 = vpop.f32.mrb[10].mxu1 }
 0x5d7   :  { %v2866_v32 = vadd.f32 %v2865_v19, %v2789_v24  ;;  %v29205_v34 = vpop.f32.mrb[11].mxu1 }
 0x5de   :  { %v2948_v35 = vpop.f32.mrb[12].mxu1 }
 0x5df   :  { %v2949_v36 = vadd.f32 %v2948_v35, %v2866_v32  ;;  %v29216_v42 = vpop.f32.mrb[13].mxu1 }
 0x5e0   :  { %v34890_v42 = vld [vmem:[#allocation5] ss:$0 sm:$0xff] }
 0x5e6   :  { %v3023_v43 = vpop.f32.mrb[14].mxu1  ;;  %v2530_v44 = vpop.f32.mrb[4].mxu0 }
 0x5e7   :  { %v3024_v47 = vadd.f32 %v3023_v43, %v2949_v36  ;;  %v33588_v48 = vadd.f32 %v34630_v58, %v2530_v44  ;;  %v29227_v49 = vpop.f32.mrb[15].mxu1  ;;  %v29161_v50 = vpop.f32.mrb[5].mxu0 }
 0x5e9   :  { %v27436_v51 = vmul.f32 -1.442695, %v33588_v48 }
 0x5eb   :  { %34055 = vpow2.f32 %v27436_v51 }
 0x5f5   :  { %v34056_v52 = vpop.eup %34055 }
 0x5f6   :  { %v2537_v53 = vadd.f32 1.0, %v34056_v52 }
 0x5f8   :  { %34057 = vrcp.f32 %v2537_v53 }
 0x602   :  { %v34058_v25 = vpop.eup %34057 }
 0x603   :  { %v2540_v54 = vmul.f32 2.0, %v34058_v25 }
 0x605   :  { %v2541_v59 = vmul.f32 %v2540_v54, %v34711_v45 }
 0x607   :  { %v3028_v60 = vsel %vm609_vm3, %v2541_v59, 0 }
 0x608   :  { %v3097_v62 = vand.u32 4294901760, %v3028_v60 }
 0x60a   :  { %v3098_v63 = vsub.f32 %v3028_v60, %v3097_v62  ;;  %29240 = vmatmul.mubr.f32.vlgmr.msra.gmra.mrb[16].mxu1 %v3097_v62 }
 0x60b   :  { %32191 = vmatpush3.bf16.msra.mxu1 %v34849_v9  ;;  %29253 = vmatprep.mubr.msk.f32.mxu1 %vm34420_vm1, %v34421_v1 }
 0x60c   :  { %v3099_v2 = vand.u32 4294901760, %v3098_v63  ;;  %32195 = vmatprep.subr.bf16.mxu1 %v34419_v0 }
 0x60e   :  { %29254 = vmatmul.mubr.f32.vlgmr.msra.gmra.mrb[18].mxu1 %v3099_v2  ;;  %v3100_v3 = vsub.f32 %v3098_v63, %v3099_v2 }
 0x60f   :  { %32197 = vmatpush3.bf16.msra.mxu1 %v34849_v9  ;;  %29267 = vmatprep.mubr.msk.f32.mxu1 %vm34420_vm1, %v34421_v1 }
 0x610   :  { %v3101_v45 = vand.u32 4294901760, %v3100_v3  ;;  %32234 = vmatprep.subr.bf16.mxu1 %v34419_v0 }
 0x612   :  { %29233 = vmatmul.mubr.f32.vlgmr.msra.gmra.mrb[6].mxu0 %v3101_v45  ;;  %29268 = vmatmul.mubr.f32.vlgmr.msra.gmra.mrb[20].mxu1 %v3097_v62 }
 0x613   :  { %32188 = vmatpush3.bf16.msra.mxu0 %v34857_v12  ;;  %29246 = vmatprep.mubr.msk.f32.mxu0 %vm34420_vm1, %v34421_v1 }
 0x614   :  { %32192 = vmatprep.subr.bf16.mxu0 %v34419_v0  ;;  %32236 = vmatpush3.bf16.msra.mxu1 %v34618_v46 }
 0x615   :  { %29340 = vmatprep.mubr.msk.f32.mxu1 %vm34420_vm1, %v34421_v1  ;;  %32237 = vmatprep.subr.bf16.mxu1 %v34419_v0 }
 0x616   :  { %29247 = vmatmul.mubr.f32.vlgmr.msra.gmra.mrb[8].mxu0 %v3098_v63 }
 0x617   :  { %32194 = vmatpush3.bf16.msra.mxu0 %v34859_v13  ;;  %29260 = vmatprep.mubr.msk.f32.mxu0 %vm34420_vm1, %v34421_v1 }
 0x618   :  { %32198 = vmatprep.subr.bf16.mxu0 %v34419_v0 }
 0x61a   :  { %29261 = vmatmul.mubr.f32.vlgmr.msra.gmra.mrb[10].mxu0 %v3097_v62 }
 0x61b   :  { %32200 = vmatpush3.bf16.msra.mxu0 %v34556_v11  ;;  %29278 = vmatprep.mubr.msk.f32.mxu0 %vm34420_vm1, %v34421_v1 }
 0x61c   :  { %32201 = vmatprep.subr.bf16.mxu0 %v34419_v0 }
 0x61f   :  { %32203 = vmatpush3.bf16.msra.mxu0 %v34559_v14 }
 0x620   :  { %32204 = vmatprep.subr.bf16.mxu0 %v34419_v0 }
 0x6dd   :  { %v3184_v4 = vpop.f32.mrb[16].mxu1 }
 0x6de   :  { %v29241_v5 = vpop.f32.mrb[17].mxu1 }
 0x6e1   :  { %v3335_v6 = vpop.f32.mrb[18].mxu1 }
 0x6e2   :  { %v29255_v7 = vpop.f32.mrb[19].mxu1 }
 0x6e5   :  { %v3103_v16 = vpop.f32.mrb[6].mxu0  ;;  %v3485_v17 = vpop.f32.mrb[20].mxu1 }
 0x6e6   :  { %v3104_v18 = vadd.f32 %v3103_v16, %v3024_v47  ;;  %v29234_v20 = vpop.f32.mrb[7].mxu0  ;;  %v29269_v22 = vpop.f32.mrb[21].mxu1  ;;  %v98_v47 = vld [vmem:[#allocation11] sm:$0x3] }
 0x6e8   :  { %v3185_v23 = vadd.f32 %v3184_v4, %v3104_v18 }
 0x6e9   :  { %v3260_v24 = vpop.f32.mrb[8].mxu0 }
 0x6ea   :  { %v3261_v26 = vadd.f32 %v3260_v24, %v3185_v23  ;;  %v29248_v19 = vpop.f32.mrb[9].mxu0 }
 0x6ec   :  { %v3336_v32 = vadd.f32 %v3335_v6, %v3261_v26 }
 0x6ed   :  { %v3412_v34 = vpop.f32.mrb[10].mxu0 }
 0x6ee   :  { %v3413_v35 = vadd.f32 %v3412_v34, %v3336_v32  ;;  %v29262_v36 = vpop.f32.mrb[11].mxu0  ;;  %v27439_v32 = vld [vmem:[%s36837_s0 + $0x2] sm:$0x3] }
 0x6f0   :  { %v3486_v43 = vadd.f32 %v3485_v17, %v3413_v35 }
 0x6f2   :  { %v3495_v44 = vadd.f32 %v34890_v42, %v3486_v43 }
 0x6f4   :  { %34059 = vtanh.f32 %v3495_v44  ;;  %v27438_v49 = vmul.f32 -1.442695, %v3495_v44 }
 0x6f6   :  { %34061 = vpow2.f32 %v27438_v49 }
 0x6fe   :  { %v34060_v48 = vpop.eup %34059 }
 0x6ff   :  { %3509 = vrot.lane.b32.xlu0 %v34060_v48, %s34422_s2 }
 0x700   :  { %v34062_v50 = vpop.eup %34061 }
 0x701   :  { %v3499_v51 = vadd.f32 1.0, %v34062_v50 }
 0x703   :  { %3504 = vrot.lane.b32.xlu0 %v98_v47, %s34423_s17  ;;  %34063 = vrcp.f32 %v3499_v51 }
 0x70d   :  { %v34064_v52 = vpop.eup %34063 }
 0x771   :  { %v3510_v53 = vpop.permute.xlu0 %3509 }
 0x772   :  { %v3512_v25 = vmul.f32 %v34064_v52, %v3510_v53 }
 0x774   :  { %3514 = vrot.lane.b32.xlu1 %v3512_v25, %s34423_s17 }
 0x775   :  { %v3505_v54 = vpop.permute.xlu0 %3504 }
 0x776   :  { %v3507_v59 = vmul.f32 %v34064_v52, %v3505_v54 }
 0x7e6   :  { %v3515_v60 = vpop.permute.xlu1 %3514 }
 0x7e7   :  { %v34896_v62 = vadd.f32 %v3515_v60, %v3507_v59 }
 0x7e9   :  { %34065 = vtanh.f32 %v34896_v62 }
 0x7f3   :  { %v34066_v63 = vpop.eup %34065 }
 0x7f4   :  { %3520 = vrot.lane.b32.xlu1 %v34066_v63, %s34422_s2 }
 0x866   :  { %v3521_v2 = vpop.permute.xlu1 %3520 }
 0x867   :  { %v3523_v3 = vmul.f32 %v34064_v52, %v3521_v2 }
 0x869   :  { %3525 = vrot.lane.b32.xlu0 %v3523_v3, %s34423_s17 }
 0x8db   :  { %v34901_v45 = vpop.permute.xlu0 %3525 }
 0x8dc   :  { %3529 = vst.msk [vmem:[#allocation8] sm:$0x3] %vm79_vm0, %v34901_v45  ;;  %v3532_v4 = vsel %vm106_vm2, %v34901_v45, 0 }
 0x8dd   :  { %v3603_v5 = vand.u32 4294901760, %v3532_v4 }
 0x8df   :  { %v3604_v6 = vsub.f32 %v3532_v4, %v3603_v5 }
 0x8e1   :  { %v3605_v7 = vand.u32 4294901760, %v3604_v6 }
 0x8e3   :  { %v3606_v16 = vsub.f32 %v3604_v6, %v3605_v7 }
 0x8e5   :  { %v3607_v17 = vand.u32 4294901760, %v3606_v16 }
 0x8e7   :  { %29279 = vmatmul.mubr.f32.vlgmr.msra.gmra.mrb[12].mxu0 %v3607_v17 }
 0x8e8   :  { %32206 = vmatpush3.bf16.msra.mxu0 %v34568_v33  ;;  %29289 = vmatprep.mubr.msk.f32.mxu0 %vm34420_vm1, %v34421_v1 }
 0x8e9   :  { %32207 = vmatprep.subr.bf16.mxu0 %v34419_v0 }
 0x8ec   :  { %32209 = vmatpush3.bf16.msra.mxu0 %v34571_v37 }
 0x8ed   :  { %32210 = vmatprep.subr.bf16.mxu0 %v34419_v0 }
 0x8ef   :  { %29290 = vmatmul.mubr.f32.vlgmr.msra.gmra.mrb[12].mxu0 %v3603_v5 }
 0x8f0   :  { %32212 = vmatpush3.bf16.msra.mxu0 %v34577_v38  ;;  %29300 = vmatprep.mubr.msk.f32.mxu0 %vm34420_vm1, %v34421_v1 }
 0x8f1   :  { %32213 = vmatprep.subr.bf16.mxu0 %v34419_v0 }
 0x8f4   :  { %32215 = vmatpush3.bf16.msra.mxu0 %v34581_v39 }
 0x8f5   :  { %32216 = vmatprep.subr.bf16.mxu0 %v34419_v0 }
 0x8f7   :  { %29301 = vmatmul.mubr.f32.vlgmr.msra.gmra.mrb[12].mxu0 %v3604_v6 }
 0x8f8   :  { %32218 = vmatpush3.bf16.msra.mxu0 %v34556_v11  ;;  %29311 = vmatprep.mubr.msk.f32.mxu0 %vm34420_vm1, %v34421_v1 }
 0x8f9   :  { %32219 = vmatprep.subr.bf16.mxu0 %v34419_v0 }
 0x8fc   :  { %32221 = vmatpush3.bf16.msra.mxu0 %v34559_v14 }
 0x8fd   :  { %32222 = vmatprep.subr.bf16.mxu0 %v34419_v0 }
 0x8ff   :  { %29312 = vmatmul.mubr.f32.vlgmr.msra.gmra.mrb[12].mxu0 %v3605_v7 }
 0x900   :  { %32224 = vmatpush3.bf16.msra.mxu0 %v34593_v40  ;;  %29322 = vmatprep.mubr.msk.f32.mxu0 %vm34420_vm1, %v34421_v1 }
 0x901   :  { %32225 = vmatprep.subr.bf16.mxu0 %v34419_v0 }
 0x904   :  { %32227 = vmatpush3.bf16.msra.mxu0 %v34597_v41 }
 0x905   :  { %32228 = vmatprep.subr.bf16.mxu0 %v34419_v0 }
 0x907   :  { %29323 = vmatmul.mubr.f32.vlgmr.msra.gmra.mrb[12].mxu0 %v3603_v5 }
 0x908   :  { %32230 = vmatpush3.bf16.msra.mxu0 %v34556_v11  ;;  %29333 = vmatprep.mubr.msk.f32.mxu0 %vm34420_vm1, %v34421_v1 }
 0x909   :  { %32231 = vmatprep.subr.bf16.mxu0 %v34419_v0 }
 0x90c   :  { %32233 = vmatpush3.bf16.msra.mxu0 %v34559_v14 }
 0x90d   :  { %32288 = vmatprep.subr.bf16.mxu0 %v34419_v0 }
 0x90f   :  { %29334 = vmatmul.mubr.f32.vlgmr.msra.gmra.mrb[12].mxu0 %v3603_v5 }
 0x910   :  { %32290 = vmatpush3.bf16.msra.mxu0 %v34618_v46  ;;  %29448 = vmatprep.mubr.msk.f32.mxu0 %vm34420_vm1, %v34421_v1 }
 0x911   :  { %32291 = vmatprep.subr.bf16.mxu0 %v34419_v0 }
 0x9e2   :  { %v4015_v18 = vpop.f32.mrb[12].mxu0 }
 0x9e3   :  { %v33589_v20 = vadd.f32 %v34630_v58, %v4015_v18  ;;  %v29335_v22 = vpop.f32.mrb[13].mxu0 }
 0x9e5   :  { %v27440_v23 = vmul.f32 -1.442695, %v33589_v20 }
 0x9e7   :  { %34067 = vpow2.f32 %v27440_v23 }
 0x9f1   :  { %v34068_v24 = vpop.eup %34067 }
 0x9f2   :  { %v4022_v26 = vadd.f32 1.0, %v34068_v24 }
 0x9f4   :  { %34069 = vrcp.f32 %v4022_v26 }
 0x9fe   :  { %v34070_v19 = vpop.eup %34069 }
 0x9ff   :  { %v4025_v34 = vmul.f32 2.0, %v34070_v19 }
 0xa01   :  { %v34945_v35 = vmul.f32 %v27439_v32, %v4025_v34 }
 0xa03   :  { %v4028_v36 = vsel %vm609_vm3, %v34945_v35, 0 }
 0xa04   :  { %v4097_v43 = vand.u32 4294901760, %v4028_v36 }
 0xa06   :  { %v4098_v44 = vsub.f32 %v4028_v36, %v4097_v43 }
 0xa08   :  { %v4099_v58 = vand.u32 4294901760, %v4098_v44 }
 0xa0a   :  { %v4100_v48 = vsub.f32 %v4098_v44, %v4099_v58 }
 0xa0c   :  { %v4101_v47 = vand.u32 4294901760, %v4100_v48 }
 0xa0e   :  { %29341 = vmatmul.mubr.f32.vlgmr.msra.gmra.mrb[22].mxu1 %v4101_v47 }
 0xa0f   :  { %32239 = vmatpush3.bf16.msra.mxu1 %v34624_v55  ;;  %29347 = vmatprep.mubr.msk.f32.mxu1 %vm34420_vm1, %v34421_v1 }
 0xa10   :  { %32240 = vmatprep.subr.bf16.mxu1 %v34419_v0 }
 0xa16   :  { %29348 = vmatmul.mubr.f32.vlgmr.msra.gmra.mrb[22].mxu1 %v4097_v43 }
 0xa17   :  { %32242 = vmatpush3.bf16.msra.mxu1 %v34626_v56  ;;  %29354 = vmatprep.mubr.msk.f32.mxu1 %vm34420_vm1, %v34421_v1 }
 0xa18   :  { %32243 = vmatprep.subr.bf16.mxu1 %v34419_v0 }
 0xa1e   :  { %29355 = vmatmul.mubr.f32.vlgmr.msra.gmra.mrb[22].mxu1 %v4098_v44  ;;  %v35054_v44 = vld [vmem:[%s36844_s7] ss:$0 sm:$0xff] }
 0xa1f   :  { %32245 = vmatpush3.bf16.msra.mxu1 %v34618_v46  ;;  %29361 = vmatprep.mubr.msk.f32.mxu1 %vm34420_vm1, %v34421_v1 }
 0xa20   :  { %32246 = vmatprep.subr.bf16.mxu1 %v34419_v0 }
 0xa26   :  { %29362 = vmatmul.mubr.f32.vlgmr.msra.gmra.mrb[22].mxu1 %v4099_v58 }
 0xa27   :  { %32248 = vmatpush3.bf16.msra.mxu1 %v34628_v57  ;;  %29368 = vmatprep.mubr.msk.f32.mxu1 %vm34420_vm1, %v34421_v1 }
 0xa28   :  { %32249 = vmatprep.subr.bf16.mxu1 %v34419_v0 }
 0xa2e   :  { %29369 = vmatmul.mubr.f32.vlgmr.msra.gmra.mrb[22].mxu1 %v4097_v43 }
 0xa2f   :  { %32251 = vmatpush3.bf16.msra.mxu1 %v34618_v46  ;;  %29375 = vmatprep.mubr.msk.f32.mxu1 %vm34420_vm1, %v34421_v1 }
 0xa30   :  { %32252 = vmatprep.subr.bf16.mxu1 %v34419_v0 }
 0xa36   :  { %29376 = vmatmul.mubr.f32.vlgmr.msra.gmra.mrb[22].mxu1 %v4097_v43 }
 0xa37   :  { %32254 = vmatpush3.bf16.msra.mxu1 %v34556_v11  ;;  %29386 = vmatprep.mubr.msk.f32.mxu1 %vm34420_vm1, %v34421_v1 }
 0xa38   :  { %32255 = vmatprep.subr.bf16.mxu1 %v34419_v0 }
 0xa3b   :  { %32257 = vmatpush3.bf16.msra.mxu1 %v34559_v14 }
 0xa3c   :  { %32258 = vmatprep.subr.bf16.mxu1 %v34419_v0 }
 0xb09   :  { %v4485_v49 = vpop.f32.mrb[22].mxu1 }
 0xb0a   :  { %v33590_v50 = vadd.f32 %v34669_v15, %v4485_v49  ;;  %v29377_v51 = vpop.f32.mrb[23].mxu1 }
 0xb0c   :  { %v27441_v52 = vmul.f32 -1.442695, %v33590_v50 }
 0xb0e   :  { %34071 = vpow2.f32 %v27441_v52 }
 0xb18   :  { %v34072_v53 = vpop.eup %34071 }
 0xb19   :  { %v4492_v25 = vadd.f32 1.0, %v34072_v53 }
 0xb1b   :  { %34073 = vrcp.f32 %v4492_v25 }
 0xb25   :  { %v34074_v54 = vpop.eup %34073 }
 0xb26   :  { %v4495_v59 = vmul.f32 2.0, %v34074_v54 }
 0xb28   :  { %v34977_v60 = vmul.f32 %v4495_v59, %v34901_v45  ;;  %v35017_v45 = vld [vmem:[#allocation7] ss:$0 sm:$0xff] }
 0xb2a   :  { %v4498_v63 = vsel %vm106_vm2, %v34977_v60, 0 }
 0xb2b   :  { %v4569_v2 = vand.u32 4294901760, %v4498_v63 }
 0xb2d   :  { %v4570_v3 = vsub.f32 %v4498_v63, %v4569_v2 }
 0xb2f   :  { %v4571_v4 = vand.u32 4294901760, %v4570_v3 }
 0xb31   :  { %v4572_v5 = vsub.f32 %v4570_v3, %v4571_v4 }
 0xb33   :  { %v4573_v6 = vand.u32 4294901760, %v4572_v5 }
 0xb35   :  { %29387 = vmatmul.mubr.f32.vlgmr.msra.gmra.mrb[24].mxu1 %v4573_v6 }
 0xb36   :  { %32260 = vmatpush3.bf16.msra.mxu1 %v34568_v33  ;;  %29397 = vmatprep.mubr.msk.f32.mxu1 %vm34420_vm1, %v34421_v1 }
 0xb37   :  { %32261 = vmatprep.subr.bf16.mxu1 %v34419_v0 }
 0xb3a   :  { %32263 = vmatpush3.bf16.msra.mxu1 %v34571_v37 }
 0xb3b   :  { %32264 = vmatprep.subr.bf16.mxu1 %v34419_v0 }
 0xb3d   :  { %29398 = vmatmul.mubr.f32.vlgmr.msra.gmra.mrb[24].mxu1 %v4569_v2 }
 0xb3e   :  { %32266 = vmatpush3.bf16.msra.mxu1 %v34577_v38  ;;  %29408 = vmatprep.mubr.msk.f32.mxu1 %vm34420_vm1, %v34421_v1 }
 0xb3f   :  { %32267 = vmatprep.subr.bf16.mxu1 %v34419_v0 }
 0xb42   :  { %32269 = vmatpush3.bf16.msra.mxu1 %v34581_v39 }
 0xb43   :  { %32270 = vmatprep.subr.bf16.mxu1 %v34419_v0 }
 0xb45   :  { %29409 = vmatmul.mubr.f32.vlgmr.msra.gmra.mrb[24].mxu1 %v4570_v3 }
 0xb46   :  { %32272 = vmatpush3.bf16.msra.mxu1 %v34556_v11  ;;  %29419 = vmatprep.mubr.msk.f32.mxu1 %vm34420_vm1, %v34421_v1 }
 0xb47   :  { %32273 = vmatprep.subr.bf16.mxu1 %v34419_v0 }
 0xb4a   :  { %32275 = vmatpush3.bf16.msra.mxu1 %v34559_v14 }
 0xb4b   :  { %32276 = vmatprep.subr.bf16.mxu1 %v34419_v0 }
 0xb4d   :  { %29420 = vmatmul.mubr.f32.vlgmr.msra.gmra.mrb[24].mxu1 %v4571_v4 }
 0xb4e   :  { %32278 = vmatpush3.bf16.msra.mxu1 %v34593_v40  ;;  %29430 = vmatprep.mubr.msk.f32.mxu1 %vm34420_vm1, %v34421_v1 }
 0xb4f   :  { %32279 = vmatprep.subr.bf16.mxu1 %v34419_v0 }
 0xb52   :  { %32281 = vmatpush3.bf16.msra.mxu1 %v34597_v41 }
 0xb53   :  { %32282 = vmatprep.subr.bf16.mxu1 %v34419_v0 }
 0xb55   :  { %29431 = vmatmul.mubr.f32.vlgmr.msra.gmra.mrb[24].mxu1 %v4569_v2 }
 0xb56   :  { %32284 = vmatpush3.bf16.msra.mxu1 %v34556_v11  ;;  %29441 = vmatprep.mubr.msk.f32.mxu1 %vm34420_vm1, %v34421_v1 }
 0xb57   :  { %32285 = vmatprep.subr.bf16.mxu1 %v34419_v0 }
 0xb5a   :  { %32287 = vmatpush3.bf16.msra.mxu1 %v34559_v14 }
 0xb5b   :  { %32342 = vmatprep.subr.bf16.mxu1 %v34419_v0 }
 0xb5d   :  { %29442 = vmatmul.mubr.f32.vlgmr.msra.gmra.mrb[24].mxu1 %v4569_v2 }
 0xb5e   :  { %32344 = vmatpush3.bf16.msra.mxu1 %v34747_v61  ;;  %29560 = vmatprep.mubr.msk.f32.mxu1 %vm34420_vm1, %v34421_v1 }
 0xb5f   :  { %32345 = vmatprep.subr.bf16.mxu1 %v34419_v0 }
 0xb62   :  { %32347 = vmatpush3.bf16.msra.mxu1 %v34757_v8 }
 0xb63   :  { %32348 = vmatprep.subr.bf16.mxu1 %v34419_v0 }
 0xc30   :  { %v4981_v15 = vpop.f32.mrb[24].mxu1 }
 0xc31   :  { %v33591_v7 = vadd.f32 %v35017_v45, %v4981_v15  ;;  %v29443_v16 = vpop.f32.mrb[25].mxu1 }
 0xc33   :  { %v27442_v17 = vmul.f32 -1.442695, %v33591_v7 }
 0xc35   :  { %34075 = vpow2.f32 %v27442_v17 }
 0xc3f   :  { %v34076_v18 = vpop.eup %34075 }
 0xc40   :  { %v4988_v20 = vadd.f32 1.0, %v34076_v18 }
 0xc42   :  { %34077 = vrcp.f32 %v4988_v20 }
 0xc4c   :  { %v34078_v22 = vpop.eup %34077 }
 0xc4d   :  { %v4991_v23 = vmul.f32 2.0, %v34078_v22 }
 0xc4f   :  { %v35021_v24 = vmul.f32 %v4991_v23, %v34945_v35 }
 0xc51   :  { %v4994_v26 = vsel %vm609_vm3, %v35021_v24, 0 }
 0xc52   :  { %v5063_v19 = vand.u32 4294901760, %v4994_v26 }
 0xc54   :  { %v5064_v32 = vsub.f32 %v4994_v26, %v5063_v19 }
 0xc56   :  { %v5065_v34 = vand.u32 4294901760, %v5064_v32 }
 0xc58   :  { %v5066_v36 = vsub.f32 %v5064_v32, %v5065_v34 }
 0xc5a   :  { %v5067_v43 = vand.u32 4294901760, %v5066_v36 }
 0xc5c   :  { %29449 = vmatmul.mubr.f32.vlgmr.msra.gmra.mrb[14].mxu0 %v5067_v43 }
 0xc5d   :  { %32293 = vmatpush3.bf16.msra.mxu0 %v34624_v55  ;;  %29455 = vmatprep.mubr.msk.f32.mxu0 %vm34420_vm1, %v34421_v1 }
 0xc5e   :  { %32294 = vmatprep.subr.bf16.mxu0 %v34419_v0 }
 0xc64   :  { %29456 = vmatmul.mubr.f32.vlgmr.msra.gmra.mrb[14].mxu0 %v5063_v19 }
 0xc65   :  { %32296 = vmatpush3.bf16.msra.mxu0 %v34626_v56  ;;  %29462 = vmatprep.mubr.msk.f32.mxu0 %vm34420_vm1, %v34421_v1 }
 0xc66   :  { %32297 = vmatprep.subr.bf16.mxu0 %v34419_v0 }
 0xc6c   :  { %29463 = vmatmul.mubr.f32.vlgmr.msra.gmra.mrb[14].mxu0 %v5064_v32 }
 0xc6d   :  { %32299 = vmatpush3.bf16.msra.mxu0 %v34618_v46  ;;  %29469 = vmatprep.mubr.msk.f32.mxu0 %vm34420_vm1, %v34421_v1 }
 0xc6e   :  { %32300 = vmatprep.subr.bf16.mxu0 %v34419_v0 }
 0xc74   :  { %29470 = vmatmul.mubr.f32.vlgmr.msra.gmra.mrb[14].mxu0 %v5065_v34 }
 0xc75   :  { %32302 = vmatpush3.bf16.msra.mxu0 %v34628_v57  ;;  %29476 = vmatprep.mubr.msk.f32.mxu0 %vm34420_vm1, %v34421_v1 }
 0xc76   :  { %32303 = vmatprep.subr.bf16.mxu0 %v34419_v0 }
 0xc7c   :  { %29477 = vmatmul.mubr.f32.vlgmr.msra.gmra.mrb[14].mxu0 %v5063_v19 }
 0xc7d   :  { %32305 = vmatpush3.bf16.msra.mxu0 %v34618_v46  ;;  %29483 = vmatprep.mubr.msk.f32.mxu0 %vm34420_vm1, %v34421_v1 }
 0xc7e   :  { %32306 = vmatprep.subr.bf16.mxu0 %v34419_v0 }
 0xc84   :  { %29484 = vmatmul.mubr.f32.vlgmr.msra.gmra.mrb[14].mxu0 %v5063_v19 }
 0xc85   :  { %32308 = vmatpush3.bf16.msra.mxu0 %v34556_v11  ;;  %29494 = vmatprep.mubr.msk.f32.mxu0 %vm34420_vm1, %v34421_v1 }
 0xc86   :  { %32309 = vmatprep.subr.bf16.mxu0 %v34419_v0 }
 0xc89   :  { %32311 = vmatpush3.bf16.msra.mxu0 %v34559_v14 }
 0xc8a   :  { %32312 = vmatprep.subr.bf16.mxu0 %v34419_v0 }
 0xd57   :  { %v5451_v35 = vpop.f32.mrb[14].mxu0 }
 0xd58   :  { %v33592_v58 = vadd.f32 %v35054_v44, %v5451_v35  ;;  %v29485_v48 = vpop.f32.mrb[15].mxu0 }
 0xd5a   :  { %v27443_v47 = vmul.f32 -1.442695, %v33592_v58 }
 0xd5c   :  { %34079 = vpow2.f32 %v27443_v47 }
 0xd66   :  { %v34080_v49 = vpop.eup %34079 }
 0xd67   :  { %v5458_v50 = vadd.f32 1.0, %v34080_v49 }
 0xd69   :  { %34081 = vrcp.f32 %v5458_v50 }
 0xd73   :  { %v34082_v51 = vpop.eup %34081 }
 0xd74   :  { %v5461_v52 = vmul.f32 2.0, %v34082_v51 }
 0xd76   :  { %v5462_v53 = vmul.f32 %v5461_v52, %v34977_v60 }
 0xd78   :  { %v5464_v25 = vsel %vm106_vm2, %v5462_v53, 0 }
 0xd79   :  { %v35059_v54 = vand.u32 4294901760, %v5464_v25 }
 0xd7b   :  { %v5536_v59 = vsub.f32 %v5464_v25, %v35059_v54 }
 0xd7d   :  { %v5537_v63 = vand.u32 4294901760, %v5536_v59 }
 0xd7f   :  { %v5538_v2 = vsub.f32 %v5536_v59, %v5537_v63 }
 0xd81   :  { %v5539_v3 = vand.u32 4294901760, %v5538_v2 }
 0xd83   :  { %29495 = vmatmul.mubr.f32.vlgmr.msra.gmra.mrb[16].mxu0 %v5539_v3  ;;  %29561 = vmatmul.mubr.f32.vlgmr.msra.gmra.mrb[26].mxu1 %v5539_v3 }
 0xd84   :  { %32314 = vmatpush3.bf16.msra.mxu0 %v34568_v33  ;;  %32350 = vmatpush3.bf16.msra.mxu1 %v34761_v21 }
 0xd85   :  { %32315 = vmatprep.subr.bf16.mxu0 %v34419_v0  ;;  %32351 = vmatprep.subr.bf16.mxu1 %v34419_v0 }
 0xd86   :  { %29571 = vmatprep.mubr.msk.f32.mxu1 %vm34420_vm1, %v34421_v1  ;;  %29505 = vmatprep.mubr.msk.f32.mxu0 %vm34420_vm1, %v34421_v1 }
 0xd88   :  { %32317 = vmatpush3.bf16.msra.mxu0 %v34571_v37  ;;  %32353 = vmatpush3.bf16.msra.mxu1 %v34763_v27 }
 0xd89   :  { %32318 = vmatprep.subr.bf16.mxu0 %v34419_v0  ;;  %32354 = vmatprep.subr.bf16.mxu1 %v34419_v0 }
 0xd8b   :  { %29572 = vmatmul.mubr.f32.vlgmr.msra.gmra.mrb[28].mxu1 %v35059_v54  ;;  %29506 = vmatmul.mubr.f32.vlgmr.msra.gmra.mrb[16].mxu0 %v35059_v54 }
 0xd8c   :  { %32320 = vmatpush3.bf16.msra.mxu0 %v34577_v38  ;;  %32356 = vmatpush3.bf16.msra.mxu1 %v34765_v28 }
 0xd8d   :  { %32321 = vmatprep.subr.bf16.mxu0 %v34419_v0  ;;  %32357 = vmatprep.subr.bf16.mxu1 %v34419_v0 }
 0xd8e   :  { %29582 = vmatprep.mubr.msk.f32.mxu1 %vm34420_vm1, %v34421_v1  ;;  %29516 = vmatprep.mubr.msk.f32.mxu0 %vm34420_vm1, %v34421_v1 }
 0xd90   :  { %32323 = vmatpush3.bf16.msra.mxu0 %v34581_v39  ;;  %32359 = vmatpush3.bf16.msra.mxu1 %v34767_v29 }
 0xd91   :  { %32324 = vmatprep.subr.bf16.mxu0 %v34419_v0  ;;  %32360 = vmatprep.subr.bf16.mxu1 %v34419_v0 }
 0xd93   :  { %29583 = vmatmul.mubr.f32.vlgmr.msra.gmra.mrb[30].mxu1 %v5536_v59  ;;  %29517 = vmatmul.mubr.f32.vlgmr.msra.gmra.mrb[16].mxu0 %v5536_v59 }
 0xd94   :  { %32326 = vmatpush3.bf16.msra.mxu0 %v34556_v11  ;;  %32362 = vmatpush3.bf16.msra.mxu1 %v34747_v61 }
 0xd95   :  { %32327 = vmatprep.subr.bf16.mxu0 %v34419_v0  ;;  %32363 = vmatprep.subr.bf16.mxu1 %v34419_v0 }
 0xd96   :  { %29593 = vmatprep.mubr.msk.f32.mxu1 %vm34420_vm1, %v34421_v1  ;;  %29527 = vmatprep.mubr.msk.f32.mxu0 %vm34420_vm1, %v34421_v1 }
 0xd98   :  { %32329 = vmatpush3.bf16.msra.mxu0 %v34559_v14  ;;  %32365 = vmatpush3.bf16.msra.mxu1 %v34757_v8 }
 0xd99   :  { %32330 = vmatprep.subr.bf16.mxu0 %v34419_v0  ;;  %32366 = vmatprep.subr.bf16.mxu1 %v34419_v0 }
 0xd9b   :  { %29594 = vmatmul.mubr.f32.vlgmr.msra.gmra.mrb[32].mxu1 %v5537_v63  ;;  %29528 = vmatmul.mubr.f32.vlgmr.msra.gmra.mrb[16].mxu0 %v5537_v63 }
 0xd9c   :  { %32332 = vmatpush3.bf16.msra.mxu0 %v34593_v40  ;;  %32368 = vmatpush3.bf16.msra.mxu1 %v34769_v30 }
 0xd9d   :  { %32333 = vmatprep.subr.bf16.mxu0 %v34419_v0  ;;  %32369 = vmatprep.subr.bf16.mxu1 %v34419_v0 }
 0xd9e   :  { %29604 = vmatprep.mubr.msk.f32.mxu1 %vm34420_vm1, %v34421_v1  ;;  %29538 = vmatprep.mubr.msk.f32.mxu0 %vm34420_vm1, %v34421_v1 }
 0xda0   :  { %32335 = vmatpush3.bf16.msra.mxu0 %v34597_v41  ;;  %32371 = vmatpush3.bf16.msra.mxu1 %v34771_v31 }
 0xda1   :  { %32336 = vmatprep.subr.bf16.mxu0 %v34419_v0  ;;  %32372 = vmatprep.subr.bf16.mxu1 %v34419_v0 }
 0xda3   :  { %29605 = vmatmul.mubr.f32.vlgmr.msra.gmra.mrb[34].mxu1 %v35059_v54  ;;  %29539 = vmatmul.mubr.f32.vlgmr.msra.gmra.mrb[16].mxu0 %v35059_v54 }
 0xda4   :  { %32338 = vmatpush3.bf16.msra.mxu0 %v34556_v11  ;;  %32374 = vmatpush3.bf16.msra.mxu1 %v34747_v61 }
 0xda5   :  { %32339 = vmatprep.subr.bf16.mxu0 %v34419_v0  ;;  %32375 = vmatprep.subr.bf16.mxu1 %v34419_v0 }
 0xda6   :  { %29615 = vmatprep.mubr.msk.f32.mxu1 %vm34420_vm1, %v34421_v1  ;;  %29549 = vmatprep.mubr.msk.f32.mxu0 %vm34420_vm1, %v34421_v1 }
 0xda8   :  { %32341 = vmatpush3.bf16.msra.mxu0 %v34559_v14  ;;  %32377 = vmatpush3.bf16.msra.mxu1 %v34757_v8 }
 0xda9   :  { %32381 = vmatprep.subr.bf16.mxu1 %v34419_v0  ;;  %32378 = vmatprep.subr.bf16.mxu0 %v34419_v0 }
 0xdab   :  { %29616 = vmatmul.mubr.f32.vlgmr.msra.gmra.mrb[36].mxu1 %v35059_v54  ;;  %29550 = vmatmul.mubr.f32.vlgmr.msra.gmra.mrb[16].mxu0 %v35059_v54 }
 0xdac   :  { %32383 = vmatpush3.bf16.msra.mxu1 %v34851_v10  ;;  %29629 = vmatprep.mubr.msk.f32.mxu1 %vm34420_vm1, %v34421_v1 }
 0xdad   :  { %32387 = vmatprep.subr.bf16.mxu1 %v34419_v0  ;;  %32380 = vmatpush3.bf16.msra.mxu0 %v34849_v9 }
 0xdae   :  { %29622 = vmatprep.mubr.msk.f32.mxu0 %vm34420_vm1, %v34421_v1  ;;  %32384 = vmatprep.subr.bf16.mxu0 %v34419_v0 }
 0xe56   :  { %v6034_v60 = vpop.f32.mrb[26].mxu1 }
 0xe57   :  { %v29562_v4 = vpop.f32.mrb[27].mxu1 }
 0xe5e   :  { %v6125_v5 = vpop.f32.mrb[28].mxu1 }
 0xe5f   :  { %v6126_v6 = vadd.f32 %v6125_v5, %v6034_v60  ;;  %v29573_v15 = vpop.f32.mrb[29].mxu1 }
 0xe66   :  { %v6205_v7 = vpop.f32.mrb[30].mxu1 }
 0xe67   :  { %v6206_v16 = vadd.f32 %v6205_v7, %v6126_v6  ;;  %v29584_v17 = vpop.f32.mrb[31].mxu1 }
 0xe6e   :  { %v6282_v18 = vpop.f32.mrb[32].mxu1 }
 0xe6f   :  { %v6283_v20 = vadd.f32 %v6282_v18, %v6206_v16  ;;  %v29595_v22 = vpop.f32.mrb[33].mxu1 }
 0xe76   :  { %v6365_v23 = vpop.f32.mrb[34].mxu1 }
 0xe77   :  { %v6366_v26 = vadd.f32 %v6365_v23, %v6283_v20  ;;  %v29606_v19 = vpop.f32.mrb[35].mxu1 }
 0xe7e   :  { %v6440_v32 = vpop.f32.mrb[36].mxu1  ;;  %v5947_v34 = vpop.f32.mrb[16].mxu0 }
 0xe7f   :  { %v6441_v36 = vadd.f32 %v6440_v32, %v6366_v26  ;;  %v33593_v43 = vadd.f32 %v35017_v45, %v5947_v34  ;;  %v29617_v35 = vpop.f32.mrb[37].mxu1  ;;  %v29551_v58 = vpop.f32.mrb[17].mxu0 }
 0xe81   :  { %v27444_v48 = vmul.f32 -1.442695, %v33593_v43 }
 0xe83   :  { %34083 = vpow2.f32 %v27444_v48 }
 0xe8d   :  { %v34084_v47 = vpop.eup %34083 }
 0xe8e   :  { %v5954_v49 = vadd.f32 1.0, %v34084_v47 }
 0xe90   :  { %34085 = vrcp.f32 %v5954_v49 }
 0xe9a   :  { %v34086_v50 = vpop.eup %34085 }
 0xe9b   :  { %v5957_v51 = vmul.f32 2.0, %v34086_v50 }
 0xe9d   :  { %v5958_v52 = vmul.f32 %v5957_v51, %v35021_v24 }
 0xe9f   :  { %v6445_v53 = vsel %vm609_vm3, %v5958_v52, 0 }
 0xea0   :  { %v6514_v25 = vand.u32 4294901760, %v6445_v53 }
 0xea2   :  { %v6515_v54 = vsub.f32 %v6445_v53, %v6514_v25  ;;  %29630 = vmatmul.mubr.f32.vlgmr.msra.gmra.mrb[38].mxu1 %v6514_v25 }
 0xea3   :  { %32389 = vmatpush3.bf16.msra.mxu1 %v34849_v9  ;;  %29643 = vmatprep.mubr.msk.f32.mxu1 %vm34420_vm1, %v34421_v1 }
 0xea4   :  { %v6516_v59 = vand.u32 4294901760, %v6515_v54  ;;  %32393 = vmatprep.subr.bf16.mxu1 %v34419_v0 }
 0xea6   :  { %29644 = vmatmul.mubr.f32.vlgmr.msra.gmra.mrb[40].mxu1 %v6516_v59  ;;  %v6517_v63 = vsub.f32 %v6515_v54, %v6516_v59 }
 0xea7   :  { %32395 = vmatpush3.bf16.msra.mxu1 %v34849_v9  ;;  %29657 = vmatprep.mubr.msk.f32.mxu1 %vm34420_vm1, %v34421_v1 }
 0xea8   :  { %v6518_v24 = vand.u32 4294901760, %v6517_v63  ;;  %32432 = vmatprep.subr.bf16.mxu1 %v34419_v0 }
 0xeaa   :  { %29623 = vmatmul.mubr.f32.vlgmr.msra.gmra.mrb[18].mxu0 %v6518_v24  ;;  %29658 = vmatmul.mubr.f32.vlgmr.msra.gmra.mrb[42].mxu1 %v6514_v25 }
 0xeab   :  { %32386 = vmatpush3.bf16.msra.mxu0 %v34857_v12  ;;  %29636 = vmatprep.mubr.msk.f32.mxu0 %vm34420_vm1, %v34421_v1 }
 0xeac   :  { %32390 = vmatprep.subr.bf16.mxu0 %v34419_v0  ;;  %32434 = vmatpush3.bf16.msra.mxu1 %v34618_v46 }
 0xead   :  { %29730 = vmatprep.mubr.msk.f32.mxu1 %vm34420_vm1, %v34421_v1  ;;  %32435 = vmatprep.subr.bf16.mxu1 %v34419_v0 }
 0xeae   :  { %29637 = vmatmul.mubr.f32.vlgmr.msra.gmra.mrb[20].mxu0 %v6515_v54 }
 0xeaf   :  { %32392 = vmatpush3.bf16.msra.mxu0 %v34859_v13  ;;  %29650 = vmatprep.mubr.msk.f32.mxu0 %vm34420_vm1, %v34421_v1 }
 0xeb0   :  { %32396 = vmatprep.subr.bf16.mxu0 %v34419_v0 }
 0xeb2   :  { %29651 = vmatmul.mubr.f32.vlgmr.msra.gmra.mrb[22].mxu0 %v6514_v25 }
 0xeb3   :  { %32398 = vmatpush3.bf16.msra.mxu0 %v34556_v11  ;;  %29668 = vmatprep.mubr.msk.f32.mxu0 %vm34420_vm1, %v34421_v1 }
 0xeb4   :  { %32399 = vmatprep.subr.bf16.mxu0 %v34419_v0 }
 0xeb7   :  { %32401 = vmatpush3.bf16.msra.mxu0 %v34559_v14 }
 0xeb8   :  { %32402 = vmatprep.subr.bf16.mxu0 %v34419_v0 }
 0xf75   :  { %v6601_v2 = vpop.f32.mrb[38].mxu1 }
 0xf76   :  { %v29631_v3 = vpop.f32.mrb[39].mxu1 }
 0xf79   :  { %v6752_v60 = vpop.f32.mrb[40].mxu1 }
 0xf7a   :  { %v29645_v4 = vpop.f32.mrb[41].mxu1 }
 0xf7d   :  { %v6520_v5 = vpop.f32.mrb[18].mxu0  ;;  %v6902_v6 = vpop.f32.mrb[42].mxu1 }
 0xf7e   :  { %v6521_v15 = vadd.f32 %v6520_v5, %v6441_v36  ;;  %v29624_v7 = vpop.f32.mrb[19].mxu0  ;;  %v29659_v16 = vpop.f32.mrb[43].mxu1 }
 0xf80   :  { %v6602_v17 = vadd.f32 %v6601_v2, %v6521_v15 }
 0xf81   :  { %v6677_v18 = vpop.f32.mrb[20].mxu0 }
 0xf82   :  { %v6678_v20 = vadd.f32 %v6677_v18, %v6602_v17  ;;  %v29638_v22 = vpop.f32.mrb[21].mxu0  ;;  %v27446_v18 = vld [vmem:[%s36837_s0 + $0x4] sm:$0x3] }
 0xf84   :  { %v6753_v23 = vadd.f32 %v6752_v60, %v6678_v20 }
 0xf85   :  { %v6829_v26 = vpop.f32.mrb[22].mxu0 }
 0xf86   :  { %v6830_v19 = vadd.f32 %v6829_v26, %v6753_v23  ;;  %v29652_v32 = vpop.f32.mrb[23].mxu0 }
 0xf88   :  { %v6903_v34 = vadd.f32 %v6902_v6, %v6830_v19 }
 0xf8a   :  { %v6906_v43 = vadd.f32 %v34890_v42, %v6903_v34 }
 0xf8c   :  { %34087 = vtanh.f32 %v6906_v43  ;;  %v27445_v58 = vmul.f32 -1.442695, %v6906_v43 }
 0xf8e   :  { %34089 = vpow2.f32 %v27445_v58 }
 0xf96   :  { %v34088_v35 = vpop.eup %34087 }
 0xf97   :  { %6916 = vrot.lane.b32.xlu1 %v34088_v35, %s34422_s2 }
 0xf98   :  { %v34090_v36 = vpop.eup %34089 }
 0xf99   :  { %v6910_v48 = vadd.f32 1.0, %v34090_v36 }
 0xf9b   :  { %34091 = vrcp.f32 %v6910_v48 }
 0xfa5   :  { %v34092_v47 = vpop.eup %34091 }
 0xfa6   :  { %v6914_v51 = vmul.f32 %v34092_v47, %v34896_v62 }
0x1009   :  { %v6917_v49 = vpop.permute.xlu1 %6916 }
0x100a   :  { %v6919_v50 = vmul.f32 %v34092_v47, %v6917_v49 }
0x100c   :  { %6921 = vrot.lane.b32.xlu0 %v6919_v50, %s34423_s17 }
0x107e   :  { %v6922_v52 = vpop.permute.xlu0 %6921 }
0x107f   :  { %v35169_v53 = vadd.f32 %v6922_v52, %v6914_v51 }
0x1081   :  { %34093 = vtanh.f32 %v35169_v53 }
0x108b   :  { %v34094_v42 = vpop.eup %34093 }
0x108c   :  { %6927 = vrot.lane.b32.xlu1 %v34094_v42, %s34422_s2 }
0x10fe   :  { %v6928_v25 = vpop.permute.xlu1 %6927 }
0x10ff   :  { %v6930_v54 = vmul.f32 %v34092_v47, %v6928_v25 }
0x1101   :  { %6932 = vrot.lane.b32.xlu0 %v6930_v54, %s34423_s17 }
0x1173   :  { %v35174_v59 = vpop.permute.xlu0 %6932 }
0x1174   :  { %6936 = vst.msk [vmem:[#allocation8 + $0x2] sm:$0x3] %vm79_vm0, %v35174_v59  ;;  %v6939_v62 = vsel %vm106_vm2, %v35174_v59, 0 }
0x1175   :  { %v7010_v63 = vand.u32 4294901760, %v6939_v62 }
0x1177   :  { %v7011_v24 = vsub.f32 %v6939_v62, %v7010_v63 }
0x1179   :  { %v7012_v2 = vand.u32 4294901760, %v7011_v24 }
0x117b   :  { %v7013_v3 = vsub.f32 %v7011_v24, %v7012_v2 }
0x117d   :  { %v7014_v60 = vand.u32 4294901760, %v7013_v3 }
0x117f   :  { %29669 = vmatmul.mubr.f32.vlgmr.msra.gmra.mrb[24].mxu0 %v7014_v60 }
0x1180   :  { %32404 = vmatpush3.bf16.msra.mxu0 %v34568_v33  ;;  %29679 = vmatprep.mubr.msk.f32.mxu0 %vm34420_vm1, %v34421_v1 }
0x1181   :  { %32405 = vmatprep.subr.bf16.mxu0 %v34419_v0 }
0x1184   :  { %32407 = vmatpush3.bf16.msra.mxu0 %v34571_v37 }
0x1185   :  { %32408 = vmatprep.subr.bf16.mxu0 %v34419_v0 }
0x1187   :  { %29680 = vmatmul.mubr.f32.vlgmr.msra.gmra.mrb[24].mxu0 %v7010_v63 }
0x1188   :  { %32410 = vmatpush3.bf16.msra.mxu0 %v34577_v38  ;;  %29690 = vmatprep.mubr.msk.f32.mxu0 %vm34420_vm1, %v34421_v1 }
0x1189   :  { %32411 = vmatprep.subr.bf16.mxu0 %v34419_v0 }
0x118c   :  { %32413 = vmatpush3.bf16.msra.mxu0 %v34581_v39 }
0x118d   :  { %32414 = vmatprep.subr.bf16.mxu0 %v34419_v0 }
0x118f   :  { %29691 = vmatmul.mubr.f32.vlgmr.msra.gmra.mrb[24].mxu0 %v7011_v24 }
0x1190   :  { %32416 = vmatpush3.bf16.msra.mxu0 %v34556_v11  ;;  %29701 = vmatprep.mubr.msk.f32.mxu0 %vm34420_vm1, %v34421_v1 }
0x1191   :  { %32417 = vmatprep.subr.bf16.mxu0 %v34419_v0 }
0x1194   :  { %32419 = vmatpush3.bf16.msra.mxu0 %v34559_v14 }
0x1195   :  { %32420 = vmatprep.subr.bf16.mxu0 %v34419_v0 }
0x1197   :  { %29702 = vmatmul.mubr.f32.vlgmr.msra.gmra.mrb[24].mxu0 %v7012_v2 }
0x1198   :  { %32422 = vmatpush3.bf16.msra.mxu0 %v34593_v40  ;;  %29712 = vmatprep.mubr.msk.f32.mxu0 %vm34420_vm1, %v34421_v1 }
0x1199   :  { %32423 = vmatprep.subr.bf16.mxu0 %v34419_v0 }
0x119c   :  { %32425 = vmatpush3.bf16.msra.mxu0 %v34597_v41 }
0x119d   :  { %32426 = vmatprep.subr.bf16.mxu0 %v34419_v0 }
0x119f   :  { %29713 = vmatmul.mubr.f32.vlgmr.msra.gmra.mrb[24].mxu0 %v7010_v63 }
0x11a0   :  { %32428 = vmatpush3.bf16.msra.mxu0 %v34556_v11  ;;  %29723 = vmatprep.mubr.msk.f32.mxu0 %vm34420_vm1, %v34421_v1 }
0x11a1   :  { %32429 = vmatprep.subr.bf16.mxu0 %v34419_v0 }
0x11a4   :  { %32431 = vmatpush3.bf16.msra.mxu0 %v34559_v14 }
0x11a5   :  { %32486 = vmatprep.subr.bf16.mxu0 %v34419_v0 }
0x11a7   :  { %29724 = vmatmul.mubr.f32.vlgmr.msra.gmra.mrb[24].mxu0 %v7010_v63 }
0x11a8   :  { %32488 = vmatpush3.bf16.msra.mxu0 %v34618_v46  ;;  %29838 = vmatprep.mubr.msk.f32.mxu0 %vm34420_vm1, %v34421_v1 }
0x11a9   :  { %32489 = vmatprep.subr.bf16.mxu0 %v34419_v0 }
0x127a   :  { %v7422_v4 = vpop.f32.mrb[24].mxu0 }
0x127b   :  { %v33594_v5 = vadd.f32 %v35017_v45, %v7422_v4  ;;  %v29725_v6 = vpop.f32.mrb[25].mxu0 }
0x127d   :  { %v27447_v15 = vmul.f32 -1.442695, %v33594_v5 }
0x127f   :  { %34095 = vpow2.f32 %v27447_v15 }
0x1289   :  { %v34096_v7 = vpop.eup %34095 }
0x128a   :  { %v7429_v16 = vadd.f32 1.0, %v34096_v7 }
0x128c   :  { %34097 = vrcp.f32 %v7429_v16 }
0x1296   :  { %v34098_v17 = vpop.eup %34097 }
0x1297   :  { %v7432_v20 = vmul.f32 2.0, %v34098_v17 }
0x1299   :  { %v35218_v22 = vmul.f32 %v27446_v18, %v7432_v20 }
0x129b   :  { %v7435_v23 = vsel %vm609_vm3, %v35218_v22, 0 }
0x129c   :  { %v7504_v26 = vand.u32 4294901760, %v7435_v23 }
0x129e   :  { %v7505_v19 = vsub.f32 %v7435_v23, %v7504_v26 }
0x12a0   :  { %v7506_v32 = vand.u32 4294901760, %v7505_v19 }
0x12a2   :  { %v7507_v34 = vsub.f32 %v7505_v19, %v7506_v32 }
0x12a4   :  { %v7508_v43 = vand.u32 4294901760, %v7507_v34 }
0x12a6   :  { %29731 = vmatmul.mubr.f32.vlgmr.msra.gmra.mrb[44].mxu1 %v7508_v43 }
0x12a7   :  { %32437 = vmatpush3.bf16.msra.mxu1 %v34624_v55  ;;  %29737 = vmatprep.mubr.msk.f32.mxu1 %vm34420_vm1, %v34421_v1 }
0x12a8   :  { %32438 = vmatprep.subr.bf16.mxu1 %v34419_v0 }
0x12ae   :  { %29738 = vmatmul.mubr.f32.vlgmr.msra.gmra.mrb[44].mxu1 %v7504_v26 }
0x12af   :  { %32440 = vmatpush3.bf16.msra.mxu1 %v34626_v56  ;;  %29744 = vmatprep.mubr.msk.f32.mxu1 %vm34420_vm1, %v34421_v1 }
0x12b0   :  { %32441 = vmatprep.subr.bf16.mxu1 %v34419_v0 }
0x12b6   :  { %29745 = vmatmul.mubr.f32.vlgmr.msra.gmra.mrb[44].mxu1 %v7505_v19 }
0x12b7   :  { %32443 = vmatpush3.bf16.msra.mxu1 %v34618_v46  ;;  %29751 = vmatprep.mubr.msk.f32.mxu1 %vm34420_vm1, %v34421_v1 }
0x12b8   :  { %32444 = vmatprep.subr.bf16.mxu1 %v34419_v0 }
0x12be   :  { %29752 = vmatmul.mubr.f32.vlgmr.msra.gmra.mrb[44].mxu1 %v7506_v32 }
0x12bf   :  { %32446 = vmatpush3.bf16.msra.mxu1 %v34628_v57  ;;  %29758 = vmatprep.mubr.msk.f32.mxu1 %vm34420_vm1, %v34421_v1 }
0x12c0   :  { %32447 = vmatprep.subr.bf16.mxu1 %v34419_v0 }
0x12c6   :  { %29759 = vmatmul.mubr.f32.vlgmr.msra.gmra.mrb[44].mxu1 %v7504_v26 }
0x12c7   :  { %32449 = vmatpush3.bf16.msra.mxu1 %v34618_v46  ;;  %29765 = vmatprep.mubr.msk.f32.mxu1 %vm34420_vm1, %v34421_v1 }
0x12c8   :  { %32450 = vmatprep.subr.bf16.mxu1 %v34419_v0 }
0x12ce   :  { %29766 = vmatmul.mubr.f32.vlgmr.msra.gmra.mrb[44].mxu1 %v7504_v26 }
0x12cf   :  { %32452 = vmatpush3.bf16.msra.mxu1 %v34556_v11  ;;  %29776 = vmatprep.mubr.msk.f32.mxu1 %vm34420_vm1, %v34421_v1 }
0x12d0   :  { %32453 = vmatprep.subr.bf16.mxu1 %v34419_v0 }
0x12d3   :  { %32455 = vmatpush3.bf16.msra.mxu1 %v34559_v14 }
0x12d4   :  { %32456 = vmatprep.subr.bf16.mxu1 %v34419_v0 }
0x13a1   :  { %v7892_v35 = vpop.f32.mrb[44].mxu1 }
0x13a2   :  { %v33595_v58 = vadd.f32 %v35054_v44, %v7892_v35  ;;  %v29767_v36 = vpop.f32.mrb[45].mxu1 }
0x13a4   :  { %v27448_v48 = vmul.f32 -1.442695, %v33595_v58 }
0x13a6   :  { %34099 = vpow2.f32 %v27448_v48 }
0x13b0   :  { %v34100_v47 = vpop.eup %34099 }
0x13b1   :  { %v7899_v49 = vadd.f32 1.0, %v34100_v47 }
0x13b3   :  { %34101 = vrcp.f32 %v7899_v49 }
0x13bd   :  { %v34102_v50 = vpop.eup %34101 }
0x13be   :  { %v7902_v51 = vmul.f32 2.0, %v34102_v50 }
0x13c0   :  { %v35250_v52 = vmul.f32 %v7902_v51, %v35174_v59 }
0x13c2   :  { %v7905_v42 = vsel %vm106_vm2, %v35250_v52, 0 }
0x13c3   :  { %v7976_v25 = vand.u32 4294901760, %v7905_v42 }
0x13c5   :  { %v7977_v54 = vsub.f32 %v7905_v42, %v7976_v25 }
0x13c7   :  { %v7978_v62 = vand.u32 4294901760, %v7977_v54 }
0x13c9   :  { %v7979_v63 = vsub.f32 %v7977_v54, %v7978_v62 }
0x13cb   :  { %v7980_v24 = vand.u32 4294901760, %v7979_v63 }
0x13cd   :  { %29777 = vmatmul.mubr.f32.vlgmr.msra.gmra.mrb[46].mxu1 %v7980_v24 }
0x13ce   :  { %32458 = vmatpush3.bf16.msra.mxu1 %v34568_v33  ;;  %29787 = vmatprep.mubr.msk.f32.mxu1 %vm34420_vm1, %v34421_v1 }
0x13cf   :  { %32459 = vmatprep.subr.bf16.mxu1 %v34419_v0 }
0x13d2   :  { %32461 = vmatpush3.bf16.msra.mxu1 %v34571_v37 }
0x13d3   :  { %32462 = vmatprep.subr.bf16.mxu1 %v34419_v0 }
0x13d5   :  { %29788 = vmatmul.mubr.f32.vlgmr.msra.gmra.mrb[46].mxu1 %v7976_v25 }
0x13d6   :  { %32464 = vmatpush3.bf16.msra.mxu1 %v34577_v38  ;;  %29798 = vmatprep.mubr.msk.f32.mxu1 %vm34420_vm1, %v34421_v1 }
0x13d7   :  { %32465 = vmatprep.subr.bf16.mxu1 %v34419_v0 }
0x13da   :  { %32467 = vmatpush3.bf16.msra.mxu1 %v34581_v39 }
0x13db   :  { %32468 = vmatprep.subr.bf16.mxu1 %v34419_v0 }
0x13dd   :  { %29799 = vmatmul.mubr.f32.vlgmr.msra.gmra.mrb[46].mxu1 %v7977_v54 }
0x13de   :  { %32470 = vmatpush3.bf16.msra.mxu1 %v34556_v11  ;;  %29809 = vmatprep.mubr.msk.f32.mxu1 %vm34420_vm1, %v34421_v1 }
0x13df   :  { %32471 = vmatprep.subr.bf16.mxu1 %v34419_v0 }
0x13e2   :  { %32473 = vmatpush3.bf16.msra.mxu1 %v34559_v14 }
0x13e3   :  { %32474 = vmatprep.subr.bf16.mxu1 %v34419_v0 }
0x13e5   :  { %29810 = vmatmul.mubr.f32.vlgmr.msra.gmra.mrb[46].mxu1 %v7978_v62 }
0x13e6   :  { %32476 = vmatpush3.bf16.msra.mxu1 %v34593_v40  ;;  %29820 = vmatprep.mubr.msk.f32.mxu1 %vm34420_vm1, %v34421_v1 }
0x13e7   :  { %32477 = vmatprep.subr.bf16.mxu1 %v34419_v0 }
0x13ea   :  { %32479 = vmatpush3.bf16.msra.mxu1 %v34597_v41 }
0x13eb   :  { %32480 = vmatprep.subr.bf16.mxu1 %v34419_v0 }
0x13ed   :  { %29821 = vmatmul.mubr.f32.vlgmr.msra.gmra.mrb[46].mxu1 %v7976_v25 }
0x13ee   :  { %32482 = vmatpush3.bf16.msra.mxu1 %v34556_v11  ;;  %29831 = vmatprep.mubr.msk.f32.mxu1 %vm34420_vm1, %v34421_v1 }
0x13ef   :  { %32483 = vmatprep.subr.bf16.mxu1 %v34419_v0 }
0x13f2   :  { %32485 = vmatpush3.bf16.msra.mxu1 %v34559_v14 }
0x13f3   :  { %32540 = vmatprep.subr.bf16.mxu1 %v34419_v0 }
0x13f5   :  { %29832 = vmatmul.mubr.f32.vlgmr.msra.gmra.mrb[46].mxu1 %v7976_v25 }
0x13f6   :  { %32542 = vmatpush3.bf16.msra.mxu1 %v34747_v61  ;;  %29950 = vmatprep.mubr.msk.f32.mxu1 %vm34420_vm1, %v34421_v1 }
0x13f7   :  { %32543 = vmatprep.subr.bf16.mxu1 %v34419_v0 }
0x13fa   :  { %32545 = vmatpush3.bf16.msra.mxu1 %v34757_v8 }
0x13fb   :  { %32546 = vmatprep.subr.bf16.mxu1 %v34419_v0 }
0x14c8   :  { %v8388_v59 = vpop.f32.mrb[46].mxu1 }
0x14c9   :  { %v33596_v2 = vadd.f32 %v35017_v45, %v8388_v59  ;;  %v29833_v3 = vpop.f32.mrb[47].mxu1 }
0x14cb   :  { %v27449_v60 = vmul.f32 -1.442695, %v33596_v2 }
0x14cd   :  { %34103 = vpow2.f32 %v27449_v60 }
0x14d7   :  { %v34104_v4 = vpop.eup %34103 }
0x14d8   :  { %v8395_v5 = vadd.f32 1.0, %v34104_v4 }
0x14da   :  { %34105 = vrcp.f32 %v8395_v5 }
0x14e4   :  { %v34106_v6 = vpop.eup %34105 }
0x14e5   :  { %v8398_v15 = vmul.f32 2.0, %v34106_v6 }
0x14e7   :  { %v35292_v7 = vmul.f32 %v8398_v15, %v35218_v22 }
0x14e9   :  { %v8401_v16 = vsel %vm609_vm3, %v35292_v7, 0 }
0x14ea   :  { %v8470_v17 = vand.u32 4294901760, %v8401_v16 }
0x14ec   :  { %v8471_v18 = vsub.f32 %v8401_v16, %v8470_v17 }
0x14ee   :  { %v8472_v20 = vand.u32 4294901760, %v8471_v18 }
0x14f0   :  { %v8473_v23 = vsub.f32 %v8471_v18, %v8472_v20 }
0x14f2   :  { %v8474_v26 = vand.u32 4294901760, %v8473_v23 }
0x14f4   :  { %29839 = vmatmul.mubr.f32.vlgmr.msra.gmra.mrb[26].mxu0 %v8474_v26 }
0x14f5   :  { %32491 = vmatpush3.bf16.msra.mxu0 %v34624_v55  ;;  %29845 = vmatprep.mubr.msk.f32.mxu0 %vm34420_vm1, %v34421_v1 }
0x14f6   :  { %32492 = vmatprep.subr.bf16.mxu0 %v34419_v0 }
0x14fc   :  { %29846 = vmatmul.mubr.f32.vlgmr.msra.gmra.mrb[26].mxu0 %v8470_v17 }
0x14fd   :  { %32494 = vmatpush3.bf16.msra.mxu0 %v34626_v56  ;;  %29852 = vmatprep.mubr.msk.f32.mxu0 %vm34420_vm1, %v34421_v1 }
0x14fe   :  { %32495 = vmatprep.subr.bf16.mxu0 %v34419_v0 }
0x1504   :  { %29853 = vmatmul.mubr.f32.vlgmr.msra.gmra.mrb[26].mxu0 %v8471_v18 }
0x1505   :  { %32497 = vmatpush3.bf16.msra.mxu0 %v34618_v46  ;;  %29859 = vmatprep.mubr.msk.f32.mxu0 %vm34420_vm1, %v34421_v1 }
0x1506   :  { %32498 = vmatprep.subr.bf16.mxu0 %v34419_v0 }
0x150c   :  { %29860 = vmatmul.mubr.f32.vlgmr.msra.gmra.mrb[26].mxu0 %v8472_v20 }
0x150d   :  { %32500 = vmatpush3.bf16.msra.mxu0 %v34628_v57  ;;  %29866 = vmatprep.mubr.msk.f32.mxu0 %vm34420_vm1, %v34421_v1 }
0x150e   :  { %32501 = vmatprep.subr.bf16.mxu0 %v34419_v0 }
0x1514   :  { %29867 = vmatmul.mubr.f32.vlgmr.msra.gmra.mrb[26].mxu0 %v8470_v17 }
0x1515   :  { %32503 = vmatpush3.bf16.msra.mxu0 %v34618_v46  ;;  %29873 = vmatprep.mubr.msk.f32.mxu0 %vm34420_vm1, %v34421_v1 }
0x1516   :  { %32504 = vmatprep.subr.bf16.mxu0 %v34419_v0 }
0x151c   :  { %29874 = vmatmul.mubr.f32.vlgmr.msra.gmra.mrb[26].mxu0 %v8470_v17 }
0x151d   :  { %32506 = vmatpush3.bf16.msra.mxu0 %v34556_v11  ;;  %29884 = vmatprep.mubr.msk.f32.mxu0 %vm34420_vm1, %v34421_v1 }
0x151e   :  { %32507 = vmatprep.subr.bf16.mxu0 %v34419_v0 }
0x1521   :  { %32509 = vmatpush3.bf16.msra.mxu0 %v34559_v14 }
0x1522   :  { %32510 = vmatprep.subr.bf16.mxu0 %v34419_v0 }
0x15ef   :  { %v8858_v22 = vpop.f32.mrb[26].mxu0 }
0x15f0   :  { %v33597_v19 = vadd.f32 %v35054_v44, %v8858_v22  ;;  %v29875_v32 = vpop.f32.mrb[27].mxu0 }
0x15f2   :  { %v27450_v34 = vmul.f32 -1.442695, %v33597_v19 }
0x15f4   :  { %34107 = vpow2.f32 %v27450_v34 }
0x15fe   :  { %v34108_v43 = vpop.eup %34107 }
0x15ff   :  { %v8865_v35 = vadd.f32 1.0, %v34108_v43 }
0x1601   :  { %34109 = vrcp.f32 %v8865_v35 }
0x160b   :  { %v34110_v58 = vpop.eup %34109 }
0x160c   :  { %v8868_v36 = vmul.f32 2.0, %v34110_v58 }
0x160e   :  { %v8869_v48 = vmul.f32 %v8868_v36, %v35250_v52 }
0x1610   :  { %v8871_v47 = vsel %vm106_vm2, %v8869_v48, 0 }
0x1611   :  { %v35325_v49 = vand.u32 4294901760, %v8871_v47 }
0x1613   :  { %v8943_v50 = vsub.f32 %v8871_v47, %v35325_v49 }
0x1615   :  { %v8944_v51 = vand.u32 4294901760, %v8943_v50 }
0x1617   :  { %v8945_v42 = vsub.f32 %v8943_v50, %v8944_v51 }
0x1619   :  { %v8946_v25 = vand.u32 4294901760, %v8945_v42 }
0x161b   :  { %29885 = vmatmul.mubr.f32.vlgmr.msra.gmra.mrb[28].mxu0 %v8946_v25  ;;  %29951 = vmatmul.mubr.f32.vlgmr.msra.gmra.mrb[48].mxu1 %v8946_v25 }
0x161c   :  { %32512 = vmatpush3.bf16.msra.mxu0 %v34568_v33  ;;  %32548 = vmatpush3.bf16.msra.mxu1 %v34761_v21 }
0x161d   :  { %32513 = vmatprep.subr.bf16.mxu0 %v34419_v0  ;;  %32549 = vmatprep.subr.bf16.mxu1 %v34419_v0 }
0x161e   :  { %29961 = vmatprep.mubr.msk.f32.mxu1 %vm34420_vm1, %v34421_v1  ;;  %29895 = vmatprep.mubr.msk.f32.mxu0 %vm34420_vm1, %v34421_v1 }
0x1620   :  { %32515 = vmatpush3.bf16.msra.mxu0 %v34571_v37  ;;  %32551 = vmatpush3.bf16.msra.mxu1 %v34763_v27 }
0x1621   :  { %32516 = vmatprep.subr.bf16.mxu0 %v34419_v0  ;;  %32552 = vmatprep.subr.bf16.mxu1 %v34419_v0 }
0x1623   :  { %29962 = vmatmul.mubr.f32.vlgmr.msra.gmra.mrb[50].mxu1 %v35325_v49  ;;  %29896 = vmatmul.mubr.f32.vlgmr.msra.gmra.mrb[28].mxu0 %v35325_v49 }
0x1624   :  { %32518 = vmatpush3.bf16.msra.mxu0 %v34577_v38  ;;  %32554 = vmatpush3.bf16.msra.mxu1 %v34765_v28 }
0x1625   :  { %32519 = vmatprep.subr.bf16.mxu0 %v34419_v0  ;;  %32555 = vmatprep.subr.bf16.mxu1 %v34419_v0 }
0x1626   :  { %29972 = vmatprep.mubr.msk.f32.mxu1 %vm34420_vm1, %v34421_v1  ;;  %29906 = vmatprep.mubr.msk.f32.mxu0 %vm34420_vm1, %v34421_v1 }
0x1628   :  { %32521 = vmatpush3.bf16.msra.mxu0 %v34581_v39  ;;  %32557 = vmatpush3.bf16.msra.mxu1 %v34767_v29 }
0x1629   :  { %32522 = vmatprep.subr.bf16.mxu0 %v34419_v0  ;;  %32558 = vmatprep.subr.bf16.mxu1 %v34419_v0 }
0x162b   :  { %29973 = vmatmul.mubr.f32.vlgmr.msra.gmra.mrb[52].mxu1 %v8943_v50  ;;  %29907 = vmatmul.mubr.f32.vlgmr.msra.gmra.mrb[28].mxu0 %v8943_v50 }
0x162c   :  { %32524 = vmatpush3.bf16.msra.mxu0 %v34556_v11  ;;  %32560 = vmatpush3.bf16.msra.mxu1 %v34747_v61 }
0x162d   :  { %32525 = vmatprep.subr.bf16.mxu0 %v34419_v0  ;;  %32561 = vmatprep.subr.bf16.mxu1 %v34419_v0 }
0x162e   :  { %29983 = vmatprep.mubr.msk.f32.mxu1 %vm34420_vm1, %v34421_v1  ;;  %29917 = vmatprep.mubr.msk.f32.mxu0 %vm34420_vm1, %v34421_v1 }
0x1630   :  { %32527 = vmatpush3.bf16.msra.mxu0 %v34559_v14  ;;  %32563 = vmatpush3.bf16.msra.mxu1 %v34757_v8 }
0x1631   :  { %32528 = vmatprep.subr.bf16.mxu0 %v34419_v0  ;;  %32564 = vmatprep.subr.bf16.mxu1 %v34419_v0 }
0x1633   :  { %29984 = vmatmul.mubr.f32.vlgmr.msra.gmra.mrb[54].mxu1 %v8944_v51  ;;  %29918 = vmatmul.mubr.f32.vlgmr.msra.gmra.mrb[28].mxu0 %v8944_v51 }
0x1634   :  { %32530 = vmatpush3.bf16.msra.mxu0 %v34593_v40  ;;  %32566 = vmatpush3.bf16.msra.mxu1 %v34769_v30 }
0x1635   :  { %32531 = vmatprep.subr.bf16.mxu0 %v34419_v0  ;;  %32567 = vmatprep.subr.bf16.mxu1 %v34419_v0 }
0x1636   :  { %29994 = vmatprep.mubr.msk.f32.mxu1 %vm34420_vm1, %v34421_v1  ;;  %29928 = vmatprep.mubr.msk.f32.mxu0 %vm34420_vm1, %v34421_v1 }
0x1638   :  { %32533 = vmatpush3.bf16.msra.mxu0 %v34597_v41  ;;  %32569 = vmatpush3.bf16.msra.mxu1 %v34771_v31 }
0x1639   :  { %32534 = vmatprep.subr.bf16.mxu0 %v34419_v0  ;;  %32570 = vmatprep.subr.bf16.mxu1 %v34419_v0 }
0x163b   :  { %29995 = vmatmul.mubr.f32.vlgmr.msra.gmra.mrb[56].mxu1 %v35325_v49  ;;  %29929 = vmatmul.mubr.f32.vlgmr.msra.gmra.mrb[28].mxu0 %v35325_v49 }
0x163c   :  { %32536 = vmatpush3.bf16.msra.mxu0 %v34556_v11  ;;  %32572 = vmatpush3.bf16.msra.mxu1 %v34747_v61 }
0x163d   :  { %32537 = vmatprep.subr.bf16.mxu0 %v34419_v0  ;;  %32573 = vmatprep.subr.bf16.mxu1 %v34419_v0 }
0x163e   :  { %30005 = vmatprep.mubr.msk.f32.mxu1 %vm34420_vm1, %v34421_v1  ;;  %29939 = vmatprep.mubr.msk.f32.mxu0 %vm34420_vm1, %v34421_v1 }
0x1640   :  { %32539 = vmatpush3.bf16.msra.mxu0 %v34559_v14  ;;  %32575 = vmatpush3.bf16.msra.mxu1 %v34757_v8 }
0x1641   :  { %32579 = vmatprep.subr.bf16.mxu1 %v34419_v0  ;;  %32576 = vmatprep.subr.bf16.mxu0 %v34419_v0 }
0x1643   :  { %30006 = vmatmul.mubr.f32.vlgmr.msra.gmra.mrb[58].mxu1 %v35325_v49  ;;  %29940 = vmatmul.mubr.f32.vlgmr.msra.gmra.mrb[28].mxu0 %v35325_v49 }
0x1644   :  { %32581 = vmatpush3.bf16.msra.mxu1 %v34851_v10  ;;  %30019 = vmatprep.mubr.msk.f32.mxu1 %vm34420_vm1, %v34421_v1 }
0x1645   :  { %32585 = vmatprep.subr.bf16.mxu1 %v34419_v0  ;;  %32578 = vmatpush3.bf16.msra.mxu0 %v34849_v9 }
0x1646   :  { %30012 = vmatprep.mubr.msk.f32.mxu0 %vm34420_vm1, %v34421_v1  ;;  %32582 = vmatprep.subr.bf16.mxu0 %v34419_v0 }
0x16ee   :  { %v9441_v44 = vpop.f32.mrb[48].mxu1 }
0x16ef   :  { %v29952_v52 = vpop.f32.mrb[49].mxu1 }
0x16f6   :  { %v9532_v54 = vpop.f32.mrb[50].mxu1 }
0x16f7   :  { %v9533_v62 = vadd.f32 %v9532_v54, %v9441_v44  ;;  %v29963_v63 = vpop.f32.mrb[51].mxu1 }
0x16fe   :  { %v9612_v24 = vpop.f32.mrb[52].mxu1 }
0x16ff   :  { %v9613_v59 = vadd.f32 %v9612_v24, %v9533_v62  ;;  %v29974_v2 = vpop.f32.mrb[53].mxu1 }
0x1706   :  { %v9689_v3 = vpop.f32.mrb[54].mxu1 }
0x1707   :  { %v9690_v60 = vadd.f32 %v9689_v3, %v9613_v59  ;;  %v29985_v4 = vpop.f32.mrb[55].mxu1 }
0x170e   :  { %v9772_v5 = vpop.f32.mrb[56].mxu1 }
0x170f   :  { %v9773_v6 = vadd.f32 %v9772_v5, %v9690_v60  ;;  %v29996_v15 = vpop.f32.mrb[57].mxu1 }
0x1710   :  { %v35431_v15 = vld [vmem:[#allocation5] ss:$0 sm:$0xff] }
0x1716   :  { %v9847_v16 = vpop.f32.mrb[58].mxu1  ;;  %v9354_v17 = vpop.f32.mrb[28].mxu0 }
0x1717   :  { %v9848_v18 = vadd.f32 %v9847_v16, %v9773_v6  ;;  %v33598_v20 = vadd.f32 %v35017_v45, %v9354_v17  ;;  %v30007_v23 = vpop.f32.mrb[59].mxu1  ;;  %v29941_v26 = vpop.f32.mrb[29].mxu0 }
0x1719   :  { %v27451_v22 = vmul.f32 -1.442695, %v33598_v20 }
0x171b   :  { %34111 = vpow2.f32 %v27451_v22 }
0x1725   :  { %v34112_v19 = vpop.eup %34111 }
0x1726   :  { %v9361_v32 = vadd.f32 1.0, %v34112_v19 }
0x1728   :  { %34113 = vrcp.f32 %v9361_v32 }
0x1732   :  { %v34114_v34 = vpop.eup %34113 }
0x1733   :  { %v9364_v43 = vmul.f32 2.0, %v34114_v34 }
0x1735   :  { %v9365_v35 = vmul.f32 %v9364_v43, %v35292_v7 }
0x1737   :  { %v9852_v58 = vsel %vm609_vm3, %v9365_v35, 0 }
0x1738   :  { %v9921_v36 = vand.u32 4294901760, %v9852_v58 }
0x173a   :  { %v9922_v48 = vsub.f32 %v9852_v58, %v9921_v36  ;;  %30020 = vmatmul.mubr.f32.vlgmr.msra.gmra.mrb[60].mxu1 %v9921_v36 }
0x173b   :  { %32587 = vmatpush3.bf16.msra.mxu1 %v34849_v9  ;;  %30033 = vmatprep.mubr.msk.f32.mxu1 %vm34420_vm1, %v34421_v1 }
0x173c   :  { %v9923_v45 = vand.u32 4294901760, %v9922_v48  ;;  %32591 = vmatprep.subr.bf16.mxu1 %v34419_v0 }
0x173e   :  { %30034 = vmatmul.mubr.f32.vlgmr.msra.gmra.mrb[62].mxu1 %v9923_v45  ;;  %v9924_v47 = vsub.f32 %v9922_v48, %v9923_v45 }
0x173f   :  { %32593 = vmatpush3.bf16.msra.mxu1 %v34849_v9  ;;  %30047 = vmatprep.mubr.msk.f32.mxu1 %vm34420_vm1, %v34421_v1 }
0x1740   :  { %v9925_v7 = vand.u32 4294901760, %v9924_v47  ;;  %32630 = vmatprep.subr.bf16.mxu1 %v34419_v0 }
0x1742   :  { %30013 = vmatmul.mubr.f32.vlgmr.msra.gmra.mrb[30].mxu0 %v9925_v7  ;;  %30048 = vmatmul.mubr.f32.vlgmr.msra.gmra.mrb[64].mxu1 %v9921_v36 }
0x1743   :  { %32584 = vmatpush3.bf16.msra.mxu0 %v34857_v12  ;;  %30026 = vmatprep.mubr.msk.f32.mxu0 %vm34420_vm1, %v34421_v1 }
0x1744   :  { %32588 = vmatprep.subr.bf16.mxu0 %v34419_v0  ;;  %32632 = vmatpush3.bf16.msra.mxu1 %v34618_v46 }
0x1745   :  { %30120 = vmatprep.mubr.msk.f32.mxu1 %vm34420_vm1, %v34421_v1  ;;  %32633 = vmatprep.subr.bf16.mxu1 %v34419_v0 }
0x1746   :  { %30027 = vmatmul.mubr.f32.vlgmr.msra.gmra.mrb[32].mxu0 %v9922_v48 }
0x1747   :  { %32590 = vmatpush3.bf16.msra.mxu0 %v34859_v13  ;;  %30040 = vmatprep.mubr.msk.f32.mxu0 %vm34420_vm1, %v34421_v1 }
0x1748   :  { %32594 = vmatprep.subr.bf16.mxu0 %v34419_v0 }
0x174a   :  { %30041 = vmatmul.mubr.f32.vlgmr.msra.gmra.mrb[34].mxu0 %v9921_v36 }
0x174b   :  { %32596 = vmatpush3.bf16.msra.mxu0 %v34556_v11  ;;  %30058 = vmatprep.mubr.msk.f32.mxu0 %vm34420_vm1, %v34421_v1 }
0x174c   :  { %32597 = vmatprep.subr.bf16.mxu0 %v34419_v0 }
0x174f   :  { %32599 = vmatpush3.bf16.msra.mxu0 %v34559_v14 }
0x1750   :  { %32600 = vmatprep.subr.bf16.mxu0 %v34419_v0 }
0x180d   :  { %v10008_v49 = vpop.f32.mrb[60].mxu1 }
0x180e   :  { %v30021_v50 = vpop.f32.mrb[61].mxu1 }
0x1811   :  { %v10159_v51 = vpop.f32.mrb[62].mxu1 }
0x1812   :  { %v30035_v42 = vpop.f32.mrb[63].mxu1 }
0x1813   :  { %v35482_v42 = vld [vmem:[#allocation7] ss:$0 sm:$0xff] }
0x1815   :  { %v9927_v25 = vpop.f32.mrb[30].mxu0  ;;  %v10309_v44 = vpop.f32.mrb[64].mxu1 }
0x1816   :  { %v9928_v52 = vadd.f32 %v9927_v25, %v9848_v18  ;;  %v30014_v54 = vpop.f32.mrb[31].mxu0  ;;  %v30049_v62 = vpop.f32.mrb[65].mxu1 }
0x1818   :  { %v10009_v63 = vadd.f32 %v10008_v49, %v9928_v52 }
0x1819   :  { %v10084_v24 = vpop.f32.mrb[32].mxu0 }
0x181a   :  { %v10085_v59 = vadd.f32 %v10084_v24, %v10009_v63  ;;  %v30028_v2 = vpop.f32.mrb[33].mxu0  ;;  %v27453_v24 = vld [vmem:[%s36837_s0 + $0x6] sm:$0x3] }
0x181c   :  { %v10160_v3 = vadd.f32 %v10159_v51, %v10085_v59 }
0x181d   :  { %v10236_v60 = vpop.f32.mrb[34].mxu0 }
0x181e   :  { %v10237_v4 = vadd.f32 %v10236_v60, %v10160_v3  ;;  %v30042_v5 = vpop.f32.mrb[35].mxu0 }
0x1820   :  { %v10310_v6 = vadd.f32 %v10309_v44, %v10237_v4 }
0x1822   :  { %v10313_v16 = vadd.f32 %v35431_v15, %v10310_v6 }
0x1824   :  { %34115 = vtanh.f32 %v10313_v16  ;;  %v27452_v18 = vmul.f32 -1.442695, %v10313_v16 }
0x1826   :  { %34117 = vpow2.f32 %v27452_v18  ;;  %v35521_v18 = vld [vmem:[%s36844_s7] ss:$0 sm:$0xff] }
0x182e   :  { %v34116_v17 = vpop.eup %34115 }
0x182f   :  { %10323 = vrot.lane.b32.xlu1 %v34116_v17, %s34422_s2 }
0x1830   :  { %v34118_v20 = vpop.eup %34117 }
0x1831   :  { %v10317_v23 = vadd.f32 1.0, %v34118_v20 }
0x1833   :  { %34119 = vrcp.f32 %v10317_v23 }
0x183d   :  { %v34120_v26 = vpop.eup %34119 }
0x183e   :  { %v10321_v32 = vmul.f32 %v34120_v26, %v35169_v53 }
0x18a1   :  { %v10324_v22 = vpop.permute.xlu1 %10323 }
0x18a2   :  { %v10326_v19 = vmul.f32 %v34120_v26, %v10324_v22 }
0x18a4   :  { %10328 = vrot.lane.b32.xlu0 %v10326_v19, %s34423_s17 }
0x1916   :  { %v10329_v34 = vpop.permute.xlu0 %10328 }
0x1917   :  { %v35437_v43 = vadd.f32 %v10329_v34, %v10321_v32 }
0x1919   :  { %34121 = vtanh.f32 %v35437_v43 }
0x1923   :  { %v34122_v35 = vpop.eup %34121 }
0x1924   :  { %10334 = vrot.lane.b32.xlu1 %v34122_v35, %s34422_s2 }
0x1996   :  { %v10335_v58 = vpop.permute.xlu1 %10334 }
0x1997   :  { %v10337_v36 = vmul.f32 %v34120_v26, %v10335_v58 }
0x1999   :  { %10339 = vrot.lane.b32.xlu0 %v10337_v36, %s34423_s17 }
0x1a0b   :  { %v35442_v48 = vpop.permute.xlu0 %10339 }
0x1a0c   :  { %10343 = vst.msk [vmem:[#allocation8 + $0x4] sm:$0x3] %vm79_vm0, %v35442_v48  ;;  %v10346_v53 = vsel %vm106_vm2, %v35442_v48, 0 }
0x1a0d   :  { %v10417_v45 = vand.u32 4294901760, %v10346_v53 }
0x1a0f   :  { %v10418_v47 = vsub.f32 %v10346_v53, %v10417_v45 }
0x1a11   :  { %v10419_v7 = vand.u32 4294901760, %v10418_v47 }
0x1a13   :  { %v10420_v49 = vsub.f32 %v10418_v47, %v10419_v7 }
0x1a15   :  { %v10421_v50 = vand.u32 4294901760, %v10420_v49 }
0x1a17   :  { %30059 = vmatmul.mubr.f32.vlgmr.msra.gmra.mrb[36].mxu0 %v10421_v50 }
0x1a18   :  { %32602 = vmatpush3.bf16.msra.mxu0 %v34568_v33  ;;  %30069 = vmatprep.mubr.msk.f32.mxu0 %vm34420_vm1, %v34421_v1 }
0x1a19   :  { %32603 = vmatprep.subr.bf16.mxu0 %v34419_v0 }
0x1a1c   :  { %32605 = vmatpush3.bf16.msra.mxu0 %v34571_v37 }
0x1a1d   :  { %32606 = vmatprep.subr.bf16.mxu0 %v34419_v0 }
0x1a1f   :  { %30070 = vmatmul.mubr.f32.vlgmr.msra.gmra.mrb[36].mxu0 %v10417_v45 }
0x1a20   :  { %32608 = vmatpush3.bf16.msra.mxu0 %v34577_v38  ;;  %30080 = vmatprep.mubr.msk.f32.mxu0 %vm34420_vm1, %v34421_v1 }
0x1a21   :  { %32609 = vmatprep.subr.bf16.mxu0 %v34419_v0 }
0x1a24   :  { %32611 = vmatpush3.bf16.msra.mxu0 %v34581_v39 }
0x1a25   :  { %32612 = vmatprep.subr.bf16.mxu0 %v34419_v0 }
0x1a27   :  { %30081 = vmatmul.mubr.f32.vlgmr.msra.gmra.mrb[36].mxu0 %v10418_v47 }
0x1a28   :  { %32614 = vmatpush3.bf16.msra.mxu0 %v34556_v11  ;;  %30091 = vmatprep.mubr.msk.f32.mxu0 %vm34420_vm1, %v34421_v1 }
0x1a29   :  { %32615 = vmatprep.subr.bf16.mxu0 %v34419_v0 }
0x1a2c   :  { %32617 = vmatpush3.bf16.msra.mxu0 %v34559_v14 }
0x1a2d   :  { %32618 = vmatprep.subr.bf16.mxu0 %v34419_v0 }
0x1a2f   :  { %30092 = vmatmul.mubr.f32.vlgmr.msra.gmra.mrb[36].mxu0 %v10419_v7 }
0x1a30   :  { %32620 = vmatpush3.bf16.msra.mxu0 %v34593_v40  ;;  %30102 = vmatprep.mubr.msk.f32.mxu0 %vm34420_vm1, %v34421_v1 }
0x1a31   :  { %32621 = vmatprep.subr.bf16.mxu0 %v34419_v0 }
0x1a34   :  { %32623 = vmatpush3.bf16.msra.mxu0 %v34597_v41 }
0x1a35   :  { %32624 = vmatprep.subr.bf16.mxu0 %v34419_v0 }
0x1a37   :  { %30103 = vmatmul.mubr.f32.vlgmr.msra.gmra.mrb[36].mxu0 %v10417_v45 }
0x1a38   :  { %32626 = vmatpush3.bf16.msra.mxu0 %v34556_v11  ;;  %30113 = vmatprep.mubr.msk.f32.mxu0 %vm34420_vm1, %v34421_v1 }
0x1a39   :  { %32627 = vmatprep.subr.bf16.mxu0 %v34419_v0 }
0x1a3c   :  { %32629 = vmatpush3.bf16.msra.mxu0 %v34559_v14 }
0x1a3d   :  { %32684 = vmatprep.subr.bf16.mxu0 %v34419_v0 }
0x1a3f   :  { %30114 = vmatmul.mubr.f32.vlgmr.msra.gmra.mrb[36].mxu0 %v10417_v45 }
0x1a40   :  { %32686 = vmatpush3.bf16.msra.mxu0 %v34618_v46  ;;  %30228 = vmatprep.mubr.msk.f32.mxu0 %vm34420_vm1, %v34421_v1 }
0x1a41   :  { %32687 = vmatprep.subr.bf16.mxu0 %v34419_v0 }
0x1b12   :  { %v10829_v51 = vpop.f32.mrb[36].mxu0 }
0x1b13   :  { %v33599_v25 = vadd.f32 %v35482_v42, %v10829_v51  ;;  %v30115_v44 = vpop.f32.mrb[37].mxu0 }
0x1b15   :  { %v27454_v52 = vmul.f32 -1.442695, %v33599_v25 }
0x1b17   :  { %34123 = vpow2.f32 %v27454_v52 }
0x1b21   :  { %v34124_v54 = vpop.eup %34123 }
0x1b22   :  { %v10836_v62 = vadd.f32 1.0, %v34124_v54 }
0x1b24   :  { %34125 = vrcp.f32 %v10836_v62 }
0x1b2e   :  { %v34126_v63 = vpop.eup %34125 }
0x1b2f   :  { %v10839_v59 = vmul.f32 2.0, %v34126_v63 }
0x1b31   :  { %v35488_v2 = vmul.f32 %v27453_v24, %v10839_v59 }
0x1b33   :  { %v10842_v3 = vsel %vm609_vm3, %v35488_v2, 0 }
0x1b34   :  { %v10911_v60 = vand.u32 4294901760, %v10842_v3 }
0x1b36   :  { %v10912_v4 = vsub.f32 %v10842_v3, %v10911_v60 }
0x1b38   :  { %v10913_v5 = vand.u32 4294901760, %v10912_v4 }
0x1b3a   :  { %v10914_v6 = vsub.f32 %v10912_v4, %v10913_v5 }
0x1b3c   :  { %v10915_v16 = vand.u32 4294901760, %v10914_v6 }
0x1b3e   :  { %30121 = vmatmul.mubr.f32.vlgmr.msra.gmra.mrb[66].mxu1 %v10915_v16 }
0x1b3f   :  { %32635 = vmatpush3.bf16.msra.mxu1 %v34624_v55  ;;  %30127 = vmatprep.mubr.msk.f32.mxu1 %vm34420_vm1, %v34421_v1 }
0x1b40   :  { %32636 = vmatprep.subr.bf16.mxu1 %v34419_v0 }
0x1b46   :  { %30128 = vmatmul.mubr.f32.vlgmr.msra.gmra.mrb[66].mxu1 %v10911_v60 }
0x1b47   :  { %32638 = vmatpush3.bf16.msra.mxu1 %v34626_v56  ;;  %30134 = vmatprep.mubr.msk.f32.mxu1 %vm34420_vm1, %v34421_v1 }
0x1b48   :  { %32639 = vmatprep.subr.bf16.mxu1 %v34419_v0 }
0x1b4e   :  { %30135 = vmatmul.mubr.f32.vlgmr.msra.gmra.mrb[66].mxu1 %v10912_v4 }
0x1b4f   :  { %32641 = vmatpush3.bf16.msra.mxu1 %v34618_v46  ;;  %30141 = vmatprep.mubr.msk.f32.mxu1 %vm34420_vm1, %v34421_v1 }
0x1b50   :  { %32642 = vmatprep.subr.bf16.mxu1 %v34419_v0 }
0x1b56   :  { %30142 = vmatmul.mubr.f32.vlgmr.msra.gmra.mrb[66].mxu1 %v10913_v5 }
0x1b57   :  { %32644 = vmatpush3.bf16.msra.mxu1 %v34628_v57  ;;  %30148 = vmatprep.mubr.msk.f32.mxu1 %vm34420_vm1, %v34421_v1 }
0x1b58   :  { %32645 = vmatprep.subr.bf16.mxu1 %v34419_v0 }
0x1b5e   :  { %30149 = vmatmul.mubr.f32.vlgmr.msra.gmra.mrb[66].mxu1 %v10911_v60 }
0x1b5f   :  { %32647 = vmatpush3.bf16.msra.mxu1 %v34618_v46  ;;  %30155 = vmatprep.mubr.msk.f32.mxu1 %vm34420_vm1, %v34421_v1 }
0x1b60   :  { %32648 = vmatprep.subr.bf16.mxu1 %v34419_v0 }
0x1b66   :  { %30156 = vmatmul.mubr.f32.vlgmr.msra.gmra.mrb[66].mxu1 %v10911_v60 }
0x1b67   :  { %32650 = vmatpush3.bf16.msra.mxu1 %v34556_v11  ;;  %30166 = vmatprep.mubr.msk.f32.mxu1 %vm34420_vm1, %v34421_v1 }
0x1b68   :  { %32651 = vmatprep.subr.bf16.mxu1 %v34419_v0 }
0x1b6b   :  { %32653 = vmatpush3.bf16.msra.mxu1 %v34559_v14 }
0x1b6c   :  { %32654 = vmatprep.subr.bf16.mxu1 %v34419_v0 }
0x1c39   :  { %v11299_v17 = vpop.f32.mrb[66].mxu1 }
0x1c3a   :  { %v33600_v20 = vadd.f32 %v35521_v18, %v11299_v17  ;;  %v30157_v23 = vpop.f32.mrb[67].mxu1 }
0x1c3c   :  { %v27455_v26 = vmul.f32 -1.442695, %v33600_v20 }
0x1c3e   :  { %34127 = vpow2.f32 %v27455_v26 }
0x1c48   :  { %v34128_v22 = vpop.eup %34127 }
0x1c49   :  { %v11306_v19 = vadd.f32 1.0, %v34128_v22 }
0x1c4b   :  { %34129 = vrcp.f32 %v11306_v19 }
0x1c55   :  { %v34130_v32 = vpop.eup %34129 }
0x1c56   :  { %v11309_v34 = vmul.f32 2.0, %v34130_v32 }
0x1c58   :  { %v35525_v35 = vmul.f32 %v11309_v34, %v35442_v48 }
0x1c5a   :  { %v11312_v58 = vsel %vm106_vm2, %v35525_v35, 0 }
0x1c5b   :  { %v11383_v36 = vand.u32 4294901760, %v11312_v58 }
0x1c5d   :  { %v11384_v53 = vsub.f32 %v11312_v58, %v11383_v36 }
0x1c5f   :  { %v11385_v45 = vand.u32 4294901760, %v11384_v53 }
0x1c61   :  { %v11386_v47 = vsub.f32 %v11384_v53, %v11385_v45 }
0x1c63   :  { %v11387_v7 = vand.u32 4294901760, %v11386_v47 }
0x1c65   :  { %30167 = vmatmul.mubr.f32.vlgmr.msra.gmra.mrb[68].mxu1 %v11387_v7 }
0x1c66   :  { %32656 = vmatpush3.bf16.msra.mxu1 %v34568_v33  ;;  %30177 = vmatprep.mubr.msk.f32.mxu1 %vm34420_vm1, %v34421_v1 }
0x1c67   :  { %32657 = vmatprep.subr.bf16.mxu1 %v34419_v0 }
0x1c6a   :  { %32659 = vmatpush3.bf16.msra.mxu1 %v34571_v37 }
0x1c6b   :  { %32660 = vmatprep.subr.bf16.mxu1 %v34419_v0 }
0x1c6d   :  { %30178 = vmatmul.mubr.f32.vlgmr.msra.gmra.mrb[68].mxu1 %v11383_v36 }
0x1c6e   :  { %32662 = vmatpush3.bf16.msra.mxu1 %v34577_v38  ;;  %30188 = vmatprep.mubr.msk.f32.mxu1 %vm34420_vm1, %v34421_v1 }
0x1c6f   :  { %32663 = vmatprep.subr.bf16.mxu1 %v34419_v0 }
0x1c72   :  { %32665 = vmatpush3.bf16.msra.mxu1 %v34581_v39 }
0x1c73   :  { %32666 = vmatprep.subr.bf16.mxu1 %v34419_v0 }
0x1c75   :  { %30189 = vmatmul.mubr.f32.vlgmr.msra.gmra.mrb[68].mxu1 %v11384_v53 }
0x1c76   :  { %32668 = vmatpush3.bf16.msra.mxu1 %v34556_v11  ;;  %30199 = vmatprep.mubr.msk.f32.mxu1 %vm34420_vm1, %v34421_v1 }
0x1c77   :  { %32669 = vmatprep.subr.bf16.mxu1 %v34419_v0 }
0x1c7a   :  { %32671 = vmatpush3.bf16.msra.mxu1 %v34559_v14 }
0x1c7b   :  { %32672 = vmatprep.subr.bf16.mxu1 %v34419_v0 }
0x1c7d   :  { %30200 = vmatmul.mubr.f32.vlgmr.msra.gmra.mrb[68].mxu1 %v11385_v45 }
0x1c7e   :  { %32674 = vmatpush3.bf16.msra.mxu1 %v34593_v40  ;;  %30210 = vmatprep.mubr.msk.f32.mxu1 %vm34420_vm1, %v34421_v1 }
0x1c7f   :  { %32675 = vmatprep.subr.bf16.mxu1 %v34419_v0 }
0x1c82   :  { %32677 = vmatpush3.bf16.msra.mxu1 %v34597_v41 }
0x1c83   :  { %32678 = vmatprep.subr.bf16.mxu1 %v34419_v0 }
0x1c85   :  { %30211 = vmatmul.mubr.f32.vlgmr.msra.gmra.mrb[68].mxu1 %v11383_v36 }
0x1c86   :  { %32680 = vmatpush3.bf16.msra.mxu1 %v34556_v11  ;;  %30221 = vmatprep.mubr.msk.f32.mxu1 %vm34420_vm1, %v34421_v1 }
0x1c87   :  { %32681 = vmatprep.subr.bf16.mxu1 %v34419_v0 }
0x1c8a   :  { %32683 = vmatpush3.bf16.msra.mxu1 %v34559_v14 }
0x1c8b   :  { %32738 = vmatprep.subr.bf16.mxu1 %v34419_v0 }
0x1c8d   :  { %30222 = vmatmul.mubr.f32.vlgmr.msra.gmra.mrb[68].mxu1 %v11383_v36 }
0x1c8e   :  { %32740 = vmatpush3.bf16.msra.mxu1 %v34747_v61  ;;  %30340 = vmatprep.mubr.msk.f32.mxu1 %vm34420_vm1, %v34421_v1 }
0x1c8f   :  { %32741 = vmatprep.subr.bf16.mxu1 %v34419_v0 }
0x1c92   :  { %32743 = vmatpush3.bf16.msra.mxu1 %v34757_v8 }
0x1c93   :  { %32744 = vmatprep.subr.bf16.mxu1 %v34419_v0 }
0x1d60   :  { %v11795_v48 = vpop.f32.mrb[68].mxu1 }
0x1d61   :  { %v33601_v49 = vadd.f32 %v35482_v42, %v11795_v48  ;;  %v30223_v50 = vpop.f32.mrb[69].mxu1 }
0x1d63   :  { %v27456_v51 = vmul.f32 -1.442695, %v33601_v49 }
0x1d65   :  { %34131 = vpow2.f32 %v27456_v51 }
0x1d6f   :  { %v34132_v25 = vpop.eup %34131 }
0x1d70   :  { %v11802_v44 = vadd.f32 1.0, %v34132_v25 }
0x1d72   :  { %34133 = vrcp.f32 %v11802_v44 }
0x1d7c   :  { %v34134_v52 = vpop.eup %34133 }
0x1d7d   :  { %v11805_v54 = vmul.f32 2.0, %v34134_v52 }
0x1d7f   :  { %v35567_v62 = vmul.f32 %v11805_v54, %v35488_v2 }
0x1d81   :  { %v11808_v63 = vsel %vm609_vm3, %v35567_v62, 0 }
0x1d82   :  { %v11877_v24 = vand.u32 4294901760, %v11808_v63 }
0x1d84   :  { %v11878_v59 = vsub.f32 %v11808_v63, %v11877_v24 }
0x1d86   :  { %v11879_v3 = vand.u32 4294901760, %v11878_v59 }
0x1d88   :  { %v11880_v60 = vsub.f32 %v11878_v59, %v11879_v3 }
0x1d8a   :  { %v11881_v4 = vand.u32 4294901760, %v11880_v60 }
0x1d8c   :  { %30229 = vmatmul.mubr.f32.vlgmr.msra.gmra.mrb[38].mxu0 %v11881_v4 }
0x1d8d   :  { %32689 = vmatpush3.bf16.msra.mxu0 %v34624_v55  ;;  %30235 = vmatprep.mubr.msk.f32.mxu0 %vm34420_vm1, %v34421_v1 }
0x1d8e   :  { %32690 = vmatprep.subr.bf16.mxu0 %v34419_v0 }
0x1d94   :  { %30236 = vmatmul.mubr.f32.vlgmr.msra.gmra.mrb[38].mxu0 %v11877_v24 }
0x1d95   :  { %32692 = vmatpush3.bf16.msra.mxu0 %v34626_v56  ;;  %30242 = vmatprep.mubr.msk.f32.mxu0 %vm34420_vm1, %v34421_v1 }
0x1d96   :  { %32693 = vmatprep.subr.bf16.mxu0 %v34419_v0 }
0x1d9c   :  { %30243 = vmatmul.mubr.f32.vlgmr.msra.gmra.mrb[38].mxu0 %v11878_v59 }
0x1d9d   :  { %32695 = vmatpush3.bf16.msra.mxu0 %v34618_v46  ;;  %30249 = vmatprep.mubr.msk.f32.mxu0 %vm34420_vm1, %v34421_v1 }
0x1d9e   :  { %32696 = vmatprep.subr.bf16.mxu0 %v34419_v0 }
0x1da4   :  { %30250 = vmatmul.mubr.f32.vlgmr.msra.gmra.mrb[38].mxu0 %v11879_v3 }
0x1da5   :  { %32698 = vmatpush3.bf16.msra.mxu0 %v34628_v57  ;;  %30256 = vmatprep.mubr.msk.f32.mxu0 %vm34420_vm1, %v34421_v1 }
0x1da6   :  { %32699 = vmatprep.subr.bf16.mxu0 %v34419_v0 }
0x1dac   :  { %30257 = vmatmul.mubr.f32.vlgmr.msra.gmra.mrb[38].mxu0 %v11877_v24 }
0x1dad   :  { %32701 = vmatpush3.bf16.msra.mxu0 %v34618_v46  ;;  %30263 = vmatprep.mubr.msk.f32.mxu0 %vm34420_vm1, %v34421_v1 }
0x1dae   :  { %32702 = vmatprep.subr.bf16.mxu0 %v34419_v0 }
0x1db4   :  { %30264 = vmatmul.mubr.f32.vlgmr.msra.gmra.mrb[38].mxu0 %v11877_v24 }
0x1db5   :  { %32704 = vmatpush3.bf16.msra.mxu0 %v34556_v11  ;;  %30274 = vmatprep.mubr.msk.f32.mxu0 %vm34420_vm1, %v34421_v1 }
0x1db6   :  { %32705 = vmatprep.subr.bf16.mxu0 %v34419_v0 }
0x1db9   :  { %32707 = vmatpush3.bf16.msra.mxu0 %v34559_v14 }
0x1dba   :  { %32708 = vmatprep.subr.bf16.mxu0 %v34419_v0 }
0x1e87   :  { %v12265_v2 = vpop.f32.mrb[38].mxu0 }
0x1e88   :  { %v33602_v5 = vadd.f32 %v35521_v18, %v12265_v2  ;;  %v30265_v6 = vpop.f32.mrb[39].mxu0 }
0x1e8a   :  { %v27457_v16 = vmul.f32 -1.442695, %v33602_v5 }
0x1e8c   :  { %34135 = vpow2.f32 %v27457_v16 }
0x1e96   :  { %v34136_v17 = vpop.eup %34135 }
0x1e97   :  { %v12272_v20 = vadd.f32 1.0, %v34136_v17 }
0x1e99   :  { %34137 = vrcp.f32 %v12272_v20 }
0x1ea3   :  { %v34138_v23 = vpop.eup %34137 }
0x1ea4   :  { %v12275_v26 = vmul.f32 2.0, %v34138_v23 }
0x1ea6   :  { %v12276_v22 = vmul.f32 %v12275_v26, %v35525_v35 }
0x1ea8   :  { %v12278_v19 = vsel %vm106_vm2, %v12276_v22, 0 }
0x1ea9   :  { %v35600_v32 = vand.u32 4294901760, %v12278_v19 }
0x1eab   :  { %v12350_v34 = vsub.f32 %v12278_v19, %v35600_v32 }
0x1ead   :  { %v12351_v58 = vand.u32 4294901760, %v12350_v34 }
0x1eaf   :  { %v12352_v36 = vsub.f32 %v12350_v34, %v12351_v58 }
0x1eb1   :  { %v12353_v53 = vand.u32 4294901760, %v12352_v36 }
0x1eb3   :  { %30275 = vmatmul.mubr.f32.vlgmr.msra.gmra.mrb[40].mxu0 %v12353_v53  ;;  %30341 = vmatmul.mubr.f32.vlgmr.msra.gmra.mrb[70].mxu1 %v12353_v53 }
0x1eb4   :  { %32710 = vmatpush3.bf16.msra.mxu0 %v34568_v33  ;;  %32746 = vmatpush3.bf16.msra.mxu1 %v34761_v21 }
0x1eb5   :  { %32711 = vmatprep.subr.bf16.mxu0 %v34419_v0  ;;  %32747 = vmatprep.subr.bf16.mxu1 %v34419_v0 }
0x1eb6   :  { %30351 = vmatprep.mubr.msk.f32.mxu1 %vm34420_vm1, %v34421_v1  ;;  %30285 = vmatprep.mubr.msk.f32.mxu0 %vm34420_vm1, %v34421_v1 }
0x1eb8   :  { %32713 = vmatpush3.bf16.msra.mxu0 %v34571_v37  ;;  %32749 = vmatpush3.bf16.msra.mxu1 %v34763_v27 }
0x1eb9   :  { %32714 = vmatprep.subr.bf16.mxu0 %v34419_v0  ;;  %32750 = vmatprep.subr.bf16.mxu1 %v34419_v0 }
0x1ebb   :  { %30352 = vmatmul.mubr.f32.vlgmr.msra.gmra.mrb[72].mxu1 %v35600_v32  ;;  %30286 = vmatmul.mubr.f32.vlgmr.msra.gmra.mrb[40].mxu0 %v35600_v32 }
0x1ebc   :  { %32716 = vmatpush3.bf16.msra.mxu0 %v34577_v38  ;;  %32752 = vmatpush3.bf16.msra.mxu1 %v34765_v28 }
0x1ebd   :  { %32717 = vmatprep.subr.bf16.mxu0 %v34419_v0  ;;  %32753 = vmatprep.subr.bf16.mxu1 %v34419_v0 }
0x1ebe   :  { %30362 = vmatprep.mubr.msk.f32.mxu1 %vm34420_vm1, %v34421_v1  ;;  %30296 = vmatprep.mubr.msk.f32.mxu0 %vm34420_vm1, %v34421_v1 }
0x1ec0   :  { %32719 = vmatpush3.bf16.msra.mxu0 %v34581_v39  ;;  %32755 = vmatpush3.bf16.msra.mxu1 %v34767_v29 }
0x1ec1   :  { %32720 = vmatprep.subr.bf16.mxu0 %v34419_v0  ;;  %32756 = vmatprep.subr.bf16.mxu1 %v34419_v0 }
0x1ec3   :  { %30363 = vmatmul.mubr.f32.vlgmr.msra.gmra.mrb[74].mxu1 %v12350_v34  ;;  %30297 = vmatmul.mubr.f32.vlgmr.msra.gmra.mrb[40].mxu0 %v12350_v34 }
0x1ec4   :  { %32722 = vmatpush3.bf16.msra.mxu0 %v34556_v11  ;;  %32758 = vmatpush3.bf16.msra.mxu1 %v34747_v61 }
0x1ec5   :  { %32723 = vmatprep.subr.bf16.mxu0 %v34419_v0  ;;  %32759 = vmatprep.subr.bf16.mxu1 %v34419_v0 }
0x1ec6   :  { %30373 = vmatprep.mubr.msk.f32.mxu1 %vm34420_vm1, %v34421_v1  ;;  %30307 = vmatprep.mubr.msk.f32.mxu0 %vm34420_vm1, %v34421_v1 }
0x1ec8   :  { %32725 = vmatpush3.bf16.msra.mxu0 %v34559_v14  ;;  %32761 = vmatpush3.bf16.msra.mxu1 %v34757_v8 }
0x1ec9   :  { %32726 = vmatprep.subr.bf16.mxu0 %v34419_v0  ;;  %32762 = vmatprep.subr.bf16.mxu1 %v34419_v0 }
0x1ecb   :  { %30374 = vmatmul.mubr.f32.vlgmr.msra.gmra.mrb[76].mxu1 %v12351_v58  ;;  %30308 = vmatmul.mubr.f32.vlgmr.msra.gmra.mrb[40].mxu0 %v12351_v58 }
0x1ecc   :  { %32728 = vmatpush3.bf16.msra.mxu0 %v34593_v40  ;;  %32764 = vmatpush3.bf16.msra.mxu1 %v34769_v30 }
0x1ecd   :  { %32729 = vmatprep.subr.bf16.mxu0 %v34419_v0  ;;  %32765 = vmatprep.subr.bf16.mxu1 %v34419_v0 }
0x1ece   :  { %30384 = vmatprep.mubr.msk.f32.mxu1 %vm34420_vm1, %v34421_v1  ;;  %30318 = vmatprep.mubr.msk.f32.mxu0 %vm34420_vm1, %v34421_v1 }
0x1ed0   :  { %32731 = vmatpush3.bf16.msra.mxu0 %v34597_v41  ;;  %32767 = vmatpush3.bf16.msra.mxu1 %v34771_v31 }
0x1ed1   :  { %32732 = vmatprep.subr.bf16.mxu0 %v34419_v0  ;;  %32768 = vmatprep.subr.bf16.mxu1 %v34419_v0 }
0x1ed3   :  { %30385 = vmatmul.mubr.f32.vlgmr.msra.gmra.mrb[78].mxu1 %v35600_v32  ;;  %30319 = vmatmul.mubr.f32.vlgmr.msra.gmra.mrb[40].mxu0 %v35600_v32 }
0x1ed4   :  { %32734 = vmatpush3.bf16.msra.mxu0 %v34556_v11  ;;  %32770 = vmatpush3.bf16.msra.mxu1 %v34747_v61 }
0x1ed5   :  { %32735 = vmatprep.subr.bf16.mxu0 %v34419_v0  ;;  %32771 = vmatprep.subr.bf16.mxu1 %v34419_v0 }
0x1ed6   :  { %30395 = vmatprep.mubr.msk.f32.mxu1 %vm34420_vm1, %v34421_v1  ;;  %30329 = vmatprep.mubr.msk.f32.mxu0 %vm34420_vm1, %v34421_v1 }
0x1ed8   :  { %32737 = vmatpush3.bf16.msra.mxu0 %v34559_v14  ;;  %32773 = vmatpush3.bf16.msra.mxu1 %v34757_v8 }
0x1ed9   :  { %32777 = vmatprep.subr.bf16.mxu1 %v34419_v0  ;;  %32774 = vmatprep.subr.bf16.mxu0 %v34419_v0 }
0x1edb   :  { %30396 = vmatmul.mubr.f32.vlgmr.msra.gmra.mrb[80].mxu1 %v35600_v32  ;;  %30330 = vmatmul.mubr.f32.vlgmr.msra.gmra.mrb[40].mxu0 %v35600_v32 }
0x1edc   :  { %32779 = vmatpush3.bf16.msra.mxu1 %v34851_v10  ;;  %30409 = vmatprep.mubr.msk.f32.mxu1 %vm34420_vm1, %v34421_v1 }
0x1edd   :  { %32783 = vmatprep.subr.bf16.mxu1 %v34419_v0  ;;  %32776 = vmatpush3.bf16.msra.mxu0 %v34849_v9 }
0x1ede   :  { %30402 = vmatprep.mubr.msk.f32.mxu0 %vm34420_vm1, %v34421_v1  ;;  %32780 = vmatprep.subr.bf16.mxu0 %v34419_v0 }
0x1f86   :  { %v12848_v35 = vpop.f32.mrb[70].mxu1 }
0x1f87   :  { %v30342_v45 = vpop.f32.mrb[71].mxu1 }
0x1f8e   :  { %v12939_v47 = vpop.f32.mrb[72].mxu1 }
0x1f8f   :  { %v12940_v7 = vadd.f32 %v12939_v47, %v12848_v35  ;;  %v30353_v48 = vpop.f32.mrb[73].mxu1 }
0x1f96   :  { %v13019_v49 = vpop.f32.mrb[74].mxu1 }
0x1f97   :  { %v13020_v50 = vadd.f32 %v13019_v49, %v12940_v7  ;;  %v30364_v51 = vpop.f32.mrb[75].mxu1 }
0x1f9e   :  { %v13096_v25 = vpop.f32.mrb[76].mxu1 }
0x1f9f   :  { %v13097_v44 = vadd.f32 %v13096_v25, %v13020_v50  ;;  %v30375_v52 = vpop.f32.mrb[77].mxu1 }
0x1fa6   :  { %v13179_v54 = vpop.f32.mrb[78].mxu1 }
0x1fa7   :  { %v13180_v63 = vadd.f32 %v13179_v54, %v13097_v44  ;;  %v30386_v24 = vpop.f32.mrb[79].mxu1 }
0x1fae   :  { %v13254_v59 = vpop.f32.mrb[80].mxu1  ;;  %v12761_v3 = vpop.f32.mrb[40].mxu0 }
0x1faf   :  { %v13255_v60 = vadd.f32 %v13254_v59, %v13180_v63  ;;  %v33603_v4 = vadd.f32 %v35482_v42, %v12761_v3  ;;  %v30397_v2 = vpop.f32.mrb[81].mxu1  ;;  %v30331_v5 = vpop.f32.mrb[41].mxu0 }
0x1fb1   :  { %v27458_v6 = vmul.f32 -1.442695, %v33603_v4 }
0x1fb3   :  { %34139 = vpow2.f32 %v27458_v6 }
0x1fbd   :  { %v34140_v16 = vpop.eup %34139 }
0x1fbe   :  { %v12768_v17 = vadd.f32 1.0, %v34140_v16 }
0x1fc0   :  { %34141 = vrcp.f32 %v12768_v17 }
0x1fca   :  { %v34142_v20 = vpop.eup %34141 }
0x1fcb   :  { %v12771_v23 = vmul.f32 2.0, %v34142_v20 }
0x1fcd   :  { %v12772_v26 = vmul.f32 %v12771_v23, %v35567_v62 }
0x1fcf   :  { %v13259_v22 = vsel %vm609_vm3, %v12772_v26, 0 }
0x1fd0   :  { %v13328_v19 = vand.u32 4294901760, %v13259_v22 }
0x1fd2   :  { %v13329_v32 = vsub.f32 %v13259_v22, %v13328_v19  ;;  %30410 = vmatmul.mubr.f32.vlgmr.msra.gmra.mrb[82].mxu1 %v13328_v19 }
0x1fd3   :  { %32785 = vmatpush3.bf16.msra.mxu1 %v34849_v9  ;;  %30423 = vmatprep.mubr.msk.f32.mxu1 %vm34420_vm1, %v34421_v1 }
0x1fd4   :  { %v13330_v34 = vand.u32 4294901760, %v13329_v32  ;;  %32789 = vmatprep.subr.bf16.mxu1 %v34419_v0 }
0x1fd6   :  { %30424 = vmatmul.mubr.f32.vlgmr.msra.gmra.mrb[84].mxu1 %v13330_v34  ;;  %v13331_v58 = vsub.f32 %v13329_v32, %v13330_v34 }
0x1fd7   :  { %32791 = vmatpush3.bf16.msra.mxu1 %v34849_v9  ;;  %30437 = vmatprep.mubr.msk.f32.mxu1 %vm34420_vm1, %v34421_v1 }
0x1fd8   :  { %v13332_v62 = vand.u32 4294901760, %v13331_v58  ;;  %32828 = vmatprep.subr.bf16.mxu1 %v34419_v0 }
0x1fda   :  { %30403 = vmatmul.mubr.f32.vlgmr.msra.gmra.mrb[42].mxu0 %v13332_v62  ;;  %30438 = vmatmul.mubr.f32.vlgmr.msra.gmra.mrb[86].mxu1 %v13328_v19 }
0x1fdb   :  { %32782 = vmatpush3.bf16.msra.mxu0 %v34857_v12  ;;  %30416 = vmatprep.mubr.msk.f32.mxu0 %vm34420_vm1, %v34421_v1 }
0x1fdc   :  { %32786 = vmatprep.subr.bf16.mxu0 %v34419_v0  ;;  %32830 = vmatpush3.bf16.msra.mxu1 %v34618_v46 }
0x1fdd   :  { %30510 = vmatprep.mubr.msk.f32.mxu1 %vm34420_vm1, %v34421_v1  ;;  %32831 = vmatprep.subr.bf16.mxu1 %v34419_v0 }
0x1fde   :  { %30417 = vmatmul.mubr.f32.vlgmr.msra.gmra.mrb[44].mxu0 %v13329_v32 }
0x1fdf   :  { %32788 = vmatpush3.bf16.msra.mxu0 %v34859_v13  ;;  %30430 = vmatprep.mubr.msk.f32.mxu0 %vm34420_vm1, %v34421_v1 }
0x1fe0   :  { %32792 = vmatprep.subr.bf16.mxu0 %v34419_v0 }
0x1fe2   :  { %30431 = vmatmul.mubr.f32.vlgmr.msra.gmra.mrb[46].mxu0 %v13328_v19 }
0x1fe3   :  { %32794 = vmatpush3.bf16.msra.mxu0 %v34556_v11  ;;  %30448 = vmatprep.mubr.msk.f32.mxu0 %vm34420_vm1, %v34421_v1 }
0x1fe4   :  { %32795 = vmatprep.subr.bf16.mxu0 %v34419_v0 }
0x1fe7   :  { %32797 = vmatpush3.bf16.msra.mxu0 %v34559_v14 }
0x1fe8   :  { %32798 = vmatprep.subr.bf16.mxu0 %v34419_v0 }
0x20a5   :  { %v13415_v36 = vpop.f32.mrb[82].mxu1 }
0x20a6   :  { %v30411_v53 = vpop.f32.mrb[83].mxu1 }
0x20a9   :  { %v13566_v35 = vpop.f32.mrb[84].mxu1 }
0x20aa   :  { %v30425_v45 = vpop.f32.mrb[85].mxu1 }
0x20ad   :  { %v13334_v47 = vpop.f32.mrb[42].mxu0  ;;  %v13716_v7 = vpop.f32.mrb[86].mxu1 }
0x20ae   :  { %v13335_v48 = vadd.f32 %v13334_v47, %v13255_v60  ;;  %v30404_v49 = vpop.f32.mrb[43].mxu0  ;;  %v30439_v50 = vpop.f32.mrb[87].mxu1 }
0x20b0   :  { %v13416_v51 = vadd.f32 %v13415_v36, %v13335_v48 }
0x20b1   :  { %v13491_v25 = vpop.f32.mrb[44].mxu0 }
0x20b2   :  { %v13492_v44 = vadd.f32 %v13491_v25, %v13416_v51  ;;  %v30418_v52 = vpop.f32.mrb[45].mxu0  ;;  %v27460_v25 = vld [vmem:[%s36837_s0 + $0x8] sm:$0x3] }
0x20b4   :  { %v13567_v54 = vadd.f32 %v13566_v35, %v13492_v44 }
0x20b5   :  { %v13643_v63 = vpop.f32.mrb[46].mxu0 }
0x20b6   :  { %v13644_v24 = vadd.f32 %v13643_v63, %v13567_v54  ;;  %v30432_v59 = vpop.f32.mrb[47].mxu0 }
0x20b8   :  { %v13717_v3 = vadd.f32 %v13716_v7, %v13644_v24 }
0x20ba   :  { %v13720_v4 = vadd.f32 %v35431_v15, %v13717_v3 }
0x20bc   :  { %34143 = vtanh.f32 %v13720_v4  ;;  %v27459_v5 = vmul.f32 -1.442695, %v13720_v4 }
0x20be   :  { %34145 = vpow2.f32 %v27459_v5 }
0x20c6   :  { %v34144_v2 = vpop.eup %34143 }
0x20c7   :  { %13730 = vrot.lane.b32.xlu1 %v34144_v2, %s34422_s2 }
0x20c8   :  { %v34146_v60 = vpop.eup %34145 }
0x20c9   :  { %v13724_v6 = vadd.f32 1.0, %v34146_v60 }
0x20cb   :  { %34147 = vrcp.f32 %v13724_v6 }
0x20d5   :  { %v34148_v16 = vpop.eup %34147 }
0x20d6   :  { %v13728_v23 = vmul.f32 %v34148_v16, %v35437_v43 }
0x2139   :  { %v13731_v17 = vpop.permute.xlu1 %13730 }
0x213a   :  { %v13733_v20 = vmul.f32 %v34148_v16, %v13731_v17 }
0x213c   :  { %13735 = vrot.lane.b32.xlu0 %v13733_v20, %s34423_s17 }
0x21ae   :  { %v13736_v26 = vpop.permute.xlu0 %13735 }
0x21af   :  { %v35710_v22 = vadd.f32 %v13736_v26, %v13728_v23 }
0x21b1   :  { %34149 = vtanh.f32 %v35710_v22 }
0x21bb   :  { %v34150_v15 = vpop.eup %34149 }
0x21bc   :  { %13741 = vrot.lane.b32.xlu1 %v34150_v15, %s34422_s2 }
0x222e   :  { %v13742_v19 = vpop.permute.xlu1 %13741 }
0x222f   :  { %v13744_v32 = vmul.f32 %v34148_v16, %v13742_v19 }
0x2231   :  { %13746 = vrot.lane.b32.xlu0 %v13744_v32, %s34423_s17 }
0x22a3   :  { %v35715_v34 = vpop.permute.xlu0 %13746 }
0x22a4   :  { %13750 = vst.msk [vmem:[#allocation8 + $0x6] sm:$0x3] %vm79_vm0, %v35715_v34  ;;  %v13753_v43 = vsel %vm106_vm2, %v35715_v34, 0 }
0x22a5   :  { %v13824_v58 = vand.u32 4294901760, %v13753_v43 }
0x22a7   :  { %v13825_v62 = vsub.f32 %v13753_v43, %v13824_v58 }
0x22a9   :  { %v13826_v36 = vand.u32 4294901760, %v13825_v62 }
0x22ab   :  { %v13827_v53 = vsub.f32 %v13825_v62, %v13826_v36 }
0x22ad   :  { %v13828_v35 = vand.u32 4294901760, %v13827_v53 }
0x22af   :  { %30449 = vmatmul.mubr.f32.vlgmr.msra.gmra.mrb[48].mxu0 %v13828_v35 }
0x22b0   :  { %32800 = vmatpush3.bf16.msra.mxu0 %v34568_v33  ;;  %30459 = vmatprep.mubr.msk.f32.mxu0 %vm34420_vm1, %v34421_v1 }
0x22b1   :  { %32801 = vmatprep.subr.bf16.mxu0 %v34419_v0 }
0x22b4   :  { %32803 = vmatpush3.bf16.msra.mxu0 %v34571_v37 }
0x22b5   :  { %32804 = vmatprep.subr.bf16.mxu0 %v34419_v0 }
0x22b7   :  { %30460 = vmatmul.mubr.f32.vlgmr.msra.gmra.mrb[48].mxu0 %v13824_v58 }
0x22b8   :  { %32806 = vmatpush3.bf16.msra.mxu0 %v34577_v38  ;;  %30470 = vmatprep.mubr.msk.f32.mxu0 %vm34420_vm1, %v34421_v1 }
0x22b9   :  { %32807 = vmatprep.subr.bf16.mxu0 %v34419_v0 }
0x22bc   :  { %32809 = vmatpush3.bf16.msra.mxu0 %v34581_v39 }
0x22bd   :  { %32810 = vmatprep.subr.bf16.mxu0 %v34419_v0 }
0x22bf   :  { %30471 = vmatmul.mubr.f32.vlgmr.msra.gmra.mrb[48].mxu0 %v13825_v62 }
0x22c0   :  { %32812 = vmatpush3.bf16.msra.mxu0 %v34556_v11  ;;  %30481 = vmatprep.mubr.msk.f32.mxu0 %vm34420_vm1, %v34421_v1 }
0x22c1   :  { %32813 = vmatprep.subr.bf16.mxu0 %v34419_v0 }
0x22c4   :  { %32815 = vmatpush3.bf16.msra.mxu0 %v34559_v14 }
0x22c5   :  { %32816 = vmatprep.subr.bf16.mxu0 %v34419_v0 }
0x22c7   :  { %30482 = vmatmul.mubr.f32.vlgmr.msra.gmra.mrb[48].mxu0 %v13826_v36 }
0x22c8   :  { %32818 = vmatpush3.bf16.msra.mxu0 %v34593_v40  ;;  %30492 = vmatprep.mubr.msk.f32.mxu0 %vm34420_vm1, %v34421_v1 }
0x22c9   :  { %32819 = vmatprep.subr.bf16.mxu0 %v34419_v0 }
0x22cc   :  { %32821 = vmatpush3.bf16.msra.mxu0 %v34597_v41 }
0x22cd   :  { %32822 = vmatprep.subr.bf16.mxu0 %v34419_v0 }
0x22cf   :  { %30493 = vmatmul.mubr.f32.vlgmr.msra.gmra.mrb[48].mxu0 %v13824_v58 }
0x22d0   :  { %32824 = vmatpush3.bf16.msra.mxu0 %v34556_v11  ;;  %30503 = vmatprep.mubr.msk.f32.mxu0 %vm34420_vm1, %v34421_v1 }
0x22d1   :  { %32825 = vmatprep.subr.bf16.mxu0 %v34419_v0 }
0x22d4   :  { %32827 = vmatpush3.bf16.msra.mxu0 %v34559_v14 }
0x22d5   :  { %32882 = vmatprep.subr.bf16.mxu0 %v34419_v0 }
0x22d7   :  { %30504 = vmatmul.mubr.f32.vlgmr.msra.gmra.mrb[48].mxu0 %v13824_v58 }
0x22d8   :  { %32884 = vmatpush3.bf16.msra.mxu0 %v34618_v46  ;;  %30618 = vmatprep.mubr.msk.f32.mxu0 %vm34420_vm1, %v34421_v1 }
0x22d9   :  { %32885 = vmatprep.subr.bf16.mxu0 %v34419_v0 }
0x23aa   :  { %v14236_v45 = vpop.f32.mrb[48].mxu0 }
0x23ab   :  { %v33604_v47 = vadd.f32 %v35482_v42, %v14236_v45  ;;  %v30505_v7 = vpop.f32.mrb[49].mxu0 }
0x23ad   :  { %v27461_v48 = vmul.f32 -1.442695, %v33604_v47 }
0x23af   :  { %34151 = vpow2.f32 %v27461_v48 }
0x23b9   :  { %v34152_v49 = vpop.eup %34151 }
0x23ba   :  { %v14243_v50 = vadd.f32 1.0, %v34152_v49 }
0x23bc   :  { %34153 = vrcp.f32 %v14243_v50 }
0x23c6   :  { %v34154_v51 = vpop.eup %34153 }
0x23c7   :  { %v14246_v44 = vmul.f32 2.0, %v34154_v51 }
0x23c9   :  { %v35759_v52 = vmul.f32 %v27460_v25, %v14246_v44 }
0x23cb   :  { %v14249_v54 = vsel %vm609_vm3, %v35759_v52, 0 }
0x23cc   :  { %v14318_v63 = vand.u32 4294901760, %v14249_v54 }
0x23ce   :  { %v14319_v24 = vsub.f32 %v14249_v54, %v14318_v63 }
0x23d0   :  { %v14320_v59 = vand.u32 4294901760, %v14319_v24 }
0x23d2   :  { %v14321_v3 = vsub.f32 %v14319_v24, %v14320_v59 }
0x23d4   :  { %v14322_v4 = vand.u32 4294901760, %v14321_v3 }
0x23d6   :  { %30511 = vmatmul.mubr.f32.vlgmr.msra.gmra.mrb[88].mxu1 %v14322_v4 }
0x23d7   :  { %32833 = vmatpush3.bf16.msra.mxu1 %v34624_v55  ;;  %30517 = vmatprep.mubr.msk.f32.mxu1 %vm34420_vm1, %v34421_v1 }
0x23d8   :  { %32834 = vmatprep.subr.bf16.mxu1 %v34419_v0 }
0x23de   :  { %30518 = vmatmul.mubr.f32.vlgmr.msra.gmra.mrb[88].mxu1 %v14318_v63 }
0x23df   :  { %32836 = vmatpush3.bf16.msra.mxu1 %v34626_v56  ;;  %30524 = vmatprep.mubr.msk.f32.mxu1 %vm34420_vm1, %v34421_v1 }
0x23e0   :  { %32837 = vmatprep.subr.bf16.mxu1 %v34419_v0 }
0x23e6   :  { %30525 = vmatmul.mubr.f32.vlgmr.msra.gmra.mrb[88].mxu1 %v14319_v24 }
0x23e7   :  { %32839 = vmatpush3.bf16.msra.mxu1 %v34618_v46  ;;  %30531 = vmatprep.mubr.msk.f32.mxu1 %vm34420_vm1, %v34421_v1 }
0x23e8   :  { %32840 = vmatprep.subr.bf16.mxu1 %v34419_v0 }
0x23ee   :  { %30532 = vmatmul.mubr.f32.vlgmr.msra.gmra.mrb[88].mxu1 %v14320_v59 }
0x23ef   :  { %32842 = vmatpush3.bf16.msra.mxu1 %v34628_v57  ;;  %30538 = vmatprep.mubr.msk.f32.mxu1 %vm34420_vm1, %v34421_v1 }
0x23f0   :  { %32843 = vmatprep.subr.bf16.mxu1 %v34419_v0 }
0x23f6   :  { %30539 = vmatmul.mubr.f32.vlgmr.msra.gmra.mrb[88].mxu1 %v14318_v63 }
0x23f7   :  { %32845 = vmatpush3.bf16.msra.mxu1 %v34618_v46  ;;  %30545 = vmatprep.mubr.msk.f32.mxu1 %vm34420_vm1, %v34421_v1 }
0x23f8   :  { %32846 = vmatprep.subr.bf16.mxu1 %v34419_v0 }
0x23fe   :  { %30546 = vmatmul.mubr.f32.vlgmr.msra.gmra.mrb[88].mxu1 %v14318_v63 }
0x23ff   :  { %32848 = vmatpush3.bf16.msra.mxu1 %v34556_v11  ;;  %30556 = vmatprep.mubr.msk.f32.mxu1 %vm34420_vm1, %v34421_v1 }
0x2400   :  { %32849 = vmatprep.subr.bf16.mxu1 %v34419_v0 }
0x2403   :  { %32851 = vmatpush3.bf16.msra.mxu1 %v34559_v14 }
0x2404   :  { %32852 = vmatprep.subr.bf16.mxu1 %v34419_v0 }
0x24d1   :  { %v14706_v2 = vpop.f32.mrb[88].mxu1 }
0x24d2   :  { %v33605_v5 = vadd.f32 %v35521_v18, %v14706_v2  ;;  %v30547_v60 = vpop.f32.mrb[89].mxu1 }
0x24d4   :  { %v27462_v6 = vmul.f32 -1.442695, %v33605_v5 }
0x24d6   :  { %34155 = vpow2.f32 %v27462_v6 }
0x24e0   :  { %v34156_v16 = vpop.eup %34155 }
0x24e1   :  { %v14713_v17 = vadd.f32 1.0, %v34156_v16 }
0x24e3   :  { %34157 = vrcp.f32 %v14713_v17 }
0x24ed   :  { %v34158_v20 = vpop.eup %34157 }
0x24ee   :  { %v14716_v23 = vmul.f32 2.0, %v34158_v20 }
0x24f0   :  { %v35791_v26 = vmul.f32 %v14716_v23, %v35715_v34 }
0x24f2   :  { %v14719_v15 = vsel %vm106_vm2, %v35791_v26, 0 }
0x24f3   :  { %v14790_v19 = vand.u32 4294901760, %v14719_v15 }
0x24f5   :  { %v14791_v32 = vsub.f32 %v14719_v15, %v14790_v19 }
0x24f7   :  { %v14792_v43 = vand.u32 4294901760, %v14791_v32 }
0x24f9   :  { %v14793_v58 = vsub.f32 %v14791_v32, %v14792_v43 }
0x24fb   :  { %v14794_v62 = vand.u32 4294901760, %v14793_v58 }
0x24fd   :  { %30557 = vmatmul.mubr.f32.vlgmr.msra.gmra.mrb[90].mxu1 %v14794_v62 }
0x24fe   :  { %32854 = vmatpush3.bf16.msra.mxu1 %v34568_v33  ;;  %30567 = vmatprep.mubr.msk.f32.mxu1 %vm34420_vm1, %v34421_v1 }
0x24ff   :  { %32855 = vmatprep.subr.bf16.mxu1 %v34419_v0 }
0x2502   :  { %32857 = vmatpush3.bf16.msra.mxu1 %v34571_v37 }
0x2503   :  { %32858 = vmatprep.subr.bf16.mxu1 %v34419_v0 }
0x2505   :  { %30568 = vmatmul.mubr.f32.vlgmr.msra.gmra.mrb[90].mxu1 %v14790_v19 }
0x2506   :  { %32860 = vmatpush3.bf16.msra.mxu1 %v34577_v38  ;;  %30578 = vmatprep.mubr.msk.f32.mxu1 %vm34420_vm1, %v34421_v1 }
0x2507   :  { %32861 = vmatprep.subr.bf16.mxu1 %v34419_v0 }
0x250a   :  { %32863 = vmatpush3.bf16.msra.mxu1 %v34581_v39 }
0x250b   :  { %32864 = vmatprep.subr.bf16.mxu1 %v34419_v0 }
0x250d   :  { %30579 = vmatmul.mubr.f32.vlgmr.msra.gmra.mrb[90].mxu1 %v14791_v32 }
0x250e   :  { %32866 = vmatpush3.bf16.msra.mxu1 %v34556_v11  ;;  %30589 = vmatprep.mubr.msk.f32.mxu1 %vm34420_vm1, %v34421_v1 }
0x250f   :  { %32867 = vmatprep.subr.bf16.mxu1 %v34419_v0 }
0x2512   :  { %32869 = vmatpush3.bf16.msra.mxu1 %v34559_v14 }
0x2513   :  { %32870 = vmatprep.subr.bf16.mxu1 %v34419_v0 }
0x2515   :  { %30590 = vmatmul.mubr.f32.vlgmr.msra.gmra.mrb[90].mxu1 %v14792_v43 }
0x2516   :  { %32872 = vmatpush3.bf16.msra.mxu1 %v34593_v40  ;;  %30600 = vmatprep.mubr.msk.f32.mxu1 %vm34420_vm1, %v34421_v1 }
0x2517   :  { %32873 = vmatprep.subr.bf16.mxu1 %v34419_v0 }
0x251a   :  { %32875 = vmatpush3.bf16.msra.mxu1 %v34597_v41 }
0x251b   :  { %32876 = vmatprep.subr.bf16.mxu1 %v34419_v0 }
0x251d   :  { %30601 = vmatmul.mubr.f32.vlgmr.msra.gmra.mrb[90].mxu1 %v14790_v19 }
0x251e   :  { %32878 = vmatpush3.bf16.msra.mxu1 %v34556_v11  ;;  %30611 = vmatprep.mubr.msk.f32.mxu1 %vm34420_vm1, %v34421_v1 }
0x251f   :  { %32879 = vmatprep.subr.bf16.mxu1 %v34419_v0 }
0x2522   :  { %32881 = vmatpush3.bf16.msra.mxu1 %v34559_v14 }
0x2523   :  { %32936 = vmatprep.subr.bf16.mxu1 %v34419_v0 }
0x2525   :  { %30612 = vmatmul.mubr.f32.vlgmr.msra.gmra.mrb[90].mxu1 %v14790_v19 }
0x2526   :  { %32938 = vmatpush3.bf16.msra.mxu1 %v34747_v61  ;;  %30730 = vmatprep.mubr.msk.f32.mxu1 %vm34420_vm1, %v34421_v1 }
0x2527   :  { %32939 = vmatprep.subr.bf16.mxu1 %v34419_v0 }
0x252a   :  { %32941 = vmatpush3.bf16.msra.mxu1 %v34757_v8 }
0x252b   :  { %32942 = vmatprep.subr.bf16.mxu1 %v34419_v0 }
0x25f8   :  { %v15202_v34 = vpop.f32.mrb[90].mxu1 }
0x25f9   :  { %v33606_v36 = vadd.f32 %v35482_v42, %v15202_v34  ;;  %v30613_v53 = vpop.f32.mrb[91].mxu1 }
0x25fb   :  { %v27463_v35 = vmul.f32 -1.442695, %v33606_v36 }
0x25fd   :  { %34159 = vpow2.f32 %v27463_v35 }
0x2607   :  { %v34160_v45 = vpop.eup %34159 }
0x2608   :  { %v15209_v47 = vadd.f32 1.0, %v34160_v45 }
0x260a   :  { %34161 = vrcp.f32 %v15209_v47 }
0x2614   :  { %v34162_v7 = vpop.eup %34161 }
0x2615   :  { %v15212_v48 = vmul.f32 2.0, %v34162_v7 }
0x2617   :  { %v35833_v49 = vmul.f32 %v15212_v48, %v35759_v52 }
0x2619   :  { %v15215_v50 = vsel %vm609_vm3, %v35833_v49, 0 }
0x261a   :  { %v15284_v51 = vand.u32 4294901760, %v15215_v50 }
0x261c   :  { %v15285_v25 = vsub.f32 %v15215_v50, %v15284_v51 }
0x261e   :  { %v15286_v44 = vand.u32 4294901760, %v15285_v25 }
0x2620   :  { %v15287_v54 = vsub.f32 %v15285_v25, %v15286_v44 }
0x2622   :  { %v15288_v63 = vand.u32 4294901760, %v15287_v54 }
0x2624   :  { %30619 = vmatmul.mubr.f32.vlgmr.msra.gmra.mrb[50].mxu0 %v15288_v63 }
0x2625   :  { %32887 = vmatpush3.bf16.msra.mxu0 %v34624_v55  ;;  %30625 = vmatprep.mubr.msk.f32.mxu0 %vm34420_vm1, %v34421_v1 }
0x2626   :  { %32888 = vmatprep.subr.bf16.mxu0 %v34419_v0 }
0x262c   :  { %30626 = vmatmul.mubr.f32.vlgmr.msra.gmra.mrb[50].mxu0 %v15284_v51 }
0x262d   :  { %32890 = vmatpush3.bf16.msra.mxu0 %v34626_v56  ;;  %30632 = vmatprep.mubr.msk.f32.mxu0 %vm34420_vm1, %v34421_v1 }
0x262e   :  { %32891 = vmatprep.subr.bf16.mxu0 %v34419_v0 }
0x2634   :  { %30633 = vmatmul.mubr.f32.vlgmr.msra.gmra.mrb[50].mxu0 %v15285_v25  ;;  %v35943_v25 = vld [vmem:[#allocation7] ss:$0 sm:$0xff] }
0x2635   :  { %32893 = vmatpush3.bf16.msra.mxu0 %v34618_v46  ;;  %30639 = vmatprep.mubr.msk.f32.mxu0 %vm34420_vm1, %v34421_v1 }
0x2636   :  { %32894 = vmatprep.subr.bf16.mxu0 %v34419_v0 }
0x263c   :  { %30640 = vmatmul.mubr.f32.vlgmr.msra.gmra.mrb[50].mxu0 %v15286_v44 }
0x263d   :  { %32896 = vmatpush3.bf16.msra.mxu0 %v34628_v57  ;;  %30646 = vmatprep.mubr.msk.f32.mxu0 %vm34420_vm1, %v34421_v1 }
0x263e   :  { %32897 = vmatprep.subr.bf16.mxu0 %v34419_v0 }
0x2644   :  { %30647 = vmatmul.mubr.f32.vlgmr.msra.gmra.mrb[50].mxu0 %v15284_v51 }
0x2645   :  { %32899 = vmatpush3.bf16.msra.mxu0 %v34618_v46  ;;  %30653 = vmatprep.mubr.msk.f32.mxu0 %vm34420_vm1, %v34421_v1 }
0x2646   :  { %32900 = vmatprep.subr.bf16.mxu0 %v34419_v0 }
0x264c   :  { %30654 = vmatmul.mubr.f32.vlgmr.msra.gmra.mrb[50].mxu0 %v15284_v51 }
0x264d   :  { %32902 = vmatpush3.bf16.msra.mxu0 %v34556_v11  ;;  %30664 = vmatprep.mubr.msk.f32.mxu0 %vm34420_vm1, %v34421_v1 }
0x264e   :  { %32903 = vmatprep.subr.bf16.mxu0 %v34419_v0 }
0x2651   :  { %32905 = vmatpush3.bf16.msra.mxu0 %v34559_v14 }
0x2652   :  { %32906 = vmatprep.subr.bf16.mxu0 %v34419_v0 }
0x271f   :  { %v15672_v42 = vpop.f32.mrb[50].mxu0 }
0x2720   :  { %v33607_v52 = vadd.f32 %v35521_v18, %v15672_v42  ;;  %v30655_v24 = vpop.f32.mrb[51].mxu0 }
0x2722   :  { %v27464_v59 = vmul.f32 -1.442695, %v33607_v52 }
0x2724   :  { %34163 = vpow2.f32 %v27464_v59 }
0x272e   :  { %v34164_v3 = vpop.eup %34163 }
0x272f   :  { %v15679_v4 = vadd.f32 1.0, %v34164_v3 }
0x2731   :  { %34165 = vrcp.f32 %v15679_v4 }
0x273b   :  { %v34166_v2 = vpop.eup %34165 }
0x273c   :  { %v15682_v5 = vmul.f32 2.0, %v34166_v2 }
0x273e   :  { %v15683_v60 = vmul.f32 %v15682_v5, %v35791_v26 }
0x2740   :  { %v15685_v6 = vsel %vm106_vm2, %v15683_v60, 0 }
0x2741   :  { %v35866_v16 = vand.u32 4294901760, %v15685_v6 }
0x2743   :  { %v15757_v17 = vsub.f32 %v15685_v6, %v35866_v16 }
0x2745   :  { %v15758_v20 = vand.u32 4294901760, %v15757_v17 }
0x2747   :  { %v15759_v23 = vsub.f32 %v15757_v17, %v15758_v20 }
0x2749   :  { %v15760_v15 = vand.u32 4294901760, %v15759_v23 }
0x274b   :  { %30665 = vmatmul.mubr.f32.vlgmr.msra.gmra.mrb[52].mxu0 %v15760_v15  ;;  %30731 = vmatmul.mubr.f32.vlgmr.msra.gmra.mrb[92].mxu1 %v15760_v15 }
0x274c   :  { %32908 = vmatpush3.bf16.msra.mxu0 %v34568_v33  ;;  %32944 = vmatpush3.bf16.msra.mxu1 %v34761_v21 }
0x274d   :  { %32909 = vmatprep.subr.bf16.mxu0 %v34419_v0  ;;  %32945 = vmatprep.subr.bf16.mxu1 %v34419_v0 }
0x274e   :  { %30741 = vmatprep.mubr.msk.f32.mxu1 %vm34420_vm1, %v34421_v1  ;;  %30675 = vmatprep.mubr.msk.f32.mxu0 %vm34420_vm1, %v34421_v1 }
0x2750   :  { %32911 = vmatpush3.bf16.msra.mxu0 %v34571_v37  ;;  %32947 = vmatpush3.bf16.msra.mxu1 %v34763_v27 }
0x2751   :  { %32912 = vmatprep.subr.bf16.mxu0 %v34419_v0  ;;  %32948 = vmatprep.subr.bf16.mxu1 %v34419_v0 }
0x2753   :  { %30742 = vmatmul.mubr.f32.vlgmr.msra.gmra.mrb[94].mxu1 %v35866_v16  ;;  %30676 = vmatmul.mubr.f32.vlgmr.msra.gmra.mrb[52].mxu0 %v35866_v16 }
0x2754   :  { %32914 = vmatpush3.bf16.msra.mxu0 %v34577_v38  ;;  %32950 = vmatpush3.bf16.msra.mxu1 %v34765_v28 }
0x2755   :  { %32915 = vmatprep.subr.bf16.mxu0 %v34419_v0  ;;  %32951 = vmatprep.subr.bf16.mxu1 %v34419_v0 }
0x2756   :  { %30752 = vmatprep.mubr.msk.f32.mxu1 %vm34420_vm1, %v34421_v1  ;;  %30686 = vmatprep.mubr.msk.f32.mxu0 %vm34420_vm1, %v34421_v1 }
0x2758   :  { %32917 = vmatpush3.bf16.msra.mxu0 %v34581_v39  ;;  %32953 = vmatpush3.bf16.msra.mxu1 %v34767_v29 }
0x2759   :  { %32918 = vmatprep.subr.bf16.mxu0 %v34419_v0  ;;  %32954 = vmatprep.subr.bf16.mxu1 %v34419_v0 }
0x275b   :  { %30753 = vmatmul.mubr.f32.vlgmr.msra.gmra.mrb[96].mxu1 %v15757_v17  ;;  %30687 = vmatmul.mubr.f32.vlgmr.msra.gmra.mrb[52].mxu0 %v15757_v17 }
0x275c   :  { %32920 = vmatpush3.bf16.msra.mxu0 %v34556_v11  ;;  %32956 = vmatpush3.bf16.msra.mxu1 %v34747_v61 }
0x275d   :  { %32921 = vmatprep.subr.bf16.mxu0 %v34419_v0  ;;  %32957 = vmatprep.subr.bf16.mxu1 %v34419_v0 }
0x275e   :  { %30763 = vmatprep.mubr.msk.f32.mxu1 %vm34420_vm1, %v34421_v1  ;;  %30697 = vmatprep.mubr.msk.f32.mxu0 %vm34420_vm1, %v34421_v1 }
0x2760   :  { %32923 = vmatpush3.bf16.msra.mxu0 %v34559_v14  ;;  %32959 = vmatpush3.bf16.msra.mxu1 %v34757_v8 }
0x2761   :  { %32924 = vmatprep.subr.bf16.mxu0 %v34419_v0  ;;  %32960 = vmatprep.subr.bf16.mxu1 %v34419_v0 }
0x2763   :  { %30764 = vmatmul.mubr.f32.vlgmr.msra.gmra.mrb[98].mxu1 %v15758_v20  ;;  %30698 = vmatmul.mubr.f32.vlgmr.msra.gmra.mrb[52].mxu0 %v15758_v20 }
0x2764   :  { %32926 = vmatpush3.bf16.msra.mxu0 %v34593_v40  ;;  %32962 = vmatpush3.bf16.msra.mxu1 %v34769_v30 }
0x2765   :  { %32927 = vmatprep.subr.bf16.mxu0 %v34419_v0  ;;  %32963 = vmatprep.subr.bf16.mxu1 %v34419_v0 }
0x2766   :  { %30774 = vmatprep.mubr.msk.f32.mxu1 %vm34420_vm1, %v34421_v1  ;;  %30708 = vmatprep.mubr.msk.f32.mxu0 %vm34420_vm1, %v34421_v1 }
0x2768   :  { %32929 = vmatpush3.bf16.msra.mxu0 %v34597_v41  ;;  %32965 = vmatpush3.bf16.msra.mxu1 %v34771_v31 }
0x2769   :  { %32930 = vmatprep.subr.bf16.mxu0 %v34419_v0  ;;  %32966 = vmatprep.subr.bf16.mxu1 %v34419_v0 }
0x276b   :  { %30775 = vmatmul.mubr.f32.vlgmr.msra.gmra.mrb[100].mxu1 %v35866_v16  ;;  %30709 = vmatmul.mubr.f32.vlgmr.msra.gmra.mrb[52].mxu0 %v35866_v16 }
0x276c   :  { %32932 = vmatpush3.bf16.msra.mxu0 %v34556_v11  ;;  %32968 = vmatpush3.bf16.msra.mxu1 %v34747_v61 }
0x276d   :  { %32933 = vmatprep.subr.bf16.mxu0 %v34419_v0  ;;  %32969 = vmatprep.subr.bf16.mxu1 %v34419_v0 }
0x276e   :  { %30785 = vmatprep.mubr.msk.f32.mxu1 %vm34420_vm1, %v34421_v1  ;;  %30719 = vmatprep.mubr.msk.f32.mxu0 %vm34420_vm1, %v34421_v1 }
0x2770   :  { %32935 = vmatpush3.bf16.msra.mxu0 %v34559_v14  ;;  %32971 = vmatpush3.bf16.msra.mxu1 %v34757_v8 }
0x2771   :  { %32975 = vmatprep.subr.bf16.mxu1 %v34419_v0  ;;  %32972 = vmatprep.subr.bf16.mxu0 %v34419_v0 }
0x2773   :  { %30786 = vmatmul.mubr.f32.vlgmr.msra.gmra.mrb[102].mxu1 %v35866_v16  ;;  %30720 = vmatmul.mubr.f32.vlgmr.msra.gmra.mrb[52].mxu0 %v35866_v16 }
0x2774   :  { %32977 = vmatpush3.bf16.msra.mxu1 %v34851_v10  ;;  %30799 = vmatprep.mubr.msk.f32.mxu1 %vm34420_vm1, %v34421_v1 }
0x2775   :  { %32981 = vmatprep.subr.bf16.mxu1 %v34419_v0  ;;  %32974 = vmatpush3.bf16.msra.mxu0 %v34849_v9 }
0x2776   :  { %30792 = vmatprep.mubr.msk.f32.mxu0 %vm34420_vm1, %v34421_v1  ;;  %32978 = vmatprep.subr.bf16.mxu0 %v34419_v0 }
0x281e   :  { %v16255_v18 = vpop.f32.mrb[92].mxu1 }
0x281f   :  { %v30732_v26 = vpop.f32.mrb[93].mxu1 }
0x2826   :  { %v16346_v19 = vpop.f32.mrb[94].mxu1 }
0x2827   :  { %v16347_v32 = vadd.f32 %v16346_v19, %v16255_v18  ;;  %v30743_v43 = vpop.f32.mrb[95].mxu1 }
0x282e   :  { %v16426_v58 = vpop.f32.mrb[96].mxu1 }
0x282f   :  { %v16427_v62 = vadd.f32 %v16426_v58, %v16347_v32  ;;  %v30754_v34 = vpop.f32.mrb[97].mxu1 }
0x2836   :  { %v16503_v36 = vpop.f32.mrb[98].mxu1 }
0x2837   :  { %v16504_v53 = vadd.f32 %v16503_v36, %v16427_v62  ;;  %v30765_v35 = vpop.f32.mrb[99].mxu1 }
0x283e   :  { %v16586_v45 = vpop.f32.mrb[100].mxu1 }
0x283f   :  { %v16587_v47 = vadd.f32 %v16586_v45, %v16504_v53  ;;  %v30776_v7 = vpop.f32.mrb[101].mxu1 }
0x2846   :  { %v16661_v48 = vpop.f32.mrb[102].mxu1  ;;  %v16168_v50 = vpop.f32.mrb[52].mxu0 }
0x2847   :  { %v16662_v51 = vadd.f32 %v16661_v48, %v16587_v47  ;;  %v33608_v44 = vadd.f32 %v35943_v25, %v16168_v50  ;;  %v30787_v54 = vpop.f32.mrb[103].mxu1  ;;  %v30721_v63 = vpop.f32.mrb[53].mxu0  ;;  %v35974_v48 = vld [vmem:[#allocation5] ss:$0 sm:$0xff] }
0x2849   :  { %v27465_v42 = vmul.f32 -1.442695, %v33608_v44 }
0x284b   :  { %34167 = vpow2.f32 %v27465_v42 }
0x2855   :  { %v34168_v52 = vpop.eup %34167 }
0x2856   :  { %v16175_v24 = vadd.f32 1.0, %v34168_v52 }
0x2858   :  { %34169 = vrcp.f32 %v16175_v24 }
0x2862   :  { %v34170_v59 = vpop.eup %34169 }
0x2863   :  { %v16178_v3 = vmul.f32 2.0, %v34170_v59 }
0x2865   :  { %v16179_v4 = vmul.f32 %v16178_v3, %v35833_v49 }
0x2867   :  { %v16666_v2 = vsel %vm609_vm3, %v16179_v4, 0 }
0x2868   :  { %v16735_v5 = vand.u32 4294901760, %v16666_v2 }
0x286a   :  { %v16736_v60 = vsub.f32 %v16666_v2, %v16735_v5  ;;  %30800 = vmatmul.mubr.f32.vlgmr.msra.gmra.mrb[104].mxu1 %v16735_v5 }
0x286b   :  { %32983 = vmatpush3.bf16.msra.mxu1 %v34849_v9  ;;  %30813 = vmatprep.mubr.msk.f32.mxu1 %vm34420_vm1, %v34421_v1 }
0x286c   :  { %v16737_v6 = vand.u32 4294901760, %v16736_v60  ;;  %32987 = vmatprep.subr.bf16.mxu1 %v34419_v0 }
0x286e   :  { %30814 = vmatmul.mubr.f32.vlgmr.msra.gmra.mrb[106].mxu1 %v16737_v6  ;;  %v16738_v16 = vsub.f32 %v16736_v60, %v16737_v6 }
0x286f   :  { %32989 = vmatpush3.bf16.msra.mxu1 %v34849_v9  ;;  %30827 = vmatprep.mubr.msk.f32.mxu1 %vm34420_vm1, %v34421_v1 }
0x2870   :  { %v16739_v49 = vand.u32 4294901760, %v16738_v16  ;;  %33026 = vmatprep.subr.bf16.mxu1 %v34419_v0 }
0x2872   :  { %30793 = vmatmul.mubr.f32.vlgmr.msra.gmra.mrb[54].mxu0 %v16739_v49  ;;  %30828 = vmatmul.mubr.f32.vlgmr.msra.gmra.mrb[108].mxu1 %v16735_v5 }
0x2873   :  { %32980 = vmatpush3.bf16.msra.mxu0 %v34857_v12  ;;  %30806 = vmatprep.mubr.msk.f32.mxu0 %vm34420_vm1, %v34421_v1 }
0x2874   :  { %32984 = vmatprep.subr.bf16.mxu0 %v34419_v0  ;;  %33028 = vmatpush3.bf16.msra.mxu1 %v34618_v46 }
0x2875   :  { %30900 = vmatprep.mubr.msk.f32.mxu1 %vm34420_vm1, %v34421_v1  ;;  %33029 = vmatprep.subr.bf16.mxu1 %v34419_v0 }
0x2876   :  { %30807 = vmatmul.mubr.f32.vlgmr.msra.gmra.mrb[56].mxu0 %v16736_v60 }
0x2877   :  { %32986 = vmatpush3.bf16.msra.mxu0 %v34859_v13  ;;  %30820 = vmatprep.mubr.msk.f32.mxu0 %vm34420_vm1, %v34421_v1 }
0x2878   :  { %32990 = vmatprep.subr.bf16.mxu0 %v34419_v0 }
0x287a   :  { %30821 = vmatmul.mubr.f32.vlgmr.msra.gmra.mrb[58].mxu0 %v16735_v5 }
0x287b   :  { %32992 = vmatpush3.bf16.msra.mxu0 %v34556_v11  ;;  %30838 = vmatprep.mubr.msk.f32.mxu0 %vm34420_vm1, %v34421_v1 }
0x287c   :  { %32993 = vmatprep.subr.bf16.mxu0 %v34419_v0 }
0x287f   :  { %32995 = vmatpush3.bf16.msra.mxu0 %v34559_v14 }
0x2880   :  { %32996 = vmatprep.subr.bf16.mxu0 %v34419_v0 }
0x293d   :  { %v16822_v17 = vpop.f32.mrb[104].mxu1 }
0x293e   :  { %v30801_v20 = vpop.f32.mrb[105].mxu1 }
0x2941   :  { %v16973_v23 = vpop.f32.mrb[106].mxu1 }
0x2942   :  { %v30815_v15 = vpop.f32.mrb[107].mxu1 }
0x2945   :  { %v16741_v18 = vpop.f32.mrb[54].mxu0  ;;  %v17123_v26 = vpop.f32.mrb[108].mxu1 }
0x2946   :  { %v16742_v19 = vadd.f32 %v16741_v18, %v16662_v51  ;;  %v30794_v32 = vpop.f32.mrb[55].mxu0  ;;  %v30829_v43 = vpop.f32.mrb[109].mxu1 }
0x2948   :  { %v16823_v58 = vadd.f32 %v16822_v17, %v16742_v19 }
0x2949   :  { %v16898_v62 = vpop.f32.mrb[56].mxu0 }
0x294a   :  { %v16899_v34 = vadd.f32 %v16898_v62, %v16823_v58  ;;  %v30808_v36 = vpop.f32.mrb[57].mxu0  ;;  %v27467_v62 = vld [vmem:[%s36837_s0 + $0xa] sm:$0x3] }
0x294c   :  { %v16974_v53 = vadd.f32 %v16973_v23, %v16899_v34 }
0x294d   :  { %v17050_v35 = vpop.f32.mrb[58].mxu0 }
0x294e   :  { %v17051_v45 = vadd.f32 %v17050_v35, %v16974_v53  ;;  %v30822_v47 = vpop.f32.mrb[59].mxu0 }
0x2950   :  { %v17124_v7 = vadd.f32 %v17123_v26, %v17051_v45 }
0x2952   :  { %v17127_v50 = vadd.f32 %v35974_v48, %v17124_v7 }
0x2954   :  { %34171 = vtanh.f32 %v17127_v50  ;;  %v27466_v51 = vmul.f32 -1.442695, %v17127_v50 }
0x2956   :  { %34173 = vpow2.f32 %v27466_v51  ;;  %v36062_v51 = vld [vmem:[%s36844_s7] ss:$0 sm:$0xff] }
0x295e   :  { %v34172_v44 = vpop.eup %34171 }
0x295f   :  { %17137 = vrot.lane.b32.xlu1 %v34172_v44, %s34422_s2 }
0x2960   :  { %v34174_v54 = vpop.eup %34173 }
0x2961   :  { %v17131_v63 = vadd.f32 1.0, %v34174_v54 }
0x2963   :  { %34175 = vrcp.f32 %v17131_v63 }
0x296d   :  { %v34176_v42 = vpop.eup %34175 }
0x296e   :  { %v17135_v59 = vmul.f32 %v34176_v42, %v35710_v22 }
0x29d1   :  { %v17138_v52 = vpop.permute.xlu1 %17137 }
0x29d2   :  { %v17140_v24 = vmul.f32 %v34176_v42, %v17138_v52 }
0x29d4   :  { %17142 = vrot.lane.b32.xlu0 %v17140_v24, %s34423_s17 }
0x2a46   :  { %v17143_v3 = vpop.permute.xlu0 %17142 }
0x2a47   :  { %v35980_v4 = vadd.f32 %v17143_v3, %v17135_v59 }
0x2a49   :  { %34177 = vtanh.f32 %v35980_v4 }
0x2a53   :  { %v34178_v2 = vpop.eup %34177 }
0x2a54   :  { %17148 = vrot.lane.b32.xlu1 %v34178_v2, %s34422_s2 }
0x2ac6   :  { %v17149_v5 = vpop.permute.xlu1 %17148 }
0x2ac7   :  { %v17151_v60 = vmul.f32 %v34176_v42, %v17149_v5 }
0x2ac9   :  { %17153 = vrot.lane.b32.xlu0 %v17151_v60, %s34423_s17 }
0x2b3b   :  { %v35985_v6 = vpop.permute.xlu0 %17153 }
0x2b3c   :  { %17157 = vst.msk [vmem:[#allocation8 + $0x8] sm:$0x3] %vm79_vm0, %v35985_v6  ;;  %v17160_v22 = vsel %vm106_vm2, %v35985_v6, 0 }
0x2b3d   :  { %v17231_v16 = vand.u32 4294901760, %v17160_v22 }
0x2b3f   :  { %v17232_v49 = vsub.f32 %v17160_v22, %v17231_v16 }
0x2b41   :  { %v17233_v17 = vand.u32 4294901760, %v17232_v49 }
0x2b43   :  { %v17234_v20 = vsub.f32 %v17232_v49, %v17233_v17 }
0x2b45   :  { %v17235_v23 = vand.u32 4294901760, %v17234_v20 }
0x2b47   :  { %30839 = vmatmul.mubr.f32.vlgmr.msra.gmra.mrb[60].mxu0 %v17235_v23 }
0x2b48   :  { %32998 = vmatpush3.bf16.msra.mxu0 %v34568_v33  ;;  %30849 = vmatprep.mubr.msk.f32.mxu0 %vm34420_vm1, %v34421_v1 }
0x2b49   :  { %32999 = vmatprep.subr.bf16.mxu0 %v34419_v0 }
0x2b4c   :  { %33001 = vmatpush3.bf16.msra.mxu0 %v34571_v37 }
0x2b4d   :  { %33002 = vmatprep.subr.bf16.mxu0 %v34419_v0 }
0x2b4f   :  { %30850 = vmatmul.mubr.f32.vlgmr.msra.gmra.mrb[60].mxu0 %v17231_v16 }
0x2b50   :  { %33004 = vmatpush3.bf16.msra.mxu0 %v34577_v38  ;;  %30860 = vmatprep.mubr.msk.f32.mxu0 %vm34420_vm1, %v34421_v1 }
0x2b51   :  { %33005 = vmatprep.subr.bf16.mxu0 %v34419_v0 }
0x2b54   :  { %33007 = vmatpush3.bf16.msra.mxu0 %v34581_v39 }
0x2b55   :  { %33008 = vmatprep.subr.bf16.mxu0 %v34419_v0 }
0x2b57   :  { %30861 = vmatmul.mubr.f32.vlgmr.msra.gmra.mrb[60].mxu0 %v17232_v49 }
0x2b58   :  { %33010 = vmatpush3.bf16.msra.mxu0 %v34556_v11  ;;  %30871 = vmatprep.mubr.msk.f32.mxu0 %vm34420_vm1, %v34421_v1 }
0x2b59   :  { %33011 = vmatprep.subr.bf16.mxu0 %v34419_v0 }
0x2b5c   :  { %33013 = vmatpush3.bf16.msra.mxu0 %v34559_v14 }
0x2b5d   :  { %33014 = vmatprep.subr.bf16.mxu0 %v34419_v0 }
0x2b5f   :  { %30872 = vmatmul.mubr.f32.vlgmr.msra.gmra.mrb[60].mxu0 %v17233_v17 }
0x2b60   :  { %33016 = vmatpush3.bf16.msra.mxu0 %v34593_v40  ;;  %30882 = vmatprep.mubr.msk.f32.mxu0 %vm34420_vm1, %v34421_v1 }
0x2b61   :  { %33017 = vmatprep.subr.bf16.mxu0 %v34419_v0 }
0x2b64   :  { %33019 = vmatpush3.bf16.msra.mxu0 %v34597_v41 }
0x2b65   :  { %33020 = vmatprep.subr.bf16.mxu0 %v34419_v0 }
0x2b67   :  { %30883 = vmatmul.mubr.f32.vlgmr.msra.gmra.mrb[60].mxu0 %v17231_v16 }
0x2b68   :  { %33022 = vmatpush3.bf16.msra.mxu0 %v34556_v11  ;;  %30893 = vmatprep.mubr.msk.f32.mxu0 %vm34420_vm1, %v34421_v1 }
0x2b69   :  { %33023 = vmatprep.subr.bf16.mxu0 %v34419_v0 }
0x2b6c   :  { %33025 = vmatpush3.bf16.msra.mxu0 %v34559_v14 }
0x2b6d   :  { %33080 = vmatprep.subr.bf16.mxu0 %v34419_v0 }
0x2b6f   :  { %30894 = vmatmul.mubr.f32.vlgmr.msra.gmra.mrb[60].mxu0 %v17231_v16 }
0x2b70   :  { %33082 = vmatpush3.bf16.msra.mxu0 %v34618_v46  ;;  %31008 = vmatprep.mubr.msk.f32.mxu0 %vm34420_vm1, %v34421_v1 }
0x2b71   :  { %33083 = vmatprep.subr.bf16.mxu0 %v34419_v0 }
0x2c42   :  { %v17643_v15 = vpop.f32.mrb[60].mxu0 }
0x2c43   :  { %v33609_v18 = vadd.f32 %v35943_v25, %v17643_v15  ;;  %v30895_v26 = vpop.f32.mrb[61].mxu0 }
0x2c45   :  { %v27468_v19 = vmul.f32 -1.442695, %v33609_v18 }
0x2c47   :  { %34179 = vpow2.f32 %v27468_v19 }
0x2c51   :  { %v34180_v32 = vpop.eup %34179 }
0x2c52   :  { %v17650_v43 = vadd.f32 1.0, %v34180_v32 }
0x2c54   :  { %34181 = vrcp.f32 %v17650_v43 }
0x2c5e   :  { %v34182_v58 = vpop.eup %34181 }
0x2c5f   :  { %v17653_v34 = vmul.f32 2.0, %v34182_v58 }
0x2c61   :  { %v36029_v36 = vmul.f32 %v27467_v62, %v17653_v34 }
0x2c63   :  { %v17656_v53 = vsel %vm609_vm3, %v36029_v36, 0 }
0x2c64   :  { %v17725_v35 = vand.u32 4294901760, %v17656_v53 }
0x2c66   :  { %v17726_v45 = vsub.f32 %v17656_v53, %v17725_v35 }
0x2c68   :  { %v17727_v47 = vand.u32 4294901760, %v17726_v45 }
0x2c6a   :  { %v17728_v7 = vsub.f32 %v17726_v45, %v17727_v47 }
0x2c6c   :  { %v17729_v50 = vand.u32 4294901760, %v17728_v7 }
0x2c6e   :  { %30901 = vmatmul.mubr.f32.vlgmr.msra.gmra.mrb[110].mxu1 %v17729_v50 }
0x2c6f   :  { %33031 = vmatpush3.bf16.msra.mxu1 %v34624_v55  ;;  %30907 = vmatprep.mubr.msk.f32.mxu1 %vm34420_vm1, %v34421_v1 }
0x2c70   :  { %33032 = vmatprep.subr.bf16.mxu1 %v34419_v0 }
0x2c76   :  { %30908 = vmatmul.mubr.f32.vlgmr.msra.gmra.mrb[110].mxu1 %v17725_v35 }
0x2c77   :  { %33034 = vmatpush3.bf16.msra.mxu1 %v34626_v56  ;;  %30914 = vmatprep.mubr.msk.f32.mxu1 %vm34420_vm1, %v34421_v1 }
0x2c78   :  { %33035 = vmatprep.subr.bf16.mxu1 %v34419_v0 }
0x2c7e   :  { %30915 = vmatmul.mubr.f32.vlgmr.msra.gmra.mrb[110].mxu1 %v17726_v45 }
0x2c7f   :  { %33037 = vmatpush3.bf16.msra.mxu1 %v34618_v46  ;;  %30921 = vmatprep.mubr.msk.f32.mxu1 %vm34420_vm1, %v34421_v1 }
0x2c80   :  { %33038 = vmatprep.subr.bf16.mxu1 %v34419_v0 }
0x2c86   :  { %30922 = vmatmul.mubr.f32.vlgmr.msra.gmra.mrb[110].mxu1 %v17727_v47 }
0x2c87   :  { %33040 = vmatpush3.bf16.msra.mxu1 %v34628_v57  ;;  %30928 = vmatprep.mubr.msk.f32.mxu1 %vm34420_vm1, %v34421_v1 }
0x2c88   :  { %33041 = vmatprep.subr.bf16.mxu1 %v34419_v0 }
0x2c8e   :  { %30929 = vmatmul.mubr.f32.vlgmr.msra.gmra.mrb[110].mxu1 %v17725_v35 }
0x2c8f   :  { %33043 = vmatpush3.bf16.msra.mxu1 %v34618_v46  ;;  %30935 = vmatprep.mubr.msk.f32.mxu1 %vm34420_vm1, %v34421_v1 }
0x2c90   :  { %33044 = vmatprep.subr.bf16.mxu1 %v34419_v0 }
0x2c96   :  { %30936 = vmatmul.mubr.f32.vlgmr.msra.gmra.mrb[110].mxu1 %v17725_v35 }
0x2c97   :  { %33046 = vmatpush3.bf16.msra.mxu1 %v34556_v11  ;;  %30946 = vmatprep.mubr.msk.f32.mxu1 %vm34420_vm1, %v34421_v1 }
0x2c98   :  { %33047 = vmatprep.subr.bf16.mxu1 %v34419_v0 }
0x2c9b   :  { %33049 = vmatpush3.bf16.msra.mxu1 %v34559_v14 }
0x2c9c   :  { %33050 = vmatprep.subr.bf16.mxu1 %v34419_v0 }
0x2d69   :  { %v18113_v44 = vpop.f32.mrb[110].mxu1 }
0x2d6a   :  { %v33610_v54 = vadd.f32 %v36062_v51, %v18113_v44  ;;  %v30937_v63 = vpop.f32.mrb[111].mxu1 }
0x2d6c   :  { %v27469_v42 = vmul.f32 -1.442695, %v33610_v54 }
0x2d6e   :  { %34183 = vpow2.f32 %v27469_v42 }
0x2d78   :  { %v34184_v52 = vpop.eup %34183 }
0x2d79   :  { %v18120_v24 = vadd.f32 1.0, %v34184_v52 }
0x2d7b   :  { %34185 = vrcp.f32 %v18120_v24 }
0x2d85   :  { %v34186_v59 = vpop.eup %34185 }
0x2d86   :  { %v18123_v3 = vmul.f32 2.0, %v34186_v59 }
0x2d88   :  { %v36066_v2 = vmul.f32 %v18123_v3, %v35985_v6 }
0x2d8a   :  { %v18126_v5 = vsel %vm106_vm2, %v36066_v2, 0 }
0x2d8b   :  { %v18197_v60 = vand.u32 4294901760, %v18126_v5 }
0x2d8d   :  { %v18198_v22 = vsub.f32 %v18126_v5, %v18197_v60 }
0x2d8f   :  { %v18199_v16 = vand.u32 4294901760, %v18198_v22 }
0x2d91   :  { %v18200_v49 = vsub.f32 %v18198_v22, %v18199_v16 }
0x2d93   :  { %v18201_v17 = vand.u32 4294901760, %v18200_v49 }
0x2d95   :  { %30947 = vmatmul.mubr.f32.vlgmr.msra.gmra.mrb[112].mxu1 %v18201_v17 }
0x2d96   :  { %33052 = vmatpush3.bf16.msra.mxu1 %v34568_v33  ;;  %30957 = vmatprep.mubr.msk.f32.mxu1 %vm34420_vm1, %v34421_v1 }
0x2d97   :  { %33053 = vmatprep.subr.bf16.mxu1 %v34419_v0 }
0x2d9a   :  { %33055 = vmatpush3.bf16.msra.mxu1 %v34571_v37 }
0x2d9b   :  { %33056 = vmatprep.subr.bf16.mxu1 %v34419_v0 }
0x2d9d   :  { %30958 = vmatmul.mubr.f32.vlgmr.msra.gmra.mrb[112].mxu1 %v18197_v60 }
0x2d9e   :  { %33058 = vmatpush3.bf16.msra.mxu1 %v34577_v38  ;;  %30968 = vmatprep.mubr.msk.f32.mxu1 %vm34420_vm1, %v34421_v1 }
0x2d9f   :  { %33059 = vmatprep.subr.bf16.mxu1 %v34419_v0 }
0x2da2   :  { %33061 = vmatpush3.bf16.msra.mxu1 %v34581_v39 }
0x2da3   :  { %33062 = vmatprep.subr.bf16.mxu1 %v34419_v0 }
0x2da5   :  { %30969 = vmatmul.mubr.f32.vlgmr.msra.gmra.mrb[112].mxu1 %v18198_v22 }
0x2da6   :  { %33064 = vmatpush3.bf16.msra.mxu1 %v34556_v11  ;;  %30979 = vmatprep.mubr.msk.f32.mxu1 %vm34420_vm1, %v34421_v1 }
0x2da7   :  { %33065 = vmatprep.subr.bf16.mxu1 %v34419_v0 }
0x2daa   :  { %33067 = vmatpush3.bf16.msra.mxu1 %v34559_v14 }
0x2dab   :  { %33068 = vmatprep.subr.bf16.mxu1 %v34419_v0 }
0x2dad   :  { %30980 = vmatmul.mubr.f32.vlgmr.msra.gmra.mrb[112].mxu1 %v18199_v16 }
0x2dae   :  { %33070 = vmatpush3.bf16.msra.mxu1 %v34593_v40  ;;  %30990 = vmatprep.mubr.msk.f32.mxu1 %vm34420_vm1, %v34421_v1 }
0x2daf   :  { %33071 = vmatprep.subr.bf16.mxu1 %v34419_v0 }
0x2db2   :  { %33073 = vmatpush3.bf16.msra.mxu1 %v34597_v41 }
0x2db3   :  { %33074 = vmatprep.subr.bf16.mxu1 %v34419_v0 }
0x2db5   :  { %30991 = vmatmul.mubr.f32.vlgmr.msra.gmra.mrb[112].mxu1 %v18197_v60 }
0x2db6   :  { %33076 = vmatpush3.bf16.msra.mxu1 %v34556_v11  ;;  %31001 = vmatprep.mubr.msk.f32.mxu1 %vm34420_vm1, %v34421_v1 }
0x2db7   :  { %33077 = vmatprep.subr.bf16.mxu1 %v34419_v0 }
0x2dba   :  { %33079 = vmatpush3.bf16.msra.mxu1 %v34559_v14 }
0x2dbb   :  { %33134 = vmatprep.subr.bf16.mxu1 %v34419_v0 }
0x2dbd   :  { %31002 = vmatmul.mubr.f32.vlgmr.msra.gmra.mrb[112].mxu1 %v18197_v60 }
0x2dbe   :  { %33136 = vmatpush3.bf16.msra.mxu1 %v34747_v61  ;;  %31120 = vmatprep.mubr.msk.f32.mxu1 %vm34420_vm1, %v34421_v1 }
0x2dbf   :  { %33137 = vmatprep.subr.bf16.mxu1 %v34419_v0 }
0x2dc2   :  { %33139 = vmatpush3.bf16.msra.mxu1 %v34757_v8 }
0x2dc3   :  { %33140 = vmatprep.subr.bf16.mxu1 %v34419_v0 }
0x2e90   :  { %v18609_v6 = vpop.f32.mrb[112].mxu1 }
0x2e91   :  { %v33611_v20 = vadd.f32 %v35943_v25, %v18609_v6  ;;  %v31003_v23 = vpop.f32.mrb[113].mxu1 }
0x2e93   :  { %v27470_v15 = vmul.f32 -1.442695, %v33611_v20 }
0x2e95   :  { %34187 = vpow2.f32 %v27470_v15 }
0x2e9f   :  { %v34188_v18 = vpop.eup %34187 }
0x2ea0   :  { %v18616_v26 = vadd.f32 1.0, %v34188_v18 }
0x2ea2   :  { %34189 = vrcp.f32 %v18616_v26 }
0x2eac   :  { %v34190_v19 = vpop.eup %34189 }
0x2ead   :  { %v18619_v32 = vmul.f32 2.0, %v34190_v19 }
0x2eaf   :  { %v36108_v43 = vmul.f32 %v18619_v32, %v36029_v36 }
0x2eb1   :  { %v18622_v58 = vsel %vm609_vm3, %v36108_v43, 0 }
0x2eb2   :  { %v18691_v62 = vand.u32 4294901760, %v18622_v58 }
0x2eb4   :  { %v18692_v34 = vsub.f32 %v18622_v58, %v18691_v62 }
0x2eb6   :  { %v18693_v53 = vand.u32 4294901760, %v18692_v34 }
0x2eb8   :  { %v18694_v35 = vsub.f32 %v18692_v34, %v18693_v53 }
0x2eba   :  { %v18695_v45 = vand.u32 4294901760, %v18694_v35 }
0x2ebc   :  { %31009 = vmatmul.mubr.f32.vlgmr.msra.gmra.mrb[62].mxu0 %v18695_v45 }
0x2ebd   :  { %33085 = vmatpush3.bf16.msra.mxu0 %v34624_v55  ;;  %31015 = vmatprep.mubr.msk.f32.mxu0 %vm34420_vm1, %v34421_v1 }
0x2ebe   :  { %33086 = vmatprep.subr.bf16.mxu0 %v34419_v0 }
0x2ec4   :  { %31016 = vmatmul.mubr.f32.vlgmr.msra.gmra.mrb[62].mxu0 %v18691_v62 }
0x2ec5   :  { %33088 = vmatpush3.bf16.msra.mxu0 %v34626_v56  ;;  %31022 = vmatprep.mubr.msk.f32.mxu0 %vm34420_vm1, %v34421_v1 }
0x2ec6   :  { %33089 = vmatprep.subr.bf16.mxu0 %v34419_v0 }
0x2ecc   :  { %31023 = vmatmul.mubr.f32.vlgmr.msra.gmra.mrb[62].mxu0 %v18692_v34 }
0x2ecd   :  { %33091 = vmatpush3.bf16.msra.mxu0 %v34618_v46  ;;  %31029 = vmatprep.mubr.msk.f32.mxu0 %vm34420_vm1, %v34421_v1 }
0x2ece   :  { %33092 = vmatprep.subr.bf16.mxu0 %v34419_v0 }
0x2ed4   :  { %31030 = vmatmul.mubr.f32.vlgmr.msra.gmra.mrb[62].mxu0 %v18693_v53 }
0x2ed5   :  { %33094 = vmatpush3.bf16.msra.mxu0 %v34628_v57  ;;  %31036 = vmatprep.mubr.msk.f32.mxu0 %vm34420_vm1, %v34421_v1 }
0x2ed6   :  { %33095 = vmatprep.subr.bf16.mxu0 %v34419_v0 }
0x2edc   :  { %31037 = vmatmul.mubr.f32.vlgmr.msra.gmra.mrb[62].mxu0 %v18691_v62 }
0x2edd   :  { %33097 = vmatpush3.bf16.msra.mxu0 %v34618_v46  ;;  %31043 = vmatprep.mubr.msk.f32.mxu0 %vm34420_vm1, %v34421_v1 }
0x2ede   :  { %33098 = vmatprep.subr.bf16.mxu0 %v34419_v0 }
0x2ee4   :  { %31044 = vmatmul.mubr.f32.vlgmr.msra.gmra.mrb[62].mxu0 %v18691_v62 }
0x2ee5   :  { %33100 = vmatpush3.bf16.msra.mxu0 %v34556_v11  ;;  %31054 = vmatprep.mubr.msk.f32.mxu0 %vm34420_vm1, %v34421_v1 }
0x2ee6   :  { %33101 = vmatprep.subr.bf16.mxu0 %v34419_v0 }
0x2ee9   :  { %33103 = vmatpush3.bf16.msra.mxu0 %v34559_v14 }
0x2eea   :  { %33104 = vmatprep.subr.bf16.mxu0 %v34419_v0 }
0x2fb7   :  { %v19079_v36 = vpop.f32.mrb[62].mxu0 }
0x2fb8   :  { %v33612_v47 = vadd.f32 %v36062_v51, %v19079_v36  ;;  %v31045_v7 = vpop.f32.mrb[63].mxu0 }
0x2fba   :  { %v27471_v50 = vmul.f32 -1.442695, %v33612_v47 }
0x2fbc   :  { %34191 = vpow2.f32 %v27471_v50 }
0x2fc6   :  { %v34192_v44 = vpop.eup %34191 }
0x2fc7   :  { %v19086_v54 = vadd.f32 1.0, %v34192_v44 }
0x2fc9   :  { %34193 = vrcp.f32 %v19086_v54 }
0x2fd3   :  { %v34194_v63 = vpop.eup %34193 }
0x2fd4   :  { %v19089_v42 = vmul.f32 2.0, %v34194_v63 }
0x2fd6   :  { %v19090_v52 = vmul.f32 %v19089_v42, %v36066_v2 }
0x2fd8   :  { %v19092_v24 = vsel %vm106_vm2, %v19090_v52, 0 }
0x2fd9   :  { %v36141_v59 = vand.u32 4294901760, %v19092_v24 }
0x2fdb   :  { %v19164_v3 = vsub.f32 %v19092_v24, %v36141_v59 }
0x2fdd   :  { %v19165_v5 = vand.u32 4294901760, %v19164_v3 }
0x2fdf   :  { %v19166_v60 = vsub.f32 %v19164_v3, %v19165_v5 }
0x2fe1   :  { %v19167_v22 = vand.u32 4294901760, %v19166_v60 }
0x2fe3   :  { %31055 = vmatmul.mubr.f32.vlgmr.msra.gmra.mrb[64].mxu0 %v19167_v22  ;;  %31121 = vmatmul.mubr.f32.vlgmr.msra.gmra.mrb[114].mxu1 %v19167_v22 }
0x2fe4   :  { %33106 = vmatpush3.bf16.msra.mxu0 %v34568_v33  ;;  %33142 = vmatpush3.bf16.msra.mxu1 %v34761_v21 }
0x2fe5   :  { %33107 = vmatprep.subr.bf16.mxu0 %v34419_v0  ;;  %33143 = vmatprep.subr.bf16.mxu1 %v34419_v0 }
0x2fe6   :  { %31131 = vmatprep.mubr.msk.f32.mxu1 %vm34420_vm1, %v34421_v1  ;;  %31065 = vmatprep.mubr.msk.f32.mxu0 %vm34420_vm1, %v34421_v1 }
0x2fe8   :  { %33109 = vmatpush3.bf16.msra.mxu0 %v34571_v37  ;;  %33145 = vmatpush3.bf16.msra.mxu1 %v34763_v27 }
0x2fe9   :  { %33110 = vmatprep.subr.bf16.mxu0 %v34419_v0  ;;  %33146 = vmatprep.subr.bf16.mxu1 %v34419_v0 }
0x2feb   :  { %31132 = vmatmul.mubr.f32.vlgmr.msra.gmra.mrb[116].mxu1 %v36141_v59  ;;  %31066 = vmatmul.mubr.f32.vlgmr.msra.gmra.mrb[64].mxu0 %v36141_v59 }
0x2fec   :  { %33112 = vmatpush3.bf16.msra.mxu0 %v34577_v38  ;;  %33148 = vmatpush3.bf16.msra.mxu1 %v34765_v28 }
0x2fed   :  { %33113 = vmatprep.subr.bf16.mxu0 %v34419_v0  ;;  %33149 = vmatprep.subr.bf16.mxu1 %v34419_v0 }
0x2fee   :  { %31142 = vmatprep.mubr.msk.f32.mxu1 %vm34420_vm1, %v34421_v1  ;;  %31076 = vmatprep.mubr.msk.f32.mxu0 %vm34420_vm1, %v34421_v1 }
0x2ff0   :  { %33115 = vmatpush3.bf16.msra.mxu0 %v34581_v39  ;;  %33151 = vmatpush3.bf16.msra.mxu1 %v34767_v29 }
0x2ff1   :  { %33116 = vmatprep.subr.bf16.mxu0 %v34419_v0  ;;  %33152 = vmatprep.subr.bf16.mxu1 %v34419_v0 }
0x2ff3   :  { %31143 = vmatmul.mubr.f32.vlgmr.msra.gmra.mrb[118].mxu1 %v19164_v3  ;;  %31077 = vmatmul.mubr.f32.vlgmr.msra.gmra.mrb[64].mxu0 %v19164_v3 }
0x2ff4   :  { %33118 = vmatpush3.bf16.msra.mxu0 %v34556_v11  ;;  %33154 = vmatpush3.bf16.msra.mxu1 %v34747_v61 }
0x2ff5   :  { %33119 = vmatprep.subr.bf16.mxu0 %v34419_v0  ;;  %33155 = vmatprep.subr.bf16.mxu1 %v34419_v0 }
0x2ff6   :  { %31153 = vmatprep.mubr.msk.f32.mxu1 %vm34420_vm1, %v34421_v1  ;;  %31087 = vmatprep.mubr.msk.f32.mxu0 %vm34420_vm1, %v34421_v1 }
0x2ff8   :  { %33121 = vmatpush3.bf16.msra.mxu0 %v34559_v14  ;;  %33157 = vmatpush3.bf16.msra.mxu1 %v34757_v8 }
0x2ff9   :  { %33122 = vmatprep.subr.bf16.mxu0 %v34419_v0  ;;  %33158 = vmatprep.subr.bf16.mxu1 %v34419_v0 }
0x2ffb   :  { %31154 = vmatmul.mubr.f32.vlgmr.msra.gmra.mrb[120].mxu1 %v19165_v5  ;;  %31088 = vmatmul.mubr.f32.vlgmr.msra.gmra.mrb[64].mxu0 %v19165_v5 }
0x2ffc   :  { %33124 = vmatpush3.bf16.msra.mxu0 %v34593_v40  ;;  %33160 = vmatpush3.bf16.msra.mxu1 %v34769_v30 }
0x2ffd   :  { %33125 = vmatprep.subr.bf16.mxu0 %v34419_v0  ;;  %33161 = vmatprep.subr.bf16.mxu1 %v34419_v0 }
0x2ffe   :  { %31164 = vmatprep.mubr.msk.f32.mxu1 %vm34420_vm1, %v34421_v1  ;;  %31098 = vmatprep.mubr.msk.f32.mxu0 %vm34420_vm1, %v34421_v1 }
0x3000   :  { %33127 = vmatpush3.bf16.msra.mxu0 %v34597_v41  ;;  %33163 = vmatpush3.bf16.msra.mxu1 %v34771_v31 }
0x3001   :  { %33128 = vmatprep.subr.bf16.mxu0 %v34419_v0  ;;  %33164 = vmatprep.subr.bf16.mxu1 %v34419_v0 }
0x3003   :  { %31165 = vmatmul.mubr.f32.vlgmr.msra.gmra.mrb[122].mxu1 %v36141_v59  ;;  %31099 = vmatmul.mubr.f32.vlgmr.msra.gmra.mrb[64].mxu0 %v36141_v59 }
0x3004   :  { %33130 = vmatpush3.bf16.msra.mxu0 %v34556_v11  ;;  %33166 = vmatpush3.bf16.msra.mxu1 %v34747_v61 }
0x3005   :  { %33131 = vmatprep.subr.bf16.mxu0 %v34419_v0  ;;  %33167 = vmatprep.subr.bf16.mxu1 %v34419_v0 }
0x3006   :  { %31175 = vmatprep.mubr.msk.f32.mxu1 %vm34420_vm1, %v34421_v1  ;;  %31109 = vmatprep.mubr.msk.f32.mxu0 %vm34420_vm1, %v34421_v1 }
0x3008   :  { %33133 = vmatpush3.bf16.msra.mxu0 %v34559_v14  ;;  %33169 = vmatpush3.bf16.msra.mxu1 %v34757_v8 }
0x3009   :  { %33173 = vmatprep.subr.bf16.mxu1 %v34419_v0  ;;  %33170 = vmatprep.subr.bf16.mxu0 %v34419_v0 }
0x300b   :  { %31176 = vmatmul.mubr.f32.vlgmr.msra.gmra.mrb[124].mxu1 %v36141_v59  ;;  %31110 = vmatmul.mubr.f32.vlgmr.msra.gmra.mrb[64].mxu0 %v36141_v59 }
0x300c   :  { %33175 = vmatpush3.bf16.msra.mxu1 %v34851_v10  ;;  %31189 = vmatprep.mubr.msk.f32.mxu1 %vm34420_vm1, %v34421_v1 }
0x300d   :  { %33179 = vmatprep.subr.bf16.mxu1 %v34419_v0  ;;  %33172 = vmatpush3.bf16.msra.mxu0 %v34849_v9 }
0x300e   :  { %31182 = vmatprep.mubr.msk.f32.mxu0 %vm34420_vm1, %v34421_v1  ;;  %33176 = vmatprep.subr.bf16.mxu0 %v34419_v0 }
0x30b6   :  { %v19662_v2 = vpop.f32.mrb[114].mxu1 }
0x30b7   :  { %v31122_v16 = vpop.f32.mrb[115].mxu1 }
0x30be   :  { %v19753_v49 = vpop.f32.mrb[116].mxu1 }
0x30bf   :  { %v19754_v17 = vadd.f32 %v19753_v49, %v19662_v2  ;;  %v31133_v6 = vpop.f32.mrb[117].mxu1 }
0x30c6   :  { %v19833_v20 = vpop.f32.mrb[118].mxu1 }
0x30c7   :  { %v19834_v23 = vadd.f32 %v19833_v20, %v19754_v17  ;;  %v31144_v15 = vpop.f32.mrb[119].mxu1 }
0x30ce   :  { %v19910_v18 = vpop.f32.mrb[120].mxu1 }
0x30cf   :  { %v19911_v26 = vadd.f32 %v19910_v18, %v19834_v23  ;;  %v31155_v19 = vpop.f32.mrb[121].mxu1 }
0x30d6   :  { %v19993_v32 = vpop.f32.mrb[122].mxu1 }
0x30d7   :  { %v19994_v58 = vadd.f32 %v19993_v32, %v19911_v26  ;;  %v31166_v62 = vpop.f32.mrb[123].mxu1 }
0x30de   :  { %v20068_v34 = vpop.f32.mrb[124].mxu1  ;;  %v19575_v53 = vpop.f32.mrb[64].mxu0 }
0x30df   :  { %v20069_v35 = vadd.f32 %v20068_v34, %v19994_v58  ;;  %v33613_v45 = vadd.f32 %v35943_v25, %v19575_v53  ;;  %v31177_v36 = vpop.f32.mrb[125].mxu1  ;;  %v31111_v47 = vpop.f32.mrb[65].mxu0 }
0x30e1   :  { %v27472_v7 = vmul.f32 -1.442695, %v33613_v45 }
0x30e3   :  { %34195 = vpow2.f32 %v27472_v7 }
0x30ed   :  { %v34196_v50 = vpop.eup %34195 }
0x30ee   :  { %v19582_v44 = vadd.f32 1.0, %v34196_v50 }
0x30f0   :  { %34197 = vrcp.f32 %v19582_v44 }
0x30fa   :  { %v34198_v54 = vpop.eup %34197 }
0x30fb   :  { %v19585_v63 = vmul.f32 2.0, %v34198_v54 }
0x30fd   :  { %v19586_v42 = vmul.f32 %v19585_v63, %v36108_v43 }
0x30ff   :  { %v20073_v52 = vsel %vm609_vm3, %v19586_v42, 0 }
0x3100   :  { %v20142_v24 = vand.u32 4294901760, %v20073_v52 }
0x3102   :  { %v20143_v59 = vsub.f32 %v20073_v52, %v20142_v24  ;;  %31190 = vmatmul.mubr.f32.vlgmr.msra.gmra.mrb[126].mxu1 %v20142_v24 }
0x3103   :  { %33181 = vmatpush3.bf16.msra.mxu1 %v34849_v9  ;;  %31203 = vmatprep.mubr.msk.f32.mxu1 %vm34420_vm1, %v34421_v1 }
0x3104   :  { %v20144_v3 = vand.u32 4294901760, %v20143_v59  ;;  %33185 = vmatprep.subr.bf16.mxu1 %v34419_v0 }
0x3106   :  { %31204 = vmatmul.mubr.f32.vlgmr.msra.gmra.mrb[128].mxu1 %v20144_v3  ;;  %v20145_v5 = vsub.f32 %v20143_v59, %v20144_v3 }
0x3107   :  { %33187 = vmatpush3.bf16.msra.mxu1 %v34849_v9  ;;  %31217 = vmatprep.mubr.msk.f32.mxu1 %vm34420_vm1, %v34421_v1 }
0x3108   :  { %v20146_v43 = vand.u32 4294901760, %v20145_v5  ;;  %33224 = vmatprep.subr.bf16.mxu1 %v34419_v0 }
0x310a   :  { %31183 = vmatmul.mubr.f32.vlgmr.msra.gmra.mrb[66].mxu0 %v20146_v43  ;;  %31218 = vmatmul.mubr.f32.vlgmr.msra.gmra.mrb[130].mxu1 %v20142_v24 }
0x310b   :  { %33178 = vmatpush3.bf16.msra.mxu0 %v34857_v12  ;;  %31196 = vmatprep.mubr.msk.f32.mxu0 %vm34420_vm1, %v34421_v1 }
0x310c   :  { %33182 = vmatprep.subr.bf16.mxu0 %v34419_v0  ;;  %33226 = vmatpush3.bf16.msra.mxu1 %v34618_v46 }
0x310d   :  { %31290 = vmatprep.mubr.msk.f32.mxu1 %vm34420_vm1, %v34421_v1  ;;  %33227 = vmatprep.subr.bf16.mxu1 %v34419_v0 }
0x310e   :  { %31197 = vmatmul.mubr.f32.vlgmr.msra.gmra.mrb[68].mxu0 %v20143_v59 }
0x310f   :  { %33184 = vmatpush3.bf16.msra.mxu0 %v34859_v13  ;;  %31210 = vmatprep.mubr.msk.f32.mxu0 %vm34420_vm1, %v34421_v1 }
0x3110   :  { %33188 = vmatprep.subr.bf16.mxu0 %v34419_v0 }
0x3112   :  { %31211 = vmatmul.mubr.f32.vlgmr.msra.gmra.mrb[70].mxu0 %v20142_v24 }
0x3113   :  { %33190 = vmatpush3.bf16.msra.mxu0 %v34556_v11  ;;  %31228 = vmatprep.mubr.msk.f32.mxu0 %vm34420_vm1, %v34421_v1 }
0x3114   :  { %33191 = vmatprep.subr.bf16.mxu0 %v34419_v0 }
0x3117   :  { %33193 = vmatpush3.bf16.msra.mxu0 %v34559_v14 }
0x3118   :  { %33194 = vmatprep.subr.bf16.mxu0 %v34419_v0 }
0x31d5   :  { %v20229_v60 = vpop.f32.mrb[126].mxu1 }
0x31d6   :  { %v31191_v22 = vpop.f32.mrb[127].mxu1 }
0x31d9   :  { %v20380_v2 = vpop.f32.mrb[128].mxu1 }
0x31da   :  { %v31205_v16 = vpop.f32.mrb[129].mxu1 }
0x31dd   :  { %v20148_v49 = vpop.f32.mrb[66].mxu0  ;;  %v20530_v17 = vpop.f32.mrb[130].mxu1 }
0x31de   :  { %v20149_v6 = vadd.f32 %v20148_v49, %v20069_v35  ;;  %v31184_v20 = vpop.f32.mrb[67].mxu0  ;;  %v31219_v23 = vpop.f32.mrb[131].mxu1 }
0x31e0   :  { %v20230_v15 = vadd.f32 %v20229_v60, %v20149_v6 }
0x31e1   :  { %v20305_v18 = vpop.f32.mrb[68].mxu0 }
0x31e2   :  { %v20306_v26 = vadd.f32 %v20305_v18, %v20230_v15  ;;  %v31198_v19 = vpop.f32.mrb[69].mxu0  ;;  %v27474_v18 = vld [vmem:[%s36837_s0 + $0xc] sm:$0x3] }
0x31e4   :  { %v20381_v32 = vadd.f32 %v20380_v2, %v20306_v26 }
0x31e5   :  { %v20457_v58 = vpop.f32.mrb[70].mxu0 }
0x31e6   :  { %v20458_v62 = vadd.f32 %v20457_v58, %v20381_v32  ;;  %v31212_v34 = vpop.f32.mrb[71].mxu0 }
0x31e8   :  { %v20531_v53 = vadd.f32 %v20530_v17, %v20458_v62 }
0x31ea   :  { %v20534_v45 = vadd.f32 %v35974_v48, %v20531_v53 }
0x31ec   :  { %34199 = vtanh.f32 %v20534_v45  ;;  %v27473_v47 = vmul.f32 -1.442695, %v20534_v45 }
0x31ee   :  { %34201 = vpow2.f32 %v27473_v47 }
0x31f6   :  { %v34200_v36 = vpop.eup %34199 }
0x31f7   :  { %20544 = vrot.lane.b32.xlu1 %v34200_v36, %s34422_s2 }
0x31f8   :  { %v34202_v35 = vpop.eup %34201 }
0x31f9   :  { %v20538_v7 = vadd.f32 1.0, %v34202_v35 }
0x31fb   :  { %34203 = vrcp.f32 %v20538_v7 }
0x3205   :  { %v34204_v50 = vpop.eup %34203 }
0x3206   :  { %v20542_v63 = vmul.f32 %v34204_v50, %v35980_v4 }
0x3269   :  { %v20545_v44 = vpop.permute.xlu1 %20544 }
0x326a   :  { %v20547_v54 = vmul.f32 %v34204_v50, %v20545_v44 }
0x326c   :  { %20549 = vrot.lane.b32.xlu0 %v20547_v54, %s34423_s17 }
0x32de   :  { %v20550_v42 = vpop.permute.xlu0 %20549 }
0x32df   :  { %v36251_v52 = vadd.f32 %v20550_v42, %v20542_v63 }
0x32e1   :  { %34205 = vtanh.f32 %v36251_v52 }
0x32eb   :  { %v34206_v48 = vpop.eup %34205 }
0x32ec   :  { %20555 = vrot.lane.b32.xlu1 %v34206_v48, %s34422_s2 }
0x335e   :  { %v20556_v24 = vpop.permute.xlu1 %20555 }
0x335f   :  { %v20558_v59 = vmul.f32 %v34204_v50, %v20556_v24 }
0x3361   :  { %20560 = vrot.lane.b32.xlu0 %v20558_v59, %s34423_s17 }
0x33d3   :  { %v36256_v3 = vpop.permute.xlu0 %20560 }
0x33d4   :  { %20564 = vst.msk [vmem:[#allocation8 + $0xa] sm:$0x3] %vm79_vm0, %v36256_v3  ;;  %v20567_v4 = vsel %vm106_vm2, %v36256_v3, 0 }
0x33d5   :  { %v20638_v5 = vand.u32 4294901760, %v20567_v4 }
0x33d7   :  { %v20639_v43 = vsub.f32 %v20567_v4, %v20638_v5 }
0x33d9   :  { %v20640_v60 = vand.u32 4294901760, %v20639_v43 }
0x33db   :  { %v20641_v22 = vsub.f32 %v20639_v43, %v20640_v60 }
0x33dd   :  { %v20642_v2 = vand.u32 4294901760, %v20641_v22 }
0x33df   :  { %31229 = vmatmul.mubr.f32.vlgmr.msra.gmra.mrb[72].mxu0 %v20642_v2 }
0x33e0   :  { %33196 = vmatpush3.bf16.msra.mxu0 %v34568_v33  ;;  %31239 = vmatprep.mubr.msk.f32.mxu0 %vm34420_vm1, %v34421_v1 }
0x33e1   :  { %33197 = vmatprep.subr.bf16.mxu0 %v34419_v0 }
0x33e4   :  { %33199 = vmatpush3.bf16.msra.mxu0 %v34571_v37 }
0x33e5   :  { %33200 = vmatprep.subr.bf16.mxu0 %v34419_v0 }
0x33e7   :  { %31240 = vmatmul.mubr.f32.vlgmr.msra.gmra.mrb[72].mxu0 %v20638_v5 }
0x33e8   :  { %33202 = vmatpush3.bf16.msra.mxu0 %v34577_v38  ;;  %31250 = vmatprep.mubr.msk.f32.mxu0 %vm34420_vm1, %v34421_v1 }
0x33e9   :  { %33203 = vmatprep.subr.bf16.mxu0 %v34419_v0 }
0x33ec   :  { %33205 = vmatpush3.bf16.msra.mxu0 %v34581_v39 }
0x33ed   :  { %33206 = vmatprep.subr.bf16.mxu0 %v34419_v0 }
0x33ef   :  { %31251 = vmatmul.mubr.f32.vlgmr.msra.gmra.mrb[72].mxu0 %v20639_v43  ;;  %v36372_v43 = vld [vmem:[#allocation7] ss:$0 sm:$0xff] }
0x33f0   :  { %33208 = vmatpush3.bf16.msra.mxu0 %v34556_v11  ;;  %31261 = vmatprep.mubr.msk.f32.mxu0 %vm34420_vm1, %v34421_v1 }
0x33f1   :  { %33209 = vmatprep.subr.bf16.mxu0 %v34419_v0 }
0x33f4   :  { %33211 = vmatpush3.bf16.msra.mxu0 %v34559_v14 }
0x33f5   :  { %33212 = vmatprep.subr.bf16.mxu0 %v34419_v0 }
0x33f7   :  { %31262 = vmatmul.mubr.f32.vlgmr.msra.gmra.mrb[72].mxu0 %v20640_v60 }
0x33f8   :  { %33214 = vmatpush3.bf16.msra.mxu0 %v34593_v40  ;;  %31272 = vmatprep.mubr.msk.f32.mxu0 %vm34420_vm1, %v34421_v1 }
0x33f9   :  { %33215 = vmatprep.subr.bf16.mxu0 %v34419_v0 }
0x33fc   :  { %33217 = vmatpush3.bf16.msra.mxu0 %v34597_v41 }
0x33fd   :  { %33218 = vmatprep.subr.bf16.mxu0 %v34419_v0 }
0x33ff   :  { %31273 = vmatmul.mubr.f32.vlgmr.msra.gmra.mrb[72].mxu0 %v20638_v5 }
0x3400   :  { %33220 = vmatpush3.bf16.msra.mxu0 %v34556_v11  ;;  %31283 = vmatprep.mubr.msk.f32.mxu0 %vm34420_vm1, %v34421_v1 }
0x3401   :  { %33221 = vmatprep.subr.bf16.mxu0 %v34419_v0 }
0x3404   :  { %33223 = vmatpush3.bf16.msra.mxu0 %v34559_v14 }
0x3405   :  { %33278 = vmatprep.subr.bf16.mxu0 %v34419_v0 }
0x3407   :  { %31284 = vmatmul.mubr.f32.vlgmr.msra.gmra.mrb[72].mxu0 %v20638_v5 }
0x3408   :  { %33280 = vmatpush3.bf16.msra.mxu0 %v34618_v46  ;;  %31398 = vmatprep.mubr.msk.f32.mxu0 %vm34420_vm1, %v34421_v1 }
0x3409   :  { %33281 = vmatprep.subr.bf16.mxu0 %v34419_v0 }
0x34da   :  { %v21050_v16 = vpop.f32.mrb[72].mxu0 }
0x34db   :  { %v33614_v49 = vadd.f32 %v35943_v25, %v21050_v16  ;;  %v31285_v17 = vpop.f32.mrb[73].mxu0 }
0x34dd   :  { %v27475_v6 = vmul.f32 -1.442695, %v33614_v49 }
0x34df   :  { %34207 = vpow2.f32 %v27475_v6 }
0x34e9   :  { %v34208_v20 = vpop.eup %34207 }
0x34ea   :  { %v21057_v23 = vadd.f32 1.0, %v34208_v20 }
0x34ec   :  { %34209 = vrcp.f32 %v21057_v23 }
0x34f6   :  { %v34210_v15 = vpop.eup %34209 }
0x34f7   :  { %v21060_v26 = vmul.f32 2.0, %v34210_v15 }
0x34f9   :  { %v36300_v19 = vmul.f32 %v27474_v18, %v21060_v26 }
0x34fb   :  { %v21063_v32 = vsel %vm609_vm3, %v36300_v19, 0 }
0x34fc   :  { %v21132_v58 = vand.u32 4294901760, %v21063_v32 }
0x34fe   :  { %v21133_v62 = vsub.f32 %v21063_v32, %v21132_v58 }
0x3500   :  { %v21134_v25 = vand.u32 4294901760, %v21133_v62 }
0x3502   :  { %v21135_v34 = vsub.f32 %v21133_v62, %v21134_v25 }
0x3504   :  { %v21136_v53 = vand.u32 4294901760, %v21135_v34 }
0x3506   :  { %31291 = vmatmul.mubr.f32.vlgmr.msra.gmra.mrb[132].mxu1 %v21136_v53 }
0x3507   :  { %33229 = vmatpush3.bf16.msra.mxu1 %v34624_v55  ;;  %31297 = vmatprep.mubr.msk.f32.mxu1 %vm34420_vm1, %v34421_v1 }
0x3508   :  { %33230 = vmatprep.subr.bf16.mxu1 %v34419_v0 }
0x350e   :  { %31298 = vmatmul.mubr.f32.vlgmr.msra.gmra.mrb[132].mxu1 %v21132_v58 }
0x350f   :  { %33232 = vmatpush3.bf16.msra.mxu1 %v34626_v56  ;;  %31304 = vmatprep.mubr.msk.f32.mxu1 %vm34420_vm1, %v34421_v1 }
0x3510   :  { %33233 = vmatprep.subr.bf16.mxu1 %v34419_v0 }
0x3516   :  { %31305 = vmatmul.mubr.f32.vlgmr.msra.gmra.mrb[132].mxu1 %v21133_v62 }
0x3517   :  { %33235 = vmatpush3.bf16.msra.mxu1 %v34618_v46  ;;  %31311 = vmatprep.mubr.msk.f32.mxu1 %vm34420_vm1, %v34421_v1 }
0x3518   :  { %33236 = vmatprep.subr.bf16.mxu1 %v34419_v0 }
0x351e   :  { %31312 = vmatmul.mubr.f32.vlgmr.msra.gmra.mrb[132].mxu1 %v21134_v25 }
0x351f   :  { %33238 = vmatpush3.bf16.msra.mxu1 %v34628_v57  ;;  %31318 = vmatprep.mubr.msk.f32.mxu1 %vm34420_vm1, %v34421_v1 }
0x3520   :  { %33239 = vmatprep.subr.bf16.mxu1 %v34419_v0 }
0x3526   :  { %31319 = vmatmul.mubr.f32.vlgmr.msra.gmra.mrb[132].mxu1 %v21132_v58 }
0x3527   :  { %33241 = vmatpush3.bf16.msra.mxu1 %v34618_v46  ;;  %31325 = vmatprep.mubr.msk.f32.mxu1 %vm34420_vm1, %v34421_v1 }
0x3528   :  { %33242 = vmatprep.subr.bf16.mxu1 %v34419_v0 }
0x352e   :  { %31326 = vmatmul.mubr.f32.vlgmr.msra.gmra.mrb[132].mxu1 %v21132_v58 }
0x352f   :  { %33244 = vmatpush3.bf16.msra.mxu1 %v34556_v11  ;;  %31336 = vmatprep.mubr.msk.f32.mxu1 %vm34420_vm1, %v34421_v1 }
0x3530   :  { %33245 = vmatprep.subr.bf16.mxu1 %v34419_v0 }
0x3533   :  { %33247 = vmatpush3.bf16.msra.mxu1 %v34559_v14 }
0x3534   :  { %33248 = vmatprep.subr.bf16.mxu1 %v34419_v0 }
0x3601   :  { %v21520_v45 = vpop.f32.mrb[132].mxu1 }
0x3602   :  { %v33615_v36 = vadd.f32 %v36062_v51, %v21520_v45  ;;  %v31327_v47 = vpop.f32.mrb[133].mxu1 }
0x3604   :  { %v27476_v35 = vmul.f32 -1.442695, %v33615_v36 }
0x3606   :  { %34211 = vpow2.f32 %v27476_v35 }
0x3610   :  { %v34212_v7 = vpop.eup %34211 }
0x3611   :  { %v21527_v50 = vadd.f32 1.0, %v34212_v7 }
0x3613   :  { %34213 = vrcp.f32 %v21527_v50 }
0x361d   :  { %v34214_v44 = vpop.eup %34213 }
0x361e   :  { %v21530_v54 = vmul.f32 2.0, %v34214_v44 }
0x3620   :  { %v36332_v63 = vmul.f32 %v21530_v54, %v36256_v3 }
0x3622   :  { %v21533_v42 = vsel %vm106_vm2, %v36332_v63, 0 }
0x3623   :  { %v21604_v48 = vand.u32 4294901760, %v21533_v42 }
0x3625   :  { %v21605_v24 = vsub.f32 %v21533_v42, %v21604_v48 }
0x3627   :  { %v21606_v59 = vand.u32 4294901760, %v21605_v24 }
0x3629   :  { %v21607_v4 = vsub.f32 %v21605_v24, %v21606_v59 }
0x362b   :  { %v21608_v5 = vand.u32 4294901760, %v21607_v4 }
0x362d   :  { %31337 = vmatmul.mubr.f32.vlgmr.msra.gmra.mrb[134].mxu1 %v21608_v5 }
0x362e   :  { %33250 = vmatpush3.bf16.msra.mxu1 %v34568_v33  ;;  %31347 = vmatprep.mubr.msk.f32.mxu1 %vm34420_vm1, %v34421_v1 }
0x362f   :  { %33251 = vmatprep.subr.bf16.mxu1 %v34419_v0 }
0x3632   :  { %33253 = vmatpush3.bf16.msra.mxu1 %v34571_v37 }
0x3633   :  { %33254 = vmatprep.subr.bf16.mxu1 %v34419_v0 }
0x3635   :  { %31348 = vmatmul.mubr.f32.vlgmr.msra.gmra.mrb[134].mxu1 %v21604_v48 }
0x3636   :  { %33256 = vmatpush3.bf16.msra.mxu1 %v34577_v38  ;;  %31358 = vmatprep.mubr.msk.f32.mxu1 %vm34420_vm1, %v34421_v1 }
0x3637   :  { %33257 = vmatprep.subr.bf16.mxu1 %v34419_v0 }
0x363a   :  { %33259 = vmatpush3.bf16.msra.mxu1 %v34581_v39 }
0x363b   :  { %33260 = vmatprep.subr.bf16.mxu1 %v34419_v0 }
0x363d   :  { %31359 = vmatmul.mubr.f32.vlgmr.msra.gmra.mrb[134].mxu1 %v21605_v24 }
0x363e   :  { %33262 = vmatpush3.bf16.msra.mxu1 %v34556_v11  ;;  %31369 = vmatprep.mubr.msk.f32.mxu1 %vm34420_vm1, %v34421_v1 }
0x363f   :  { %33263 = vmatprep.subr.bf16.mxu1 %v34419_v0 }
0x3642   :  { %33265 = vmatpush3.bf16.msra.mxu1 %v34559_v14 }
0x3643   :  { %33266 = vmatprep.subr.bf16.mxu1 %v34419_v0 }
0x3645   :  { %31370 = vmatmul.mubr.f32.vlgmr.msra.gmra.mrb[134].mxu1 %v21606_v59 }
0x3646   :  { %33268 = vmatpush3.bf16.msra.mxu1 %v34593_v40  ;;  %31380 = vmatprep.mubr.msk.f32.mxu1 %vm34420_vm1, %v34421_v1 }
0x3647   :  { %33269 = vmatprep.subr.bf16.mxu1 %v34419_v0 }
0x364a   :  { %33271 = vmatpush3.bf16.msra.mxu1 %v34597_v41 }
0x364b   :  { %33272 = vmatprep.subr.bf16.mxu1 %v34419_v0 }
0x364d   :  { %31381 = vmatmul.mubr.f32.vlgmr.msra.gmra.mrb[134].mxu1 %v21604_v48 }
0x364e   :  { %33274 = vmatpush3.bf16.msra.mxu1 %v34556_v11  ;;  %31391 = vmatprep.mubr.msk.f32.mxu1 %vm34420_vm1, %v34421_v1 }
0x364f   :  { %33275 = vmatprep.subr.bf16.mxu1 %v34419_v0 }
0x3652   :  { %33277 = vmatpush3.bf16.msra.mxu1 %v34559_v14 }
0x3653   :  { %33332 = vmatprep.subr.bf16.mxu1 %v34419_v0 }
0x3655   :  { %31392 = vmatmul.mubr.f32.vlgmr.msra.gmra.mrb[134].mxu1 %v21604_v48 }
0x3656   :  { %33334 = vmatpush3.bf16.msra.mxu1 %v34747_v61  ;;  %31510 = vmatprep.mubr.msk.f32.mxu1 %vm34420_vm1, %v34421_v1 }
0x3657   :  { %33335 = vmatprep.subr.bf16.mxu1 %v34419_v0 }
0x365a   :  { %33337 = vmatpush3.bf16.msra.mxu1 %v34757_v8 }
0x365b   :  { %33338 = vmatprep.subr.bf16.mxu1 %v34419_v0 }
0x3728   :  { %v22016_v3 = vpop.f32.mrb[134].mxu1 }
0x3729   :  { %v33616_v60 = vadd.f32 %v36372_v43, %v22016_v3  ;;  %v31393_v22 = vpop.f32.mrb[135].mxu1 }
0x372b   :  { %v27477_v2 = vmul.f32 -1.442695, %v33616_v60 }
0x372d   :  { %34215 = vpow2.f32 %v27477_v2 }
0x3737   :  { %v34216_v16 = vpop.eup %34215 }
0x3738   :  { %v22023_v49 = vadd.f32 1.0, %v34216_v16 }
0x373a   :  { %34217 = vrcp.f32 %v22023_v49 }
0x3744   :  { %v34218_v17 = vpop.eup %34217 }
0x3745   :  { %v22026_v6 = vmul.f32 2.0, %v34218_v17 }
0x3747   :  { %v36376_v20 = vmul.f32 %v22026_v6, %v36300_v19 }
0x3749   :  { %v22029_v23 = vsel %vm609_vm3, %v36376_v20, 0 }
0x374a   :  { %v22098_v15 = vand.u32 4294901760, %v22029_v23 }
0x374c   :  { %v22099_v18 = vsub.f32 %v22029_v23, %v22098_v15 }
0x374e   :  { %v22100_v26 = vand.u32 4294901760, %v22099_v18 }
0x3750   :  { %v22101_v32 = vsub.f32 %v22099_v18, %v22100_v26 }
0x3752   :  { %v22102_v58 = vand.u32 4294901760, %v22101_v32 }
0x3754   :  { %31399 = vmatmul.mubr.f32.vlgmr.msra.gmra.mrb[74].mxu0 %v22102_v58 }
0x3755   :  { %33283 = vmatpush3.bf16.msra.mxu0 %v34624_v55  ;;  %31405 = vmatprep.mubr.msk.f32.mxu0 %vm34420_vm1, %v34421_v1 }
0x3756   :  { %33284 = vmatprep.subr.bf16.mxu0 %v34419_v0 }
0x375c   :  { %31406 = vmatmul.mubr.f32.vlgmr.msra.gmra.mrb[74].mxu0 %v22098_v15 }
0x375d   :  { %33286 = vmatpush3.bf16.msra.mxu0 %v34626_v56  ;;  %31412 = vmatprep.mubr.msk.f32.mxu0 %vm34420_vm1, %v34421_v1 }
0x375e   :  { %33287 = vmatprep.subr.bf16.mxu0 %v34419_v0 }
0x3764   :  { %31413 = vmatmul.mubr.f32.vlgmr.msra.gmra.mrb[74].mxu0 %v22099_v18 }
0x3765   :  { %33289 = vmatpush3.bf16.msra.mxu0 %v34618_v46  ;;  %31419 = vmatprep.mubr.msk.f32.mxu0 %vm34420_vm1, %v34421_v1 }
0x3766   :  { %33290 = vmatprep.subr.bf16.mxu0 %v34419_v0 }
0x376c   :  { %31420 = vmatmul.mubr.f32.vlgmr.msra.gmra.mrb[74].mxu0 %v22100_v26 }
0x376d   :  { %33292 = vmatpush3.bf16.msra.mxu0 %v34628_v57  ;;  %31426 = vmatprep.mubr.msk.f32.mxu0 %vm34420_vm1, %v34421_v1 }
0x376e   :  { %33293 = vmatprep.subr.bf16.mxu0 %v34419_v0 }
0x3774   :  { %31427 = vmatmul.mubr.f32.vlgmr.msra.gmra.mrb[74].mxu0 %v22098_v15 }
0x3775   :  { %33295 = vmatpush3.bf16.msra.mxu0 %v34618_v46  ;;  %31433 = vmatprep.mubr.msk.f32.mxu0 %vm34420_vm1, %v34421_v1 }
0x3776   :  { %33296 = vmatprep.subr.bf16.mxu0 %v34419_v0 }
0x377c   :  { %31434 = vmatmul.mubr.f32.vlgmr.msra.gmra.mrb[74].mxu0 %v22098_v15 }
0x377d   :  { %33298 = vmatpush3.bf16.msra.mxu0 %v34556_v11  ;;  %31444 = vmatprep.mubr.msk.f32.mxu0 %vm34420_vm1, %v34421_v1 }
0x377e   :  { %33299 = vmatprep.subr.bf16.mxu0 %v34419_v0 }
0x3781   :  { %33301 = vmatpush3.bf16.msra.mxu0 %v34559_v14 }
0x3782   :  { %33302 = vmatprep.subr.bf16.mxu0 %v34419_v0 }
0x384f   :  { %v22486_v19 = vpop.f32.mrb[74].mxu0 }
0x3850   :  { %v33617_v62 = vadd.f32 %v36062_v51, %v22486_v19  ;;  %v31435_v25 = vpop.f32.mrb[75].mxu0 }
0x3852   :  { %v27478_v34 = vmul.f32 -1.442695, %v33617_v62 }
0x3854   :  { %34219 = vpow2.f32 %v27478_v34 }
0x385e   :  { %v34220_v53 = vpop.eup %34219 }
0x385f   :  { %v22493_v45 = vadd.f32 1.0, %v34220_v53 }
0x3861   :  { %34221 = vrcp.f32 %v22493_v45 }
0x386b   :  { %v34222_v36 = vpop.eup %34221 }
0x386c   :  { %v22496_v47 = vmul.f32 2.0, %v34222_v36 }
0x386e   :  { %v22497_v35 = vmul.f32 %v22496_v47, %v36332_v63 }
0x3870   :  { %v22499_v7 = vsel %vm106_vm2, %v22497_v35, 0 }
0x3871   :  { %v36409_v50 = vand.u32 4294901760, %v22499_v7 }
0x3873   :  { %v22571_v44 = vsub.f32 %v22499_v7, %v36409_v50 }
0x3875   :  { %v22572_v54 = vand.u32 4294901760, %v22571_v44 }
0x3877   :  { %v22573_v42 = vsub.f32 %v22571_v44, %v22572_v54 }
0x3879   :  { %v22574_v48 = vand.u32 4294901760, %v22573_v42 }
0x387b   :  { %31445 = vmatmul.mubr.f32.vlgmr.msra.gmra.mrb[76].mxu0 %v22574_v48  ;;  %31511 = vmatmul.mubr.f32.vlgmr.msra.gmra.mrb[136].mxu1 %v22574_v48 }
0x387c   :  { %33304 = vmatpush3.bf16.msra.mxu0 %v34568_v33  ;;  %33340 = vmatpush3.bf16.msra.mxu1 %v34761_v21 }
0x387d   :  { %33305 = vmatprep.subr.bf16.mxu0 %v34419_v0  ;;  %33341 = vmatprep.subr.bf16.mxu1 %v34419_v0 }
0x387e   :  { %31521 = vmatprep.mubr.msk.f32.mxu1 %vm34420_vm1, %v34421_v1  ;;  %31455 = vmatprep.mubr.msk.f32.mxu0 %vm34420_vm1, %v34421_v1 }
0x3880   :  { %33307 = vmatpush3.bf16.msra.mxu0 %v34571_v37  ;;  %33343 = vmatpush3.bf16.msra.mxu1 %v34763_v27 }
0x3881   :  { %33308 = vmatprep.subr.bf16.mxu0 %v34419_v0  ;;  %33344 = vmatprep.subr.bf16.mxu1 %v34419_v0 }
0x3883   :  { %31522 = vmatmul.mubr.f32.vlgmr.msra.gmra.mrb[138].mxu1 %v36409_v50  ;;  %31456 = vmatmul.mubr.f32.vlgmr.msra.gmra.mrb[76].mxu0 %v36409_v50 }
0x3884   :  { %33310 = vmatpush3.bf16.msra.mxu0 %v34577_v38  ;;  %33346 = vmatpush3.bf16.msra.mxu1 %v34765_v28 }
0x3885   :  { %33311 = vmatprep.subr.bf16.mxu0 %v34419_v0  ;;  %33347 = vmatprep.subr.bf16.mxu1 %v34419_v0 }
0x3886   :  { %31532 = vmatprep.mubr.msk.f32.mxu1 %vm34420_vm1, %v34421_v1  ;;  %31466 = vmatprep.mubr.msk.f32.mxu0 %vm34420_vm1, %v34421_v1 }
0x3888   :  { %33313 = vmatpush3.bf16.msra.mxu0 %v34581_v39  ;;  %33349 = vmatpush3.bf16.msra.mxu1 %v34767_v29 }
0x3889   :  { %33314 = vmatprep.subr.bf16.mxu0 %v34419_v0  ;;  %33350 = vmatprep.subr.bf16.mxu1 %v34419_v0 }
0x388b   :  { %31533 = vmatmul.mubr.f32.vlgmr.msra.gmra.mrb[140].mxu1 %v22571_v44  ;;  %31467 = vmatmul.mubr.f32.vlgmr.msra.gmra.mrb[76].mxu0 %v22571_v44 }
0x388c   :  { %33316 = vmatpush3.bf16.msra.mxu0 %v34556_v11  ;;  %33352 = vmatpush3.bf16.msra.mxu1 %v34747_v61 }
0x388d   :  { %33317 = vmatprep.subr.bf16.mxu0 %v34419_v0  ;;  %33353 = vmatprep.subr.bf16.mxu1 %v34419_v0 }
0x388e   :  { %31543 = vmatprep.mubr.msk.f32.mxu1 %vm34420_vm1, %v34421_v1  ;;  %31477 = vmatprep.mubr.msk.f32.mxu0 %vm34420_vm1, %v34421_v1 }
0x3890   :  { %33319 = vmatpush3.bf16.msra.mxu0 %v34559_v14  ;;  %33355 = vmatpush3.bf16.msra.mxu1 %v34757_v8 }
0x3891   :  { %33320 = vmatprep.subr.bf16.mxu0 %v34419_v0  ;;  %33356 = vmatprep.subr.bf16.mxu1 %v34419_v0 }
0x3893   :  { %31544 = vmatmul.mubr.f32.vlgmr.msra.gmra.mrb[142].mxu1 %v22572_v54  ;;  %31478 = vmatmul.mubr.f32.vlgmr.msra.gmra.mrb[76].mxu0 %v22572_v54 }
0x3894   :  { %33322 = vmatpush3.bf16.msra.mxu0 %v34593_v40  ;;  %33358 = vmatpush3.bf16.msra.mxu1 %v34769_v30 }
0x3895   :  { %33323 = vmatprep.subr.bf16.mxu0 %v34419_v0  ;;  %33359 = vmatprep.subr.bf16.mxu1 %v34419_v0 }
0x3896   :  { %31554 = vmatprep.mubr.msk.f32.mxu1 %vm34420_vm1, %v34421_v1  ;;  %31488 = vmatprep.mubr.msk.f32.mxu0 %vm34420_vm1, %v34421_v1 }
0x3898   :  { %33325 = vmatpush3.bf16.msra.mxu0 %v34597_v41  ;;  %33361 = vmatpush3.bf16.msra.mxu1 %v34771_v31 }
0x3899   :  { %33326 = vmatprep.subr.bf16.mxu0 %v34419_v0  ;;  %33362 = vmatprep.subr.bf16.mxu1 %v34419_v0 }
0x389b   :  { %31555 = vmatmul.mubr.f32.vlgmr.msra.gmra.mrb[144].mxu1 %v36409_v50  ;;  %31489 = vmatmul.mubr.f32.vlgmr.msra.gmra.mrb[76].mxu0 %v36409_v50 }
0x389c   :  { %33328 = vmatpush3.bf16.msra.mxu0 %v34556_v11  ;;  %33364 = vmatpush3.bf16.msra.mxu1 %v34747_v61 }
0x389d   :  { %33329 = vmatprep.subr.bf16.mxu0 %v34419_v0  ;;  %33365 = vmatprep.subr.bf16.mxu1 %v34419_v0 }
0x389e   :  { %31565 = vmatprep.mubr.msk.f32.mxu1 %vm34420_vm1, %v34421_v1  ;;  %31499 = vmatprep.mubr.msk.f32.mxu0 %vm34420_vm1, %v34421_v1 }
0x38a0   :  { %33331 = vmatpush3.bf16.msra.mxu0 %v34559_v14  ;;  %33367 = vmatpush3.bf16.msra.mxu1 %v34757_v8 }
0x38a1   :  { %33371 = vmatprep.subr.bf16.mxu1 %v34419_v0  ;;  %33368 = vmatprep.subr.bf16.mxu0 %v34419_v0 }
0x38a3   :  { %31566 = vmatmul.mubr.f32.vlgmr.msra.gmra.mrb[146].mxu1 %v36409_v50  ;;  %31500 = vmatmul.mubr.f32.vlgmr.msra.gmra.mrb[76].mxu0 %v36409_v50 }
0x38a4   :  { %33373 = vmatpush3.bf16.msra.mxu1 %v34851_v10  ;;  %31579 = vmatprep.mubr.msk.f32.mxu1 %vm34420_vm1, %v34421_v1 }
0x38a5   :  { %33377 = vmatprep.subr.bf16.mxu1 %v34419_v0  ;;  %33370 = vmatpush3.bf16.msra.mxu0 %v34849_v9 }
0x38a6   :  { %31572 = vmatprep.mubr.msk.f32.mxu0 %vm34420_vm1, %v34421_v1  ;;  %33374 = vmatprep.subr.bf16.mxu0 %v34419_v0 }
0x394e   :  { %v23069_v51 = vpop.f32.mrb[136].mxu1 }
0x394f   :  { %v31512_v63 = vpop.f32.mrb[137].mxu1 }
0x3956   :  { %v23160_v24 = vpop.f32.mrb[138].mxu1 }
0x3957   :  { %v23161_v59 = vadd.f32 %v23160_v24, %v23069_v51  ;;  %v31523_v4 = vpop.f32.mrb[139].mxu1 }
0x395e   :  { %v23240_v5 = vpop.f32.mrb[140].mxu1 }
0x395f   :  { %v23241_v3 = vadd.f32 %v23240_v5, %v23161_v59  ;;  %v31534_v60 = vpop.f32.mrb[141].mxu1 }
0x3966   :  { %v23317_v22 = vpop.f32.mrb[142].mxu1 }
0x3967   :  { %v23318_v2 = vadd.f32 %v23317_v22, %v23241_v3  ;;  %v31545_v16 = vpop.f32.mrb[143].mxu1 }
0x396e   :  { %v23400_v49 = vpop.f32.mrb[144].mxu1 }
0x396f   :  { %v23401_v17 = vadd.f32 %v23400_v49, %v23318_v2  ;;  %v31556_v6 = vpop.f32.mrb[145].mxu1 }
0x3976   :  { %v23475_v23 = vpop.f32.mrb[146].mxu1  ;;  %v22982_v15 = vpop.f32.mrb[76].mxu0 }
0x3977   :  { %v23476_v18 = vadd.f32 %v23475_v23, %v23401_v17  ;;  %v33618_v26 = vadd.f32 %v36372_v43, %v22982_v15  ;;  %v31567_v32 = vpop.f32.mrb[147].mxu1  ;;  %v31501_v58 = vpop.f32.mrb[77].mxu0  ;;  %v36515_v23 = vld [vmem:[#allocation5] ss:$0 sm:$0xff] }
0x3979   :  { %v27479_v19 = vmul.f32 -1.442695, %v33618_v26 }
0x397b   :  { %34223 = vpow2.f32 %v27479_v19 }
0x3985   :  { %v34224_v62 = vpop.eup %34223 }
0x3986   :  { %v22989_v25 = vadd.f32 1.0, %v34224_v62 }
0x3988   :  { %34225 = vrcp.f32 %v22989_v25 }
0x3992   :  { %v34226_v34 = vpop.eup %34225 }
0x3993   :  { %v22992_v53 = vmul.f32 2.0, %v34226_v34 }
0x3995   :  { %v22993_v45 = vmul.f32 %v22992_v53, %v36376_v20 }
0x3997   :  { %v23480_v36 = vsel %vm609_vm3, %v22993_v45, 0 }
0x3998   :  { %v23549_v47 = vand.u32 4294901760, %v23480_v36 }
0x399a   :  { %v23550_v35 = vsub.f32 %v23480_v36, %v23549_v47  ;;  %31580 = vmatmul.mubr.f32.vlgmr.msra.gmra.mrb[148].mxu1 %v23549_v47 }
0x399b   :  { %33379 = vmatpush3.bf16.msra.mxu1 %v34849_v9  ;;  %31593 = vmatprep.mubr.msk.f32.mxu1 %vm34420_vm1, %v34421_v1 }
0x399c   :  { %v23551_v7 = vand.u32 4294901760, %v23550_v35  ;;  %33383 = vmatprep.subr.bf16.mxu1 %v34419_v0 }
0x399e   :  { %31594 = vmatmul.mubr.f32.vlgmr.msra.gmra.mrb[150].mxu1 %v23551_v7  ;;  %v23552_v50 = vsub.f32 %v23550_v35, %v23551_v7 }
0x399f   :  { %33385 = vmatpush3.bf16.msra.mxu1 %v34849_v9  ;;  %31607 = vmatprep.mubr.msk.f32.mxu1 %vm34420_vm1, %v34421_v1 }
0x39a0   :  { %v23553_v20 = vand.u32 4294901760, %v23552_v50  ;;  %33422 = vmatprep.subr.bf16.mxu1 %v34419_v0 }
0x39a2   :  { %31573 = vmatmul.mubr.f32.vlgmr.msra.gmra.mrb[78].mxu0 %v23553_v20  ;;  %31608 = vmatmul.mubr.f32.vlgmr.msra.gmra.mrb[152].mxu1 %v23549_v47 }
0x39a3   :  { %33376 = vmatpush3.bf16.msra.mxu0 %v34857_v12  ;;  %31586 = vmatprep.mubr.msk.f32.mxu0 %vm34420_vm1, %v34421_v1 }
0x39a4   :  { %33380 = vmatprep.subr.bf16.mxu0 %v34419_v0  ;;  %33424 = vmatpush3.bf16.msra.mxu1 %v34618_v46 }
0x39a5   :  { %31680 = vmatprep.mubr.msk.f32.mxu1 %vm34420_vm1, %v34421_v1  ;;  %33425 = vmatprep.subr.bf16.mxu1 %v34419_v0 }
0x39a6   :  { %31587 = vmatmul.mubr.f32.vlgmr.msra.gmra.mrb[80].mxu0 %v23550_v35 }
0x39a7   :  { %33382 = vmatpush3.bf16.msra.mxu0 %v34859_v13  ;;  %31600 = vmatprep.mubr.msk.f32.mxu0 %vm34420_vm1, %v34421_v1 }
0x39a8   :  { %33386 = vmatprep.subr.bf16.mxu0 %v34419_v0 }
0x39aa   :  { %31601 = vmatmul.mubr.f32.vlgmr.msra.gmra.mrb[82].mxu0 %v23549_v47 }
0x39ab   :  { %33388 = vmatpush3.bf16.msra.mxu0 %v34556_v11  ;;  %31618 = vmatprep.mubr.msk.f32.mxu0 %vm34420_vm1, %v34421_v1 }
0x39ac   :  { %33389 = vmatprep.subr.bf16.mxu0 %v34419_v0 }
0x39af   :  { %33391 = vmatpush3.bf16.msra.mxu0 %v34559_v14 }
0x39b0   :  { %33392 = vmatprep.subr.bf16.mxu0 %v34419_v0 }
0x3a6d   :  { %v23636_v44 = vpop.f32.mrb[148].mxu1 }
0x3a6e   :  { %v31581_v54 = vpop.f32.mrb[149].mxu1 }
0x3a71   :  { %v23787_v42 = vpop.f32.mrb[150].mxu1 }
0x3a72   :  { %v31595_v48 = vpop.f32.mrb[151].mxu1 }
0x3a75   :  { %v23555_v51 = vpop.f32.mrb[78].mxu0  ;;  %v23937_v63 = vpop.f32.mrb[152].mxu1 }
0x3a76   :  { %v23556_v24 = vadd.f32 %v23555_v51, %v23476_v18  ;;  %v31574_v59 = vpop.f32.mrb[79].mxu0  ;;  %v31609_v4 = vpop.f32.mrb[153].mxu1 }
0x3a78   :  { %v23637_v5 = vadd.f32 %v23636_v44, %v23556_v24 }
0x3a79   :  { %v23712_v3 = vpop.f32.mrb[80].mxu0 }
0x3a7a   :  { %v23713_v60 = vadd.f32 %v23712_v3, %v23637_v5  ;;  %v31588_v22 = vpop.f32.mrb[81].mxu0  ;;  %v27481_v3 = vld [vmem:[%s36837_s0 + $0xe] sm:$0x3] }
0x3a7c   :  { %v23788_v2 = vadd.f32 %v23787_v42, %v23713_v60 }
0x3a7d   :  { %v23864_v16 = vpop.f32.mrb[82].mxu0 }
0x3a7e   :  { %v23865_v49 = vadd.f32 %v23864_v16, %v23788_v2  ;;  %v31602_v17 = vpop.f32.mrb[83].mxu0 }
0x3a80   :  { %v23938_v6 = vadd.f32 %v23937_v63, %v23865_v49 }
0x3a82   :  { %v23941_v15 = vadd.f32 %v36515_v23, %v23938_v6 }
0x3a84   :  { %34227 = vtanh.f32 %v23941_v15  ;;  %v27480_v18 = vmul.f32 -1.442695, %v23941_v15 }
0x3a86   :  { %34229 = vpow2.f32 %v27480_v18  ;;  %v36603_v18 = vld [vmem:[%s36844_s7] ss:$0 sm:$0xff]  ;;  %s34424_s7 = smov 96  }
0x3a8e   :  { %v34228_v26 = vpop.eup %34227 }
0x3a8f   :  { %23951 = vrot.lane.b32.xlu1 %v34228_v26, %s34422_s2 }
0x3a90   :  { %v34230_v32 = vpop.eup %34229 }
0x3a91   :  { %v23945_v58 = vadd.f32 1.0, %v34230_v32 }
0x3a93   :  { %34231 = vrcp.f32 %v23945_v58 }
0x3a9d   :  { %v34232_v19 = vpop.eup %34231 }
0x3a9e   :  { %v23949_v34 = vmul.f32 %v34232_v19, %v36251_v52 }
0x3b01   :  { %v23952_v62 = vpop.permute.xlu1 %23951 }
0x3b02   :  { %v23954_v25 = vmul.f32 %v34232_v19, %v23952_v62 }
0x3b04   :  { %23956 = vrot.lane.b32.xlu0 %v23954_v25, %s34423_s17 }
0x3b76   :  { %v23957_v53 = vpop.permute.xlu0 %23956 }
0x3b77   :  { %v36521_v45 = vadd.f32 %v23957_v53, %v23949_v34 }
0x3b79   :  { %34233 = vtanh.f32 %v36521_v45 }
0x3b83   :  { %v34234_v36 = vpop.eup %34233 }
0x3b84   :  { %23962 = vrot.lane.b32.xlu1 %v34234_v36, %s34422_s2 }
0x3bf6   :  { %v23963_v47 = vpop.permute.xlu1 %23962 }
0x3bf7   :  { %v23965_v35 = vmul.f32 %v34232_v19, %v23963_v47 }
0x3bf9   :  { %23967 = vrot.lane.b32.xlu0 %v23965_v35, %s34423_s17 }
0x3c6b   :  { %v36526_v7 = vpop.permute.xlu0 %23967 }
0x3c6c   :  { %23971 = vst.msk [vmem:[#allocation8 + $0xc] sm:$0x3] %vm79_vm0, %v36526_v7  ;;  %v23974_v52 = vsel %vm106_vm2, %v36526_v7, 0 }
0x3c6d   :  { %v24045_v50 = vand.u32 4294901760, %v23974_v52 }
0x3c6f   :  { %v24046_v20 = vsub.f32 %v23974_v52, %v24045_v50 }
0x3c71   :  { %v24047_v44 = vand.u32 4294901760, %v24046_v20 }
0x3c73   :  { %v24048_v54 = vsub.f32 %v24046_v20, %v24047_v44 }
0x3c75   :  { %v24049_v42 = vand.u32 4294901760, %v24048_v54 }
0x3c77   :  { %31619 = vmatmul.mubr.f32.vlgmr.msra.gmra.mrb[84].mxu0 %v24049_v42 }
0x3c78   :  { %33394 = vmatpush3.bf16.msra.mxu0 %v34568_v33  ;;  %31629 = vmatprep.mubr.msk.f32.mxu0 %vm34420_vm1, %v34421_v1 }
0x3c79   :  { %33395 = vmatprep.subr.bf16.mxu0 %v34419_v0 }
0x3c7c   :  { %33397 = vmatpush3.bf16.msra.mxu0 %v34571_v37 }
0x3c7d   :  { %33398 = vmatprep.subr.bf16.mxu0 %v34419_v0 }
0x3c7f   :  { %31630 = vmatmul.mubr.f32.vlgmr.msra.gmra.mrb[84].mxu0 %v24045_v50 }
0x3c80   :  { %33400 = vmatpush3.bf16.msra.mxu0 %v34577_v38  ;;  %31640 = vmatprep.mubr.msk.f32.mxu0 %vm34420_vm1, %v34421_v1 }
0x3c81   :  { %33401 = vmatprep.subr.bf16.mxu0 %v34419_v0 }
0x3c84   :  { %33403 = vmatpush3.bf16.msra.mxu0 %v34581_v39 }
0x3c85   :  { %33404 = vmatprep.subr.bf16.mxu0 %v34419_v0 }
0x3c87   :  { %31641 = vmatmul.mubr.f32.vlgmr.msra.gmra.mrb[84].mxu0 %v24046_v20 }
0x3c88   :  { %33406 = vmatpush3.bf16.msra.mxu0 %v34556_v11  ;;  %31651 = vmatprep.mubr.msk.f32.mxu0 %vm34420_vm1, %v34421_v1 }
0x3c89   :  { %33407 = vmatprep.subr.bf16.mxu0 %v34419_v0 }
0x3c8c   :  { %33409 = vmatpush3.bf16.msra.mxu0 %v34559_v14 }
0x3c8d   :  { %33410 = vmatprep.subr.bf16.mxu0 %v34419_v0 }
0x3c8f   :  { %31652 = vmatmul.mubr.f32.vlgmr.msra.gmra.mrb[84].mxu0 %v24047_v44 }
0x3c90   :  { %33412 = vmatpush3.bf16.msra.mxu0 %v34593_v40  ;;  %31662 = vmatprep.mubr.msk.f32.mxu0 %vm34420_vm1, %v34421_v1 }
0x3c91   :  { %33413 = vmatprep.subr.bf16.mxu0 %v34419_v0 }
0x3c94   :  { %33415 = vmatpush3.bf16.msra.mxu0 %v34597_v41 }
0x3c95   :  { %33416 = vmatprep.subr.bf16.mxu0 %v34419_v0 }
0x3c97   :  { %31663 = vmatmul.mubr.f32.vlgmr.msra.gmra.mrb[84].mxu0 %v24045_v50 }
0x3c98   :  { %33418 = vmatpush3.bf16.msra.mxu0 %v34556_v11  ;;  %31673 = vmatprep.mubr.msk.f32.mxu0 %vm34420_vm1, %v34421_v1 }
0x3c99   :  { %33419 = vmatprep.subr.bf16.mxu0 %v34419_v0 }
0x3c9c   :  { %33421 = vmatpush3.bf16.msra.mxu0 %v34559_v14 }
0x3c9d   :  { %33476 = vmatprep.subr.bf16.mxu0 %v34419_v0 }
0x3c9f   :  { %31674 = vmatmul.mubr.f32.vlgmr.msra.gmra.mrb[84].mxu0 %v24045_v50 }
0x3ca0   :  { %33478 = vmatpush3.bf16.msra.mxu0 %v34618_v46  ;;  %31788 = vmatprep.mubr.msk.f32.mxu0 %vm34420_vm1, %v34421_v1 }
0x3ca1   :  { %33479 = vmatprep.subr.bf16.mxu0 %v34419_v0 }
0x3d72   :  { %v24457_v48 = vpop.f32.mrb[84].mxu0 }
0x3d73   :  { %v33619_v51 = vadd.f32 %v36372_v43, %v24457_v48  ;;  %v31675_v63 = vpop.f32.mrb[85].mxu0 }
0x3d75   :  { %v27482_v24 = vmul.f32 -1.442695, %v33619_v51 }
0x3d77   :  { %34235 = vpow2.f32 %v27482_v24 }
0x3d81   :  { %v34236_v59 = vpop.eup %34235 }
0x3d82   :  { %v24464_v4 = vadd.f32 1.0, %v34236_v59 }
0x3d84   :  { %34237 = vrcp.f32 %v24464_v4 }
0x3d8e   :  { %v34238_v5 = vpop.eup %34237 }
0x3d8f   :  { %v24467_v60 = vmul.f32 2.0, %v34238_v5 }
0x3d91   :  { %v36570_v22 = vmul.f32 %v27481_v3, %v24467_v60 }
0x3d93   :  { %v24470_v2 = vsel %vm609_vm3, %v36570_v22, 0 }
0x3d94   :  { %v24539_v16 = vand.u32 4294901760, %v24470_v2 }
0x3d96   :  { %v24540_v49 = vsub.f32 %v24470_v2, %v24539_v16 }
0x3d98   :  { %v24541_v17 = vand.u32 4294901760, %v24540_v49 }
0x3d9a   :  { %v24542_v6 = vsub.f32 %v24540_v49, %v24541_v17 }
0x3d9c   :  { %v24543_v15 = vand.u32 4294901760, %v24542_v6 }
0x3d9e   :  { %31681 = vmatmul.mubr.f32.vlgmr.msra.gmra.mrb[154].mxu1 %v24543_v15 }
0x3d9f   :  { %33427 = vmatpush3.bf16.msra.mxu1 %v34624_v55  ;;  %31687 = vmatprep.mubr.msk.f32.mxu1 %vm34420_vm1, %v34421_v1 }
0x3da0   :  { %33428 = vmatprep.subr.bf16.mxu1 %v34419_v0 }
0x3da6   :  { %31688 = vmatmul.mubr.f32.vlgmr.msra.gmra.mrb[154].mxu1 %v24539_v16 }
0x3da7   :  { %33430 = vmatpush3.bf16.msra.mxu1 %v34626_v56  ;;  %31694 = vmatprep.mubr.msk.f32.mxu1 %vm34420_vm1, %v34421_v1 }
0x3da8   :  { %33431 = vmatprep.subr.bf16.mxu1 %v34419_v0 }
0x3dae   :  { %31695 = vmatmul.mubr.f32.vlgmr.msra.gmra.mrb[154].mxu1 %v24540_v49 }
0x3daf   :  { %33433 = vmatpush3.bf16.msra.mxu1 %v34618_v46  ;;  %31701 = vmatprep.mubr.msk.f32.mxu1 %vm34420_vm1, %v34421_v1 }
0x3db0   :  { %33434 = vmatprep.subr.bf16.mxu1 %v34419_v0 }
0x3db6   :  { %31702 = vmatmul.mubr.f32.vlgmr.msra.gmra.mrb[154].mxu1 %v24541_v17 }
0x3db7   :  { %33436 = vmatpush3.bf16.msra.mxu1 %v34628_v57  ;;  %31708 = vmatprep.mubr.msk.f32.mxu1 %vm34420_vm1, %v34421_v1 }
0x3db8   :  { %33437 = vmatprep.subr.bf16.mxu1 %v34419_v0 }
0x3dbe   :  { %31709 = vmatmul.mubr.f32.vlgmr.msra.gmra.mrb[154].mxu1 %v24539_v16 }
0x3dbf   :  { %33439 = vmatpush3.bf16.msra.mxu1 %v34618_v46  ;;  %31715 = vmatprep.mubr.msk.f32.mxu1 %vm34420_vm1, %v34421_v1 }
0x3dc0   :  { %33440 = vmatprep.subr.bf16.mxu1 %v34419_v0 }
0x3dc6   :  { %31716 = vmatmul.mubr.f32.vlgmr.msra.gmra.mrb[154].mxu1 %v24539_v16 }
0x3dc7   :  { %33442 = vmatpush3.bf16.msra.mxu1 %v34556_v11  ;;  %31726 = vmatprep.mubr.msk.f32.mxu1 %vm34420_vm1, %v34421_v1 }
0x3dc8   :  { %33443 = vmatprep.subr.bf16.mxu1 %v34419_v0 }
0x3dcb   :  { %33445 = vmatpush3.bf16.msra.mxu1 %v34559_v14 }
0x3dcc   :  { %33446 = vmatprep.subr.bf16.mxu1 %v34419_v0 }
0x3e99   :  { %v24927_v26 = vpop.f32.mrb[154].mxu1 }
0x3e9a   :  { %v33620_v32 = vadd.f32 %v36603_v18, %v24927_v26  ;;  %v31717_v58 = vpop.f32.mrb[155].mxu1 }
0x3e9c   :  { %v27483_v19 = vmul.f32 -1.442695, %v33620_v32 }
0x3e9e   :  { %34239 = vpow2.f32 %v27483_v19 }
0x3ea8   :  { %v34240_v62 = vpop.eup %34239 }
0x3ea9   :  { %v24934_v25 = vadd.f32 1.0, %v34240_v62 }
0x3eab   :  { %34241 = vrcp.f32 %v24934_v25 }
0x3eb5   :  { %v34242_v34 = vpop.eup %34241 }
0x3eb6   :  { %v24937_v53 = vmul.f32 2.0, %v34242_v34 }
0x3eb8   :  { %v36607_v36 = vmul.f32 %v24937_v53, %v36526_v7 }
0x3eba   :  { %v24940_v47 = vsel %vm106_vm2, %v36607_v36, 0 }
0x3ebb   :  { %v25011_v35 = vand.u32 4294901760, %v24940_v47 }
0x3ebd   :  { %v25012_v52 = vsub.f32 %v24940_v47, %v25011_v35 }
0x3ebf   :  { %v25013_v50 = vand.u32 4294901760, %v25012_v52 }
0x3ec1   :  { %v25014_v20 = vsub.f32 %v25012_v52, %v25013_v50 }
0x3ec3   :  { %v25015_v44 = vand.u32 4294901760, %v25014_v20 }
0x3ec5   :  { %31727 = vmatmul.mubr.f32.vlgmr.msra.gmra.mrb[156].mxu1 %v25015_v44 }
0x3ec6   :  { %33448 = vmatpush3.bf16.msra.mxu1 %v34568_v33  ;;  %31737 = vmatprep.mubr.msk.f32.mxu1 %vm34420_vm1, %v34421_v1 }
0x3ec7   :  { %33449 = vmatprep.subr.bf16.mxu1 %v34419_v0 }
0x3eca   :  { %33451 = vmatpush3.bf16.msra.mxu1 %v34571_v37 }
0x3ecb   :  { %33452 = vmatprep.subr.bf16.mxu1 %v34419_v0 }
0x3ecd   :  { %31738 = vmatmul.mubr.f32.vlgmr.msra.gmra.mrb[156].mxu1 %v25011_v35 }
0x3ece   :  { %33454 = vmatpush3.bf16.msra.mxu1 %v34577_v38  ;;  %31748 = vmatprep.mubr.msk.f32.mxu1 %vm34420_vm1, %v34421_v1 }
0x3ecf   :  { %33455 = vmatprep.subr.bf16.mxu1 %v34419_v0 }
0x3ed2   :  { %33457 = vmatpush3.bf16.msra.mxu1 %v34581_v39 }
0x3ed3   :  { %33458 = vmatprep.subr.bf16.mxu1 %v34419_v0 }
0x3ed5   :  { %31749 = vmatmul.mubr.f32.vlgmr.msra.gmra.mrb[156].mxu1 %v25012_v52 }
0x3ed6   :  { %33460 = vmatpush3.bf16.msra.mxu1 %v34556_v11  ;;  %31759 = vmatprep.mubr.msk.f32.mxu1 %vm34420_vm1, %v34421_v1 }
0x3ed7   :  { %33461 = vmatprep.subr.bf16.mxu1 %v34419_v0 }
0x3eda   :  { %33463 = vmatpush3.bf16.msra.mxu1 %v34559_v14 }
0x3edb   :  { %33464 = vmatprep.subr.bf16.mxu1 %v34419_v0 }
0x3edd   :  { %31760 = vmatmul.mubr.f32.vlgmr.msra.gmra.mrb[156].mxu1 %v25013_v50 }
0x3ede   :  { %33466 = vmatpush3.bf16.msra.mxu1 %v34593_v40  ;;  %31770 = vmatprep.mubr.msk.f32.mxu1 %vm34420_vm1, %v34421_v1 }
0x3edf   :  { %33467 = vmatprep.subr.bf16.mxu1 %v34419_v0 }
0x3ee2   :  { %33469 = vmatpush3.bf16.msra.mxu1 %v34597_v41 }
0x3ee3   :  { %33470 = vmatprep.subr.bf16.mxu1 %v34419_v0 }
0x3ee5   :  { %31771 = vmatmul.mubr.f32.vlgmr.msra.gmra.mrb[156].mxu1 %v25011_v35 }
0x3ee6   :  { %33472 = vmatpush3.bf16.msra.mxu1 %v34556_v11  ;;  %31781 = vmatprep.mubr.msk.f32.mxu1 %vm34420_vm1, %v34421_v1 }
0x3ee7   :  { %33473 = vmatprep.subr.bf16.mxu1 %v34419_v0 }
0x3eea   :  { %33475 = vmatpush3.bf16.msra.mxu1 %v34559_v14 }
0x3eeb   :  { %33530 = vmatprep.subr.bf16.mxu1 %v34419_v0 }
0x3eed   :  { %31782 = vmatmul.mubr.f32.vlgmr.msra.gmra.mrb[156].mxu1 %v25011_v35 }
0x3eee   :  { %33532 = vmatpush3.bf16.msra.mxu1 %v34747_v61  ;;  %31900 = vmatprep.mubr.msk.f32.mxu1 %vm34420_vm1, %v34421_v1 }
0x3eef   :  { %33533 = vmatprep.subr.bf16.mxu1 %v34419_v0 }
0x3ef2   :  { %33535 = vmatpush3.bf16.msra.mxu1 %v34757_v8 }
0x3ef3   :  { %33536 = vmatprep.subr.bf16.mxu1 %v34419_v0 }
0x3fc0   :  { %v25423_v7 = vpop.f32.mrb[156].mxu1 }
0x3fc1   :  { %v33621_v54 = vadd.f32 %v36372_v43, %v25423_v7  ;;  %v31783_v42 = vpop.f32.mrb[157].mxu1 }
0x3fc3   :  { %v27484_v48 = vmul.f32 -1.442695, %v33621_v54 }
0x3fc5   :  { %34243 = vpow2.f32 %v27484_v48 }
0x3fcf   :  { %v34244_v51 = vpop.eup %34243 }
0x3fd0   :  { %v25430_v63 = vadd.f32 1.0, %v34244_v51 }
0x3fd2   :  { %34245 = vrcp.f32 %v25430_v63 }
0x3fdc   :  { %v34246_v24 = vpop.eup %34245 }
0x3fdd   :  { %v25433_v59 = vmul.f32 2.0, %v34246_v24 }
0x3fdf   :  { %v36649_v4 = vmul.f32 %v25433_v59, %v36570_v22 }
0x3fe1   :  { %v25436_v5 = vsel %vm609_vm3, %v36649_v4, 0 }
0x3fe2   :  { %v25505_v3 = vand.u32 4294901760, %v25436_v5 }
0x3fe4   :  { %v25506_v60 = vsub.f32 %v25436_v5, %v25505_v3 }
0x3fe6   :  { %v25507_v2 = vand.u32 4294901760, %v25506_v60 }
0x3fe8   :  { %v25508_v16 = vsub.f32 %v25506_v60, %v25507_v2 }
0x3fea   :  { %v25509_v49 = vand.u32 4294901760, %v25508_v16 }
0x3fec   :  { %31789 = vmatmul.mubr.f32.vlgmr.msra.gmra.mrb[86].mxu0 %v25509_v49 }
0x3fed   :  { %33481 = vmatpush3.bf16.msra.mxu0 %v34624_v55  ;;  %31795 = vmatprep.mubr.msk.f32.mxu0 %vm34420_vm1, %v34421_v1 }
0x3fee   :  { %33482 = vmatprep.subr.bf16.mxu0 %v34419_v0 }
0x3ff4   :  { %31796 = vmatmul.mubr.f32.vlgmr.msra.gmra.mrb[86].mxu0 %v25505_v3 }
0x3ff5   :  { %33484 = vmatpush3.bf16.msra.mxu0 %v34626_v56  ;;  %31802 = vmatprep.mubr.msk.f32.mxu0 %vm34420_vm1, %v34421_v1 }
0x3ff6   :  { %33485 = vmatprep.subr.bf16.mxu0 %v34419_v0 }
0x3ffc   :  { %31803 = vmatmul.mubr.f32.vlgmr.msra.gmra.mrb[86].mxu0 %v25506_v60 }
0x3ffd   :  { %33487 = vmatpush3.bf16.msra.mxu0 %v34618_v46  ;;  %31809 = vmatprep.mubr.msk.f32.mxu0 %vm34420_vm1, %v34421_v1 }
0x3ffe   :  { %33488 = vmatprep.subr.bf16.mxu0 %v34419_v0 }
0x4004   :  { %31810 = vmatmul.mubr.f32.vlgmr.msra.gmra.mrb[86].mxu0 %v25507_v2 }
0x4005   :  { %33490 = vmatpush3.bf16.msra.mxu0 %v34628_v57  ;;  %31816 = vmatprep.mubr.msk.f32.mxu0 %vm34420_vm1, %v34421_v1 }
0x4006   :  { %33491 = vmatprep.subr.bf16.mxu0 %v34419_v0 }
0x400c   :  { %31817 = vmatmul.mubr.f32.vlgmr.msra.gmra.mrb[86].mxu0 %v25505_v3 }
0x400d   :  { %33493 = vmatpush3.bf16.msra.mxu0 %v34618_v46  ;;  %31823 = vmatprep.mubr.msk.f32.mxu0 %vm34420_vm1, %v34421_v1 }
0x400e   :  { %33494 = vmatprep.subr.bf16.mxu0 %v34419_v0 }
0x4014   :  { %31824 = vmatmul.mubr.f32.vlgmr.msra.gmra.mrb[86].mxu0 %v25505_v3 }
0x4015   :  { %33496 = vmatpush3.bf16.msra.mxu0 %v34556_v11  ;;  %31834 = vmatprep.mubr.msk.f32.mxu0 %vm34420_vm1, %v34421_v1 }
0x4016   :  { %33497 = vmatprep.subr.bf16.mxu0 %v34419_v0 }
0x4019   :  { %33499 = vmatpush3.bf16.msra.mxu0 %v34559_v14 }
0x401a   :  { %33500 = vmatprep.subr.bf16.mxu0 %v34419_v0 }
0x40e7   :  { %v25893_v55 = vpop.f32.mrb[86].mxu0 }
0x40e8   :  { %v33622_v46 = vadd.f32 %v36603_v18, %v25893_v55  ;;  %v31825_v56 = vpop.f32.mrb[87].mxu0 }
0x40ea   :  { %v27485_v57 = vmul.f32 -1.442695, %v33622_v46 }
0x40ec   :  { %34247 = vpow2.f32 %v27485_v57 }
0x40f6   :  { %v34248_v22 = vpop.eup %34247 }
0x40f7   :  { %v25900_v17 = vadd.f32 1.0, %v34248_v22 }
0x40f9   :  { %34249 = vrcp.f32 %v25900_v17 }
0x4103   :  { %v34250_v6 = vpop.eup %34249 }
0x4104   :  { %v25903_v15 = vmul.f32 2.0, %v34250_v6 }
0x4106   :  { %v25904_v26 = vmul.f32 %v25903_v15, %v36607_v36 }
0x4108   :  { %v25906_v32 = vsel %vm106_vm2, %v25904_v26, 0 }
0x4109   :  { %v36682_v58 = vand.u32 4294901760, %v25906_v32 }
0x410b   :  { %v25978_v19 = vsub.f32 %v25906_v32, %v36682_v58 }
0x410d   :  { %v25979_v62 = vand.u32 4294901760, %v25978_v19 }
0x410f   :  { %v25980_v25 = vsub.f32 %v25978_v19, %v25979_v62 }
0x4111   :  { %v25981_v34 = vand.u32 4294901760, %v25980_v25 }
0x4113   :  { %31835 = vmatmul.mubr.f32.vlgmr.msra.gmra.mrb[88].mxu0 %v25981_v34  ;;  %31901 = vmatmul.mubr.f32.vlgmr.msra.gmra.mrb[158].mxu1 %v25981_v34 }
0x4114   :  { %33502 = vmatpush3.bf16.msra.mxu0 %v34568_v33  ;;  %33538 = vmatpush3.bf16.msra.mxu1 %v34761_v21 }
0x4115   :  { %33503 = vmatprep.subr.bf16.mxu0 %v34419_v0  ;;  %33539 = vmatprep.subr.bf16.mxu1 %v34419_v0 }
0x4116   :  { %31911 = vmatprep.mubr.msk.f32.mxu1 %vm34420_vm1, %v34421_v1  ;;  %31845 = vmatprep.mubr.msk.f32.mxu0 %vm34420_vm1, %v34421_v1 }
0x4118   :  { %33505 = vmatpush3.bf16.msra.mxu0 %v34571_v37  ;;  %33541 = vmatpush3.bf16.msra.mxu1 %v34763_v27 }
0x4119   :  { %33506 = vmatprep.subr.bf16.mxu0 %v34419_v0  ;;  %33542 = vmatprep.subr.bf16.mxu1 %v34419_v0 }
0x411b   :  { %31912 = vmatmul.mubr.f32.vlgmr.msra.gmra.mrb[160].mxu1 %v36682_v58  ;;  %31846 = vmatmul.mubr.f32.vlgmr.msra.gmra.mrb[88].mxu0 %v36682_v58 }
0x411c   :  { %33508 = vmatpush3.bf16.msra.mxu0 %v34577_v38  ;;  %33544 = vmatpush3.bf16.msra.mxu1 %v34765_v28 }
0x411d   :  { %33509 = vmatprep.subr.bf16.mxu0 %v34419_v0  ;;  %33545 = vmatprep.subr.bf16.mxu1 %v34419_v0 }
0x411e   :  { %31922 = vmatprep.mubr.msk.f32.mxu1 %vm34420_vm1, %v34421_v1  ;;  %31856 = vmatprep.mubr.msk.f32.mxu0 %vm34420_vm1, %v34421_v1 }
0x4120   :  { %33511 = vmatpush3.bf16.msra.mxu0 %v34581_v39  ;;  %33547 = vmatpush3.bf16.msra.mxu1 %v34767_v29 }
0x4121   :  { %33512 = vmatprep.subr.bf16.mxu0 %v34419_v0  ;;  %33548 = vmatprep.subr.bf16.mxu1 %v34419_v0 }
0x4123   :  { %31923 = vmatmul.mubr.f32.vlgmr.msra.gmra.mrb[162].mxu1 %v25978_v19  ;;  %31857 = vmatmul.mubr.f32.vlgmr.msra.gmra.mrb[88].mxu0 %v25978_v19 }
0x4124   :  { %33514 = vmatpush3.bf16.msra.mxu0 %v34556_v11  ;;  %33550 = vmatpush3.bf16.msra.mxu1 %v34747_v61 }
0x4125   :  { %33515 = vmatprep.subr.bf16.mxu0 %v34419_v0  ;;  %33551 = vmatprep.subr.bf16.mxu1 %v34419_v0 }
0x4126   :  { %31933 = vmatprep.mubr.msk.f32.mxu1 %vm34420_vm1, %v34421_v1  ;;  %31867 = vmatprep.mubr.msk.f32.mxu0 %vm34420_vm1, %v34421_v1 }
0x4128   :  { %33517 = vmatpush3.bf16.msra.mxu0 %v34559_v14  ;;  %33553 = vmatpush3.bf16.msra.mxu1 %v34757_v8 }
0x4129   :  { %33518 = vmatprep.subr.bf16.mxu0 %v34419_v0  ;;  %33554 = vmatprep.subr.bf16.mxu1 %v34419_v0 }
0x412b   :  { %31934 = vmatmul.mubr.f32.vlgmr.msra.gmra.mrb[164].mxu1 %v25979_v62  ;;  %31868 = vmatmul.mubr.f32.vlgmr.msra.gmra.mrb[88].mxu0 %v25979_v62 }
0x412c   :  { %33520 = vmatpush3.bf16.msra.mxu0 %v34593_v40  ;;  %33556 = vmatpush3.bf16.msra.mxu1 %v34769_v30 }
0x412d   :  { %33521 = vmatprep.subr.bf16.mxu0 %v34419_v0  ;;  %33557 = vmatprep.subr.bf16.mxu1 %v34419_v0 }
0x412e   :  { %31944 = vmatprep.mubr.msk.f32.mxu1 %vm34420_vm1, %v34421_v1  ;;  %31878 = vmatprep.mubr.msk.f32.mxu0 %vm34420_vm1, %v34421_v1 }
0x4130   :  { %33523 = vmatpush3.bf16.msra.mxu0 %v34597_v41  ;;  %33559 = vmatpush3.bf16.msra.mxu1 %v34771_v31 }
0x4131   :  { %33524 = vmatprep.subr.bf16.mxu0 %v34419_v0  ;;  %33560 = vmatprep.subr.bf16.mxu1 %v34419_v0 }
0x4133   :  { %31945 = vmatmul.mubr.f32.vlgmr.msra.gmra.mrb[166].mxu1 %v36682_v58  ;;  %31879 = vmatmul.mubr.f32.vlgmr.msra.gmra.mrb[88].mxu0 %v36682_v58 }
0x4134   :  { %33526 = vmatpush3.bf16.msra.mxu0 %v34556_v11  ;;  %33562 = vmatpush3.bf16.msra.mxu1 %v34747_v61 }
0x4135   :  { %33527 = vmatprep.subr.bf16.mxu0 %v34419_v0  ;;  %33563 = vmatprep.subr.bf16.mxu1 %v34419_v0 }
0x4136   :  { %31955 = vmatprep.mubr.msk.f32.mxu1 %vm34420_vm1, %v34421_v1  ;;  %31889 = vmatprep.mubr.msk.f32.mxu0 %vm34420_vm1, %v34421_v1 }
0x4138   :  { %33529 = vmatpush3.bf16.msra.mxu0 %v34559_v14  ;;  %33565 = vmatpush3.bf16.msra.mxu1 %v34757_v8 }
0x4139   :  { %33569 = vmatprep.subr.bf16.mxu1 %v34419_v0  ;;  %33566 = vmatprep.subr.bf16.mxu0 %v34419_v0 }
0x413b   :  { %31956 = vmatmul.mubr.f32.vlgmr.msra.gmra.mrb[168].mxu1 %v36682_v58  ;;  %31890 = vmatmul.mubr.f32.vlgmr.msra.gmra.mrb[88].mxu0 %v36682_v58 }
0x413c   :  { %33571 = vmatpush3.bf16.msra.mxu1 %v34851_v10  ;;  %31969 = vmatprep.mubr.msk.f32.mxu1 %vm34420_vm1, %v34421_v1 }
0x413d   :  { %33575 = vmatprep.subr.bf16.mxu1 %v34419_v0  ;;  %33568 = vmatpush3.bf16.msra.mxu0 %v34849_v9 }
0x413e   :  { %31962 = vmatprep.mubr.msk.f32.mxu0 %vm34420_vm1, %v34421_v1  ;;  %33572 = vmatprep.subr.bf16.mxu0 %v34419_v0 }
0x41e6   :  { %v26476_v11 = vpop.f32.mrb[158].mxu1 }
0x41e7   :  { %v31902_v14 = vpop.f32.mrb[159].mxu1 }
0x41ee   :  { %v26567_v33 = vpop.f32.mrb[160].mxu1 }
0x41ef   :  { %v26568_v37 = vadd.f32 %v26567_v33, %v26476_v11  ;;  %v31913_v38 = vpop.f32.mrb[161].mxu1 }
0x41f6   :  { %v26647_v39 = vpop.f32.mrb[162].mxu1 }
0x41f7   :  { %v26648_v40 = vadd.f32 %v26647_v39, %v26568_v37  ;;  %v31924_v41 = vpop.f32.mrb[163].mxu1 }
0x41fe   :  { %v26724_v61 = vpop.f32.mrb[164].mxu1 }
0x41ff   :  { %v26725_v8 = vadd.f32 %v26724_v61, %v26648_v40  ;;  %v31935_v21 = vpop.f32.mrb[165].mxu1 }
0x4206   :  { %v26807_v27 = vpop.f32.mrb[166].mxu1 }
0x4207   :  { %v26808_v28 = vadd.f32 %v26807_v27, %v26725_v8  ;;  %v31946_v29 = vpop.f32.mrb[167].mxu1 }
0x420e   :  { %v26882_v30 = vpop.f32.mrb[168].mxu1  ;;  %v26389_v31 = vpop.f32.mrb[88].mxu0 }
0x420f   :  { %v26883_v10 = vadd.f32 %v26882_v30, %v26808_v28  ;;  %v33623_v18 = vadd.f32 %v36372_v43, %v26389_v31  ;;  %v31957_v53 = vpop.f32.mrb[169].mxu1  ;;  %v31891_v36 = vpop.f32.mrb[89].mxu0 }
0x4211   :  { %v27486_v47 = vmul.f32 -1.442695, %v33623_v18 }
0x4213   :  { %34251 = vpow2.f32 %v27486_v47 }
0x421d   :  { %v34252_v35 = vpop.eup %34251 }
0x421e   :  { %v26396_v52 = vadd.f32 1.0, %v34252_v35 }
0x4220   :  { %34253 = vrcp.f32 %v26396_v52 }
0x422a   :  { %v34254_v50 = vpop.eup %34253 }
0x422b   :  { %v26399_v20 = vmul.f32 2.0, %v34254_v50 }
0x422d   :  { %v26400_v44 = vmul.f32 %v26399_v20, %v36649_v4 }
0x422f   :  { %v26887_v7 = vsel %vm609_vm3, %v26400_v44, 0 }
0x4230   :  { %v26956_v54 = vand.u32 4294901760, %v26887_v7 }
0x4232   :  { %v26957_v42 = vsub.f32 %v26887_v7, %v26956_v54  ;;  %31970 = vmatmul.mubr.f32.vlgmr.msra.gmra.mrb[170].mxu1 %v26956_v54 }
0x4233   :  { %33577 = vmatpush3.bf16.msra.mxu1 %v34849_v9  ;;  %31983 = vmatprep.mubr.msk.f32.mxu1 %vm34420_vm1, %v34421_v1 }
0x4234   :  { %v26958_v43 = vand.u32 4294901760, %v26957_v42  ;;  %33581 = vmatprep.subr.bf16.mxu1 %v34419_v0 }
0x4236   :  { %31984 = vmatmul.mubr.f32.vlgmr.msra.gmra.mrb[172].mxu1 %v26958_v43  ;;  %v26959_v48 = vsub.f32 %v26957_v42, %v26958_v43 }
0x4237   :  { %33583 = vmatpush3.bf16.msra.mxu1 %v34849_v9  ;;  %31997 = vmatprep.mubr.msk.f32.mxu1 %vm34420_vm1, %v34421_v1 }
0x4238   :  { %v26960_v51 = vand.u32 4294901760, %v26959_v48 }
0x423a   :  { %31963 = vmatmul.mubr.f32.vlgmr.msra.gmra.mrb[90].mxu0 %v26960_v51  ;;  %31998 = vmatmul.mubr.f32.vlgmr.msra.gmra.mrb[174].mxu1 %v26956_v54 }
0x423b   :  { %33574 = vmatpush3.bf16.msra.mxu0 %v34857_v12  ;;  %31976 = vmatprep.mubr.msk.f32.mxu0 %vm34420_vm1, %v34421_v1 }
0x423c   :  { %33578 = vmatprep.subr.bf16.mxu0 %v34419_v0 }
0x423e   :  { %31977 = vmatmul.mubr.f32.vlgmr.msra.gmra.mrb[92].mxu0 %v26957_v42 }
0x423f   :  { %33580 = vmatpush3.bf16.msra.mxu0 %v34859_v13  ;;  %31990 = vmatprep.mubr.msk.f32.mxu0 %vm34420_vm1, %v34421_v1 }
0x4242   :  { %31991 = vmatmul.mubr.f32.vlgmr.msra.gmra.mrb[94].mxu0 %v26956_v54 }
0x4305   :  { %v27043_v9 = vpop.f32.mrb[170].mxu1 }
0x4306   :  { %v31971_v63 = vpop.f32.mrb[171].mxu1 }
0x4309   :  { %v27194_v24 = vpop.f32.mrb[172].mxu1 }
0x430a   :  { %v31985_v59 = vpop.f32.mrb[173].mxu1 }
0x430d   :  { %v26962_v4 = vpop.f32.mrb[90].mxu0  ;;  %v27344_v5 = vpop.f32.mrb[174].mxu1 }
0x430e   :  { %v26963_v3 = vadd.f32 %v26962_v4, %v26883_v10  ;;  %v31964_v12 = vpop.f32.mrb[91].mxu0  ;;  %v31999_v60 = vpop.f32.mrb[175].mxu1 }
0x4310   :  { %v27044_v2 = vadd.f32 %v27043_v9, %v26963_v3 }
0x4311   :  { %v27119_v16 = vpop.f32.mrb[92].mxu0 }
0x4312   :  { %v27120_v49 = vadd.f32 %v27119_v16, %v27044_v2  ;;  %v31978_v0 = vpop.f32.mrb[93].mxu0 }
0x4314   :  { %v27195_v55 = vadd.f32 %v27194_v24, %v27120_v49 }
0x4315   :  { %v27271_v46 = vpop.f32.mrb[94].mxu0 }
0x4316   :  { %v27272_v13 = vadd.f32 %v27271_v46, %v27195_v55  ;;  %v31992_v56 = vpop.f32.mrb[95].mxu0 }
0x4318   :  { %v27345_v57 = vadd.f32 %v27344_v5, %v27272_v13 }
0x431a   :  { %v27348_v1 = vadd.f32 %v36515_v23, %v27345_v57 }
0x431c   :  { %34255 = vtanh.f32 %v27348_v1  ;;  %v27487_v17 = vmul.f32 -1.442695, %v27348_v1 }
0x431e   :  { %34257 = vpow2.f32 %v27487_v17 }
0x4326   :  { %v34256_v22 = vpop.eup %34255 }
0x4327   :  { %27358 = vrot.lane.b32.xlu1 %v34256_v22, %s34422_s2 }
0x4328   :  { %v34258_v6 = vpop.eup %34257 }
0x4329   :  { %v27352_v15 = vadd.f32 1.0, %v34258_v6 }
0x432b   :  { %34259 = vrcp.f32 %v27352_v15 }
0x4335   :  { %v34260_v26 = vpop.eup %34259 }
0x4336   :  { %v27356_v19 = vmul.f32 %v34260_v26, %v36521_v45 }
0x4399   :  { %v27359_v32 = vpop.permute.xlu1 %27358 }
0x439a   :  { %v27361_v58 = vmul.f32 %v34260_v26, %v27359_v32 }
0x439c   :  { %27363 = vrot.lane.b32.xlu0 %v27361_v58, %s34423_s17 }
0x440e   :  { %v27364_v62 = vpop.permute.xlu0 %27363 }
0x440f   :  { %v27366_v25 = vadd.f32 %v27364_v62, %v27356_v19 }
0x4411   :  { %34261 = vtanh.f32 %v27366_v25 }
0x441b   :  { %v34262_v23 = vpop.eup %34261 }
0x441c   :  { %27369 = vrot.lane.b32.xlu1 %v34262_v23, %s34422_s2  ;;  %s34340_s2 = scalar_lea.vmem %s27404_s16, 32 }
0x441d   :  { %p34341_p10 = scmp.ne.s32.totalorder %s27404_s16, %s34340_s2  ;;  %p34346_p12 = scmp.lt.s32.totalorder %s34340_s2, %s34340_s2 }
0x441f   :  { %p34347_p13 = por %p34346_p12, %p34345_p11 }
0x4420   :  { %27381 = vrot.lane.b32.xlu1 %v27366_v25, %s34424_s7 }
0x4421   :  { %p34348_p0 = pnand %p34347_p13, %p34341_p10 }
0x448e   :  { %v27370_v34 = vpop.permute.xlu1 %27369 }
0x448f   :  { %v27372_v11 = vmul.f32 %v34260_v26, %v27370_v34 }
0x4491   :  { %27374 = vrot.lane.b32.xlu0 %v27372_v11, %s34423_s17 }
0x4492   :  { %v27382_v14 = vpop.permute.xlu1 %27381 }
0x4493   :  { %27384 = vst.msk [vmem:[#allocation11] sm:$0x3] %vm79_vm0, %v27382_v14 }
0x4503   :  { %v27375_v45 = vpop.permute.xlu0 %27374 }
0x4504   :  { %27378 = vst.msk [vmem:[#allocation8 + $0xe] sm:$0x3] %vm79_vm0, %v27375_v45  ;;  %27379 = vst.msk [vmem:[#allocation9] sm:$0x3] %vm79_vm0, %v27375_v45 }
0x4505   :  { %34351 = shalt.err (!%p34348_p0)
}
0x4506   :  { %s34352_s23 = scalar_lea.hbm %s36847_s10, 32 }
0x4507   :  { %p34353_p1 = scmp.ne.s32.totalorder %s36847_s10, %s34352_s23  ;;  %p34356_p2 = scmp.lt.u32.totalorder %s34352_s23, %s36847_s10 }
0x4509   :  { %p34358_p3 = pnand %p34356_p2, %p34353_p1 }
0x450b   :  { %34361 = shalt.err (!%p34358_p3)
}
0x450c   :  { %27406 = dma.vmem_to_hbm [thread:$0]  %s27404_s16, 32, %s36847_s10, [#allocation10]  }
0x450d   :  { %s34362_s6 = scalar_lea.vmem %s36783_s19, 256  ;;  %p34367_p5 = scmp.lt.s32.totalorder %s36783_s19, %s36783_s19 }
0x450e   :  { %p34363_p4 = scmp.ne.s32.totalorder %s36783_s19, %s34362_s6  ;;  %p34368_p6 = scmp.lt.s32.totalorder %s34362_s6, %s34362_s6 }
0x4510   :  { %p34369_p7 = por %p34368_p6, %p34367_p5 }
0x4512   :  { %p34370_p8 = pnand %p34369_p7, %p34363_p4 }
0x4514   :  { %34373 = shalt.err (!%p34370_p8)
}
0x4515   :  { %s34374_s30 = scalar_lea.hbm %s36846_s9, 256 }
0x4516   :  { %p34375_p9 = scmp.ne.s32.totalorder %s36846_s9, %s34374_s30  ;;  %p34378_p10 = scmp.lt.u32.totalorder %s34374_s30, %s36846_s9 }
0x4518   :  { %p34380_p11 = pnand %p34378_p10, %p34375_p9 }
0x451a   :  { %34383 = shalt.err (!%p34380_p11)
}
0x451b   :  { %s34428_s10 = smov 2   ;;  %s34384_s7 = scalar_lea.vmem %s36787_s22, 32 }
0x451c   :  { %27396 = dma.vmem_to_hbm [thread:$0]  %s36783_s19, 256, %s36846_s9, [#allocation4], %s34423_s17, %s34423_s17, %s34428_s10  }
0x451d   :  { %p34385_p12 = scmp.ne.s32.totalorder %s36787_s22, %s34384_s7  ;;  %p34389_p13 = scmp.lt.s32.totalorder %s36787_s22, %s36787_s22 }
0x451e   :  { %p34390_p0 = scmp.lt.s32.totalorder %s34384_s7, %s34384_s7 }
0x4520   :  { %p34391_p1 = por %p34390_p0, %p34389_p13 }
0x4522   :  { %p34392_p2 = pnand %p34391_p1, %p34385_p12 }
0x4524   :  { %34395 = shalt.err (!%p34392_p2)
}
0x4525   :  { %s34396_s5 = scalar_lea.hbm %s36848_s11, 32 }
0x4526   :  { %p34397_p3 = scmp.ne.s32.totalorder %s36848_s11, %s34396_s5  ;;  %p34400_p4 = scmp.lt.u32.totalorder %s34396_s5, %s36848_s11 }
0x4528   :  { %p34402_p5 = pnand %p34400_p4, %p34397_p3 }
0x452a   :  { %34405 = shalt.err (!%p34402_p5)
}
0x452b   :  { %27416 = dma.vmem_to_hbm [thread:$0]  %s36787_s22, 32, %s36848_s11, [#allocation10]  }
0x452c   :  { %34410 = dma.done.wait [#allocation4], 256  }
0x452d   :  { %34411 = vsyncadd [#allocation4], 4294967040 }
0x452e   :  { %34412 = dma.done.wait [#allocation10], 64  }
0x452f   :  { %34413 = vsyncadd [#allocation10], 4294967232 }
0x4530   :  { %27426 = vsyncpa [#allocation3], 1 }
0x4531   :  { %27427 = vsyncpa [#allocation6], 1 }
0x4532   :  { %27428 = vsyncpa [#allocation4], 1 }
0x4533   :  { %27429 = vsyncpa [#allocation10], 1 }

</bundles_post_ra>
